<compile_context>
chip_gen: v6e
topology: v6e:2x2x1
jax: 0.10.0
libtpu: 0.0.40
codegen_flags: <defaults>
</compile_context>

<pallas_src>
import math

import jax
import jax.numpy as jnp
import numpy as np
from jax.experimental import pallas as pl
from jax.experimental.pallas import tpu as pltpu

_LN_EPS = 1e-5  # PyTorch nn.Transformer layer_norm_eps default.
_HI = jax.lax.Precision.HIGHEST


# ---------------------------------------------------------------------------
# Pallas kernel (entire transformer forward in one invocation)
# ---------------------------------------------------------------------------
def _make_transformer_kernel(*, nhead, n_enc, n_dec, batch, src_len, tgt_len,
                             d_model, d_off, f_off, v_off):
    head_dim = d_model // nhead
    scale = 1.0 / math.sqrt(head_dim)

    def kernel(x_ref, y_ref, mat_d_ref, mat_f_ref, vec_ref, out_ref):
        # Load the three packed slabs once; everything below is static slicing of
        # VMEM-resident values (no further DMAs, no per-weight descriptors).
        mat_d = mat_d_ref[...]     # (d_model, sum of widths)
        mat_f = mat_f_ref[...]     # (d_ff,    sum of widths)
        vec = vec_ref[...]         # (n_rows,  pad_width)

        def md(name):
            o, w = d_off[name]
            return mat_d[:, o:o + w]

        def mf(name):
            o, w = f_off[name]
            return mat_f[:, o:o + w]

        def vr(name):
            r, w = v_off[name]
            return vec[r:r + 1, :w]          # (1, w) row, broadcasts over tokens

        def layer_norm(x2d, g, b):
            # Fused moments: E[x] and E[x^2] are independent reductions.
            mu = jnp.mean(x2d, axis=-1, keepdims=True)
            ms = jnp.mean(x2d * x2d, axis=-1, keepdims=True)
            var = ms - mu * mu
            return (x2d - mu) * jax.lax.rsqrt(var + _LN_EPS) * g + b

        def mha(q3, k3, v3, n_q, w_o, b_o):
            # Static unrolled head loop. Per-head context is folded straight into
            # its W_o row-block and accumulated -> no lane-wise concatenate.
            out = None
            for h in range(nhead):
                lo = h * head_dim
                q_h = q3[:, :, lo:lo + head_dim]
                k_h = k3[:, :, lo:lo + head_dim]
                v_h = v3[:, :, lo:lo + head_dim]
                s = jnp.einsum("bqd,bkd->bqk", q_h, k_h,
                               preferred_element_type=jnp.float32) * scale
                s = s - jnp.max(s, axis=-1, keepdims=True)
                prob = jnp.exp(s)
                prob = prob / jnp.sum(prob, axis=-1, keepdims=True)
                ctx = jnp.einsum("bqk,bkd->bqd", prob, v_h,
                                 preferred_element_type=jnp.float32)
                part = jnp.dot(ctx.reshape(batch * n_q, head_dim),
                               w_o[lo:lo + head_dim, :],
                               preferred_element_type=jnp.float32)
                out = part if out is None else out + part
            return out + b_o

        def self_attn(x2d, n, w_qkv, b_qkv, w_o, b_o):
            # Fused Q/K/V projection: one matmul for all three.
            qkv = jnp.dot(x2d, w_qkv, preferred_element_type=jnp.float32) + b_qkv
            q3 = qkv[:, :d_model].reshape(batch, n, d_model)
            k3 = qkv[:, d_model:2 * d_model].reshape(batch, n, d_model)
            v3 = qkv[:, 2 * d_model:].reshape(batch, n, d_model)
            return mha(q3, k3, v3, n, w_o, b_o)

        def cross_attn(q2d, mem2d, n_q, n_kv, w_q, b_q, w_kv, b_kv, w_o, b_o):
            q = jnp.dot(q2d, w_q, preferred_element_type=jnp.float32) + b_q
            kv = jnp.dot(mem2d, w_kv, preferred_element_type=jnp.float32) + b_kv
            q3 = q.reshape(batch, n_q, d_model)
            k3 = kv[:, :d_model].reshape(batch, n_kv, d_model)
            v3 = kv[:, d_model:].reshape(batch, n_kv, d_model)
            return mha(q3, k3, v3, n_q, w_o, b_o)

        def ffn(x2d, w1, b1, w2, b2):
            h = jnp.maximum(
                jnp.dot(x2d, w1, preferred_element_type=jnp.float32) + b1, 0.0)
            return jnp.dot(h, w2, preferred_element_type=jnp.float32) + b2

        # ----- Encoder stack (post-norm, ReLU FFN) -----
        src = x_ref[...]                       # (batch*src_len, d_model)
        for l in range(n_enc):
            pre = f"e{l}."
            a = self_attn(src, src_len, md(pre + "wqkv"), vr(pre + "bqkv"),
                          md(pre + "wo"), vr(pre + "bo"))
            src = layer_norm(src + a, vr(pre + "ln1g"), vr(pre + "ln1b"))
            f = ffn(src, md(pre + "w1"), vr(pre + "b1"),
                    mf(pre + "w2"), vr(pre + "b2"))
            src = layer_norm(src + f, vr(pre + "ln2g"), vr(pre + "ln2b"))
        memory = layer_norm(src, vr("enc_norm.g"), vr("enc_norm.b"))

        # ----- Decoder stack -----
        tgt = y_ref[...]                       # (batch*tgt_len, d_model)
        for l in range(n_dec):
            pre = f"d{l}."
            a = self_attn(tgt, tgt_len, md(pre + "s_wqkv"), vr(pre + "s_bqkv"),
                          md(pre + "s_wo"), vr(pre + "s_bo"))
            tgt = layer_norm(tgt + a, vr(pre + "ln1g"), vr(pre + "ln1b"))
            a = cross_attn(tgt, memory, tgt_len, src_len,
                           md(pre + "c_wq"), vr(pre + "c_bq"),
                           md(pre + "c_wkv"), vr(pre + "c_bkv"),
                           md(pre + "c_wo"), vr(pre + "c_bo"))
            tgt = layer_norm(tgt + a, vr(pre + "ln2g"), vr(pre + "ln2b"))
            f = ffn(tgt, md(pre + "w1"), vr(pre + "b1"),
                    mf(pre + "w2"), vr(pre + "b2"))
            tgt = layer_norm(tgt + f, vr(pre + "ln3g"), vr(pre + "ln3b"))
        tgt = layer_norm(tgt, vr("dec_norm.g"), vr("dec_norm.b"))

        # Single 2-D store of the whole result slab.
        out_ref[...] = tgt.astype(out_ref.dtype)

    return kernel


# ---------------------------------------------------------------------------
# Wrapper: packs all weights into 3 slabs and calls pallas_call once
# ---------------------------------------------------------------------------
def custom_transformer_forward(x, y, params, *, nhead):
    """x: (batch, src_len, d_model), y: (batch, tgt_len, d_model); batch_first."""
    batch, src_len, d_model = x.shape
    tgt_len = y.shape[1]
    n_enc = len(params["encoder"])
    n_dec = len(params["decoder"])
    d_ff = params["encoder"][0]["ffn"]["lin1_w"].shape[0]
    vec_w = max(3 * d_model, d_ff)

    # --- slab packers (static offsets recorded per named entry) ---
    d_parts, d_off, d_pos = [], {}, 0
    f_parts, f_off, f_pos = [], {}, 0
    v_rows, v_off = [], {}

    def add_d(name, a):                      # (d_model, w) matrices, lane-concat
        nonlocal d_pos
        d_off[name] = (d_pos, a.shape[1])
        d_parts.append(a)
        d_pos += a.shape[1]

    def add_f(name, a):                      # (d_ff, w) matrices, lane-concat
        nonlocal f_pos
        f_off[name] = (f_pos, a.shape[1])
        f_parts.append(a)
        f_pos += a.shape[1]

    def add_v(name, v):                      # 1-D bias / LN vectors, one row each
        v_off[name] = (len(v_rows), v.shape[0])
        v_rows.append(jnp.pad(v, (0, vec_w - v.shape[0])))

    for l, lp in enumerate(params["encoder"]):
        pre = f"e{l}."
        at, ffp, l1, l2 = lp["attn"], lp["ffn"], lp["ln1"], lp["ln2"]
        add_d(pre + "wqkv", jnp.transpose(at["in_proj_w"]))   # (D, 3D)
        add_d(pre + "wo", jnp.transpose(at["out_w"]))         # (D, D)
        add_d(pre + "w1", jnp.transpose(ffp["lin1_w"]))       # (D, F)
        add_f(pre + "w2", jnp.transpose(ffp["lin2_w"]))       # (F, D)
        add_v(pre + "bqkv", at["in_proj_b"])
        add_v(pre + "bo", at["out_b"])
        add_v(pre + "b1", ffp["lin1_b"])
        add_v(pre + "b2", ffp["lin2_b"])
        add_v(pre + "ln1g", l1["g"]); add_v(pre + "ln1b", l1["b"])
        add_v(pre + "ln2g", l2["g"]); add_v(pre + "ln2b", l2["b"])

    for l, lp in enumerate(params["decoder"]):
        pre = f"d{l}."
        sa, ca, ffp = lp["self_attn"], lp["cross_attn"], lp["ffn"]
        c_wt = jnp.transpose(ca["in_proj_w"])                 # (D, 3D)
        add_d(pre + "s_wqkv", jnp.transpose(sa["in_proj_w"]))
        add_d(pre + "s_wo", jnp.transpose(sa["out_w"]))
        add_d(pre + "c_wq", c_wt[:, :d_model])                # pre-split Q vs KV
        add_d(pre + "c_wkv", c_wt[:, d_model:])
        add_d(pre + "c_wo", jnp.transpose(ca["out_w"]))
        add_d(pre + "w1", jnp.transpose(ffp["lin1_w"]))
        add_f(pre + "w2", jnp.transpose(ffp["lin2_w"]))
        add_v(pre + "s_bqkv", sa["in_proj_b"])
        add_v(pre + "s_bo", sa["out_b"])
        add_v(pre + "c_bq", ca["in_proj_b"][:d_model])
        add_v(pre + "c_bkv", ca["in_proj_b"][d_model:])
        add_v(pre + "c_bo", ca["out_b"])
        add_v(pre + "b1", ffp["lin1_b"])
        add_v(pre + "b2", ffp["lin2_b"])
        add_v(pre + "ln1g", lp["ln1"]["g"]); add_v(pre + "ln1b", lp["ln1"]["b"])
        add_v(pre + "ln2g", lp["ln2"]["g"]); add_v(pre + "ln2b", lp["ln2"]["b"])
        add_v(pre + "ln3g", lp["ln3"]["g"]); add_v(pre + "ln3b", lp["ln3"]["b"])

    add_v("enc_norm.g", params["enc_norm"]["g"])
    add_v("enc_norm.b", params["enc_norm"]["b"])
    add_v("dec_norm.g", params["dec_norm"]["g"])
    add_v("dec_norm.b", params["dec_norm"]["b"])

    mat_d = jnp.concatenate(d_parts, axis=1)   # (d_model, sum widths)
    mat_f = jnp.concatenate(f_parts, axis=1)   # (d_ff,    sum widths)
    vec = jnp.stack(v_rows, axis=0)            # (n_rows,  vec_w)

    kernel = _make_transformer_kernel(
        nhead=nhead, n_enc=n_enc, n_dec=n_dec, batch=batch,
        src_len=src_len, tgt_len=tgt_len, d_model=d_model,
        d_off=d_off, f_off=f_off, v_off=v_off)

    # Lane-dense 2-D I/O: flatten (B, T, D) -> (B*T, D) outside the kernel.
    x2d = x.reshape(batch * src_len, d_model)
    y2d = y.reshape(batch * tgt_len, d_model)

    vmem = pl.BlockSpec(memory_space=pltpu.MemorySpace.VMEM)
    out2d = pl.pallas_call(
        kernel,
        out_shape=jax.ShapeDtypeStruct((batch * tgt_len, d_model), jnp.float32),
        in_specs=[vmem] * 5,
        out_specs=vmem,
    )(x2d, y2d, mat_d, mat_f, vec)
    return out2d.reshape(batch, tgt_len, d_model)


# ---------------------------------------------------------------------------
# Pure-JAX reference (mirrors torch nn.Transformer eval forward, post-norm, ReLU)
# ---------------------------------------------------------------------------
def _ln_ref(x, p):
    mu = jnp.mean(x, axis=-1, keepdims=True)
    var = jnp.mean(jnp.square(x - mu), axis=-1, keepdims=True)
    return (x - mu) * jax.lax.rsqrt(var + _LN_EPS) * p["g"] + p["b"]


def _mha_ref(q_in, kv_in, p, nhead):
    B, Tq, D = q_in.shape
    Tk = kv_in.shape[1]
    hd = D // nhead
    wq, wk, wv = jnp.split(p["in_proj_w"], 3, axis=0)
    bq, bk, bv = jnp.split(p["in_proj_b"], 3, axis=0)
    q = (jnp.einsum("btd,ed->bte", q_in, wq, precision=_HI) + bq)
    k = (jnp.einsum("btd,ed->bte", kv_in, wk, precision=_HI) + bk)
    v = (jnp.einsum("btd,ed->bte", kv_in, wv, precision=_HI) + bv)
    q = q.reshape(B, Tq, nhead, hd).transpose(0, 2, 1, 3)
    k = k.reshape(B, Tk, nhead, hd).transpose(0, 2, 1, 3)
    v = v.reshape(B, Tk, nhead, hd).transpose(0, 2, 1, 3)
    s = jnp.einsum("bhqd,bhkd->bhqk", q, k, precision=_HI) / math.sqrt(hd)
    a = jax.nn.softmax(s, axis=-1)
    ctx = jnp.einsum("bhqk,bhkd->bhqd", a, v, precision=_HI)
    ctx = ctx.transpose(0, 2, 1, 3).reshape(B, Tq, D)
    return jnp.einsum("btd,ed->bte", ctx, p["out_w"], precision=_HI) + p["out_b"]


def _ffn_ref(x, p):
    h = jax.nn.relu(jnp.einsum("btd,fd->btf", x, p["lin1_w"], precision=_HI)
                    + p["lin1_b"])
    return jnp.einsum("btf,df->btd", h, p["lin2_w"], precision=_HI) + p["lin2_b"]


def transformer_reference(x, y, params, nhead):
    src = x
    for lp in params["encoder"]:
        src = _ln_ref(src + _mha_ref(src, src, lp["attn"], nhead), lp["ln1"])
        src = _ln_ref(src + _ffn_ref(src, lp["ffn"]), lp["ln2"])
    memory = _ln_ref(src, params["enc_norm"])
    tgt = y
    for lp in params["decoder"]:
        tgt = _ln_ref(tgt + _mha_ref(tgt, tgt, lp["self_attn"], nhead), lp["ln1"])
        tgt = _ln_ref(tgt + _mha_ref(tgt, memory, lp["cross_attn"], nhead), lp["ln2"])
        tgt = _ln_ref(tgt + _ffn_ref(tgt, lp["ffn"]), lp["ln3"])
    return _ln_ref(tgt, params["dec_norm"])


# ---------------------------------------------------------------------------
# Deterministic synthetic parameters (PyTorch-like shapes)
# ---------------------------------------------------------------------------
def init_params(key, d_model, d_ff, n_enc, n_dec):
    def uni(k, shape, scale):
        return jax.random.uniform(k, shape, jnp.float32, -scale, scale)

    s = 1.0 / math.sqrt(d_model)
    s_ff = 1.0 / math.sqrt(d_ff)

    def attn_p(k):
        k1, k2, k3, k4 = jax.random.split(k, 4)
        return {"in_proj_w": uni(k1, (3 * d_model, d_model), s),
                "in_proj_b": uni(k2, (3 * d_model,), s),
                "out_w": uni(k3, (d_model, d_model), s),
                "out_b": uni(k4, (d_model,), s)}

    def ffn_p(k):
        k1, k2, k3, k4 = jax.random.split(k, 4)
        return {"lin1_w": uni(k1, (d_ff, d_model), s),
                "lin1_b": uni(k2, (d_ff,), s),
                "lin2_w": uni(k3, (d_model, d_ff), s_ff),
                "lin2_b": uni(k4, (d_model,), s_ff)}

    def ln_p(k):
        k1, k2 = jax.random.split(k)
        return {"g": 1.0 + uni(k1, (d_model,), 0.1),
                "b": uni(k2, (d_model,), 0.1)}

    keys = jax.random.split(key, n_enc + n_dec + 2)
    encoder = []
    for i in range(n_enc):
        ks = jax.random.split(keys[i], 4)
        encoder.append({"attn": attn_p(ks[0]), "ln1": ln_p(ks[1]),
                        "ffn": ffn_p(ks[2]), "ln2": ln_p(ks[3])})
    decoder = []
    for i in range(n_dec):
        ks = jax.random.split(keys[n_enc + i], 6)
        decoder.append({"self_attn": attn_p(ks[0]), "ln1": ln_p(ks[1]),
                        "cross_attn": attn_p(ks[2]), "ln2": ln_p(ks[3]),
                        "ffn": ffn_p(ks[4]), "ln3": ln_p(ks[5])})
    return {"encoder": encoder, "decoder": decoder,
            "enc_norm": ln_p(keys[-2]), "dec_norm": ln_p(keys[-1])}


if __name__ == "__main__":
    # Shapes implied by the module: d_model = matrix_size, nhead = int(sqrt(matrix_size)).
    batch, src_len, tgt_len = 2, 8, 8
    matrix_size = 16                       # d_model
    nhead = int(matrix_size ** 0.5)        # 4 heads, head_dim = 4
    num_encoder_layers = 2
    num_decoder_layers = 2
    dim_feedforward = 32

    key = jax.random.PRNGKey(0)
    kx, ky, kp = jax.random.split(key, 3)
    x = jax.random.normal(kx, (batch, src_len, matrix_size), jnp.float32)
    y = jax.random.normal(ky, (batch, tgt_len, matrix_size), jnp.float32)
    params = init_params(kp, matrix_size, dim_feedforward,
                         num_encoder_layers, num_decoder_layers)

    out = jax.block_until_ready(custom_transformer_forward(x, y, params, nhead=nhead))
    ref = jax.block_until_ready(transformer_reference(x, y, params, nhead))

    assert out.shape == (batch, tgt_len, matrix_size), out.shape
    # Reference runs at HIGHEST matmul precision; kernel matmuls are fp32 in-kernel.
    np.testing.assert_allclose(np.asarray(out), np.asarray(ref), atol=5e-4, rtol=5e-4)

    print("KERNEL_OK")
</pallas_src>

<mosaic_0001>
module attributes {stable_mosaic.version = 11 : i64} {
  func.func @kernel(%arg0: memref<16x16xf32, #tpu.memory_space<vmem>>, %arg1: memref<16x16xf32, #tpu.memory_space<vmem>>, %arg2: memref<16x512xf32, #tpu.memory_space<vmem>>, %arg3: memref<32x64xf32, #tpu.memory_space<vmem>>, %arg4: memref<46x48xf32, #tpu.memory_space<vmem>>, %arg5: memref<16x16xf32, #tpu.memory_space<vmem>>) attributes {dimension_semantics = [], scalar_prefetch = 0 : i64, scratch_operands = 0 : i64, tpu.core_type = #tpu.core_type<tc>} {
    %c0 = arith.constant 0 : index
    %c0_0 = arith.constant 0 : index
    %0 = vector.load %arg2[%c0, %c0_0] : memref<16x512xf32, #tpu.memory_space<vmem>>, vector<16x512xf32>
    %c0_1 = arith.constant 0 : index
    %c0_2 = arith.constant 0 : index
    %1 = vector.load %arg3[%c0_1, %c0_2] : memref<32x64xf32, #tpu.memory_space<vmem>>, vector<32x64xf32>
    %c0_3 = arith.constant 0 : index
    %c0_4 = arith.constant 0 : index
    %2 = vector.load %arg4[%c0_3, %c0_4] : memref<46x48xf32, #tpu.memory_space<vmem>>, vector<46x48xf32>
    %c0_5 = arith.constant 0 : index
    %c0_6 = arith.constant 0 : index
    %3 = vector.load %arg0[%c0_5, %c0_6] : memref<16x16xf32, #tpu.memory_space<vmem>>, vector<16x16xf32>
    %4 = vector.extract_strided_slice %0 {offsets = [0, 0], sizes = [16, 48], strides = [1, 1]} : vector<16x512xf32> to vector<16x48xf32>
    %5 = vector.extract_strided_slice %2 {offsets = [0, 0], sizes = [1, 48], strides = [1, 1]} : vector<46x48xf32> to vector<1x48xf32>
    %6 = vector.extract_strided_slice %0 {offsets = [0, 48], sizes = [16, 16], strides = [1, 1]} : vector<16x512xf32> to vector<16x16xf32>
    %7 = vector.extract_strided_slice %2 {offsets = [1, 0], sizes = [1, 16], strides = [1, 1]} : vector<46x48xf32> to vector<1x16xf32>
    %cst = arith.constant dense<0.000000e+00> : vector<16x48xf32>
    %8 = tpu.matmul %3, %4, %cst {dimension_numbers = #tpu.dot_dimension_numbers<[1], [0], [0], [1], [0, 0, 1, 1], [], []>} : vector<16x16xf32>, vector<16x48xf32>, vector<16x48xf32> -> vector<16x48xf32>
    %9 = vector.broadcast %5 : vector<1x48xf32> to vector<16x48xf32>
    %10 = arith.addf %8, %9 : vector<16x48xf32>
    %11 = vector.extract_strided_slice %10 {offsets = [0, 0], sizes = [16, 16], strides = [1, 1]} : vector<16x48xf32> to vector<16x16xf32>
    %12 = vector.shape_cast %11 : vector<16x16xf32> to vector<2x8x16xf32>
    %13 = vector.extract_strided_slice %10 {offsets = [0, 16], sizes = [16, 16], strides = [1, 1]} : vector<16x48xf32> to vector<16x16xf32>
    %14 = vector.shape_cast %13 : vector<16x16xf32> to vector<2x8x16xf32>
    %15 = vector.extract_strided_slice %10 {offsets = [0, 32], sizes = [16, 16], strides = [1, 1]} : vector<16x48xf32> to vector<16x16xf32>
    %16 = vector.shape_cast %15 : vector<16x16xf32> to vector<2x8x16xf32>
    %17 = vector.extract_strided_slice %12 {offsets = [0, 0, 0], sizes = [2, 8, 4], strides = [1, 1, 1]} : vector<2x8x16xf32> to vector<2x8x4xf32>
    %18 = vector.extract_strided_slice %14 {offsets = [0, 0, 0], sizes = [2, 8, 4], strides = [1, 1, 1]} : vector<2x8x16xf32> to vector<2x8x4xf32>
    %19 = vector.extract_strided_slice %16 {offsets = [0, 0, 0], sizes = [2, 8, 4], strides = [1, 1, 1]} : vector<2x8x16xf32> to vector<2x8x4xf32>
    "tpu.trace_start"() <{level = 10 : i32, message = "bqd,bkd->bqk"}> : () -> ()
    %cst_7 = arith.constant dense<0.000000e+00> : vector<2x8x8xf32>
    %20 = tpu.matmul %17, %18, %cst_7 {dimension_numbers = #tpu.dot_dimension_numbers<[2], [2], [1], [1], [0, 0, 0, 1, 1, 1], [0], [0]>} : vector<2x8x4xf32>, vector<2x8x4xf32>, vector<2x8x8xf32> -> vector<2x8x8xf32>
    "tpu.trace_stop"() : () -> ()
    %cst_8 = arith.constant 5.000000e-01 : f32
    %21 = vector.broadcast %cst_8 : f32 to vector<2x8x8xf32>
    %22 = arith.mulf %20, %21 : vector<2x8x8xf32>
    %cst_9 = arith.constant dense<0xFF800000> : vector<2x8xf32>
    %23 = vector.multi_reduction <maximumf>, %22, %cst_9 [2] : vector<2x8x8xf32> to vector<2x8xf32>
    %24 = vector.shape_cast %23 : vector<2x8xf32> to vector<2x8x1xf32>
    %25 = vector.broadcast %24 : vector<2x8x1xf32> to vector<2x8x8xf32>
    %26 = arith.subf %22, %25 : vector<2x8x8xf32>
    %27 = math.exp %26 : vector<2x8x8xf32>
    %cst_10 = arith.constant dense<0.000000e+00> : vector<2x8xf32>
    %28 = vector.multi_reduction <add>, %27, %cst_10 [2] : vector<2x8x8xf32> to vector<2x8xf32>
    %29 = vector.shape_cast %28 : vector<2x8xf32> to vector<2x8x1xf32>
    %30 = vector.broadcast %29 : vector<2x8x1xf32> to vector<2x8x8xf32>
    %31 = arith.divf %27, %30 : vector<2x8x8xf32>
    "tpu.trace_start"() <{level = 10 : i32, message = "bqk,bkd->bqd"}> : () -> ()
    %cst_11 = arith.constant dense<0.000000e+00> : vector<2x8x4xf32>
    %32 = tpu.matmul %31, %19, %cst_11 {dimension_numbers = #tpu.dot_dimension_numbers<[2], [1], [1], [2], [0, 0, 0, 1, 1, 2], [0], [0]>} : vector<2x8x8xf32>, vector<2x8x4xf32>, vector<2x8x4xf32> -> vector<2x8x4xf32>
    "tpu.trace_stop"() : () -> ()
    %33 = vector.shape_cast %32 : vector<2x8x4xf32> to vector<16x4xf32>
    %34 = vector.extract_strided_slice %6 {offsets = [0, 0], sizes = [4, 16], strides = [1, 1]} : vector<16x16xf32> to vector<4x16xf32>
    %cst_12 = arith.constant dense<0.000000e+00> : vector<16x16xf32>
    %35 = tpu.matmul %33, %34, %cst_12 {dimension_numbers = #tpu.dot_dimension_numbers<[1], [0], [0], [1], [0, 0, 1, 1], [], []>} : vector<16x4xf32>, vector<4x16xf32>, vector<16x16xf32> -> vector<16x16xf32>
    %36 = vector.extract_strided_slice %12 {offsets = [0, 0, 4], sizes = [2, 8, 4], strides = [1, 1, 1]} : vector<2x8x16xf32> to vector<2x8x4xf32>
    %37 = vector.extract_strided_slice %14 {offsets = [0, 0, 4], sizes = [2, 8, 4], strides = [1, 1, 1]} : vector<2x8x16xf32> to vector<2x8x4xf32>
    %38 = vector.extract_strided_slice %16 {offsets = [0, 0, 4], sizes = [2, 8, 4], strides = [1, 1, 1]} : vector<2x8x16xf32> to vector<2x8x4xf32>
    "tpu.trace_start"() <{level = 10 : i32, message = "bqd,bkd->bqk"}> : () -> ()
    %cst_13 = arith.constant dense<0.000000e+00> : vector<2x8x8xf32>
    %39 = tpu.matmul %36, %37, %cst_13 {dimension_numbers = #tpu.dot_dimension_numbers<[2], [2], [1], [1], [0, 0, 0, 1, 1, 1], [0], [0]>} : vector<2x8x4xf32>, vector<2x8x4xf32>, vector<2x8x8xf32> -> vector<2x8x8xf32>
    "tpu.trace_stop"() : () -> ()
    %cst_14 = arith.constant 5.000000e-01 : f32
    %40 = vector.broadcast %cst_14 : f32 to vector<2x8x8xf32>
    %41 = arith.mulf %39, %40 : vector<2x8x8xf32>
    %cst_15 = arith.constant dense<0xFF800000> : vector<2x8xf32>
    %42 = vector.multi_reduction <maximumf>, %41, %cst_15 [2] : vector<2x8x8xf32> to vector<2x8xf32>
    %43 = vector.shape_cast %42 : vector<2x8xf32> to vector<2x8x1xf32>
    %44 = vector.broadcast %43 : vector<2x8x1xf32> to vector<2x8x8xf32>
    %45 = arith.subf %41, %44 : vector<2x8x8xf32>
    %46 = math.exp %45 : vector<2x8x8xf32>
    %cst_16 = arith.constant dense<0.000000e+00> : vector<2x8xf32>
    %47 = vector.multi_reduction <add>, %46, %cst_16 [2] : vector<2x8x8xf32> to vector<2x8xf32>
    %48 = vector.shape_cast %47 : vector<2x8xf32> to vector<2x8x1xf32>
    %49 = vector.broadcast %48 : vector<2x8x1xf32> to vector<2x8x8xf32>
    %50 = arith.divf %46, %49 : vector<2x8x8xf32>
    "tpu.trace_start"() <{level = 10 : i32, message = "bqk,bkd->bqd"}> : () -> ()
    %cst_17 = arith.constant dense<0.000000e+00> : vector<2x8x4xf32>
    %51 = tpu.matmul %50, %38, %cst_17 {dimension_numbers = #tpu.dot_dimension_numbers<[2], [1], [1], [2], [0, 0, 0, 1, 1, 2], [0], [0]>} : vector<2x8x8xf32>, vector<2x8x4xf32>, vector<2x8x4xf32> -> vector<2x8x4xf32>
    "tpu.trace_stop"() : () -> ()
    %52 = vector.shape_cast %51 : vector<2x8x4xf32> to vector<16x4xf32>
    %53 = vector.extract_strided_slice %6 {offsets = [4, 0], sizes = [4, 16], strides = [1, 1]} : vector<16x16xf32> to vector<4x16xf32>
    %cst_18 = arith.constant dense<0.000000e+00> : vector<16x16xf32>
    %54 = tpu.matmul %52, %53, %cst_18 {dimension_numbers = #tpu.dot_dimension_numbers<[1], [0], [0], [1], [0, 0, 1, 1], [], []>} : vector<16x4xf32>, vector<4x16xf32>, vector<16x16xf32> -> vector<16x16xf32>
    %55 = arith.addf %35, %54 : vector<16x16xf32>
    %56 = vector.extract_strided_slice %12 {offsets = [0, 0, 8], sizes = [2, 8, 4], strides = [1, 1, 1]} : vector<2x8x16xf32> to vector<2x8x4xf32>
    %57 = vector.extract_strided_slice %14 {offsets = [0, 0, 8], sizes = [2, 8, 4], strides = [1, 1, 1]} : vector<2x8x16xf32> to vector<2x8x4xf32>
    %58 = vector.extract_strided_slice %16 {offsets = [0, 0, 8], sizes = [2, 8, 4], strides = [1, 1, 1]} : vector<2x8x16xf32> to vector<2x8x4xf32>
    "tpu.trace_start"() <{level = 10 : i32, message = "bqd,bkd->bqk"}> : () -> ()
    %cst_19 = arith.constant dense<0.000000e+00> : vector<2x8x8xf32>
    %59 = tpu.matmul %56, %57, %cst_19 {dimension_numbers = #tpu.dot_dimension_numbers<[2], [2], [1], [1], [0, 0, 0, 1, 1, 1], [0], [0]>} : vector<2x8x4xf32>, vector<2x8x4xf32>, vector<2x8x8xf32> -> vector<2x8x8xf32>
    "tpu.trace_stop"() : () -> ()
    %cst_20 = arith.constant 5.000000e-01 : f32
    %60 = vector.broadcast %cst_20 : f32 to vector<2x8x8xf32>
    %61 = arith.mulf %59, %60 : vector<2x8x8xf32>
    %cst_21 = arith.constant dense<0xFF800000> : vector<2x8xf32>
    %62 = vector.multi_reduction <maximumf>, %61, %cst_21 [2] : vector<2x8x8xf32> to vector<2x8xf32>
    %63 = vector.shape_cast %62 : vector<2x8xf32> to vector<2x8x1xf32>
    %64 = vector.broadcast %63 : vector<2x8x1xf32> to vector<2x8x8xf32>
    %65 = arith.subf %61, %64 : vector<2x8x8xf32>
    %66 = math.exp %65 : vector<2x8x8xf32>
    %cst_22 = arith.constant dense<0.000000e+00> : vector<2x8xf32>
    %67 = vector.multi_reduction <add>, %66, %cst_22 [2] : vector<2x8x8xf32> to vector<2x8xf32>
    %68 = vector.shape_cast %67 : vector<2x8xf32> to vector<2x8x1xf32>
    %69 = vector.broadcast %68 : vector<2x8x1xf32> to vector<2x8x8xf32>
    %70 = arith.divf %66, %69 : vector<2x8x8xf32>
    "tpu.trace_start"() <{level = 10 : i32, message = "bqk,bkd->bqd"}> : () -> ()
    %cst_23 = arith.constant dense<0.000000e+00> : vector<2x8x4xf32>
    %71 = tpu.matmul %70, %58, %cst_23 {dimension_numbers = #tpu.dot_dimension_numbers<[2], [1], [1], [2], [0, 0, 0, 1, 1, 2], [0], [0]>} : vector<2x8x8xf32>, vector<2x8x4xf32>, vector<2x8x4xf32> -> vector<2x8x4xf32>
    "tpu.trace_stop"() : () -> ()
    %72 = vector.shape_cast %71 : vector<2x8x4xf32> to vector<16x4xf32>
    %73 = vector.extract_strided_slice %6 {offsets = [8, 0], sizes = [4, 16], strides = [1, 1]} : vector<16x16xf32> to vector<4x16xf32>
    %cst_24 = arith.constant dense<0.000000e+00> : vector<16x16xf32>
    %74 = tpu.matmul %72, %73, %cst_24 {dimension_numbers = #tpu.dot_dimension_numbers<[1], [0], [0], [1], [0, 0, 1, 1], [], []>} : vector<16x4xf32>, vector<4x16xf32>, vector<16x16xf32> -> vector<16x16xf32>
    %75 = arith.addf %55, %74 : vector<16x16xf32>
    %76 = vector.extract_strided_slice %12 {offsets = [0, 0, 12], sizes = [2, 8, 4], strides = [1, 1, 1]} : vector<2x8x16xf32> to vector<2x8x4xf32>
    %77 = vector.extract_strided_slice %14 {offsets = [0, 0, 12], sizes = [2, 8, 4], strides = [1, 1, 1]} : vector<2x8x16xf32> to vector<2x8x4xf32>
    %78 = vector.extract_strided_slice %16 {offsets = [0, 0, 12], sizes = [2, 8, 4], strides = [1, 1, 1]} : vector<2x8x16xf32> to vector<2x8x4xf32>
    "tpu.trace_start"() <{level = 10 : i32, message = "bqd,bkd->bqk"}> : () -> ()
    %cst_25 = arith.constant dense<0.000000e+00> : vector<2x8x8xf32>
    %79 = tpu.matmul %76, %77, %cst_25 {dimension_numbers = #tpu.dot_dimension_numbers<[2], [2], [1], [1], [0, 0, 0, 1, 1, 1], [0], [0]>} : vector<2x8x4xf32>, vector<2x8x4xf32>, vector<2x8x8xf32> -> vector<2x8x8xf32>
    "tpu.trace_stop"() : () -> ()
    %cst_26 = arith.constant 5.000000e-01 : f32
    %80 = vector.broadcast %cst_26 : f32 to vector<2x8x8xf32>
    %81 = arith.mulf %79, %80 : vector<2x8x8xf32>
    %cst_27 = arith.constant dense<0xFF800000> : vector<2x8xf32>
    %82 = vector.multi_reduction <maximumf>, %81, %cst_27 [2] : vector<2x8x8xf32> to vector<2x8xf32>
    %83 = vector.shape_cast %82 : vector<2x8xf32> to vector<2x8x1xf32>
    %84 = vector.broadcast %83 : vector<2x8x1xf32> to vector<2x8x8xf32>
    %85 = arith.subf %81, %84 : vector<2x8x8xf32>
    %86 = math.exp %85 : vector<2x8x8xf32>
    %cst_28 = arith.constant dense<0.000000e+00> : vector<2x8xf32>
    %87 = vector.multi_reduction <add>, %86, %cst_28 [2] : vector<2x8x8xf32> to vector<2x8xf32>
    %88 = vector.shape_cast %87 : vector<2x8xf32> to vector<2x8x1xf32>
    %89 = vector.broadcast %88 : vector<2x8x1xf32> to vector<2x8x8xf32>
    %90 = arith.divf %86, %89 : vector<2x8x8xf32>
    "tpu.trace_start"() <{level = 10 : i32, message = "bqk,bkd->bqd"}> : () -> ()
    %cst_29 = arith.constant dense<0.000000e+00> : vector<2x8x4xf32>
    %91 = tpu.matmul %90, %78, %cst_29 {dimension_numbers = #tpu.dot_dimension_numbers<[2], [1], [1], [2], [0, 0, 0, 1, 1, 2], [0], [0]>} : vector<2x8x8xf32>, vector<2x8x4xf32>, vector<2x8x4xf32> -> vector<2x8x4xf32>
    "tpu.trace_stop"() : () -> ()
    %92 = vector.shape_cast %91 : vector<2x8x4xf32> to vector<16x4xf32>
    %93 = vector.extract_strided_slice %6 {offsets = [12, 0], sizes = [4, 16], strides = [1, 1]} : vector<16x16xf32> to vector<4x16xf32>
    %cst_30 = arith.constant dense<0.000000e+00> : vector<16x16xf32>
    %94 = tpu.matmul %92, %93, %cst_30 {dimension_numbers = #tpu.dot_dimension_numbers<[1], [0], [0], [1], [0, 0, 1, 1], [], []>} : vector<16x4xf32>, vector<4x16xf32>, vector<16x16xf32> -> vector<16x16xf32>
    %95 = arith.addf %75, %94 : vector<16x16xf32>
    %96 = vector.broadcast %7 : vector<1x16xf32> to vector<16x16xf32>
    %97 = arith.addf %95, %96 : vector<16x16xf32>
    %98 = arith.addf %3, %97 : vector<16x16xf32>
    %99 = vector.extract_strided_slice %2 {offsets = [4, 0], sizes = [1, 16], strides = [1, 1]} : vector<46x48xf32> to vector<1x16xf32>
    %100 = vector.extract_strided_slice %2 {offsets = [5, 0], sizes = [1, 16], strides = [1, 1]} : vector<46x48xf32> to vector<1x16xf32>
    %cst_31 = arith.constant dense<0.000000e+00> : vector<16xf32>
    %101 = vector.multi_reduction <add>, %98, %cst_31 [1] : vector<16x16xf32> to vector<16xf32>
    %102 = vector.shape_cast %101 : vector<16xf32> to vector<16x1xf32>
    %cst_32 = arith.constant 1.600000e+01 : f32
    %103 = vector.broadcast %cst_32 : f32 to vector<16x1xf32>
    %104 = arith.divf %102, %103 : vector<16x1xf32>
    %105 = arith.mulf %98, %98 : vector<16x16xf32>
    %cst_33 = arith.constant dense<0.000000e+00> : vector<16xf32>
    %106 = vector.multi_reduction <add>, %105, %cst_33 [1] : vector<16x16xf32> to vector<16xf32>
    %107 = vector.shape_cast %106 : vector<16xf32> to vector<16x1xf32>
    %cst_34 = arith.constant 1.600000e+01 : f32
    %108 = vector.broadcast %cst_34 : f32 to vector<16x1xf32>
    %109 = arith.divf %107, %108 : vector<16x1xf32>
    %110 = arith.mulf %104, %104 : vector<16x1xf32>
    %111 = arith.subf %109, %110 : vector<16x1xf32>
    %112 = vector.broadcast %104 : vector<16x1xf32> to vector<16x16xf32>
    %113 = arith.subf %98, %112 : vector<16x16xf32>
    %cst_35 = arith.constant 9.99999974E-6 : f32
    %114 = vector.broadcast %cst_35 : f32 to vector<16x1xf32>
    %115 = arith.addf %111, %114 : vector<16x1xf32>
    %116 = math.rsqrt %115 : vector<16x1xf32>
    %117 = vector.broadcast %116 : vector<16x1xf32> to vector<16x16xf32>
    %118 = arith.mulf %113, %117 : vector<16x16xf32>
    %119 = vector.broadcast %99 : vector<1x16xf32> to vector<16x16xf32>
    %120 = arith.mulf %118, %119 : vector<16x16xf32>
    %121 = vector.broadcast %100 : vector<1x16xf32> to vector<16x16xf32>
    %122 = arith.addf %120, %121 : vector<16x16xf32>
    %123 = vector.extract_strided_slice %0 {offsets = [0, 64], sizes = [16, 32], strides = [1, 1]} : vector<16x512xf32> to vector<16x32xf32>
    %124 = vector.extract_strided_slice %2 {offsets = [2, 0], sizes = [1, 32], strides = [1, 1]} : vector<46x48xf32> to vector<1x32xf32>
    %125 = vector.extract_strided_slice %1 {offsets = [0, 0], sizes = [32, 16], strides = [1, 1]} : vector<32x64xf32> to vector<32x16xf32>
    %126 = vector.extract_strided_slice %2 {offsets = [3, 0], sizes = [1, 16], strides = [1, 1]} : vector<46x48xf32> to vector<1x16xf32>
    %cst_36 = arith.constant dense<0.000000e+00> : vector<16x32xf32>
    %127 = tpu.matmul %122, %123, %cst_36 {dimension_numbers = #tpu.dot_dimension_numbers<[1], [0], [0], [1], [0, 0, 1, 1], [], []>} : vector<16x16xf32>, vector<16x32xf32>, vector<16x32xf32> -> vector<16x32xf32>
    %128 = vector.broadcast %124 : vector<1x32xf32> to vector<16x32xf32>
    %129 = arith.addf %127, %128 : vector<16x32xf32>
    %cst_37 = arith.constant 0.000000e+00 : f32
    %130 = vector.broadcast %cst_37 : f32 to vector<16x32xf32>
    %131 = arith.maximumf %129, %130 : vector<16x32xf32>
    %cst_38 = arith.constant dense<0.000000e+00> : vector<16x16xf32>
    %132 = tpu.matmul %131, %125, %cst_38 {dimension_numbers = #tpu.dot_dimension_numbers<[1], [0], [0], [1], [0, 0, 1, 1], [], []>} : vector<16x32xf32>, vector<32x16xf32>, vector<16x16xf32> -> vector<16x16xf32>
    %133 = vector.broadcast %126 : vector<1x16xf32> to vector<16x16xf32>
    %134 = arith.addf %132, %133 : vector<16x16xf32>
    %135 = arith.addf %122, %134 : vector<16x16xf32>
    %136 = vector.extract_strided_slice %2 {offsets = [6, 0], sizes = [1, 16], strides = [1, 1]} : vector<46x48xf32> to vector<1x16xf32>
    %137 = vector.extract_strided_slice %2 {offsets = [7, 0], sizes = [1, 16], strides = [1, 1]} : vector<46x48xf32> to vector<1x16xf32>
    %cst_39 = arith.constant dense<0.000000e+00> : vector<16xf32>
    %138 = vector.multi_reduction <add>, %135, %cst_39 [1] : vector<16x16xf32> to vector<16xf32>
    %139 = vector.shape_cast %138 : vector<16xf32> to vector<16x1xf32>
    %cst_40 = arith.constant 1.600000e+01 : f32
    %140 = vector.broadcast %cst_40 : f32 to vector<16x1xf32>
    %141 = arith.divf %139, %140 : vector<16x1xf32>
    %142 = arith.mulf %135, %135 : vector<16x16xf32>
    %cst_41 = arith.constant dense<0.000000e+00> : vector<16xf32>
    %143 = vector.multi_reduction <add>, %142, %cst_41 [1] : vector<16x16xf32> to vector<16xf32>
    %144 = vector.shape_cast %143 : vector<16xf32> to vector<16x1xf32>
    %cst_42 = arith.constant 1.600000e+01 : f32
    %145 = vector.broadcast %cst_42 : f32 to vector<16x1xf32>
    %146 = arith.divf %144, %145 : vector<16x1xf32>
    %147 = arith.mulf %141, %141 : vector<16x1xf32>
    %148 = arith.subf %146, %147 : vector<16x1xf32>
    %149 = vector.broadcast %141 : vector<16x1xf32> to vector<16x16xf32>
    %150 = arith.subf %135, %149 : vector<16x16xf32>
    %cst_43 = arith.constant 9.99999974E-6 : f32
    %151 = vector.broadcast %cst_43 : f32 to vector<16x1xf32>
    %152 = arith.addf %148, %151 : vector<16x1xf32>
    %153 = math.rsqrt %152 : vector<16x1xf32>
    %154 = vector.broadcast %153 : vector<16x1xf32> to vector<16x16xf32>
    %155 = arith.mulf %150, %154 : vector<16x16xf32>
    %156 = vector.broadcast %136 : vector<1x16xf32> to vector<16x16xf32>
    %157 = arith.mulf %155, %156 : vector<16x16xf32>
    %158 = vector.broadcast %137 : vector<1x16xf32> to vector<16x16xf32>
    %159 = arith.addf %157, %158 : vector<16x16xf32>
    %160 = vector.extract_strided_slice %0 {offsets = [0, 96], sizes = [16, 48], strides = [1, 1]} : vector<16x512xf32> to vector<16x48xf32>
    %161 = vector.extract_strided_slice %2 {offsets = [8, 0], sizes = [1, 48], strides = [1, 1]} : vector<46x48xf32> to vector<1x48xf32>
    %162 = vector.extract_strided_slice %0 {offsets = [0, 144], sizes = [16, 16], strides = [1, 1]} : vector<16x512xf32> to vector<16x16xf32>
    %163 = vector.extract_strided_slice %2 {offsets = [9, 0], sizes = [1, 16], strides = [1, 1]} : vector<46x48xf32> to vector<1x16xf32>
    %cst_44 = arith.constant dense<0.000000e+00> : vector<16x48xf32>
    %164 = tpu.matmul %159, %160, %cst_44 {dimension_numbers = #tpu.dot_dimension_numbers<[1], [0], [0], [1], [0, 0, 1, 1], [], []>} : vector<16x16xf32>, vector<16x48xf32>, vector<16x48xf32> -> vector<16x48xf32>
    %165 = vector.broadcast %161 : vector<1x48xf32> to vector<16x48xf32>
    %166 = arith.addf %164, %165 : vector<16x48xf32>
    %167 = vector.extract_strided_slice %166 {offsets = [0, 0], sizes = [16, 16], strides = [1, 1]} : vector<16x48xf32> to vector<16x16xf32>
    %168 = vector.shape_cast %167 : vector<16x16xf32> to vector<2x8x16xf32>
    %169 = vector.extract_strided_slice %166 {offsets = [0, 16], sizes = [16, 16], strides = [1, 1]} : vector<16x48xf32> to vector<16x16xf32>
    %170 = vector.shape_cast %169 : vector<16x16xf32> to vector<2x8x16xf32>
    %171 = vector.extract_strided_slice %166 {offsets = [0, 32], sizes = [16, 16], strides = [1, 1]} : vector<16x48xf32> to vector<16x16xf32>
    %172 = vector.shape_cast %171 : vector<16x16xf32> to vector<2x8x16xf32>
    %173 = vector.extract_strided_slice %168 {offsets = [0, 0, 0], sizes = [2, 8, 4], strides = [1, 1, 1]} : vector<2x8x16xf32> to vector<2x8x4xf32>
    %174 = vector.extract_strided_slice %170 {offsets = [0, 0, 0], sizes = [2, 8, 4], strides = [1, 1, 1]} : vector<2x8x16xf32> to vector<2x8x4xf32>
    %175 = vector.extract_strided_slice %172 {offsets = [0, 0, 0], sizes = [2, 8, 4], strides = [1, 1, 1]} : vector<2x8x16xf32> to vector<2x8x4xf32>
    "tpu.trace_start"() <{level = 10 : i32, message = "bqd,bkd->bqk"}> : () -> ()
    %cst_45 = arith.constant dense<0.000000e+00> : vector<2x8x8xf32>
    %176 = tpu.matmul %173, %174, %cst_45 {dimension_numbers = #tpu.dot_dimension_numbers<[2], [2], [1], [1], [0, 0, 0, 1, 1, 1], [0], [0]>} : vector<2x8x4xf32>, vector<2x8x4xf32>, vector<2x8x8xf32> -> vector<2x8x8xf32>
    "tpu.trace_stop"() : () -> ()
    %cst_46 = arith.constant 5.000000e-01 : f32
    %177 = vector.broadcast %cst_46 : f32 to vector<2x8x8xf32>
    %178 = arith.mulf %176, %177 : vector<2x8x8xf32>
    %cst_47 = arith.constant dense<0xFF800000> : vector<2x8xf32>
    %179 = vector.multi_reduction <maximumf>, %178, %cst_47 [2] : vector<2x8x8xf32> to vector<2x8xf32>
    %180 = vector.shape_cast %179 : vector<2x8xf32> to vector<2x8x1xf32>
    %181 = vector.broadcast %180 : vector<2x8x1xf32> to vector<2x8x8xf32>
    %182 = arith.subf %178, %181 : vector<2x8x8xf32>
    %183 = math.exp %182 : vector<2x8x8xf32>
    %cst_48 = arith.constant dense<0.000000e+00> : vector<2x8xf32>
    %184 = vector.multi_reduction <add>, %183, %cst_48 [2] : vector<2x8x8xf32> to vector<2x8xf32>
    %185 = vector.shape_cast %184 : vector<2x8xf32> to vector<2x8x1xf32>
    %186 = vector.broadcast %185 : vector<2x8x1xf32> to vector<2x8x8xf32>
    %187 = arith.divf %183, %186 : vector<2x8x8xf32>
    "tpu.trace_start"() <{level = 10 : i32, message = "bqk,bkd->bqd"}> : () -> ()
    %cst_49 = arith.constant dense<0.000000e+00> : vector<2x8x4xf32>
    %188 = tpu.matmul %187, %175, %cst_49 {dimension_numbers = #tpu.dot_dimension_numbers<[2], [1], [1], [2], [0, 0, 0, 1, 1, 2], [0], [0]>} : vector<2x8x8xf32>, vector<2x8x4xf32>, vector<2x8x4xf32> -> vector<2x8x4xf32>
    "tpu.trace_stop"() : () -> ()
    %189 = vector.shape_cast %188 : vector<2x8x4xf32> to vector<16x4xf32>
    %190 = vector.extract_strided_slice %162 {offsets = [0, 0], sizes = [4, 16], strides = [1, 1]} : vector<16x16xf32> to vector<4x16xf32>
    %cst_50 = arith.constant dense<0.000000e+00> : vector<16x16xf32>
    %191 = tpu.matmul %189, %190, %cst_50 {dimension_numbers = #tpu.dot_dimension_numbers<[1], [0], [0], [1], [0, 0, 1, 1], [], []>} : vector<16x4xf32>, vector<4x16xf32>, vector<16x16xf32> -> vector<16x16xf32>
    %192 = vector.extract_strided_slice %168 {offsets = [0, 0, 4], sizes = [2, 8, 4], strides = [1, 1, 1]} : vector<2x8x16xf32> to vector<2x8x4xf32>
    %193 = vector.extract_strided_slice %170 {offsets = [0, 0, 4], sizes = [2, 8, 4], strides = [1, 1, 1]} : vector<2x8x16xf32> to vector<2x8x4xf32>
    %194 = vector.extract_strided_slice %172 {offsets = [0, 0, 4], sizes = [2, 8, 4], strides = [1, 1, 1]} : vector<2x8x16xf32> to vector<2x8x4xf32>
    "tpu.trace_start"() <{level = 10 : i32, message = "bqd,bkd->bqk"}> : () -> ()
    %cst_51 = arith.constant dense<0.000000e+00> : vector<2x8x8xf32>
    %195 = tpu.matmul %192, %193, %cst_51 {dimension_numbers = #tpu.dot_dimension_numbers<[2], [2], [1], [1], [0, 0, 0, 1, 1, 1], [0], [0]>} : vector<2x8x4xf32>, vector<2x8x4xf32>, vector<2x8x8xf32> -> vector<2x8x8xf32>
    "tpu.trace_stop"() : () -> ()
    %cst_52 = arith.constant 5.000000e-01 : f32
    %196 = vector.broadcast %cst_52 : f32 to vector<2x8x8xf32>
    %197 = arith.mulf %195, %196 : vector<2x8x8xf32>
    %cst_53 = arith.constant dense<0xFF800000> : vector<2x8xf32>
    %198 = vector.multi_reduction <maximumf>, %197, %cst_53 [2] : vector<2x8x8xf32> to vector<2x8xf32>
    %199 = vector.shape_cast %198 : vector<2x8xf32> to vector<2x8x1xf32>
    %200 = vector.broadcast %199 : vector<2x8x1xf32> to vector<2x8x8xf32>
    %201 = arith.subf %197, %200 : vector<2x8x8xf32>
    %202 = math.exp %201 : vector<2x8x8xf32>
    %cst_54 = arith.constant dense<0.000000e+00> : vector<2x8xf32>
    %203 = vector.multi_reduction <add>, %202, %cst_54 [2] : vector<2x8x8xf32> to vector<2x8xf32>
    %204 = vector.shape_cast %203 : vector<2x8xf32> to vector<2x8x1xf32>
    %205 = vector.broadcast %204 : vector<2x8x1xf32> to vector<2x8x8xf32>
    %206 = arith.divf %202, %205 : vector<2x8x8xf32>
    "tpu.trace_start"() <{level = 10 : i32, message = "bqk,bkd->bqd"}> : () -> ()
    %cst_55 = arith.constant dense<0.000000e+00> : vector<2x8x4xf32>
    %207 = tpu.matmul %206, %194, %cst_55 {dimension_numbers = #tpu.dot_dimension_numbers<[2], [1], [1], [2], [0, 0, 0, 1, 1, 2], [0], [0]>} : vector<2x8x8xf32>, vector<2x8x4xf32>, vector<2x8x4xf32> -> vector<2x8x4xf32>
    "tpu.trace_stop"() : () -> ()
    %208 = vector.shape_cast %207 : vector<2x8x4xf32> to vector<16x4xf32>
    %209 = vector.extract_strided_slice %162 {offsets = [4, 0], sizes = [4, 16], strides = [1, 1]} : vector<16x16xf32> to vector<4x16xf32>
    %cst_56 = arith.constant dense<0.000000e+00> : vector<16x16xf32>
    %210 = tpu.matmul %208, %209, %cst_56 {dimension_numbers = #tpu.dot_dimension_numbers<[1], [0], [0], [1], [0, 0, 1, 1], [], []>} : vector<16x4xf32>, vector<4x16xf32>, vector<16x16xf32> -> vector<16x16xf32>
    %211 = arith.addf %191, %210 : vector<16x16xf32>
    %212 = vector.extract_strided_slice %168 {offsets = [0, 0, 8], sizes = [2, 8, 4], strides = [1, 1, 1]} : vector<2x8x16xf32> to vector<2x8x4xf32>
    %213 = vector.extract_strided_slice %170 {offsets = [0, 0, 8], sizes = [2, 8, 4], strides = [1, 1, 1]} : vector<2x8x16xf32> to vector<2x8x4xf32>
    %214 = vector.extract_strided_slice %172 {offsets = [0, 0, 8], sizes = [2, 8, 4], strides = [1, 1, 1]} : vector<2x8x16xf32> to vector<2x8x4xf32>
    "tpu.trace_start"() <{level = 10 : i32, message = "bqd,bkd->bqk"}> : () -> ()
    %cst_57 = arith.constant dense<0.000000e+00> : vector<2x8x8xf32>
    %215 = tpu.matmul %212, %213, %cst_57 {dimension_numbers = #tpu.dot_dimension_numbers<[2], [2], [1], [1], [0, 0, 0, 1, 1, 1], [0], [0]>} : vector<2x8x4xf32>, vector<2x8x4xf32>, vector<2x8x8xf32> -> vector<2x8x8xf32>
    "tpu.trace_stop"() : () -> ()
    %cst_58 = arith.constant 5.000000e-01 : f32
    %216 = vector.broadcast %cst_58 : f32 to vector<2x8x8xf32>
    %217 = arith.mulf %215, %216 : vector<2x8x8xf32>
    %cst_59 = arith.constant dense<0xFF800000> : vector<2x8xf32>
    %218 = vector.multi_reduction <maximumf>, %217, %cst_59 [2] : vector<2x8x8xf32> to vector<2x8xf32>
    %219 = vector.shape_cast %218 : vector<2x8xf32> to vector<2x8x1xf32>
    %220 = vector.broadcast %219 : vector<2x8x1xf32> to vector<2x8x8xf32>
    %221 = arith.subf %217, %220 : vector<2x8x8xf32>
    %222 = math.exp %221 : vector<2x8x8xf32>
    %cst_60 = arith.constant dense<0.000000e+00> : vector<2x8xf32>
    %223 = vector.multi_reduction <add>, %222, %cst_60 [2] : vector<2x8x8xf32> to vector<2x8xf32>
    %224 = vector.shape_cast %223 : vector<2x8xf32> to vector<2x8x1xf32>
    %225 = vector.broadcast %224 : vector<2x8x1xf32> to vector<2x8x8xf32>
    %226 = arith.divf %222, %225 : vector<2x8x8xf32>
    "tpu.trace_start"() <{level = 10 : i32, message = "bqk,bkd->bqd"}> : () -> ()
    %cst_61 = arith.constant dense<0.000000e+00> : vector<2x8x4xf32>
    %227 = tpu.matmul %226, %214, %cst_61 {dimension_numbers = #tpu.dot_dimension_numbers<[2], [1], [1], [2], [0, 0, 0, 1, 1, 2], [0], [0]>} : vector<2x8x8xf32>, vector<2x8x4xf32>, vector<2x8x4xf32> -> vector<2x8x4xf32>
    "tpu.trace_stop"() : () -> ()
    %228 = vector.shape_cast %227 : vector<2x8x4xf32> to vector<16x4xf32>
    %229 = vector.extract_strided_slice %162 {offsets = [8, 0], sizes = [4, 16], strides = [1, 1]} : vector<16x16xf32> to vector<4x16xf32>
    %cst_62 = arith.constant dense<0.000000e+00> : vector<16x16xf32>
    %230 = tpu.matmul %228, %229, %cst_62 {dimension_numbers = #tpu.dot_dimension_numbers<[1], [0], [0], [1], [0, 0, 1, 1], [], []>} : vector<16x4xf32>, vector<4x16xf32>, vector<16x16xf32> -> vector<16x16xf32>
    %231 = arith.addf %211, %230 : vector<16x16xf32>
    %232 = vector.extract_strided_slice %168 {offsets = [0, 0, 12], sizes = [2, 8, 4], strides = [1, 1, 1]} : vector<2x8x16xf32> to vector<2x8x4xf32>
    %233 = vector.extract_strided_slice %170 {offsets = [0, 0, 12], sizes = [2, 8, 4], strides = [1, 1, 1]} : vector<2x8x16xf32> to vector<2x8x4xf32>
    %234 = vector.extract_strided_slice %172 {offsets = [0, 0, 12], sizes = [2, 8, 4], strides = [1, 1, 1]} : vector<2x8x16xf32> to vector<2x8x4xf32>
    "tpu.trace_start"() <{level = 10 : i32, message = "bqd,bkd->bqk"}> : () -> ()
    %cst_63 = arith.constant dense<0.000000e+00> : vector<2x8x8xf32>
    %235 = tpu.matmul %232, %233, %cst_63 {dimension_numbers = #tpu.dot_dimension_numbers<[2], [2], [1], [1], [0, 0, 0, 1, 1, 1], [0], [0]>} : vector<2x8x4xf32>, vector<2x8x4xf32>, vector<2x8x8xf32> -> vector<2x8x8xf32>
    "tpu.trace_stop"() : () -> ()
    %cst_64 = arith.constant 5.000000e-01 : f32
    %236 = vector.broadcast %cst_64 : f32 to vector<2x8x8xf32>
    %237 = arith.mulf %235, %236 : vector<2x8x8xf32>
    %cst_65 = arith.constant dense<0xFF800000> : vector<2x8xf32>
    %238 = vector.multi_reduction <maximumf>, %237, %cst_65 [2] : vector<2x8x8xf32> to vector<2x8xf32>
    %239 = vector.shape_cast %238 : vector<2x8xf32> to vector<2x8x1xf32>
    %240 = vector.broadcast %239 : vector<2x8x1xf32> to vector<2x8x8xf32>
    %241 = arith.subf %237, %240 : vector<2x8x8xf32>
    %242 = math.exp %241 : vector<2x8x8xf32>
    %cst_66 = arith.constant dense<0.000000e+00> : vector<2x8xf32>
    %243 = vector.multi_reduction <add>, %242, %cst_66 [2] : vector<2x8x8xf32> to vector<2x8xf32>
    %244 = vector.shape_cast %243 : vector<2x8xf32> to vector<2x8x1xf32>
    %245 = vector.broadcast %244 : vector<2x8x1xf32> to vector<2x8x8xf32>
    %246 = arith.divf %242, %245 : vector<2x8x8xf32>
    "tpu.trace_start"() <{level = 10 : i32, message = "bqk,bkd->bqd"}> : () -> ()
    %cst_67 = arith.constant dense<0.000000e+00> : vector<2x8x4xf32>
    %247 = tpu.matmul %246, %234, %cst_67 {dimension_numbers = #tpu.dot_dimension_numbers<[2], [1], [1], [2], [0, 0, 0, 1, 1, 2], [0], [0]>} : vector<2x8x8xf32>, vector<2x8x4xf32>, vector<2x8x4xf32> -> vector<2x8x4xf32>
    "tpu.trace_stop"() : () -> ()
    %248 = vector.shape_cast %247 : vector<2x8x4xf32> to vector<16x4xf32>
    %249 = vector.extract_strided_slice %162 {offsets = [12, 0], sizes = [4, 16], strides = [1, 1]} : vector<16x16xf32> to vector<4x16xf32>
    %cst_68 = arith.constant dense<0.000000e+00> : vector<16x16xf32>
    %250 = tpu.matmul %248, %249, %cst_68 {dimension_numbers = #tpu.dot_dimension_numbers<[1], [0], [0], [1], [0, 0, 1, 1], [], []>} : vector<16x4xf32>, vector<4x16xf32>, vector<16x16xf32> -> vector<16x16xf32>
    %251 = arith.addf %231, %250 : vector<16x16xf32>
    %252 = vector.broadcast %163 : vector<1x16xf32> to vector<16x16xf32>
    %253 = arith.addf %251, %252 : vector<16x16xf32>
    %254 = arith.addf %159, %253 : vector<16x16xf32>
    %255 = vector.extract_strided_slice %2 {offsets = [12, 0], sizes = [1, 16], strides = [1, 1]} : vector<46x48xf32> to vector<1x16xf32>
    %256 = vector.extract_strided_slice %2 {offsets = [13, 0], sizes = [1, 16], strides = [1, 1]} : vector<46x48xf32> to vector<1x16xf32>
    %cst_69 = arith.constant dense<0.000000e+00> : vector<16xf32>
    %257 = vector.multi_reduction <add>, %254, %cst_69 [1] : vector<16x16xf32> to vector<16xf32>
    %258 = vector.shape_cast %257 : vector<16xf32> to vector<16x1xf32>
    %cst_70 = arith.constant 1.600000e+01 : f32
    %259 = vector.broadcast %cst_70 : f32 to vector<16x1xf32>
    %260 = arith.divf %258, %259 : vector<16x1xf32>
    %261 = arith.mulf %254, %254 : vector<16x16xf32>
    %cst_71 = arith.constant dense<0.000000e+00> : vector<16xf32>
    %262 = vector.multi_reduction <add>, %261, %cst_71 [1] : vector<16x16xf32> to vector<16xf32>
    %263 = vector.shape_cast %262 : vector<16xf32> to vector<16x1xf32>
    %cst_72 = arith.constant 1.600000e+01 : f32
    %264 = vector.broadcast %cst_72 : f32 to vector<16x1xf32>
    %265 = arith.divf %263, %264 : vector<16x1xf32>
    %266 = arith.mulf %260, %260 : vector<16x1xf32>
    %267 = arith.subf %265, %266 : vector<16x1xf32>
    %268 = vector.broadcast %260 : vector<16x1xf32> to vector<16x16xf32>
    %269 = arith.subf %254, %268 : vector<16x16xf32>
    %cst_73 = arith.constant 9.99999974E-6 : f32
    %270 = vector.broadcast %cst_73 : f32 to vector<16x1xf32>
    %271 = arith.addf %267, %270 : vector<16x1xf32>
    %272 = math.rsqrt %271 : vector<16x1xf32>
    %273 = vector.broadcast %272 : vector<16x1xf32> to vector<16x16xf32>
    %274 = arith.mulf %269, %273 : vector<16x16xf32>
    %275 = vector.broadcast %255 : vector<1x16xf32> to vector<16x16xf32>
    %276 = arith.mulf %274, %275 : vector<16x16xf32>
    %277 = vector.broadcast %256 : vector<1x16xf32> to vector<16x16xf32>
    %278 = arith.addf %276, %277 : vector<16x16xf32>
    %279 = vector.extract_strided_slice %0 {offsets = [0, 160], sizes = [16, 32], strides = [1, 1]} : vector<16x512xf32> to vector<16x32xf32>
    %280 = vector.extract_strided_slice %2 {offsets = [10, 0], sizes = [1, 32], strides = [1, 1]} : vector<46x48xf32> to vector<1x32xf32>
    %281 = vector.extract_strided_slice %1 {offsets = [0, 16], sizes = [32, 16], strides = [1, 1]} : vector<32x64xf32> to vector<32x16xf32>
    %282 = vector.extract_strided_slice %2 {offsets = [11, 0], sizes = [1, 16], strides = [1, 1]} : vector<46x48xf32> to vector<1x16xf32>
    %cst_74 = arith.constant dense<0.000000e+00> : vector<16x32xf32>
    %283 = tpu.matmul %278, %279, %cst_74 {dimension_numbers = #tpu.dot_dimension_numbers<[1], [0], [0], [1], [0, 0, 1, 1], [], []>} : vector<16x16xf32>, vector<16x32xf32>, vector<16x32xf32> -> vector<16x32xf32>
    %284 = vector.broadcast %280 : vector<1x32xf32> to vector<16x32xf32>
    %285 = arith.addf %283, %284 : vector<16x32xf32>
    %cst_75 = arith.constant 0.000000e+00 : f32
    %286 = vector.broadcast %cst_75 : f32 to vector<16x32xf32>
    %287 = arith.maximumf %285, %286 : vector<16x32xf32>
    %cst_76 = arith.constant dense<0.000000e+00> : vector<16x16xf32>
    %288 = tpu.matmul %287, %281, %cst_76 {dimension_numbers = #tpu.dot_dimension_numbers<[1], [0], [0], [1], [0, 0, 1, 1], [], []>} : vector<16x32xf32>, vector<32x16xf32>, vector<16x16xf32> -> vector<16x16xf32>
    %289 = vector.broadcast %282 : vector<1x16xf32> to vector<16x16xf32>
    %290 = arith.addf %288, %289 : vector<16x16xf32>
    %291 = arith.addf %278, %290 : vector<16x16xf32>
    %292 = vector.extract_strided_slice %2 {offsets = [14, 0], sizes = [1, 16], strides = [1, 1]} : vector<46x48xf32> to vector<1x16xf32>
    %293 = vector.extract_strided_slice %2 {offsets = [15, 0], sizes = [1, 16], strides = [1, 1]} : vector<46x48xf32> to vector<1x16xf32>
    %cst_77 = arith.constant dense<0.000000e+00> : vector<16xf32>
    %294 = vector.multi_reduction <add>, %291, %cst_77 [1] : vector<16x16xf32> to vector<16xf32>
    %295 = vector.shape_cast %294 : vector<16xf32> to vector<16x1xf32>
    %cst_78 = arith.constant 1.600000e+01 : f32
    %296 = vector.broadcast %cst_78 : f32 to vector<16x1xf32>
    %297 = arith.divf %295, %296 : vector<16x1xf32>
    %298 = arith.mulf %291, %291 : vector<16x16xf32>
    %cst_79 = arith.constant dense<0.000000e+00> : vector<16xf32>
    %299 = vector.multi_reduction <add>, %298, %cst_79 [1] : vector<16x16xf32> to vector<16xf32>
    %300 = vector.shape_cast %299 : vector<16xf32> to vector<16x1xf32>
    %cst_80 = arith.constant 1.600000e+01 : f32
    %301 = vector.broadcast %cst_80 : f32 to vector<16x1xf32>
    %302 = arith.divf %300, %301 : vector<16x1xf32>
    %303 = arith.mulf %297, %297 : vector<16x1xf32>
    %304 = arith.subf %302, %303 : vector<16x1xf32>
    %305 = vector.broadcast %297 : vector<16x1xf32> to vector<16x16xf32>
    %306 = arith.subf %291, %305 : vector<16x16xf32>
    %cst_81 = arith.constant 9.99999974E-6 : f32
    %307 = vector.broadcast %cst_81 : f32 to vector<16x1xf32>
    %308 = arith.addf %304, %307 : vector<16x1xf32>
    %309 = math.rsqrt %308 : vector<16x1xf32>
    %310 = vector.broadcast %309 : vector<16x1xf32> to vector<16x16xf32>
    %311 = arith.mulf %306, %310 : vector<16x16xf32>
    %312 = vector.broadcast %292 : vector<1x16xf32> to vector<16x16xf32>
    %313 = arith.mulf %311, %312 : vector<16x16xf32>
    %314 = vector.broadcast %293 : vector<1x16xf32> to vector<16x16xf32>
    %315 = arith.addf %313, %314 : vector<16x16xf32>
    %316 = vector.extract_strided_slice %2 {offsets = [42, 0], sizes = [1, 16], strides = [1, 1]} : vector<46x48xf32> to vector<1x16xf32>
    %317 = vector.extract_strided_slice %2 {offsets = [43, 0], sizes = [1, 16], strides = [1, 1]} : vector<46x48xf32> to vector<1x16xf32>
    %cst_82 = arith.constant dense<0.000000e+00> : vector<16xf32>
    %318 = vector.multi_reduction <add>, %315, %cst_82 [1] : vector<16x16xf32> to vector<16xf32>
    %319 = vector.shape_cast %318 : vector<16xf32> to vector<16x1xf32>
    %cst_83 = arith.constant 1.600000e+01 : f32
    %320 = vector.broadcast %cst_83 : f32 to vector<16x1xf32>
    %321 = arith.divf %319, %320 : vector<16x1xf32>
    %322 = arith.mulf %315, %315 : vector<16x16xf32>
    %cst_84 = arith.constant dense<0.000000e+00> : vector<16xf32>
    %323 = vector.multi_reduction <add>, %322, %cst_84 [1] : vector<16x16xf32> to vector<16xf32>
    %324 = vector.shape_cast %323 : vector<16xf32> to vector<16x1xf32>
    %cst_85 = arith.constant 1.600000e+01 : f32
    %325 = vector.broadcast %cst_85 : f32 to vector<16x1xf32>
    %326 = arith.divf %324, %325 : vector<16x1xf32>
    %327 = arith.mulf %321, %321 : vector<16x1xf32>
    %328 = arith.subf %326, %327 : vector<16x1xf32>
    %329 = vector.broadcast %321 : vector<16x1xf32> to vector<16x16xf32>
    %330 = arith.subf %315, %329 : vector<16x16xf32>
    %cst_86 = arith.constant 9.99999974E-6 : f32
    %331 = vector.broadcast %cst_86 : f32 to vector<16x1xf32>
    %332 = arith.addf %328, %331 : vector<16x1xf32>
    %333 = math.rsqrt %332 : vector<16x1xf32>
    %334 = vector.broadcast %333 : vector<16x1xf32> to vector<16x16xf32>
    %335 = arith.mulf %330, %334 : vector<16x16xf32>
    %336 = vector.broadcast %316 : vector<1x16xf32> to vector<16x16xf32>
    %337 = arith.mulf %335, %336 : vector<16x16xf32>
    %338 = vector.broadcast %317 : vector<1x16xf32> to vector<16x16xf32>
    %339 = arith.addf %337, %338 : vector<16x16xf32>
    %c0_87 = arith.constant 0 : index
    %c0_88 = arith.constant 0 : index
    %340 = vector.load %arg1[%c0_87, %c0_88] : memref<16x16xf32, #tpu.memory_space<vmem>>, vector<16x16xf32>
    %341 = vector.extract_strided_slice %0 {offsets = [0, 192], sizes = [16, 48], strides = [1, 1]} : vector<16x512xf32> to vector<16x48xf32>
    %342 = vector.extract_strided_slice %2 {offsets = [16, 0], sizes = [1, 48], strides = [1, 1]} : vector<46x48xf32> to vector<1x48xf32>
    %343 = vector.extract_strided_slice %0 {offsets = [0, 240], sizes = [16, 16], strides = [1, 1]} : vector<16x512xf32> to vector<16x16xf32>
    %344 = vector.extract_strided_slice %2 {offsets = [17, 0], sizes = [1, 16], strides = [1, 1]} : vector<46x48xf32> to vector<1x16xf32>
    %cst_89 = arith.constant dense<0.000000e+00> : vector<16x48xf32>
    %345 = tpu.matmul %340, %341, %cst_89 {dimension_numbers = #tpu.dot_dimension_numbers<[1], [0], [0], [1], [0, 0, 1, 1], [], []>} : vector<16x16xf32>, vector<16x48xf32>, vector<16x48xf32> -> vector<16x48xf32>
    %346 = vector.broadcast %342 : vector<1x48xf32> to vector<16x48xf32>
    %347 = arith.addf %345, %346 : vector<16x48xf32>
    %348 = vector.extract_strided_slice %347 {offsets = [0, 0], sizes = [16, 16], strides = [1, 1]} : vector<16x48xf32> to vector<16x16xf32>
    %349 = vector.shape_cast %348 : vector<16x16xf32> to vector<2x8x16xf32>
    %350 = vector.extract_strided_slice %347 {offsets = [0, 16], sizes = [16, 16], strides = [1, 1]} : vector<16x48xf32> to vector<16x16xf32>
    %351 = vector.shape_cast %350 : vector<16x16xf32> to vector<2x8x16xf32>
    %352 = vector.extract_strided_slice %347 {offsets = [0, 32], sizes = [16, 16], strides = [1, 1]} : vector<16x48xf32> to vector<16x16xf32>
    %353 = vector.shape_cast %352 : vector<16x16xf32> to vector<2x8x16xf32>
    %354 = vector.extract_strided_slice %349 {offsets = [0, 0, 0], sizes = [2, 8, 4], strides = [1, 1, 1]} : vector<2x8x16xf32> to vector<2x8x4xf32>
    %355 = vector.extract_strided_slice %351 {offsets = [0, 0, 0], sizes = [2, 8, 4], strides = [1, 1, 1]} : vector<2x8x16xf32> to vector<2x8x4xf32>
    %356 = vector.extract_strided_slice %353 {offsets = [0, 0, 0], sizes = [2, 8, 4], strides = [1, 1, 1]} : vector<2x8x16xf32> to vector<2x8x4xf32>
    "tpu.trace_start"() <{level = 10 : i32, message = "bqd,bkd->bqk"}> : () -> ()
    %cst_90 = arith.constant dense<0.000000e+00> : vector<2x8x8xf32>
    %357 = tpu.matmul %354, %355, %cst_90 {dimension_numbers = #tpu.dot_dimension_numbers<[2], [2], [1], [1], [0, 0, 0, 1, 1, 1], [0], [0]>} : vector<2x8x4xf32>, vector<2x8x4xf32>, vector<2x8x8xf32> -> vector<2x8x8xf32>
    "tpu.trace_stop"() : () -> ()
    %cst_91 = arith.constant 5.000000e-01 : f32
    %358 = vector.broadcast %cst_91 : f32 to vector<2x8x8xf32>
    %359 = arith.mulf %357, %358 : vector<2x8x8xf32>
    %cst_92 = arith.constant dense<0xFF800000> : vector<2x8xf32>
    %360 = vector.multi_reduction <maximumf>, %359, %cst_92 [2] : vector<2x8x8xf32> to vector<2x8xf32>
    %361 = vector.shape_cast %360 : vector<2x8xf32> to vector<2x8x1xf32>
    %362 = vector.broadcast %361 : vector<2x8x1xf32> to vector<2x8x8xf32>
    %363 = arith.subf %359, %362 : vector<2x8x8xf32>
    %364 = math.exp %363 : vector<2x8x8xf32>
    %cst_93 = arith.constant dense<0.000000e+00> : vector<2x8xf32>
    %365 = vector.multi_reduction <add>, %364, %cst_93 [2] : vector<2x8x8xf32> to vector<2x8xf32>
    %366 = vector.shape_cast %365 : vector<2x8xf32> to vector<2x8x1xf32>
    %367 = vector.broadcast %366 : vector<2x8x1xf32> to vector<2x8x8xf32>
    %368 = arith.divf %364, %367 : vector<2x8x8xf32>
    "tpu.trace_start"() <{level = 10 : i32, message = "bqk,bkd->bqd"}> : () -> ()
    %cst_94 = arith.constant dense<0.000000e+00> : vector<2x8x4xf32>
    %369 = tpu.matmul %368, %356, %cst_94 {dimension_numbers = #tpu.dot_dimension_numbers<[2], [1], [1], [2], [0, 0, 0, 1, 1, 2], [0], [0]>} : vector<2x8x8xf32>, vector<2x8x4xf32>, vector<2x8x4xf32> -> vector<2x8x4xf32>
    "tpu.trace_stop"() : () -> ()
    %370 = vector.shape_cast %369 : vector<2x8x4xf32> to vector<16x4xf32>
    %371 = vector.extract_strided_slice %343 {offsets = [0, 0], sizes = [4, 16], strides = [1, 1]} : vector<16x16xf32> to vector<4x16xf32>
    %cst_95 = arith.constant dense<0.000000e+00> : vector<16x16xf32>
    %372 = tpu.matmul %370, %371, %cst_95 {dimension_numbers = #tpu.dot_dimension_numbers<[1], [0], [0], [1], [0, 0, 1, 1], [], []>} : vector<16x4xf32>, vector<4x16xf32>, vector<16x16xf32> -> vector<16x16xf32>
    %373 = vector.extract_strided_slice %349 {offsets = [0, 0, 4], sizes = [2, 8, 4], strides = [1, 1, 1]} : vector<2x8x16xf32> to vector<2x8x4xf32>
    %374 = vector.extract_strided_slice %351 {offsets = [0, 0, 4], sizes = [2, 8, 4], strides = [1, 1, 1]} : vector<2x8x16xf32> to vector<2x8x4xf32>
    %375 = vector.extract_strided_slice %353 {offsets = [0, 0, 4], sizes = [2, 8, 4], strides = [1, 1, 1]} : vector<2x8x16xf32> to vector<2x8x4xf32>
    "tpu.trace_start"() <{level = 10 : i32, message = "bqd,bkd->bqk"}> : () -> ()
    %cst_96 = arith.constant dense<0.000000e+00> : vector<2x8x8xf32>
    %376 = tpu.matmul %373, %374, %cst_96 {dimension_numbers = #tpu.dot_dimension_numbers<[2], [2], [1], [1], [0, 0, 0, 1, 1, 1], [0], [0]>} : vector<2x8x4xf32>, vector<2x8x4xf32>, vector<2x8x8xf32> -> vector<2x8x8xf32>
    "tpu.trace_stop"() : () -> ()
    %cst_97 = arith.constant 5.000000e-01 : f32
    %377 = vector.broadcast %cst_97 : f32 to vector<2x8x8xf32>
    %378 = arith.mulf %376, %377 : vector<2x8x8xf32>
    %cst_98 = arith.constant dense<0xFF800000> : vector<2x8xf32>
    %379 = vector.multi_reduction <maximumf>, %378, %cst_98 [2] : vector<2x8x8xf32> to vector<2x8xf32>
    %380 = vector.shape_cast %379 : vector<2x8xf32> to vector<2x8x1xf32>
    %381 = vector.broadcast %380 : vector<2x8x1xf32> to vector<2x8x8xf32>
    %382 = arith.subf %378, %381 : vector<2x8x8xf32>
    %383 = math.exp %382 : vector<2x8x8xf32>
    %cst_99 = arith.constant dense<0.000000e+00> : vector<2x8xf32>
    %384 = vector.multi_reduction <add>, %383, %cst_99 [2] : vector<2x8x8xf32> to vector<2x8xf32>
    %385 = vector.shape_cast %384 : vector<2x8xf32> to vector<2x8x1xf32>
    %386 = vector.broadcast %385 : vector<2x8x1xf32> to vector<2x8x8xf32>
    %387 = arith.divf %383, %386 : vector<2x8x8xf32>
    "tpu.trace_start"() <{level = 10 : i32, message = "bqk,bkd->bqd"}> : () -> ()
    %cst_100 = arith.constant dense<0.000000e+00> : vector<2x8x4xf32>
    %388 = tpu.matmul %387, %375, %cst_100 {dimension_numbers = #tpu.dot_dimension_numbers<[2], [1], [1], [2], [0, 0, 0, 1, 1, 2], [0], [0]>} : vector<2x8x8xf32>, vector<2x8x4xf32>, vector<2x8x4xf32> -> vector<2x8x4xf32>
    "tpu.trace_stop"() : () -> ()
    %389 = vector.shape_cast %388 : vector<2x8x4xf32> to vector<16x4xf32>
    %390 = vector.extract_strided_slice %343 {offsets = [4, 0], sizes = [4, 16], strides = [1, 1]} : vector<16x16xf32> to vector<4x16xf32>
    %cst_101 = arith.constant dense<0.000000e+00> : vector<16x16xf32>
    %391 = tpu.matmul %389, %390, %cst_101 {dimension_numbers = #tpu.dot_dimension_numbers<[1], [0], [0], [1], [0, 0, 1, 1], [], []>} : vector<16x4xf32>, vector<4x16xf32>, vector<16x16xf32> -> vector<16x16xf32>
    %392 = arith.addf %372, %391 : vector<16x16xf32>
    %393 = vector.extract_strided_slice %349 {offsets = [0, 0, 8], sizes = [2, 8, 4], strides = [1, 1, 1]} : vector<2x8x16xf32> to vector<2x8x4xf32>
    %394 = vector.extract_strided_slice %351 {offsets = [0, 0, 8], sizes = [2, 8, 4], strides = [1, 1, 1]} : vector<2x8x16xf32> to vector<2x8x4xf32>
    %395 = vector.extract_strided_slice %353 {offsets = [0, 0, 8], sizes = [2, 8, 4], strides = [1, 1, 1]} : vector<2x8x16xf32> to vector<2x8x4xf32>
    "tpu.trace_start"() <{level = 10 : i32, message = "bqd,bkd->bqk"}> : () -> ()
    %cst_102 = arith.constant dense<0.000000e+00> : vector<2x8x8xf32>
    %396 = tpu.matmul %393, %394, %cst_102 {dimension_numbers = #tpu.dot_dimension_numbers<[2], [2], [1], [1], [0, 0, 0, 1, 1, 1], [0], [0]>} : vector<2x8x4xf32>, vector<2x8x4xf32>, vector<2x8x8xf32> -> vector<2x8x8xf32>
    "tpu.trace_stop"() : () -> ()
    %cst_103 = arith.constant 5.000000e-01 : f32
    %397 = vector.broadcast %cst_103 : f32 to vector<2x8x8xf32>
    %398 = arith.mulf %396, %397 : vector<2x8x8xf32>
    %cst_104 = arith.constant dense<0xFF800000> : vector<2x8xf32>
    %399 = vector.multi_reduction <maximumf>, %398, %cst_104 [2] : vector<2x8x8xf32> to vector<2x8xf32>
    %400 = vector.shape_cast %399 : vector<2x8xf32> to vector<2x8x1xf32>
    %401 = vector.broadcast %400 : vector<2x8x1xf32> to vector<2x8x8xf32>
    %402 = arith.subf %398, %401 : vector<2x8x8xf32>
    %403 = math.exp %402 : vector<2x8x8xf32>
    %cst_105 = arith.constant dense<0.000000e+00> : vector<2x8xf32>
    %404 = vector.multi_reduction <add>, %403, %cst_105 [2] : vector<2x8x8xf32> to vector<2x8xf32>
    %405 = vector.shape_cast %404 : vector<2x8xf32> to vector<2x8x1xf32>
    %406 = vector.broadcast %405 : vector<2x8x1xf32> to vector<2x8x8xf32>
    %407 = arith.divf %403, %406 : vector<2x8x8xf32>
    "tpu.trace_start"() <{level = 10 : i32, message = "bqk,bkd->bqd"}> : () -> ()
    %cst_106 = arith.constant dense<0.000000e+00> : vector<2x8x4xf32>
    %408 = tpu.matmul %407, %395, %cst_106 {dimension_numbers = #tpu.dot_dimension_numbers<[2], [1], [1], [2], [0, 0, 0, 1, 1, 2], [0], [0]>} : vector<2x8x8xf32>, vector<2x8x4xf32>, vector<2x8x4xf32> -> vector<2x8x4xf32>
    "tpu.trace_stop"() : () -> ()
    %409 = vector.shape_cast %408 : vector<2x8x4xf32> to vector<16x4xf32>
    %410 = vector.extract_strided_slice %343 {offsets = [8, 0], sizes = [4, 16], strides = [1, 1]} : vector<16x16xf32> to vector<4x16xf32>
    %cst_107 = arith.constant dense<0.000000e+00> : vector<16x16xf32>
    %411 = tpu.matmul %409, %410, %cst_107 {dimension_numbers = #tpu.dot_dimension_numbers<[1], [0], [0], [1], [0, 0, 1, 1], [], []>} : vector<16x4xf32>, vector<4x16xf32>, vector<16x16xf32> -> vector<16x16xf32>
    %412 = arith.addf %392, %411 : vector<16x16xf32>
    %413 = vector.extract_strided_slice %349 {offsets = [0, 0, 12], sizes = [2, 8, 4], strides = [1, 1, 1]} : vector<2x8x16xf32> to vector<2x8x4xf32>
    %414 = vector.extract_strided_slice %351 {offsets = [0, 0, 12], sizes = [2, 8, 4], strides = [1, 1, 1]} : vector<2x8x16xf32> to vector<2x8x4xf32>
    %415 = vector.extract_strided_slice %353 {offsets = [0, 0, 12], sizes = [2, 8, 4], strides = [1, 1, 1]} : vector<2x8x16xf32> to vector<2x8x4xf32>
    "tpu.trace_start"() <{level = 10 : i32, message = "bqd,bkd->bqk"}> : () -> ()
    %cst_108 = arith.constant dense<0.000000e+00> : vector<2x8x8xf32>
    %416 = tpu.matmul %413, %414, %cst_108 {dimension_numbers = #tpu.dot_dimension_numbers<[2], [2], [1], [1], [0, 0, 0, 1, 1, 1], [0], [0]>} : vector<2x8x4xf32>, vector<2x8x4xf32>, vector<2x8x8xf32> -> vector<2x8x8xf32>
    "tpu.trace_stop"() : () -> ()
    %cst_109 = arith.constant 5.000000e-01 : f32
    %417 = vector.broadcast %cst_109 : f32 to vector<2x8x8xf32>
    %418 = arith.mulf %416, %417 : vector<2x8x8xf32>
    %cst_110 = arith.constant dense<0xFF800000> : vector<2x8xf32>
    %419 = vector.multi_reduction <maximumf>, %418, %cst_110 [2] : vector<2x8x8xf32> to vector<2x8xf32>
    %420 = vector.shape_cast %419 : vector<2x8xf32> to vector<2x8x1xf32>
    %421 = vector.broadcast %420 : vector<2x8x1xf32> to vector<2x8x8xf32>
    %422 = arith.subf %418, %421 : vector<2x8x8xf32>
    %423 = math.exp %422 : vector<2x8x8xf32>
    %cst_111 = arith.constant dense<0.000000e+00> : vector<2x8xf32>
    %424 = vector.multi_reduction <add>, %423, %cst_111 [2] : vector<2x8x8xf32> to vector<2x8xf32>
    %425 = vector.shape_cast %424 : vector<2x8xf32> to vector<2x8x1xf32>
    %426 = vector.broadcast %425 : vector<2x8x1xf32> to vector<2x8x8xf32>
    %427 = arith.divf %423, %426 : vector<2x8x8xf32>
    "tpu.trace_start"() <{level = 10 : i32, message = "bqk,bkd->bqd"}> : () -> ()
    %cst_112 = arith.constant dense<0.000000e+00> : vector<2x8x4xf32>
    %428 = tpu.matmul %427, %415, %cst_112 {dimension_numbers = #tpu.dot_dimension_numbers<[2], [1], [1], [2], [0, 0, 0, 1, 1, 2], [0], [0]>} : vector<2x8x8xf32>, vector<2x8x4xf32>, vector<2x8x4xf32> -> vector<2x8x4xf32>
    "tpu.trace_stop"() : () -> ()
    %429 = vector.shape_cast %428 : vector<2x8x4xf32> to vector<16x4xf32>
    %430 = vector.extract_strided_slice %343 {offsets = [12, 0], sizes = [4, 16], strides = [1, 1]} : vector<16x16xf32> to vector<4x16xf32>
    %cst_113 = arith.constant dense<0.000000e+00> : vector<16x16xf32>
    %431 = tpu.matmul %429, %430, %cst_113 {dimension_numbers = #tpu.dot_dimension_numbers<[1], [0], [0], [1], [0, 0, 1, 1], [], []>} : vector<16x4xf32>, vector<4x16xf32>, vector<16x16xf32> -> vector<16x16xf32>
    %432 = arith.addf %412, %431 : vector<16x16xf32>
    %433 = vector.broadcast %344 : vector<1x16xf32> to vector<16x16xf32>
    %434 = arith.addf %432, %433 : vector<16x16xf32>
    %435 = arith.addf %340, %434 : vector<16x16xf32>
    %436 = vector.extract_strided_slice %2 {offsets = [23, 0], sizes = [1, 16], strides = [1, 1]} : vector<46x48xf32> to vector<1x16xf32>
    %437 = vector.extract_strided_slice %2 {offsets = [24, 0], sizes = [1, 16], strides = [1, 1]} : vector<46x48xf32> to vector<1x16xf32>
    %cst_114 = arith.constant dense<0.000000e+00> : vector<16xf32>
    %438 = vector.multi_reduction <add>, %435, %cst_114 [1] : vector<16x16xf32> to vector<16xf32>
    %439 = vector.shape_cast %438 : vector<16xf32> to vector<16x1xf32>
    %cst_115 = arith.constant 1.600000e+01 : f32
    %440 = vector.broadcast %cst_115 : f32 to vector<16x1xf32>
    %441 = arith.divf %439, %440 : vector<16x1xf32>
    %442 = arith.mulf %435, %435 : vector<16x16xf32>
    %cst_116 = arith.constant dense<0.000000e+00> : vector<16xf32>
    %443 = vector.multi_reduction <add>, %442, %cst_116 [1] : vector<16x16xf32> to vector<16xf32>
    %444 = vector.shape_cast %443 : vector<16xf32> to vector<16x1xf32>
    %cst_117 = arith.constant 1.600000e+01 : f32
    %445 = vector.broadcast %cst_117 : f32 to vector<16x1xf32>
    %446 = arith.divf %444, %445 : vector<16x1xf32>
    %447 = arith.mulf %441, %441 : vector<16x1xf32>
    %448 = arith.subf %446, %447 : vector<16x1xf32>
    %449 = vector.broadcast %441 : vector<16x1xf32> to vector<16x16xf32>
    %450 = arith.subf %435, %449 : vector<16x16xf32>
    %cst_118 = arith.constant 9.99999974E-6 : f32
    %451 = vector.broadcast %cst_118 : f32 to vector<16x1xf32>
    %452 = arith.addf %448, %451 : vector<16x1xf32>
    %453 = math.rsqrt %452 : vector<16x1xf32>
    %454 = vector.broadcast %453 : vector<16x1xf32> to vector<16x16xf32>
    %455 = arith.mulf %450, %454 : vector<16x16xf32>
    %456 = vector.broadcast %436 : vector<1x16xf32> to vector<16x16xf32>
    %457 = arith.mulf %455, %456 : vector<16x16xf32>
    %458 = vector.broadcast %437 : vector<1x16xf32> to vector<16x16xf32>
    %459 = arith.addf %457, %458 : vector<16x16xf32>
    %460 = vector.extract_strided_slice %0 {offsets = [0, 256], sizes = [16, 16], strides = [1, 1]} : vector<16x512xf32> to vector<16x16xf32>
    %461 = vector.extract_strided_slice %2 {offsets = [18, 0], sizes = [1, 16], strides = [1, 1]} : vector<46x48xf32> to vector<1x16xf32>
    %462 = vector.extract_strided_slice %0 {offsets = [0, 272], sizes = [16, 32], strides = [1, 1]} : vector<16x512xf32> to vector<16x32xf32>
    %463 = vector.extract_strided_slice %2 {offsets = [19, 0], sizes = [1, 32], strides = [1, 1]} : vector<46x48xf32> to vector<1x32xf32>
    %464 = vector.extract_strided_slice %0 {offsets = [0, 304], sizes = [16, 16], strides = [1, 1]} : vector<16x512xf32> to vector<16x16xf32>
    %465 = vector.extract_strided_slice %2 {offsets = [20, 0], sizes = [1, 16], strides = [1, 1]} : vector<46x48xf32> to vector<1x16xf32>
    %cst_119 = arith.constant dense<0.000000e+00> : vector<16x16xf32>
    %466 = tpu.matmul %459, %460, %cst_119 {dimension_numbers = #tpu.dot_dimension_numbers<[1], [0], [0], [1], [0, 0, 1, 1], [], []>} : vector<16x16xf32>, vector<16x16xf32>, vector<16x16xf32> -> vector<16x16xf32>
    %467 = vector.broadcast %461 : vector<1x16xf32> to vector<16x16xf32>
    %468 = arith.addf %466, %467 : vector<16x16xf32>
    %cst_120 = arith.constant dense<0.000000e+00> : vector<16x32xf32>
    %469 = tpu.matmul %339, %462, %cst_120 {dimension_numbers = #tpu.dot_dimension_numbers<[1], [0], [0], [1], [0, 0, 1, 1], [], []>} : vector<16x16xf32>, vector<16x32xf32>, vector<16x32xf32> -> vector<16x32xf32>
    %470 = vector.broadcast %463 : vector<1x32xf32> to vector<16x32xf32>
    %471 = arith.addf %469, %470 : vector<16x32xf32>
    %472 = vector.shape_cast %468 : vector<16x16xf32> to vector<2x8x16xf32>
    %473 = vector.extract_strided_slice %471 {offsets = [0, 0], sizes = [16, 16], strides = [1, 1]} : vector<16x32xf32> to vector<16x16xf32>
    %474 = vector.shape_cast %473 : vector<16x16xf32> to vector<2x8x16xf32>
    %475 = vector.extract_strided_slice %471 {offsets = [0, 16], sizes = [16, 16], strides = [1, 1]} : vector<16x32xf32> to vector<16x16xf32>
    %476 = vector.shape_cast %475 : vector<16x16xf32> to vector<2x8x16xf32>
    %477 = vector.extract_strided_slice %472 {offsets = [0, 0, 0], sizes = [2, 8, 4], strides = [1, 1, 1]} : vector<2x8x16xf32> to vector<2x8x4xf32>
    %478 = vector.extract_strided_slice %474 {offsets = [0, 0, 0], sizes = [2, 8, 4], strides = [1, 1, 1]} : vector<2x8x16xf32> to vector<2x8x4xf32>
    %479 = vector.extract_strided_slice %476 {offsets = [0, 0, 0], sizes = [2, 8, 4], strides = [1, 1, 1]} : vector<2x8x16xf32> to vector<2x8x4xf32>
    "tpu.trace_start"() <{level = 10 : i32, message = "bqd,bkd->bqk"}> : () -> ()
    %cst_121 = arith.constant dense<0.000000e+00> : vector<2x8x8xf32>
    %480 = tpu.matmul %477, %478, %cst_121 {dimension_numbers = #tpu.dot_dimension_numbers<[2], [2], [1], [1], [0, 0, 0, 1, 1, 1], [0], [0]>} : vector<2x8x4xf32>, vector<2x8x4xf32>, vector<2x8x8xf32> -> vector<2x8x8xf32>
    "tpu.trace_stop"() : () -> ()
    %cst_122 = arith.constant 5.000000e-01 : f32
    %481 = vector.broadcast %cst_122 : f32 to vector<2x8x8xf32>
    %482 = arith.mulf %480, %481 : vector<2x8x8xf32>
    %cst_123 = arith.constant dense<0xFF800000> : vector<2x8xf32>
    %483 = vector.multi_reduction <maximumf>, %482, %cst_123 [2] : vector<2x8x8xf32> to vector<2x8xf32>
    %484 = vector.shape_cast %483 : vector<2x8xf32> to vector<2x8x1xf32>
    %485 = vector.broadcast %484 : vector<2x8x1xf32> to vector<2x8x8xf32>
    %486 = arith.subf %482, %485 : vector<2x8x8xf32>
    %487 = math.exp %486 : vector<2x8x8xf32>
    %cst_124 = arith.constant dense<0.000000e+00> : vector<2x8xf32>
    %488 = vector.multi_reduction <add>, %487, %cst_124 [2] : vector<2x8x8xf32> to vector<2x8xf32>
    %489 = vector.shape_cast %488 : vector<2x8xf32> to vector<2x8x1xf32>
    %490 = vector.broadcast %489 : vector<2x8x1xf32> to vector<2x8x8xf32>
    %491 = arith.divf %487, %490 : vector<2x8x8xf32>
    "tpu.trace_start"() <{level = 10 : i32, message = "bqk,bkd->bqd"}> : () -> ()
    %cst_125 = arith.constant dense<0.000000e+00> : vector<2x8x4xf32>
    %492 = tpu.matmul %491, %479, %cst_125 {dimension_numbers = #tpu.dot_dimension_numbers<[2], [1], [1], [2], [0, 0, 0, 1, 1, 2], [0], [0]>} : vector<2x8x8xf32>, vector<2x8x4xf32>, vector<2x8x4xf32> -> vector<2x8x4xf32>
    "tpu.trace_stop"() : () -> ()
    %493 = vector.shape_cast %492 : vector<2x8x4xf32> to vector<16x4xf32>
    %494 = vector.extract_strided_slice %464 {offsets = [0, 0], sizes = [4, 16], strides = [1, 1]} : vector<16x16xf32> to vector<4x16xf32>
    %cst_126 = arith.constant dense<0.000000e+00> : vector<16x16xf32>
    %495 = tpu.matmul %493, %494, %cst_126 {dimension_numbers = #tpu.dot_dimension_numbers<[1], [0], [0], [1], [0, 0, 1, 1], [], []>} : vector<16x4xf32>, vector<4x16xf32>, vector<16x16xf32> -> vector<16x16xf32>
    %496 = vector.extract_strided_slice %472 {offsets = [0, 0, 4], sizes = [2, 8, 4], strides = [1, 1, 1]} : vector<2x8x16xf32> to vector<2x8x4xf32>
    %497 = vector.extract_strided_slice %474 {offsets = [0, 0, 4], sizes = [2, 8, 4], strides = [1, 1, 1]} : vector<2x8x16xf32> to vector<2x8x4xf32>
    %498 = vector.extract_strided_slice %476 {offsets = [0, 0, 4], sizes = [2, 8, 4], strides = [1, 1, 1]} : vector<2x8x16xf32> to vector<2x8x4xf32>
    "tpu.trace_start"() <{level = 10 : i32, message = "bqd,bkd->bqk"}> : () -> ()
    %cst_127 = arith.constant dense<0.000000e+00> : vector<2x8x8xf32>
    %499 = tpu.matmul %496, %497, %cst_127 {dimension_numbers = #tpu.dot_dimension_numbers<[2], [2], [1], [1], [0, 0, 0, 1, 1, 1], [0], [0]>} : vector<2x8x4xf32>, vector<2x8x4xf32>, vector<2x8x8xf32> -> vector<2x8x8xf32>
    "tpu.trace_stop"() : () -> ()
    %cst_128 = arith.constant 5.000000e-01 : f32
    %500 = vector.broadcast %cst_128 : f32 to vector<2x8x8xf32>
    %501 = arith.mulf %499, %500 : vector<2x8x8xf32>
    %cst_129 = arith.constant dense<0xFF800000> : vector<2x8xf32>
    %502 = vector.multi_reduction <maximumf>, %501, %cst_129 [2] : vector<2x8x8xf32> to vector<2x8xf32>
    %503 = vector.shape_cast %502 : vector<2x8xf32> to vector<2x8x1xf32>
    %504 = vector.broadcast %503 : vector<2x8x1xf32> to vector<2x8x8xf32>
    %505 = arith.subf %501, %504 : vector<2x8x8xf32>
    %506 = math.exp %505 : vector<2x8x8xf32>
    %cst_130 = arith.constant dense<0.000000e+00> : vector<2x8xf32>
    %507 = vector.multi_reduction <add>, %506, %cst_130 [2] : vector<2x8x8xf32> to vector<2x8xf32>
    %508 = vector.shape_cast %507 : vector<2x8xf32> to vector<2x8x1xf32>
    %509 = vector.broadcast %508 : vector<2x8x1xf32> to vector<2x8x8xf32>
    %510 = arith.divf %506, %509 : vector<2x8x8xf32>
    "tpu.trace_start"() <{level = 10 : i32, message = "bqk,bkd->bqd"}> : () -> ()
    %cst_131 = arith.constant dense<0.000000e+00> : vector<2x8x4xf32>
    %511 = tpu.matmul %510, %498, %cst_131 {dimension_numbers = #tpu.dot_dimension_numbers<[2], [1], [1], [2], [0, 0, 0, 1, 1, 2], [0], [0]>} : vector<2x8x8xf32>, vector<2x8x4xf32>, vector<2x8x4xf32> -> vector<2x8x4xf32>
    "tpu.trace_stop"() : () -> ()
    %512 = vector.shape_cast %511 : vector<2x8x4xf32> to vector<16x4xf32>
    %513 = vector.extract_strided_slice %464 {offsets = [4, 0], sizes = [4, 16], strides = [1, 1]} : vector<16x16xf32> to vector<4x16xf32>
    %cst_132 = arith.constant dense<0.000000e+00> : vector<16x16xf32>
    %514 = tpu.matmul %512, %513, %cst_132 {dimension_numbers = #tpu.dot_dimension_numbers<[1], [0], [0], [1], [0, 0, 1, 1], [], []>} : vector<16x4xf32>, vector<4x16xf32>, vector<16x16xf32> -> vector<16x16xf32>
    %515 = arith.addf %495, %514 : vector<16x16xf32>
    %516 = vector.extract_strided_slice %472 {offsets = [0, 0, 8], sizes = [2, 8, 4], strides = [1, 1, 1]} : vector<2x8x16xf32> to vector<2x8x4xf32>
    %517 = vector.extract_strided_slice %474 {offsets = [0, 0, 8], sizes = [2, 8, 4], strides = [1, 1, 1]} : vector<2x8x16xf32> to vector<2x8x4xf32>
    %518 = vector.extract_strided_slice %476 {offsets = [0, 0, 8], sizes = [2, 8, 4], strides = [1, 1, 1]} : vector<2x8x16xf32> to vector<2x8x4xf32>
    "tpu.trace_start"() <{level = 10 : i32, message = "bqd,bkd->bqk"}> : () -> ()
    %cst_133 = arith.constant dense<0.000000e+00> : vector<2x8x8xf32>
    %519 = tpu.matmul %516, %517, %cst_133 {dimension_numbers = #tpu.dot_dimension_numbers<[2], [2], [1], [1], [0, 0, 0, 1, 1, 1], [0], [0]>} : vector<2x8x4xf32>, vector<2x8x4xf32>, vector<2x8x8xf32> -> vector<2x8x8xf32>
    "tpu.trace_stop"() : () -> ()
    %cst_134 = arith.constant 5.000000e-01 : f32
    %520 = vector.broadcast %cst_134 : f32 to vector<2x8x8xf32>
    %521 = arith.mulf %519, %520 : vector<2x8x8xf32>
    %cst_135 = arith.constant dense<0xFF800000> : vector<2x8xf32>
    %522 = vector.multi_reduction <maximumf>, %521, %cst_135 [2] : vector<2x8x8xf32> to vector<2x8xf32>
    %523 = vector.shape_cast %522 : vector<2x8xf32> to vector<2x8x1xf32>
    %524 = vector.broadcast %523 : vector<2x8x1xf32> to vector<2x8x8xf32>
    %525 = arith.subf %521, %524 : vector<2x8x8xf32>
    %526 = math.exp %525 : vector<2x8x8xf32>
    %cst_136 = arith.constant dense<0.000000e+00> : vector<2x8xf32>
    %527 = vector.multi_reduction <add>, %526, %cst_136 [2] : vector<2x8x8xf32> to vector<2x8xf32>
    %528 = vector.shape_cast %527 : vector<2x8xf32> to vector<2x8x1xf32>
    %529 = vector.broadcast %528 : vector<2x8x1xf32> to vector<2x8x8xf32>
    %530 = arith.divf %526, %529 : vector<2x8x8xf32>
    "tpu.trace_start"() <{level = 10 : i32, message = "bqk,bkd->bqd"}> : () -> ()
    %cst_137 = arith.constant dense<0.000000e+00> : vector<2x8x4xf32>
    %531 = tpu.matmul %530, %518, %cst_137 {dimension_numbers = #tpu.dot_dimension_numbers<[2], [1], [1], [2], [0, 0, 0, 1, 1, 2], [0], [0]>} : vector<2x8x8xf32>, vector<2x8x4xf32>, vector<2x8x4xf32> -> vector<2x8x4xf32>
    "tpu.trace_stop"() : () -> ()
    %532 = vector.shape_cast %531 : vector<2x8x4xf32> to vector<16x4xf32>
    %533 = vector.extract_strided_slice %464 {offsets = [8, 0], sizes = [4, 16], strides = [1, 1]} : vector<16x16xf32> to vector<4x16xf32>
    %cst_138 = arith.constant dense<0.000000e+00> : vector<16x16xf32>
    %534 = tpu.matmul %532, %533, %cst_138 {dimension_numbers = #tpu.dot_dimension_numbers<[1], [0], [0], [1], [0, 0, 1, 1], [], []>} : vector<16x4xf32>, vector<4x16xf32>, vector<16x16xf32> -> vector<16x16xf32>
    %535 = arith.addf %515, %534 : vector<16x16xf32>
    %536 = vector.extract_strided_slice %472 {offsets = [0, 0, 12], sizes = [2, 8, 4], strides = [1, 1, 1]} : vector<2x8x16xf32> to vector<2x8x4xf32>
    %537 = vector.extract_strided_slice %474 {offsets = [0, 0, 12], sizes = [2, 8, 4], strides = [1, 1, 1]} : vector<2x8x16xf32> to vector<2x8x4xf32>
    %538 = vector.extract_strided_slice %476 {offsets = [0, 0, 12], sizes = [2, 8, 4], strides = [1, 1, 1]} : vector<2x8x16xf32> to vector<2x8x4xf32>
    "tpu.trace_start"() <{level = 10 : i32, message = "bqd,bkd->bqk"}> : () -> ()
    %cst_139 = arith.constant dense<0.000000e+00> : vector<2x8x8xf32>
    %539 = tpu.matmul %536, %537, %cst_139 {dimension_numbers = #tpu.dot_dimension_numbers<[2], [2], [1], [1], [0, 0, 0, 1, 1, 1], [0], [0]>} : vector<2x8x4xf32>, vector<2x8x4xf32>, vector<2x8x8xf32> -> vector<2x8x8xf32>
    "tpu.trace_stop"() : () -> ()
    %cst_140 = arith.constant 5.000000e-01 : f32
    %540 = vector.broadcast %cst_140 : f32 to vector<2x8x8xf32>
    %541 = arith.mulf %539, %540 : vector<2x8x8xf32>
    %cst_141 = arith.constant dense<0xFF800000> : vector<2x8xf32>
    %542 = vector.multi_reduction <maximumf>, %541, %cst_141 [2] : vector<2x8x8xf32> to vector<2x8xf32>
    %543 = vector.shape_cast %542 : vector<2x8xf32> to vector<2x8x1xf32>
    %544 = vector.broadcast %543 : vector<2x8x1xf32> to vector<2x8x8xf32>
    %545 = arith.subf %541, %544 : vector<2x8x8xf32>
    %546 = math.exp %545 : vector<2x8x8xf32>
    %cst_142 = arith.constant dense<0.000000e+00> : vector<2x8xf32>
    %547 = vector.multi_reduction <add>, %546, %cst_142 [2] : vector<2x8x8xf32> to vector<2x8xf32>
    %548 = vector.shape_cast %547 : vector<2x8xf32> to vector<2x8x1xf32>
    %549 = vector.broadcast %548 : vector<2x8x1xf32> to vector<2x8x8xf32>
    %550 = arith.divf %546, %549 : vector<2x8x8xf32>
    "tpu.trace_start"() <{level = 10 : i32, message = "bqk,bkd->bqd"}> : () -> ()
    %cst_143 = arith.constant dense<0.000000e+00> : vector<2x8x4xf32>
    %551 = tpu.matmul %550, %538, %cst_143 {dimension_numbers = #tpu.dot_dimension_numbers<[2], [1], [1], [2], [0, 0, 0, 1, 1, 2], [0], [0]>} : vector<2x8x8xf32>, vector<2x8x4xf32>, vector<2x8x4xf32> -> vector<2x8x4xf32>
    "tpu.trace_stop"() : () -> ()
    %552 = vector.shape_cast %551 : vector<2x8x4xf32> to vector<16x4xf32>
    %553 = vector.extract_strided_slice %464 {offsets = [12, 0], sizes = [4, 16], strides = [1, 1]} : vector<16x16xf32> to vector<4x16xf32>
    %cst_144 = arith.constant dense<0.000000e+00> : vector<16x16xf32>
    %554 = tpu.matmul %552, %553, %cst_144 {dimension_numbers = #tpu.dot_dimension_numbers<[1], [0], [0], [1], [0, 0, 1, 1], [], []>} : vector<16x4xf32>, vector<4x16xf32>, vector<16x16xf32> -> vector<16x16xf32>
    %555 = arith.addf %535, %554 : vector<16x16xf32>
    %556 = vector.broadcast %465 : vector<1x16xf32> to vector<16x16xf32>
    %557 = arith.addf %555, %556 : vector<16x16xf32>
    %558 = arith.addf %459, %557 : vector<16x16xf32>
    %559 = vector.extract_strided_slice %2 {offsets = [25, 0], sizes = [1, 16], strides = [1, 1]} : vector<46x48xf32> to vector<1x16xf32>
    %560 = vector.extract_strided_slice %2 {offsets = [26, 0], sizes = [1, 16], strides = [1, 1]} : vector<46x48xf32> to vector<1x16xf32>
    %cst_145 = arith.constant dense<0.000000e+00> : vector<16xf32>
    %561 = vector.multi_reduction <add>, %558, %cst_145 [1] : vector<16x16xf32> to vector<16xf32>
    %562 = vector.shape_cast %561 : vector<16xf32> to vector<16x1xf32>
    %cst_146 = arith.constant 1.600000e+01 : f32
    %563 = vector.broadcast %cst_146 : f32 to vector<16x1xf32>
    %564 = arith.divf %562, %563 : vector<16x1xf32>
    %565 = arith.mulf %558, %558 : vector<16x16xf32>
    %cst_147 = arith.constant dense<0.000000e+00> : vector<16xf32>
    %566 = vector.multi_reduction <add>, %565, %cst_147 [1] : vector<16x16xf32> to vector<16xf32>
    %567 = vector.shape_cast %566 : vector<16xf32> to vector<16x1xf32>
    %cst_148 = arith.constant 1.600000e+01 : f32
    %568 = vector.broadcast %cst_148 : f32 to vector<16x1xf32>
    %569 = arith.divf %567, %568 : vector<16x1xf32>
    %570 = arith.mulf %564, %564 : vector<16x1xf32>
    %571 = arith.subf %569, %570 : vector<16x1xf32>
    %572 = vector.broadcast %564 : vector<16x1xf32> to vector<16x16xf32>
    %573 = arith.subf %558, %572 : vector<16x16xf32>
    %cst_149 = arith.constant 9.99999974E-6 : f32
    %574 = vector.broadcast %cst_149 : f32 to vector<16x1xf32>
    %575 = arith.addf %571, %574 : vector<16x1xf32>
    %576 = math.rsqrt %575 : vector<16x1xf32>
    %577 = vector.broadcast %576 : vector<16x1xf32> to vector<16x16xf32>
    %578 = arith.mulf %573, %577 : vector<16x16xf32>
    %579 = vector.broadcast %559 : vector<1x16xf32> to vector<16x16xf32>
    %580 = arith.mulf %578, %579 : vector<16x16xf32>
    %581 = vector.broadcast %560 : vector<1x16xf32> to vector<16x16xf32>
    %582 = arith.addf %580, %581 : vector<16x16xf32>
    %583 = vector.extract_strided_slice %0 {offsets = [0, 320], sizes = [16, 32], strides = [1, 1]} : vector<16x512xf32> to vector<16x32xf32>
    %584 = vector.extract_strided_slice %2 {offsets = [21, 0], sizes = [1, 32], strides = [1, 1]} : vector<46x48xf32> to vector<1x32xf32>
    %585 = vector.extract_strided_slice %1 {offsets = [0, 32], sizes = [32, 16], strides = [1, 1]} : vector<32x64xf32> to vector<32x16xf32>
    %586 = vector.extract_strided_slice %2 {offsets = [22, 0], sizes = [1, 16], strides = [1, 1]} : vector<46x48xf32> to vector<1x16xf32>
    %cst_150 = arith.constant dense<0.000000e+00> : vector<16x32xf32>
    %587 = tpu.matmul %582, %583, %cst_150 {dimension_numbers = #tpu.dot_dimension_numbers<[1], [0], [0], [1], [0, 0, 1, 1], [], []>} : vector<16x16xf32>, vector<16x32xf32>, vector<16x32xf32> -> vector<16x32xf32>
    %588 = vector.broadcast %584 : vector<1x32xf32> to vector<16x32xf32>
    %589 = arith.addf %587, %588 : vector<16x32xf32>
    %cst_151 = arith.constant 0.000000e+00 : f32
    %590 = vector.broadcast %cst_151 : f32 to vector<16x32xf32>
    %591 = arith.maximumf %589, %590 : vector<16x32xf32>
    %cst_152 = arith.constant dense<0.000000e+00> : vector<16x16xf32>
    %592 = tpu.matmul %591, %585, %cst_152 {dimension_numbers = #tpu.dot_dimension_numbers<[1], [0], [0], [1], [0, 0, 1, 1], [], []>} : vector<16x32xf32>, vector<32x16xf32>, vector<16x16xf32> -> vector<16x16xf32>
    %593 = vector.broadcast %586 : vector<1x16xf32> to vector<16x16xf32>
    %594 = arith.addf %592, %593 : vector<16x16xf32>
    %595 = arith.addf %582, %594 : vector<16x16xf32>
    %596 = vector.extract_strided_slice %2 {offsets = [27, 0], sizes = [1, 16], strides = [1, 1]} : vector<46x48xf32> to vector<1x16xf32>
    %597 = vector.extract_strided_slice %2 {offsets = [28, 0], sizes = [1, 16], strides = [1, 1]} : vector<46x48xf32> to vector<1x16xf32>
    %cst_153 = arith.constant dense<0.000000e+00> : vector<16xf32>
    %598 = vector.multi_reduction <add>, %595, %cst_153 [1] : vector<16x16xf32> to vector<16xf32>
    %599 = vector.shape_cast %598 : vector<16xf32> to vector<16x1xf32>
    %cst_154 = arith.constant 1.600000e+01 : f32
    %600 = vector.broadcast %cst_154 : f32 to vector<16x1xf32>
    %601 = arith.divf %599, %600 : vector<16x1xf32>
    %602 = arith.mulf %595, %595 : vector<16x16xf32>
    %cst_155 = arith.constant dense<0.000000e+00> : vector<16xf32>
    %603 = vector.multi_reduction <add>, %602, %cst_155 [1] : vector<16x16xf32> to vector<16xf32>
    %604 = vector.shape_cast %603 : vector<16xf32> to vector<16x1xf32>
    %cst_156 = arith.constant 1.600000e+01 : f32
    %605 = vector.broadcast %cst_156 : f32 to vector<16x1xf32>
    %606 = arith.divf %604, %605 : vector<16x1xf32>
    %607 = arith.mulf %601, %601 : vector<16x1xf32>
    %608 = arith.subf %606, %607 : vector<16x1xf32>
    %609 = vector.broadcast %601 : vector<16x1xf32> to vector<16x16xf32>
    %610 = arith.subf %595, %609 : vector<16x16xf32>
    %cst_157 = arith.constant 9.99999974E-6 : f32
    %611 = vector.broadcast %cst_157 : f32 to vector<16x1xf32>
    %612 = arith.addf %608, %611 : vector<16x1xf32>
    %613 = math.rsqrt %612 : vector<16x1xf32>
    %614 = vector.broadcast %613 : vector<16x1xf32> to vector<16x16xf32>
    %615 = arith.mulf %610, %614 : vector<16x16xf32>
    %616 = vector.broadcast %596 : vector<1x16xf32> to vector<16x16xf32>
    %617 = arith.mulf %615, %616 : vector<16x16xf32>
    %618 = vector.broadcast %597 : vector<1x16xf32> to vector<16x16xf32>
    %619 = arith.addf %617, %618 : vector<16x16xf32>
    %620 = vector.extract_strided_slice %0 {offsets = [0, 352], sizes = [16, 48], strides = [1, 1]} : vector<16x512xf32> to vector<16x48xf32>
    %621 = vector.extract_strided_slice %2 {offsets = [29, 0], sizes = [1, 48], strides = [1, 1]} : vector<46x48xf32> to vector<1x48xf32>
    %622 = vector.extract_strided_slice %0 {offsets = [0, 400], sizes = [16, 16], strides = [1, 1]} : vector<16x512xf32> to vector<16x16xf32>
    %623 = vector.extract_strided_slice %2 {offsets = [30, 0], sizes = [1, 16], strides = [1, 1]} : vector<46x48xf32> to vector<1x16xf32>
    %cst_158 = arith.constant dense<0.000000e+00> : vector<16x48xf32>
    %624 = tpu.matmul %619, %620, %cst_158 {dimension_numbers = #tpu.dot_dimension_numbers<[1], [0], [0], [1], [0, 0, 1, 1], [], []>} : vector<16x16xf32>, vector<16x48xf32>, vector<16x48xf32> -> vector<16x48xf32>
    %625 = vector.broadcast %621 : vector<1x48xf32> to vector<16x48xf32>
    %626 = arith.addf %624, %625 : vector<16x48xf32>
    %627 = vector.extract_strided_slice %626 {offsets = [0, 0], sizes = [16, 16], strides = [1, 1]} : vector<16x48xf32> to vector<16x16xf32>
    %628 = vector.shape_cast %627 : vector<16x16xf32> to vector<2x8x16xf32>
    %629 = vector.extract_strided_slice %626 {offsets = [0, 16], sizes = [16, 16], strides = [1, 1]} : vector<16x48xf32> to vector<16x16xf32>
    %630 = vector.shape_cast %629 : vector<16x16xf32> to vector<2x8x16xf32>
    %631 = vector.extract_strided_slice %626 {offsets = [0, 32], sizes = [16, 16], strides = [1, 1]} : vector<16x48xf32> to vector<16x16xf32>
    %632 = vector.shape_cast %631 : vector<16x16xf32> to vector<2x8x16xf32>
    %633 = vector.extract_strided_slice %628 {offsets = [0, 0, 0], sizes = [2, 8, 4], strides = [1, 1, 1]} : vector<2x8x16xf32> to vector<2x8x4xf32>
    %634 = vector.extract_strided_slice %630 {offsets = [0, 0, 0], sizes = [2, 8, 4], strides = [1, 1, 1]} : vector<2x8x16xf32> to vector<2x8x4xf32>
    %635 = vector.extract_strided_slice %632 {offsets = [0, 0, 0], sizes = [2, 8, 4], strides = [1, 1, 1]} : vector<2x8x16xf32> to vector<2x8x4xf32>
    "tpu.trace_start"() <{level = 10 : i32, message = "bqd,bkd->bqk"}> : () -> ()
    %cst_159 = arith.constant dense<0.000000e+00> : vector<2x8x8xf32>
    %636 = tpu.matmul %633, %634, %cst_159 {dimension_numbers = #tpu.dot_dimension_numbers<[2], [2], [1], [1], [0, 0, 0, 1, 1, 1], [0], [0]>} : vector<2x8x4xf32>, vector<2x8x4xf32>, vector<2x8x8xf32> -> vector<2x8x8xf32>
    "tpu.trace_stop"() : () -> ()
    %cst_160 = arith.constant 5.000000e-01 : f32
    %637 = vector.broadcast %cst_160 : f32 to vector<2x8x8xf32>
    %638 = arith.mulf %636, %637 : vector<2x8x8xf32>
    %cst_161 = arith.constant dense<0xFF800000> : vector<2x8xf32>
    %639 = vector.multi_reduction <maximumf>, %638, %cst_161 [2] : vector<2x8x8xf32> to vector<2x8xf32>
    %640 = vector.shape_cast %639 : vector<2x8xf32> to vector<2x8x1xf32>
    %641 = vector.broadcast %640 : vector<2x8x1xf32> to vector<2x8x8xf32>
    %642 = arith.subf %638, %641 : vector<2x8x8xf32>
    %643 = math.exp %642 : vector<2x8x8xf32>
    %cst_162 = arith.constant dense<0.000000e+00> : vector<2x8xf32>
    %644 = vector.multi_reduction <add>, %643, %cst_162 [2] : vector<2x8x8xf32> to vector<2x8xf32>
    %645 = vector.shape_cast %644 : vector<2x8xf32> to vector<2x8x1xf32>
    %646 = vector.broadcast %645 : vector<2x8x1xf32> to vector<2x8x8xf32>
    %647 = arith.divf %643, %646 : vector<2x8x8xf32>
    "tpu.trace_start"() <{level = 10 : i32, message = "bqk,bkd->bqd"}> : () -> ()
    %cst_163 = arith.constant dense<0.000000e+00> : vector<2x8x4xf32>
    %648 = tpu.matmul %647, %635, %cst_163 {dimension_numbers = #tpu.dot_dimension_numbers<[2], [1], [1], [2], [0, 0, 0, 1, 1, 2], [0], [0]>} : vector<2x8x8xf32>, vector<2x8x4xf32>, vector<2x8x4xf32> -> vector<2x8x4xf32>
    "tpu.trace_stop"() : () -> ()
    %649 = vector.shape_cast %648 : vector<2x8x4xf32> to vector<16x4xf32>
    %650 = vector.extract_strided_slice %622 {offsets = [0, 0], sizes = [4, 16], strides = [1, 1]} : vector<16x16xf32> to vector<4x16xf32>
    %cst_164 = arith.constant dense<0.000000e+00> : vector<16x16xf32>
    %651 = tpu.matmul %649, %650, %cst_164 {dimension_numbers = #tpu.dot_dimension_numbers<[1], [0], [0], [1], [0, 0, 1, 1], [], []>} : vector<16x4xf32>, vector<4x16xf32>, vector<16x16xf32> -> vector<16x16xf32>
    %652 = vector.extract_strided_slice %628 {offsets = [0, 0, 4], sizes = [2, 8, 4], strides = [1, 1, 1]} : vector<2x8x16xf32> to vector<2x8x4xf32>
    %653 = vector.extract_strided_slice %630 {offsets = [0, 0, 4], sizes = [2, 8, 4], strides = [1, 1, 1]} : vector<2x8x16xf32> to vector<2x8x4xf32>
    %654 = vector.extract_strided_slice %632 {offsets = [0, 0, 4], sizes = [2, 8, 4], strides = [1, 1, 1]} : vector<2x8x16xf32> to vector<2x8x4xf32>
    "tpu.trace_start"() <{level = 10 : i32, message = "bqd,bkd->bqk"}> : () -> ()
    %cst_165 = arith.constant dense<0.000000e+00> : vector<2x8x8xf32>
    %655 = tpu.matmul %652, %653, %cst_165 {dimension_numbers = #tpu.dot_dimension_numbers<[2], [2], [1], [1], [0, 0, 0, 1, 1, 1], [0], [0]>} : vector<2x8x4xf32>, vector<2x8x4xf32>, vector<2x8x8xf32> -> vector<2x8x8xf32>
    "tpu.trace_stop"() : () -> ()
    %cst_166 = arith.constant 5.000000e-01 : f32
    %656 = vector.broadcast %cst_166 : f32 to vector<2x8x8xf32>
    %657 = arith.mulf %655, %656 : vector<2x8x8xf32>
    %cst_167 = arith.constant dense<0xFF800000> : vector<2x8xf32>
    %658 = vector.multi_reduction <maximumf>, %657, %cst_167 [2] : vector<2x8x8xf32> to vector<2x8xf32>
    %659 = vector.shape_cast %658 : vector<2x8xf32> to vector<2x8x1xf32>
    %660 = vector.broadcast %659 : vector<2x8x1xf32> to vector<2x8x8xf32>
    %661 = arith.subf %657, %660 : vector<2x8x8xf32>
    %662 = math.exp %661 : vector<2x8x8xf32>
    %cst_168 = arith.constant dense<0.000000e+00> : vector<2x8xf32>
    %663 = vector.multi_reduction <add>, %662, %cst_168 [2] : vector<2x8x8xf32> to vector<2x8xf32>
    %664 = vector.shape_cast %663 : vector<2x8xf32> to vector<2x8x1xf32>
    %665 = vector.broadcast %664 : vector<2x8x1xf32> to vector<2x8x8xf32>
    %666 = arith.divf %662, %665 : vector<2x8x8xf32>
    "tpu.trace_start"() <{level = 10 : i32, message = "bqk,bkd->bqd"}> : () -> ()
    %cst_169 = arith.constant dense<0.000000e+00> : vector<2x8x4xf32>
    %667 = tpu.matmul %666, %654, %cst_169 {dimension_numbers = #tpu.dot_dimension_numbers<[2], [1], [1], [2], [0, 0, 0, 1, 1, 2], [0], [0]>} : vector<2x8x8xf32>, vector<2x8x4xf32>, vector<2x8x4xf32> -> vector<2x8x4xf32>
    "tpu.trace_stop"() : () -> ()
    %668 = vector.shape_cast %667 : vector<2x8x4xf32> to vector<16x4xf32>
    %669 = vector.extract_strided_slice %622 {offsets = [4, 0], sizes = [4, 16], strides = [1, 1]} : vector<16x16xf32> to vector<4x16xf32>
    %cst_170 = arith.constant dense<0.000000e+00> : vector<16x16xf32>
    %670 = tpu.matmul %668, %669, %cst_170 {dimension_numbers = #tpu.dot_dimension_numbers<[1], [0], [0], [1], [0, 0, 1, 1], [], []>} : vector<16x4xf32>, vector<4x16xf32>, vector<16x16xf32> -> vector<16x16xf32>
    %671 = arith.addf %651, %670 : vector<16x16xf32>
    %672 = vector.extract_strided_slice %628 {offsets = [0, 0, 8], sizes = [2, 8, 4], strides = [1, 1, 1]} : vector<2x8x16xf32> to vector<2x8x4xf32>
    %673 = vector.extract_strided_slice %630 {offsets = [0, 0, 8], sizes = [2, 8, 4], strides = [1, 1, 1]} : vector<2x8x16xf32> to vector<2x8x4xf32>
    %674 = vector.extract_strided_slice %632 {offsets = [0, 0, 8], sizes = [2, 8, 4], strides = [1, 1, 1]} : vector<2x8x16xf32> to vector<2x8x4xf32>
    "tpu.trace_start"() <{level = 10 : i32, message = "bqd,bkd->bqk"}> : () -> ()
    %cst_171 = arith.constant dense<0.000000e+00> : vector<2x8x8xf32>
    %675 = tpu.matmul %672, %673, %cst_171 {dimension_numbers = #tpu.dot_dimension_numbers<[2], [2], [1], [1], [0, 0, 0, 1, 1, 1], [0], [0]>} : vector<2x8x4xf32>, vector<2x8x4xf32>, vector<2x8x8xf32> -> vector<2x8x8xf32>
    "tpu.trace_stop"() : () -> ()
    %cst_172 = arith.constant 5.000000e-01 : f32
    %676 = vector.broadcast %cst_172 : f32 to vector<2x8x8xf32>
    %677 = arith.mulf %675, %676 : vector<2x8x8xf32>
    %cst_173 = arith.constant dense<0xFF800000> : vector<2x8xf32>
    %678 = vector.multi_reduction <maximumf>, %677, %cst_173 [2] : vector<2x8x8xf32> to vector<2x8xf32>
    %679 = vector.shape_cast %678 : vector<2x8xf32> to vector<2x8x1xf32>
    %680 = vector.broadcast %679 : vector<2x8x1xf32> to vector<2x8x8xf32>
    %681 = arith.subf %677, %680 : vector<2x8x8xf32>
    %682 = math.exp %681 : vector<2x8x8xf32>
    %cst_174 = arith.constant dense<0.000000e+00> : vector<2x8xf32>
    %683 = vector.multi_reduction <add>, %682, %cst_174 [2] : vector<2x8x8xf32> to vector<2x8xf32>
    %684 = vector.shape_cast %683 : vector<2x8xf32> to vector<2x8x1xf32>
    %685 = vector.broadcast %684 : vector<2x8x1xf32> to vector<2x8x8xf32>
    %686 = arith.divf %682, %685 : vector<2x8x8xf32>
    "tpu.trace_start"() <{level = 10 : i32, message = "bqk,bkd->bqd"}> : () -> ()
    %cst_175 = arith.constant dense<0.000000e+00> : vector<2x8x4xf32>
    %687 = tpu.matmul %686, %674, %cst_175 {dimension_numbers = #tpu.dot_dimension_numbers<[2], [1], [1], [2], [0, 0, 0, 1, 1, 2], [0], [0]>} : vector<2x8x8xf32>, vector<2x8x4xf32>, vector<2x8x4xf32> -> vector<2x8x4xf32>
    "tpu.trace_stop"() : () -> ()
    %688 = vector.shape_cast %687 : vector<2x8x4xf32> to vector<16x4xf32>
    %689 = vector.extract_strided_slice %622 {offsets = [8, 0], sizes = [4, 16], strides = [1, 1]} : vector<16x16xf32> to vector<4x16xf32>
    %cst_176 = arith.constant dense<0.000000e+00> : vector<16x16xf32>
    %690 = tpu.matmul %688, %689, %cst_176 {dimension_numbers = #tpu.dot_dimension_numbers<[1], [0], [0], [1], [0, 0, 1, 1], [], []>} : vector<16x4xf32>, vector<4x16xf32>, vector<16x16xf32> -> vector<16x16xf32>
    %691 = arith.addf %671, %690 : vector<16x16xf32>
    %692 = vector.extract_strided_slice %628 {offsets = [0, 0, 12], sizes = [2, 8, 4], strides = [1, 1, 1]} : vector<2x8x16xf32> to vector<2x8x4xf32>
    %693 = vector.extract_strided_slice %630 {offsets = [0, 0, 12], sizes = [2, 8, 4], strides = [1, 1, 1]} : vector<2x8x16xf32> to vector<2x8x4xf32>
    %694 = vector.extract_strided_slice %632 {offsets = [0, 0, 12], sizes = [2, 8, 4], strides = [1, 1, 1]} : vector<2x8x16xf32> to vector<2x8x4xf32>
    "tpu.trace_start"() <{level = 10 : i32, message = "bqd,bkd->bqk"}> : () -> ()
    %cst_177 = arith.constant dense<0.000000e+00> : vector<2x8x8xf32>
    %695 = tpu.matmul %692, %693, %cst_177 {dimension_numbers = #tpu.dot_dimension_numbers<[2], [2], [1], [1], [0, 0, 0, 1, 1, 1], [0], [0]>} : vector<2x8x4xf32>, vector<2x8x4xf32>, vector<2x8x8xf32> -> vector<2x8x8xf32>
    "tpu.trace_stop"() : () -> ()
    %cst_178 = arith.constant 5.000000e-01 : f32
    %696 = vector.broadcast %cst_178 : f32 to vector<2x8x8xf32>
    %697 = arith.mulf %695, %696 : vector<2x8x8xf32>
    %cst_179 = arith.constant dense<0xFF800000> : vector<2x8xf32>
    %698 = vector.multi_reduction <maximumf>, %697, %cst_179 [2] : vector<2x8x8xf32> to vector<2x8xf32>
    %699 = vector.shape_cast %698 : vector<2x8xf32> to vector<2x8x1xf32>
    %700 = vector.broadcast %699 : vector<2x8x1xf32> to vector<2x8x8xf32>
    %701 = arith.subf %697, %700 : vector<2x8x8xf32>
    %702 = math.exp %701 : vector<2x8x8xf32>
    %cst_180 = arith.constant dense<0.000000e+00> : vector<2x8xf32>
    %703 = vector.multi_reduction <add>, %702, %cst_180 [2] : vector<2x8x8xf32> to vector<2x8xf32>
    %704 = vector.shape_cast %703 : vector<2x8xf32> to vector<2x8x1xf32>
    %705 = vector.broadcast %704 : vector<2x8x1xf32> to vector<2x8x8xf32>
    %706 = arith.divf %702, %705 : vector<2x8x8xf32>
    "tpu.trace_start"() <{level = 10 : i32, message = "bqk,bkd->bqd"}> : () -> ()
    %cst_181 = arith.constant dense<0.000000e+00> : vector<2x8x4xf32>
    %707 = tpu.matmul %706, %694, %cst_181 {dimension_numbers = #tpu.dot_dimension_numbers<[2], [1], [1], [2], [0, 0, 0, 1, 1, 2], [0], [0]>} : vector<2x8x8xf32>, vector<2x8x4xf32>, vector<2x8x4xf32> -> vector<2x8x4xf32>
    "tpu.trace_stop"() : () -> ()
    %708 = vector.shape_cast %707 : vector<2x8x4xf32> to vector<16x4xf32>
    %709 = vector.extract_strided_slice %622 {offsets = [12, 0], sizes = [4, 16], strides = [1, 1]} : vector<16x16xf32> to vector<4x16xf32>
    %cst_182 = arith.constant dense<0.000000e+00> : vector<16x16xf32>
    %710 = tpu.matmul %708, %709, %cst_182 {dimension_numbers = #tpu.dot_dimension_numbers<[1], [0], [0], [1], [0, 0, 1, 1], [], []>} : vector<16x4xf32>, vector<4x16xf32>, vector<16x16xf32> -> vector<16x16xf32>
    %711 = arith.addf %691, %710 : vector<16x16xf32>
    %712 = vector.broadcast %623 : vector<1x16xf32> to vector<16x16xf32>
    %713 = arith.addf %711, %712 : vector<16x16xf32>
    %714 = arith.addf %619, %713 : vector<16x16xf32>
    %715 = vector.extract_strided_slice %2 {offsets = [36, 0], sizes = [1, 16], strides = [1, 1]} : vector<46x48xf32> to vector<1x16xf32>
    %716 = vector.extract_strided_slice %2 {offsets = [37, 0], sizes = [1, 16], strides = [1, 1]} : vector<46x48xf32> to vector<1x16xf32>
    %cst_183 = arith.constant dense<0.000000e+00> : vector<16xf32>
    %717 = vector.multi_reduction <add>, %714, %cst_183 [1] : vector<16x16xf32> to vector<16xf32>
    %718 = vector.shape_cast %717 : vector<16xf32> to vector<16x1xf32>
    %cst_184 = arith.constant 1.600000e+01 : f32
    %719 = vector.broadcast %cst_184 : f32 to vector<16x1xf32>
    %720 = arith.divf %718, %719 : vector<16x1xf32>
    %721 = arith.mulf %714, %714 : vector<16x16xf32>
    %cst_185 = arith.constant dense<0.000000e+00> : vector<16xf32>
    %722 = vector.multi_reduction <add>, %721, %cst_185 [1] : vector<16x16xf32> to vector<16xf32>
    %723 = vector.shape_cast %722 : vector<16xf32> to vector<16x1xf32>
    %cst_186 = arith.constant 1.600000e+01 : f32
    %724 = vector.broadcast %cst_186 : f32 to vector<16x1xf32>
    %725 = arith.divf %723, %724 : vector<16x1xf32>
    %726 = arith.mulf %720, %720 : vector<16x1xf32>
    %727 = arith.subf %725, %726 : vector<16x1xf32>
    %728 = vector.broadcast %720 : vector<16x1xf32> to vector<16x16xf32>
    %729 = arith.subf %714, %728 : vector<16x16xf32>
    %cst_187 = arith.constant 9.99999974E-6 : f32
    %730 = vector.broadcast %cst_187 : f32 to vector<16x1xf32>
    %731 = arith.addf %727, %730 : vector<16x1xf32>
    %732 = math.rsqrt %731 : vector<16x1xf32>
    %733 = vector.broadcast %732 : vector<16x1xf32> to vector<16x16xf32>
    %734 = arith.mulf %729, %733 : vector<16x16xf32>
    %735 = vector.broadcast %715 : vector<1x16xf32> to vector<16x16xf32>
    %736 = arith.mulf %734, %735 : vector<16x16xf32>
    %737 = vector.broadcast %716 : vector<1x16xf32> to vector<16x16xf32>
    %738 = arith.addf %736, %737 : vector<16x16xf32>
    %739 = vector.extract_strided_slice %0 {offsets = [0, 416], sizes = [16, 16], strides = [1, 1]} : vector<16x512xf32> to vector<16x16xf32>
    %740 = vector.extract_strided_slice %2 {offsets = [31, 0], sizes = [1, 16], strides = [1, 1]} : vector<46x48xf32> to vector<1x16xf32>
    %741 = vector.extract_strided_slice %0 {offsets = [0, 432], sizes = [16, 32], strides = [1, 1]} : vector<16x512xf32> to vector<16x32xf32>
    %742 = vector.extract_strided_slice %2 {offsets = [32, 0], sizes = [1, 32], strides = [1, 1]} : vector<46x48xf32> to vector<1x32xf32>
    %743 = vector.extract_strided_slice %0 {offsets = [0, 464], sizes = [16, 16], strides = [1, 1]} : vector<16x512xf32> to vector<16x16xf32>
    %744 = vector.extract_strided_slice %2 {offsets = [33, 0], sizes = [1, 16], strides = [1, 1]} : vector<46x48xf32> to vector<1x16xf32>
    %cst_188 = arith.constant dense<0.000000e+00> : vector<16x16xf32>
    %745 = tpu.matmul %738, %739, %cst_188 {dimension_numbers = #tpu.dot_dimension_numbers<[1], [0], [0], [1], [0, 0, 1, 1], [], []>} : vector<16x16xf32>, vector<16x16xf32>, vector<16x16xf32> -> vector<16x16xf32>
    %746 = vector.broadcast %740 : vector<1x16xf32> to vector<16x16xf32>
    %747 = arith.addf %745, %746 : vector<16x16xf32>
    %cst_189 = arith.constant dense<0.000000e+00> : vector<16x32xf32>
    %748 = tpu.matmul %339, %741, %cst_189 {dimension_numbers = #tpu.dot_dimension_numbers<[1], [0], [0], [1], [0, 0, 1, 1], [], []>} : vector<16x16xf32>, vector<16x32xf32>, vector<16x32xf32> -> vector<16x32xf32>
    %749 = vector.broadcast %742 : vector<1x32xf32> to vector<16x32xf32>
    %750 = arith.addf %748, %749 : vector<16x32xf32>
    %751 = vector.shape_cast %747 : vector<16x16xf32> to vector<2x8x16xf32>
    %752 = vector.extract_strided_slice %750 {offsets = [0, 0], sizes = [16, 16], strides = [1, 1]} : vector<16x32xf32> to vector<16x16xf32>
    %753 = vector.shape_cast %752 : vector<16x16xf32> to vector<2x8x16xf32>
    %754 = vector.extract_strided_slice %750 {offsets = [0, 16], sizes = [16, 16], strides = [1, 1]} : vector<16x32xf32> to vector<16x16xf32>
    %755 = vector.shape_cast %754 : vector<16x16xf32> to vector<2x8x16xf32>
    %756 = vector.extract_strided_slice %751 {offsets = [0, 0, 0], sizes = [2, 8, 4], strides = [1, 1, 1]} : vector<2x8x16xf32> to vector<2x8x4xf32>
    %757 = vector.extract_strided_slice %753 {offsets = [0, 0, 0], sizes = [2, 8, 4], strides = [1, 1, 1]} : vector<2x8x16xf32> to vector<2x8x4xf32>
    %758 = vector.extract_strided_slice %755 {offsets = [0, 0, 0], sizes = [2, 8, 4], strides = [1, 1, 1]} : vector<2x8x16xf32> to vector<2x8x4xf32>
    "tpu.trace_start"() <{level = 10 : i32, message = "bqd,bkd->bqk"}> : () -> ()
    %cst_190 = arith.constant dense<0.000000e+00> : vector<2x8x8xf32>
    %759 = tpu.matmul %756, %757, %cst_190 {dimension_numbers = #tpu.dot_dimension_numbers<[2], [2], [1], [1], [0, 0, 0, 1, 1, 1], [0], [0]>} : vector<2x8x4xf32>, vector<2x8x4xf32>, vector<2x8x8xf32> -> vector<2x8x8xf32>
    "tpu.trace_stop"() : () -> ()
    %cst_191 = arith.constant 5.000000e-01 : f32
    %760 = vector.broadcast %cst_191 : f32 to vector<2x8x8xf32>
    %761 = arith.mulf %759, %760 : vector<2x8x8xf32>
    %cst_192 = arith.constant dense<0xFF800000> : vector<2x8xf32>
    %762 = vector.multi_reduction <maximumf>, %761, %cst_192 [2] : vector<2x8x8xf32> to vector<2x8xf32>
    %763 = vector.shape_cast %762 : vector<2x8xf32> to vector<2x8x1xf32>
    %764 = vector.broadcast %763 : vector<2x8x1xf32> to vector<2x8x8xf32>
    %765 = arith.subf %761, %764 : vector<2x8x8xf32>
    %766 = math.exp %765 : vector<2x8x8xf32>
    %cst_193 = arith.constant dense<0.000000e+00> : vector<2x8xf32>
    %767 = vector.multi_reduction <add>, %766, %cst_193 [2] : vector<2x8x8xf32> to vector<2x8xf32>
    %768 = vector.shape_cast %767 : vector<2x8xf32> to vector<2x8x1xf32>
    %769 = vector.broadcast %768 : vector<2x8x1xf32> to vector<2x8x8xf32>
    %770 = arith.divf %766, %769 : vector<2x8x8xf32>
    "tpu.trace_start"() <{level = 10 : i32, message = "bqk,bkd->bqd"}> : () -> ()
    %cst_194 = arith.constant dense<0.000000e+00> : vector<2x8x4xf32>
    %771 = tpu.matmul %770, %758, %cst_194 {dimension_numbers = #tpu.dot_dimension_numbers<[2], [1], [1], [2], [0, 0, 0, 1, 1, 2], [0], [0]>} : vector<2x8x8xf32>, vector<2x8x4xf32>, vector<2x8x4xf32> -> vector<2x8x4xf32>
    "tpu.trace_stop"() : () -> ()
    %772 = vector.shape_cast %771 : vector<2x8x4xf32> to vector<16x4xf32>
    %773 = vector.extract_strided_slice %743 {offsets = [0, 0], sizes = [4, 16], strides = [1, 1]} : vector<16x16xf32> to vector<4x16xf32>
    %cst_195 = arith.constant dense<0.000000e+00> : vector<16x16xf32>
    %774 = tpu.matmul %772, %773, %cst_195 {dimension_numbers = #tpu.dot_dimension_numbers<[1], [0], [0], [1], [0, 0, 1, 1], [], []>} : vector<16x4xf32>, vector<4x16xf32>, vector<16x16xf32> -> vector<16x16xf32>
    %775 = vector.extract_strided_slice %751 {offsets = [0, 0, 4], sizes = [2, 8, 4], strides = [1, 1, 1]} : vector<2x8x16xf32> to vector<2x8x4xf32>
    %776 = vector.extract_strided_slice %753 {offsets = [0, 0, 4], sizes = [2, 8, 4], strides = [1, 1, 1]} : vector<2x8x16xf32> to vector<2x8x4xf32>
    %777 = vector.extract_strided_slice %755 {offsets = [0, 0, 4], sizes = [2, 8, 4], strides = [1, 1, 1]} : vector<2x8x16xf32> to vector<2x8x4xf32>
    "tpu.trace_start"() <{level = 10 : i32, message = "bqd,bkd->bqk"}> : () -> ()
    %cst_196 = arith.constant dense<0.000000e+00> : vector<2x8x8xf32>
    %778 = tpu.matmul %775, %776, %cst_196 {dimension_numbers = #tpu.dot_dimension_numbers<[2], [2], [1], [1], [0, 0, 0, 1, 1, 1], [0], [0]>} : vector<2x8x4xf32>, vector<2x8x4xf32>, vector<2x8x8xf32> -> vector<2x8x8xf32>
    "tpu.trace_stop"() : () -> ()
    %cst_197 = arith.constant 5.000000e-01 : f32
    %779 = vector.broadcast %cst_197 : f32 to vector<2x8x8xf32>
    %780 = arith.mulf %778, %779 : vector<2x8x8xf32>
    %cst_198 = arith.constant dense<0xFF800000> : vector<2x8xf32>
    %781 = vector.multi_reduction <maximumf>, %780, %cst_198 [2] : vector<2x8x8xf32> to vector<2x8xf32>
    %782 = vector.shape_cast %781 : vector<2x8xf32> to vector<2x8x1xf32>
    %783 = vector.broadcast %782 : vector<2x8x1xf32> to vector<2x8x8xf32>
    %784 = arith.subf %780, %783 : vector<2x8x8xf32>
    %785 = math.exp %784 : vector<2x8x8xf32>
    %cst_199 = arith.constant dense<0.000000e+00> : vector<2x8xf32>
    %786 = vector.multi_reduction <add>, %785, %cst_199 [2] : vector<2x8x8xf32> to vector<2x8xf32>
    %787 = vector.shape_cast %786 : vector<2x8xf32> to vector<2x8x1xf32>
    %788 = vector.broadcast %787 : vector<2x8x1xf32> to vector<2x8x8xf32>
    %789 = arith.divf %785, %788 : vector<2x8x8xf32>
    "tpu.trace_start"() <{level = 10 : i32, message = "bqk,bkd->bqd"}> : () -> ()
    %cst_200 = arith.constant dense<0.000000e+00> : vector<2x8x4xf32>
    %790 = tpu.matmul %789, %777, %cst_200 {dimension_numbers = #tpu.dot_dimension_numbers<[2], [1], [1], [2], [0, 0, 0, 1, 1, 2], [0], [0]>} : vector<2x8x8xf32>, vector<2x8x4xf32>, vector<2x8x4xf32> -> vector<2x8x4xf32>
    "tpu.trace_stop"() : () -> ()
    %791 = vector.shape_cast %790 : vector<2x8x4xf32> to vector<16x4xf32>
    %792 = vector.extract_strided_slice %743 {offsets = [4, 0], sizes = [4, 16], strides = [1, 1]} : vector<16x16xf32> to vector<4x16xf32>
    %cst_201 = arith.constant dense<0.000000e+00> : vector<16x16xf32>
    %793 = tpu.matmul %791, %792, %cst_201 {dimension_numbers = #tpu.dot_dimension_numbers<[1], [0], [0], [1], [0, 0, 1, 1], [], []>} : vector<16x4xf32>, vector<4x16xf32>, vector<16x16xf32> -> vector<16x16xf32>
    %794 = arith.addf %774, %793 : vector<16x16xf32>
    %795 = vector.extract_strided_slice %751 {offsets = [0, 0, 8], sizes = [2, 8, 4], strides = [1, 1, 1]} : vector<2x8x16xf32> to vector<2x8x4xf32>
    %796 = vector.extract_strided_slice %753 {offsets = [0, 0, 8], sizes = [2, 8, 4], strides = [1, 1, 1]} : vector<2x8x16xf32> to vector<2x8x4xf32>
    %797 = vector.extract_strided_slice %755 {offsets = [0, 0, 8], sizes = [2, 8, 4], strides = [1, 1, 1]} : vector<2x8x16xf32> to vector<2x8x4xf32>
    "tpu.trace_start"() <{level = 10 : i32, message = "bqd,bkd->bqk"}> : () -> ()
    %cst_202 = arith.constant dense<0.000000e+00> : vector<2x8x8xf32>
    %798 = tpu.matmul %795, %796, %cst_202 {dimension_numbers = #tpu.dot_dimension_numbers<[2], [2], [1], [1], [0, 0, 0, 1, 1, 1], [0], [0]>} : vector<2x8x4xf32>, vector<2x8x4xf32>, vector<2x8x8xf32> -> vector<2x8x8xf32>
    "tpu.trace_stop"() : () -> ()
    %cst_203 = arith.constant 5.000000e-01 : f32
    %799 = vector.broadcast %cst_203 : f32 to vector<2x8x8xf32>
    %800 = arith.mulf %798, %799 : vector<2x8x8xf32>
    %cst_204 = arith.constant dense<0xFF800000> : vector<2x8xf32>
    %801 = vector.multi_reduction <maximumf>, %800, %cst_204 [2] : vector<2x8x8xf32> to vector<2x8xf32>
    %802 = vector.shape_cast %801 : vector<2x8xf32> to vector<2x8x1xf32>
    %803 = vector.broadcast %802 : vector<2x8x1xf32> to vector<2x8x8xf32>
    %804 = arith.subf %800, %803 : vector<2x8x8xf32>
    %805 = math.exp %804 : vector<2x8x8xf32>
    %cst_205 = arith.constant dense<0.000000e+00> : vector<2x8xf32>
    %806 = vector.multi_reduction <add>, %805, %cst_205 [2] : vector<2x8x8xf32> to vector<2x8xf32>
    %807 = vector.shape_cast %806 : vector<2x8xf32> to vector<2x8x1xf32>
    %808 = vector.broadcast %807 : vector<2x8x1xf32> to vector<2x8x8xf32>
    %809 = arith.divf %805, %808 : vector<2x8x8xf32>
    "tpu.trace_start"() <{level = 10 : i32, message = "bqk,bkd->bqd"}> : () -> ()
    %cst_206 = arith.constant dense<0.000000e+00> : vector<2x8x4xf32>
    %810 = tpu.matmul %809, %797, %cst_206 {dimension_numbers = #tpu.dot_dimension_numbers<[2], [1], [1], [2], [0, 0, 0, 1, 1, 2], [0], [0]>} : vector<2x8x8xf32>, vector<2x8x4xf32>, vector<2x8x4xf32> -> vector<2x8x4xf32>
    "tpu.trace_stop"() : () -> ()
    %811 = vector.shape_cast %810 : vector<2x8x4xf32> to vector<16x4xf32>
    %812 = vector.extract_strided_slice %743 {offsets = [8, 0], sizes = [4, 16], strides = [1, 1]} : vector<16x16xf32> to vector<4x16xf32>
    %cst_207 = arith.constant dense<0.000000e+00> : vector<16x16xf32>
    %813 = tpu.matmul %811, %812, %cst_207 {dimension_numbers = #tpu.dot_dimension_numbers<[1], [0], [0], [1], [0, 0, 1, 1], [], []>} : vector<16x4xf32>, vector<4x16xf32>, vector<16x16xf32> -> vector<16x16xf32>
    %814 = arith.addf %794, %813 : vector<16x16xf32>
    %815 = vector.extract_strided_slice %751 {offsets = [0, 0, 12], sizes = [2, 8, 4], strides = [1, 1, 1]} : vector<2x8x16xf32> to vector<2x8x4xf32>
    %816 = vector.extract_strided_slice %753 {offsets = [0, 0, 12], sizes = [2, 8, 4], strides = [1, 1, 1]} : vector<2x8x16xf32> to vector<2x8x4xf32>
    %817 = vector.extract_strided_slice %755 {offsets = [0, 0, 12], sizes = [2, 8, 4], strides = [1, 1, 1]} : vector<2x8x16xf32> to vector<2x8x4xf32>
    "tpu.trace_start"() <{level = 10 : i32, message = "bqd,bkd->bqk"}> : () -> ()
    %cst_208 = arith.constant dense<0.000000e+00> : vector<2x8x8xf32>
    %818 = tpu.matmul %815, %816, %cst_208 {dimension_numbers = #tpu.dot_dimension_numbers<[2], [2], [1], [1], [0, 0, 0, 1, 1, 1], [0], [0]>} : vector<2x8x4xf32>, vector<2x8x4xf32>, vector<2x8x8xf32> -> vector<2x8x8xf32>
    "tpu.trace_stop"() : () -> ()
    %cst_209 = arith.constant 5.000000e-01 : f32
    %819 = vector.broadcast %cst_209 : f32 to vector<2x8x8xf32>
    %820 = arith.mulf %818, %819 : vector<2x8x8xf32>
    %cst_210 = arith.constant dense<0xFF800000> : vector<2x8xf32>
    %821 = vector.multi_reduction <maximumf>, %820, %cst_210 [2] : vector<2x8x8xf32> to vector<2x8xf32>
    %822 = vector.shape_cast %821 : vector<2x8xf32> to vector<2x8x1xf32>
    %823 = vector.broadcast %822 : vector<2x8x1xf32> to vector<2x8x8xf32>
    %824 = arith.subf %820, %823 : vector<2x8x8xf32>
    %825 = math.exp %824 : vector<2x8x8xf32>
    %cst_211 = arith.constant dense<0.000000e+00> : vector<2x8xf32>
    %826 = vector.multi_reduction <add>, %825, %cst_211 [2] : vector<2x8x8xf32> to vector<2x8xf32>
    %827 = vector.shape_cast %826 : vector<2x8xf32> to vector<2x8x1xf32>
    %828 = vector.broadcast %827 : vector<2x8x1xf32> to vector<2x8x8xf32>
    %829 = arith.divf %825, %828 : vector<2x8x8xf32>
    "tpu.trace_start"() <{level = 10 : i32, message = "bqk,bkd->bqd"}> : () -> ()
    %cst_212 = arith.constant dense<0.000000e+00> : vector<2x8x4xf32>
    %830 = tpu.matmul %829, %817, %cst_212 {dimension_numbers = #tpu.dot_dimension_numbers<[2], [1], [1], [2], [0, 0, 0, 1, 1, 2], [0], [0]>} : vector<2x8x8xf32>, vector<2x8x4xf32>, vector<2x8x4xf32> -> vector<2x8x4xf32>
    "tpu.trace_stop"() : () -> ()
    %831 = vector.shape_cast %830 : vector<2x8x4xf32> to vector<16x4xf32>
    %832 = vector.extract_strided_slice %743 {offsets = [12, 0], sizes = [4, 16], strides = [1, 1]} : vector<16x16xf32> to vector<4x16xf32>
    %cst_213 = arith.constant dense<0.000000e+00> : vector<16x16xf32>
    %833 = tpu.matmul %831, %832, %cst_213 {dimension_numbers = #tpu.dot_dimension_numbers<[1], [0], [0], [1], [0, 0, 1, 1], [], []>} : vector<16x4xf32>, vector<4x16xf32>, vector<16x16xf32> -> vector<16x16xf32>
    %834 = arith.addf %814, %833 : vector<16x16xf32>
    %835 = vector.broadcast %744 : vector<1x16xf32> to vector<16x16xf32>
    %836 = arith.addf %834, %835 : vector<16x16xf32>
    %837 = arith.addf %738, %836 : vector<16x16xf32>
    %838 = vector.extract_strided_slice %2 {offsets = [38, 0], sizes = [1, 16], strides = [1, 1]} : vector<46x48xf32> to vector<1x16xf32>
    %839 = vector.extract_strided_slice %2 {offsets = [39, 0], sizes = [1, 16], strides = [1, 1]} : vector<46x48xf32> to vector<1x16xf32>
    %cst_214 = arith.constant dense<0.000000e+00> : vector<16xf32>
    %840 = vector.multi_reduction <add>, %837, %cst_214 [1] : vector<16x16xf32> to vector<16xf32>
    %841 = vector.shape_cast %840 : vector<16xf32> to vector<16x1xf32>
    %cst_215 = arith.constant 1.600000e+01 : f32
    %842 = vector.broadcast %cst_215 : f32 to vector<16x1xf32>
    %843 = arith.divf %841, %842 : vector<16x1xf32>
    %844 = arith.mulf %837, %837 : vector<16x16xf32>
    %cst_216 = arith.constant dense<0.000000e+00> : vector<16xf32>
    %845 = vector.multi_reduction <add>, %844, %cst_216 [1] : vector<16x16xf32> to vector<16xf32>
    %846 = vector.shape_cast %845 : vector<16xf32> to vector<16x1xf32>
    %cst_217 = arith.constant 1.600000e+01 : f32
    %847 = vector.broadcast %cst_217 : f32 to vector<16x1xf32>
    %848 = arith.divf %846, %847 : vector<16x1xf32>
    %849 = arith.mulf %843, %843 : vector<16x1xf32>
    %850 = arith.subf %848, %849 : vector<16x1xf32>
    %851 = vector.broadcast %843 : vector<16x1xf32> to vector<16x16xf32>
    %852 = arith.subf %837, %851 : vector<16x16xf32>
    %cst_218 = arith.constant 9.99999974E-6 : f32
    %853 = vector.broadcast %cst_218 : f32 to vector<16x1xf32>
    %854 = arith.addf %850, %853 : vector<16x1xf32>
    %855 = math.rsqrt %854 : vector<16x1xf32>
    %856 = vector.broadcast %855 : vector<16x1xf32> to vector<16x16xf32>
    %857 = arith.mulf %852, %856 : vector<16x16xf32>
    %858 = vector.broadcast %838 : vector<1x16xf32> to vector<16x16xf32>
    %859 = arith.mulf %857, %858 : vector<16x16xf32>
    %860 = vector.broadcast %839 : vector<1x16xf32> to vector<16x16xf32>
    %861 = arith.addf %859, %860 : vector<16x16xf32>
    %862 = vector.extract_strided_slice %0 {offsets = [0, 480], sizes = [16, 32], strides = [1, 1]} : vector<16x512xf32> to vector<16x32xf32>
    %863 = vector.extract_strided_slice %2 {offsets = [34, 0], sizes = [1, 32], strides = [1, 1]} : vector<46x48xf32> to vector<1x32xf32>
    %864 = vector.extract_strided_slice %1 {offsets = [0, 48], sizes = [32, 16], strides = [1, 1]} : vector<32x64xf32> to vector<32x16xf32>
    %865 = vector.extract_strided_slice %2 {offsets = [35, 0], sizes = [1, 16], strides = [1, 1]} : vector<46x48xf32> to vector<1x16xf32>
    %cst_219 = arith.constant dense<0.000000e+00> : vector<16x32xf32>
    %866 = tpu.matmul %861, %862, %cst_219 {dimension_numbers = #tpu.dot_dimension_numbers<[1], [0], [0], [1], [0, 0, 1, 1], [], []>} : vector<16x16xf32>, vector<16x32xf32>, vector<16x32xf32> -> vector<16x32xf32>
    %867 = vector.broadcast %863 : vector<1x32xf32> to vector<16x32xf32>
    %868 = arith.addf %866, %867 : vector<16x32xf32>
    %cst_220 = arith.constant 0.000000e+00 : f32
    %869 = vector.broadcast %cst_220 : f32 to vector<16x32xf32>
    %870 = arith.maximumf %868, %869 : vector<16x32xf32>
    %cst_221 = arith.constant dense<0.000000e+00> : vector<16x16xf32>
    %871 = tpu.matmul %870, %864, %cst_221 {dimension_numbers = #tpu.dot_dimension_numbers<[1], [0], [0], [1], [0, 0, 1, 1], [], []>} : vector<16x32xf32>, vector<32x16xf32>, vector<16x16xf32> -> vector<16x16xf32>
    %872 = vector.broadcast %865 : vector<1x16xf32> to vector<16x16xf32>
    %873 = arith.addf %871, %872 : vector<16x16xf32>
    %874 = arith.addf %861, %873 : vector<16x16xf32>
    %875 = vector.extract_strided_slice %2 {offsets = [40, 0], sizes = [1, 16], strides = [1, 1]} : vector<46x48xf32> to vector<1x16xf32>
    %876 = vector.extract_strided_slice %2 {offsets = [41, 0], sizes = [1, 16], strides = [1, 1]} : vector<46x48xf32> to vector<1x16xf32>
    %cst_222 = arith.constant dense<0.000000e+00> : vector<16xf32>
    %877 = vector.multi_reduction <add>, %874, %cst_222 [1] : vector<16x16xf32> to vector<16xf32>
    %878 = vector.shape_cast %877 : vector<16xf32> to vector<16x1xf32>
    %cst_223 = arith.constant 1.600000e+01 : f32
    %879 = vector.broadcast %cst_223 : f32 to vector<16x1xf32>
    %880 = arith.divf %878, %879 : vector<16x1xf32>
    %881 = arith.mulf %874, %874 : vector<16x16xf32>
    %cst_224 = arith.constant dense<0.000000e+00> : vector<16xf32>
    %882 = vector.multi_reduction <add>, %881, %cst_224 [1] : vector<16x16xf32> to vector<16xf32>
    %883 = vector.shape_cast %882 : vector<16xf32> to vector<16x1xf32>
    %cst_225 = arith.constant 1.600000e+01 : f32
    %884 = vector.broadcast %cst_225 : f32 to vector<16x1xf32>
    %885 = arith.divf %883, %884 : vector<16x1xf32>
    %886 = arith.mulf %880, %880 : vector<16x1xf32>
    %887 = arith.subf %885, %886 : vector<16x1xf32>
    %888 = vector.broadcast %880 : vector<16x1xf32> to vector<16x16xf32>
    %889 = arith.subf %874, %888 : vector<16x16xf32>
    %cst_226 = arith.constant 9.99999974E-6 : f32
    %890 = vector.broadcast %cst_226 : f32 to vector<16x1xf32>
    %891 = arith.addf %887, %890 : vector<16x1xf32>
    %892 = math.rsqrt %891 : vector<16x1xf32>
    %893 = vector.broadcast %892 : vector<16x1xf32> to vector<16x16xf32>
    %894 = arith.mulf %889, %893 : vector<16x16xf32>
    %895 = vector.broadcast %875 : vector<1x16xf32> to vector<16x16xf32>
    %896 = arith.mulf %894, %895 : vector<16x16xf32>
    %897 = vector.broadcast %876 : vector<1x16xf32> to vector<16x16xf32>
    %898 = arith.addf %896, %897 : vector<16x16xf32>
    %899 = vector.extract_strided_slice %2 {offsets = [44, 0], sizes = [1, 16], strides = [1, 1]} : vector<46x48xf32> to vector<1x16xf32>
    %900 = vector.extract_strided_slice %2 {offsets = [45, 0], sizes = [1, 16], strides = [1, 1]} : vector<46x48xf32> to vector<1x16xf32>
    %cst_227 = arith.constant dense<0.000000e+00> : vector<16xf32>
    %901 = vector.multi_reduction <add>, %898, %cst_227 [1] : vector<16x16xf32> to vector<16xf32>
    %902 = vector.shape_cast %901 : vector<16xf32> to vector<16x1xf32>
    %cst_228 = arith.constant 1.600000e+01 : f32
    %903 = vector.broadcast %cst_228 : f32 to vector<16x1xf32>
    %904 = arith.divf %902, %903 : vector<16x1xf32>
    %905 = arith.mulf %898, %898 : vector<16x16xf32>
    %cst_229 = arith.constant dense<0.000000e+00> : vector<16xf32>
    %906 = vector.multi_reduction <add>, %905, %cst_229 [1] : vector<16x16xf32> to vector<16xf32>
    %907 = vector.shape_cast %906 : vector<16xf32> to vector<16x1xf32>
    %cst_230 = arith.constant 1.600000e+01 : f32
    %908 = vector.broadcast %cst_230 : f32 to vector<16x1xf32>
    %909 = arith.divf %907, %908 : vector<16x1xf32>
    %910 = arith.mulf %904, %904 : vector<16x1xf32>
    %911 = arith.subf %909, %910 : vector<16x1xf32>
    %912 = vector.broadcast %904 : vector<16x1xf32> to vector<16x16xf32>
    %913 = arith.subf %898, %912 : vector<16x16xf32>
    %cst_231 = arith.constant 9.99999974E-6 : f32
    %914 = vector.broadcast %cst_231 : f32 to vector<16x1xf32>
    %915 = arith.addf %911, %914 : vector<16x1xf32>
    %916 = math.rsqrt %915 : vector<16x1xf32>
    %917 = vector.broadcast %916 : vector<16x1xf32> to vector<16x16xf32>
    %918 = arith.mulf %913, %917 : vector<16x16xf32>
    %919 = vector.broadcast %899 : vector<1x16xf32> to vector<16x16xf32>
    %920 = arith.mulf %918, %919 : vector<16x16xf32>
    %921 = vector.broadcast %900 : vector<1x16xf32> to vector<16x16xf32>
    %922 = arith.addf %920, %921 : vector<16x16xf32>
    %c0_232 = arith.constant 0 : index
    %c0_233 = arith.constant 0 : index
    %923 = vector.load %arg5[%c0_232, %c0_233] : memref<16x16xf32, #tpu.memory_space<vmem>>, vector<16x16xf32>
    tpu.vector_store %arg5[%c0_232, %c0_233], %922 {strides = array<i32>} : memref<16x16xf32, #tpu.memory_space<vmem>>, vector<16x16xf32>,
    return
  }
}

</mosaic_0001>

<bundles_post_ra>
// kernel: tpu_custom_call.1
= control target key start
LH: loop header
LB: loop body
LE: loop exit
PB: predicated region body
PF: predicated region fallthrough
CT: control target
= control target key end

     0   :  { %10 = vsyncpa [#allocation3], 0  ;;  %s15481_s0 = inlined_call_operand.hbm [shape: f32[16,16], index: 0, kind: input, shape index: {}]   ;;  %s15482_s1 = inlined_call_operand.hbm [shape: f32[16,16], index: 1, kind: input, shape index: {}]   ;;  %s15483_s2 = inlined_call_operand.hbm [shape: f32[16,512], index: 2, kind: input, shape index: {}]   ;;  %s15484_s3 = inlined_call_operand.hbm [shape: f32[32,64], index: 3, kind: input, shape index: {}]   ;;  %s15485_s4 = inlined_call_operand.hbm [shape: f32[46,48], index: 4, kind: input, shape index: {}]   ;;  %s15486_s5 = inlined_call_operand.hbm [shape: f32[16,16], index: 5, kind: output, shape index: {}]  }
   0x1   :  { %11 = vsyncpa [#allocation6], 0 }
   0x2   :  { %12 = vsyncpa [#allocation9], 0 }
   0x3   :  { %13 = vsyncpa [#allocation4], 0  ;;  %s13922_s18 = smov [#allocation5]   ;;  %s13923_s20 = smov [#allocation8]  }
   0x4   :  { %s31_s19 = sshll.u32 %s13922_s18, 4  ;;  %s55_s21 = sshll.u32 %s13923_s20, 4  ;;  %s32_s19 = int_to_ptr.vmem [resolvable:$true] %s31_s19  ;;  %s56_s21 = int_to_ptr.vmem [resolvable:$true] %s55_s21 }
   0x5   :  { %s13802_s22 = scalar_lea.vmem %s32_s19, 256  ;;  %p13807_p1 = scmp.lt.s32.totalorder %s32_s19, %s32_s19 }
   0x6   :  { %p13803_p0 = scmp.ne.s32.totalorder %s32_s19, %s13802_s22  ;;  %p13808_p2 = scmp.lt.s32.totalorder %s13802_s22, %s13802_s22 }
   0x8   :  { %p13809_p3 = por %p13808_p2, %p13807_p1 }
   0xa   :  { %p13810_p4 = pnand %p13809_p3, %p13803_p0 }
   0xc   :  { %13813 = shalt.err (!%p13810_p4)
}
   0xd   :  { %s13924_s23 = smov 128   ;;  %s13925_s24 = smov 8  }
   0xe   :  { %37 = dma.hbm_to_vmem [thread:$0]  %s15482_s1, 256, %s32_s19, [#allocation6], %s13924_s23, %s13924_s23, %s13925_s24  }
   0xf   :  { %s13822_s27 = scalar_lea.vmem %s56_s21, 512  ;;  %p13827_p6 = scmp.lt.s32.totalorder %s56_s21, %s56_s21 }
  0x10   :  { %p13823_p5 = scmp.ne.s32.totalorder %s56_s21, %s13822_s27  ;;  %p13828_p7 = scmp.lt.s32.totalorder %s13822_s27, %s13822_s27 }
  0x12   :  { %p13829_p8 = por %p13828_p7, %p13827_p6 }
  0x14   :  { %p13830_p9 = pnand %p13829_p8, %p13823_p5 }
  0x16   :  { %13833 = shalt.err (!%p13830_p9)
}
  0x17   :  { %61 = dma.hbm_to_vmem [thread:$0]  %s15484_s3, 512, %s56_s21, [#allocation9], %s13924_s23, %s13924_s23, %s13925_s24  }
  0x18   :  { %s13926_s30 = smov [#allocation2]   ;;  %s13927_s7 = smov [#allocation7]  }
  0x19   :  { %s19_s6 = sshll.u32 %s13926_s30, 4  ;;  %s43_s8 = sshll.u32 %s13927_s7, 4  ;;  %s20_s6 = int_to_ptr.vmem [resolvable:$true] %s19_s6  ;;  %s44_s8 = int_to_ptr.vmem [resolvable:$true] %s43_s8 }
  0x1a   :  { %s13842_s1 = scalar_lea.vmem %s20_s6, 256  ;;  %p13847_p11 = scmp.lt.s32.totalorder %s20_s6, %s20_s6 }
  0x1b   :  { %p13843_p10 = scmp.ne.s32.totalorder %s20_s6, %s13842_s1  ;;  %p13848_p12 = scmp.lt.s32.totalorder %s13842_s1, %s13842_s1 }
  0x1d   :  { %p13849_p13 = por %p13848_p12, %p13847_p11 }
  0x1f   :  { %p13850_p0 = pnand %p13849_p13, %p13843_p10 }
  0x21   :  { %13853 = shalt.err (!%p13850_p0)
}
  0x22   :  { %25 = dma.hbm_to_vmem [thread:$0]  %s15481_s0, 256, %s20_s6, [#allocation3], %s13924_s23, %s13924_s23, %s13925_s24  }
  0x23   :  { %s13862_s3 = scalar_lea.vmem %s44_s8, 1024  ;;  %p13867_p2 = scmp.lt.s32.totalorder %s44_s8, %s44_s8 }
  0x24   :  { %p13863_p1 = scmp.ne.s32.totalorder %s44_s8, %s13862_s3  ;;  %p13868_p3 = scmp.lt.s32.totalorder %s13862_s3, %s13862_s3 }
  0x26   :  { %p13869_p4 = por %p13868_p3, %p13867_p2 }
  0x28   :  { %p13870_p5 = pnand %p13869_p4, %p13863_p1 }
  0x2a   :  { %13873 = shalt.err (!%p13870_p5)
}
  0x2b   :  { %s13928_s11 = smov 512   ;;  %s13929_s12 = smov 32  }
  0x2c   :  { %49 = dma.hbm_to_vmem [thread:$0]  %s15483_s2, 1024, %s44_s8, [#allocation6], %s13928_s11, %s13928_s11, %s13929_s12  }
  0x2d   :  { %s13930_s15 = smov [#allocation10]  }
  0x2e   :  { %s67_s16 = sshll.u32 %s13930_s15, 4  ;;  %s68_s16 = int_to_ptr.vmem [resolvable:$true] %s67_s16 }
  0x2f   :  { %s13882_s17 = scalar_lea.vmem %s68_s16, 768  ;;  %p13887_p7 = scmp.lt.s32.totalorder %s68_s16, %s68_s16 }
  0x30   :  { %p13883_p6 = scmp.ne.s32.totalorder %s68_s16, %s13882_s17  ;;  %p13888_p8 = scmp.lt.s32.totalorder %s13882_s17, %s13882_s17 }
  0x32   :  { %p13889_p9 = por %p13888_p8, %p13887_p7 }
  0x34   :  { %p13890_p10 = pnand %p13889_p9, %p13883_p6 }
  0x36   :  { %13893 = shalt.err (!%p13890_p10)
}
  0x37   :  { %73 = dma.hbm_to_vmem [thread:$0]  %s15485_s4, 768, %s68_s16, [#allocation9], %s13924_s23, %s13924_s23, %s13925_s24  }
  0x38   :  { %13914 = dma.done.wait [#allocation3], 256  }
  0x39   :  { %13915 = vsyncadd [#allocation3], 4294967040 }
  0x3a   :  { %13916 = dma.done.wait [#allocation6], 1280  }
  0x3b   :  { %13917 = vsyncadd [#allocation6], 4294966016 }
  0x3c   :  { %13918 = dma.done.wait [#allocation9], 1280  }
  0x3d   :  { %13919 = vsyncadd [#allocation9], 4294966016  ;;  %vm113_vm0 = vcmask 130048   ;;  %v14007_v0 = vld [vmem:[#allocation7 + $0x20] sm:$0xff]  ;;  %v14017_v3 = vld [vmem:[#allocation2 + $0x8] sm:$0xff]  ;;  %v13931_v4 = vmov 0.0   ;;  %v109_v5 = vlaneseq }
  0x3e   :  { %v14009_v1 = vld [vmem:[#allocation7] sm:$0xff]  ;;  %12784 = vmatprep.subr.mxu1 %v14007_v0  ;;  %12796 = vmatprep.subr.mxu0 %v13931_v4  ;;  %vm13932_vm1 = vmmov 0   ;;  %s13933_s2 = smov 112   ;;  %vm198_vm2 = vcmask 31744   ;;  %vm352_vm3 = vcmask 64512   ;;  %s13934_s4 = smov 96  }
  0x3f   :  { %v14011_v2 = vld [vmem:[#allocation2] sm:$0xff]  ;;  %12785 = vmatpush3.msra.mxu1 %v14007_v0  ;;  %v14025_v6 = vshrl.u32 %v109_v5, 7  ;;  %12798 = vmatprep.mubr.msk.f32.mxu0 %vm13932_vm1, %v13931_v4  ;;  %s13935_s19 = smov 124   ;;  %s13936_s20 = smov 108   ;;  %vm869_vm4 = vcmask 1043456   ;;  %vm2020_vm5 = vcmask 261120  }
  0x40   :  { %12788 = vmatprep.mubr.msk.f32.mxu1 %vm113_vm0, %v14011_v2  ;;  %12786 = vmatprep.subr.mxu1 %v14009_v1  ;;  %v14034_v8 = vld [vmem:[#allocation10] sm:$0xff]  ;;  %s13937_s21 = smov 92   ;;  %s13938_s22 = smov 104  }
  0x41   :  { %12787 = vmatpush3.msra.mxu1 %v14009_v1  ;;  %v14032_v7 = vsub.s32 0, %v14025_v6  ;;  %s13939_s25 = smov 120   ;;  %s13940_s26 = smov 80  }
  0x42   :  { %12789 = vmatmul.mubr.msk.f32.vlgmr.msra.gmra.mxu1 %vm113_vm0, %v14017_v3  ;;  %12791 = vmatprep.subr.mxu1 %v13931_v4  ;;  %s13941_s27 = smov 88   ;;  %s13942_s28 = smov 100  }
  0x43   :  { %12793 = vmatprep.mubr.msk.f32.mxu1 %vm13932_vm1, %v13931_v4  ;;  %v112_v10 = vrot.slane %v14034_v8, %v14032_v7  ;;  %s13943_s29 = smov 116   ;;  %s13944_s30 = smov 84  }
  0x44   :  { %s13945_s6 = smov 64   ;;  %s13946_s7 = smov 16  }
  0x45   :  { %s13947_s8 = smov 48   ;;  %s13948_s1 = smov [#allocation11]  }
  0x46   :  { %s12186_s9 = sshll.u32 %s13948_s1, 4  ;;  %s12187_s9 = int_to_ptr.vmem [resolvable:$true] %s12186_s9 }
  0x47   :  { %s13894_s10 = scalar_lea.vmem %s12187_s9, 256  ;;  %p13899_p12 = scmp.lt.s32.totalorder %s12187_s9, %s12187_s9 }
  0x48   :  { %p13895_p11 = scmp.ne.s32.totalorder %s12187_s9, %s13894_s10  ;;  %p13900_p13 = scmp.lt.s32.totalorder %s13894_s10, %s13894_s10 }
  0x4a   :  { %p13901_p0 = por %p13900_p13, %p13899_p12 }
  0x4c   :  { %p13902_p1 = pnand %p13901_p0, %p13895_p11 }
 0x102   :  { %v12790_v9 = vpop.f32.mrf.mxu1 }
 0x103   :  { %v14042_v13 = vadd.f32 %v12790_v9, %v112_v10 }
 0x104   :  { %v186_v11 = vpop.f32.mrf.mxu1 }
 0x105   :  { %v14038_v12 = vadd.f32 %v186_v11, %v112_v10 }
 0x107   :  { %196 = vrot.lane.b32.xlu0 %v14038_v12, %s13933_s2 }
 0x10b   :  { %274 = vrot.lane.b32.xlu0 %v14042_v13, %s13933_s2 }
 0x179   :  { %v197_v14 = vpop.permute.xlu0 %196 }
 0x17a   :  { %12792 = vmatpush3.xpose.msk.msra.mxu1 %vm198_vm2, %v197_v14 }
 0x17b   :  { %12801 = vmatprep.subr.mxu1 %v13931_v4 }
 0x17d   :  { %12794 = vmatmul.mubr.msk.f32.vlgmr.msra.gmra.mxu1 %vm198_vm2, %v14038_v12  ;;  %v275_v15 = vpop.permute.xlu0 %274 }
 0x17e   :  { %12797 = vmatpush3.xpose.msk.msra.mxu0 %vm198_vm2, %v275_v15  ;;  %12803 = vmatprep.mubr.msk.f32.mxu1 %vm13932_vm1, %v13931_v4  ;;  %v860_v15 = vrot.slane %v14009_v1, 4 }
 0x17f   :  { %12806 = vmatprep.subr.mxu0 %v13931_v4 }
 0x181   :  { %12799 = vmatmul.mubr.msk.f32.vlgmr.msra.gmra.mxu0 %vm198_vm2, %v14042_v13 }
 0x182   :  { %12808 = vmatprep.mubr.msk.f32.mxu0 %vm13932_vm1, %v13931_v4 }
 0x23d   :  { %v269_v16 = vpop.f32.mrf.mxu1 }
 0x23e   :  { %v350_v17 = vmul.f32 0.5, %v269_v16 }
 0x23f   :  { %v12795_v18 = vpop.f32.mrf.mxu1 }
 0x240   :  { %v353_v19 = vsel %vm352_vm3, %v350_v17, -inf }
 0x241   :  { %354 = vmax.xlane.f32.xlu1 %v353_v19  ;;  %v346_v20 = vpop.f32.mrf.mxu0 }
 0x242   :  { %v351_v21 = vmul.f32 0.5, %v346_v20 }
 0x243   :  { %v12800_v22 = vpop.f32.mrf.mxu0 }
 0x244   :  { %v356_v23 = vsel %vm352_vm3, %v351_v21, -inf }
 0x245   :  { %357 = vmax.xlane.f32.xlu1 %v356_v23 }
 0x2ca   :  { %v355_v24 = vpop.xlane.xlu1 %354 }
 0x2cb   :  { %v359_v25 = vsub.f32 %v350_v17, %v355_v24 }
 0x2cd   :  { %v361_v26 = vmul.f32 1.442695, %v359_v25 }
 0x2ce   :  { %v358_v27 = vpop.xlane.xlu1 %357 }
 0x2cf   :  { %13539 = vpow2.f32 %v361_v26  ;;  %v360_v28 = vsub.f32 %v351_v21, %v358_v27 }
 0x2d1   :  { %v363_v29 = vmul.f32 1.442695, %v360_v28 }
 0x2d3   :  { %13541 = vpow2.f32 %v363_v29 }
 0x2dc   :  { %v13540_v30 = vpop.eup %13539 }
 0x2dd   :  { %v365_v31 = vsel %vm352_vm3, %v13540_v30, 0.0 }
 0x2de   :  { %366 = vadd.xlane.f32.xlu0 %v365_v31 }
 0x2e0   :  { %v13542_v32 = vpop.eup %13541 }
 0x2e1   :  { %v368_v33 = vsel %vm352_vm3, %v13542_v32, 0.0 }
 0x2e2   :  { %369 = vadd.xlane.f32.xlu1 %v368_v33 }
 0x2f3   :  { %375 = vrot.lane.b32.xlu1 %v14038_v12, %s13934_s4 }
 0x2f4   :  { %527 = vrot.lane.b32.xlu0 %v14038_v12, %s13935_s19 }
 0x2f7   :  { %451 = vrot.lane.b32.xlu1 %v14042_v13, %s13934_s4 }
 0x2fb   :  { %529 = vrot.lane.b32.xlu1 %v14038_v12, %s13936_s20 }
 0x2ff   :  { %607 = vrot.lane.b32.xlu1 %v14042_v13, %s13936_s20 }
 0x303   :  { %605 = vrot.lane.b32.xlu1 %v14042_v13, %s13935_s19 }
 0x367   :  { %v367_v34 = vpop.xlane.xlu0 %366 }
 0x368   :  { %13543 = vrcp.f32 %v367_v34 }
 0x36b   :  { %v370_v35 = vpop.xlane.xlu1 %369  ;;  %v528_v43 = vpop.permute.xlu0 %527 }
 0x36c   :  { %13545 = vrcp.f32 %v370_v35 }
 0x36f   :  { %v376_v36 = vpop.permute.xlu1 %375 }
 0x370   :  { %12802 = vmatpush3.msra.mxu1 %v376_v36 }
 0x371   :  { %12811 = vmatprep.subr.mxu1 %v13931_v4 }
 0x373   :  { %v452_v37 = vpop.permute.xlu1 %451 }
 0x374   :  { %12807 = vmatpush3.msra.mxu0 %v452_v37 }
 0x375   :  { %v13544_v38 = vpop.eup %13543  ;;  %12816 = vmatprep.subr.mxu0 %v13931_v4 }
 0x376   :  { %v372_v39 = vmul.f32 %v13544_v38, %v13540_v30 }
 0x377   :  { %v530_v40 = vpop.permute.xlu1 %529 }
 0x378   :  { %12804 = vmatmul.mubr.msk.f32.vlgmr.msra.gmra.mxu1 %vm352_vm3, %v372_v39 }
 0x379   :  { %v13546_v41 = vpop.eup %13545  ;;  %12812 = vmatpush3.xpose.msk.msra.mxu1 %vm198_vm2, %v530_v40  ;;  %12813 = vmatprep.mubr.msk.f32.mxu1 %vm13932_vm1, %v13931_v4 }
 0x37a   :  { %v374_v42 = vmul.f32 %v13546_v41, %v13542_v32  ;;  %12821 = vmatprep.subr.mxu1 %v13931_v4 }
 0x37b   :  { %v608_v44 = vpop.permute.xlu1 %607 }
 0x37c   :  { %12809 = vmatmul.mubr.msk.f32.vlgmr.msra.gmra.mxu0 %vm352_vm3, %v374_v42  ;;  %12814 = vmatmul.mubr.msk.f32.vlgmr.msra.gmra.mxu1 %vm198_vm2, %v528_v43 }
 0x37d   :  { %12817 = vmatpush3.xpose.msk.msra.mxu0 %vm198_vm2, %v608_v44  ;;  %12818 = vmatprep.mubr.msk.f32.mxu0 %vm13932_vm1, %v13931_v4 }
 0x37e   :  { %12826 = vmatprep.subr.mxu0 %v13931_v4  ;;  %12823 = vmatprep.mubr.msk.f32.mxu1 %vm13932_vm1, %v13931_v4 }
 0x37f   :  { %v606_v45 = vpop.permute.xlu1 %605 }
 0x380   :  { %12819 = vmatmul.mubr.msk.f32.vlgmr.msra.gmra.mxu0 %vm198_vm2, %v606_v45 }
 0x381   :  { %12828 = vmatprep.mubr.msk.f32.mxu0 %vm13932_vm1, %v13931_v4 }
 0x438   :  { %v447_v46 = vpop.f32.mrf.mxu1 }
 0x43a   :  { %v12805_v47 = vpop.f32.mrf.mxu1 }
 0x43c   :  { %v523_v48 = vpop.f32.mrf.mxu0  ;;  %v601_v49 = vpop.f32.mrf.mxu1 }
 0x43d   :  { %v683_v50 = vmul.f32 0.5, %v601_v49 }
 0x43e   :  { %v12810_v51 = vpop.f32.mrf.mxu0  ;;  %v12815_v52 = vpop.f32.mrf.mxu1 }
 0x43f   :  { %v685_v53 = vsel %vm352_vm3, %v683_v50, -inf }
 0x440   :  { %v679_v54 = vpop.f32.mrf.mxu0  ;;  %686 = vmax.xlane.f32.xlu1 %v685_v53 }
 0x441   :  { %v684_v55 = vmul.f32 0.5, %v679_v54 }
 0x442   :  { %v12820_v56 = vpop.f32.mrf.mxu0 }
 0x443   :  { %v688_v57 = vsel %vm352_vm3, %v684_v55, -inf }
 0x444   :  { %689 = vmax.xlane.f32.xlu0 %v688_v57 }
 0x45a   :  { %783 = vrot.lane.b32.xlu0 %v14042_v13, %s13937_s21 }
 0x45e   :  { %1034 = vrot.lane.b32.xlu0 %v14038_v12, %s13938_s22 }
 0x462   :  { %1032 = vrot.lane.b32.xlu0 %v14038_v12, %s13939_s25 }
 0x4c9   :  { %v687_v58 = vpop.xlane.xlu1 %686 }
 0x4ca   :  { %v691_v59 = vsub.f32 %v683_v50, %v687_v58 }
 0x4cc   :  { %v693_v62 = vmul.f32 1.442695, %v691_v59 }
 0x4cd   :  { %v690_v60 = vpop.xlane.xlu0 %689 }
 0x4ce   :  { %v692_v61 = vsub.f32 %v684_v55, %v690_v60 }
 0x4d0   :  { %v695_v63 = vmul.f32 1.442695, %v692_v61 }
 0x4d1   :  { %v784_v5 = vpop.permute.xlu0 %783 }
 0x4d2   :  { %13547 = vpow2.f32 %v695_v63  ;;  %12827 = vmatpush3.msra.mxu0 %v784_v5 }
 0x4d3   :  { %13549 = vpow2.f32 %v693_v62 }
 0x4d5   :  { %v1035_v29 = vpop.permute.xlu0 %1034 }
 0x4d9   :  { %v1033_v35 = vpop.permute.xlu0 %1032 }
 0x4df   :  { %v13548_v9 = vpop.eup %13547 }
 0x4e0   :  { %v700_v10 = vsel %vm352_vm3, %v13548_v9, 0.0  ;;  %v13550_v11 = vpop.eup %13549 }
 0x4e1   :  { %701 = vadd.xlane.f32.xlu1 %v700_v10  ;;  %v697_v14 = vsel %vm352_vm3, %v13550_v11, 0.0 }
 0x4e5   :  { %698 = vadd.xlane.f32.xlu1 %v697_v14 }
 0x4f6   :  { %707 = vrot.lane.b32.xlu1 %v14038_v12, %s13937_s21 }
 0x4fa   :  { %861 = vrot.lane.b32.xlu1 %v860_v15, %s13940_s26 }
 0x4fe   :  { %947 = vrot.lane.b32.xlu1 %v14009_v1, %s13940_s26 }
 0x502   :  { %1112 = vrot.lane.b32.xlu1 %v14042_v13, %s13938_s22 }
 0x506   :  { %1110 = vrot.lane.b32.xlu1 %v14042_v13, %s13939_s25 }
 0x56a   :  { %v702_v16 = vpop.xlane.xlu1 %701 }
 0x56b   :  { %13551 = vrcp.f32 %v702_v16 }
 0x56e   :  { %v699_v17 = vpop.xlane.xlu1 %698 }
 0x56f   :  { %13553 = vrcp.f32 %v699_v17 }
 0x572   :  { %v708_v18 = vpop.permute.xlu1 %707 }
 0x573   :  { %12822 = vmatpush3.msra.mxu1 %v708_v18 }
 0x576   :  { %v862_v19 = vpop.permute.xlu1 %861 }
 0x577   :  { %12831 = vmatprep.subr.msk.mxu1 %vm869_vm4, %v862_v19 }
 0x578   :  { %v13552_v20 = vpop.eup %13551 }
 0x579   :  { %v706_v21 = vmul.f32 %v13552_v20, %v13548_v9 }
 0x57a   :  { %v948_v22 = vpop.permute.xlu1 %947 }
 0x57b   :  { %12829 = vmatmul.mubr.msk.f32.vlgmr.msra.gmra.mxu0 %vm352_vm3, %v706_v21  ;;  %12836 = vmatprep.subr.msk.mxu0 %vm869_vm4, %v948_v22 }
 0x57c   :  { %v13554_v23 = vpop.eup %13553  ;;  %12838 = vmatprep.mubr.msk.f32.mxu0 %vm198_vm2, %v447_v46  ;;  %12837 = vmatpush3.msk.msra.mxu0 %vm869_vm4, %v948_v22 }
 0x57d   :  { %12846 = vmatprep.subr.mxu0 %v13931_v4  ;;  %v704_v24 = vmul.f32 %v13554_v23, %v13550_v11 }
 0x57e   :  { %v1113_v25 = vpop.permute.xlu1 %1112 }
 0x57f   :  { %12824 = vmatmul.mubr.msk.f32.vlgmr.msra.gmra.mxu1 %vm352_vm3, %v704_v24  ;;  %12839 = vmatmul.mubr.msk.f32.vlgmr.msra.gmra.mxu0 %vm198_vm2, %v523_v48 }
 0x580   :  { %12847 = vmatpush3.xpose.msk.msra.mxu0 %vm198_vm2, %v1113_v25  ;;  %12848 = vmatprep.mubr.msk.f32.mxu0 %vm13932_vm1, %v13931_v4 }
 0x581   :  { %12832 = vmatpush3.msk.msra.mxu1 %vm869_vm4, %v862_v19  ;;  %12856 = vmatprep.subr.mxu0 %v13931_v4 }
 0x582   :  { %v1111_v26 = vpop.permute.xlu1 %1110  ;;  %12841 = vmatprep.subr.mxu1 %v13931_v4 }
 0x583   :  { %12849 = vmatmul.mubr.msk.f32.vlgmr.msra.gmra.mxu0 %vm198_vm2, %v1111_v26 }
 0x584   :  { %12858 = vmatprep.mubr.msk.f32.mxu0 %vm13932_vm1, %v13931_v4 }
 0x63b   :  { %v855_v27 = vpop.f32.mrf.mxu0 }
 0x63d   :  { %v12830_v28 = vpop.f32.mrf.mxu0 }
 0x63f   :  { %v779_v30 = vpop.f32.mrf.mxu1  ;;  %v14129_v31 = vpop.f32.mrf.mxu0 }
 0x640   :  { %12833 = vmatprep.mubr.msk.f32.mxu1 %vm198_vm2, %v779_v30 }
 0x641   :  { %v12825_v32 = vpop.f32.mrf.mxu1  ;;  %12834 = vmatmul.mubr.msk.f32.vlgmr.msra.gmra.mxu1 %vm198_vm2, %v855_v27  ;;  %v14133_v33 = vpop.f32.mrf.mxu0 }
 0x642   :  { %12842 = vmatpush3.xpose.msk.msra.mxu1 %vm198_vm2, %v1035_v29  ;;  %12843 = vmatprep.mubr.msk.f32.mxu1 %vm13932_vm1, %v13931_v4 }
 0x643   :  { %v1184_v34 = vpop.f32.mrf.mxu0  ;;  %12851 = vmatprep.subr.mxu1 %v13931_v4 }
 0x644   :  { %v1189_v36 = vmul.f32 0.5, %v1184_v34 }
 0x645   :  { %12844 = vmatmul.mubr.msk.f32.vlgmr.msra.gmra.mxu1 %vm198_vm2, %v1033_v35  ;;  %v12850_v37 = vpop.f32.mrf.mxu0 }
 0x646   :  { %v1193_v38 = vsel %vm352_vm3, %v1189_v36, -inf  ;;  %12853 = vmatprep.mubr.msk.f32.mxu1 %vm13932_vm1, %v13931_v4 }
 0x647   :  { %1194 = vmax.xlane.f32.xlu1 %v1193_v38 }
 0x658   :  { %1212 = vrot.lane.b32.xlu1 %v14038_v12, %s13941_s27 }
 0x65c   :  { %1365 = vrot.lane.b32.xlu1 %v14007_v0, %s13940_s26 }
 0x660   :  { %1454 = vrot.lane.b32.xlu1 %v14038_v12, %s13942_s28 }
 0x664   :  { %1452 = vrot.lane.b32.xlu1 %v14038_v12, %s13943_s29 }
 0x6d0   :  { %v1195_v39 = vpop.xlane.xlu1 %1194 }
 0x6d1   :  { %v1197_v42 = vsub.f32 %v1189_v36, %v1195_v39 }
 0x6d3   :  { %v1200_v43 = vmul.f32 1.442695, %v1197_v42 }
 0x6d4   :  { %v1213_v40 = vpop.permute.xlu1 %1212 }
 0x6d5   :  { %12852 = vmatpush3.msra.mxu1 %v1213_v40  ;;  %13555 = vpow2.f32 %v1200_v43 }
 0x6d8   :  { %v1366_v41 = vpop.permute.xlu1 %1365 }
 0x6d9   :  { %12861 = vmatprep.subr.msk.mxu1 %vm869_vm4, %v1366_v41 }
 0x6dc   :  { %v1455_v60 = vpop.permute.xlu1 %1454 }
 0x6e0   :  { %v1453_v63 = vpop.permute.xlu1 %1452 }
 0x6e2   :  { %v13556_v50 = vpop.eup %13555 }
 0x6e3   :  { %v1205_v51 = vsel %vm352_vm3, %v13556_v50, 0.0 }
 0x701   :  { %v14152_v44 = vpop.f32.mrf.mxu1 }
 0x702   :  { %v1029_v25 = vadd.f32 %v14129_v31, %v14152_v44 }
 0x703   :  { %v14154_v45 = vpop.f32.mrf.mxu1 }
 0x705   :  { %v1106_v46 = vpop.f32.mrf.mxu1 }
 0x706   :  { %v1188_v47 = vmul.f32 0.5, %v1106_v46 }
 0x707   :  { %v12845_v48 = vpop.f32.mrf.mxu1 }
 0x708   :  { %v1190_v49 = vsel %vm352_vm3, %v1188_v47, -inf }
 0x709   :  { %1191 = vmax.xlane.f32.xlu0 %v1190_v49 }
 0x70d   :  { %1206 = vadd.xlane.f32.xlu0 %v1205_v51 }
 0x792   :  { %v1192_v52 = vpop.xlane.xlu0 %1191 }
 0x793   :  { %v1196_v53 = vsub.f32 %v1188_v47, %v1192_v52 }
 0x795   :  { %v1198_v54 = vmul.f32 1.442695, %v1196_v53 }
 0x796   :  { %v1207_v57 = vpop.xlane.xlu0 %1206 }
 0x797   :  { %13557 = vpow2.f32 %v1198_v54  ;;  %v14205_v54 = vsub.s32 1, %v14025_v6 }
 0x798   :  { %13559 = vrcp.f32 %v1207_v57 }
 0x7a4   :  { %v13558_v55 = vpop.eup %13557 }
 0x7a5   :  { %v1202_v56 = vsel %vm352_vm3, %v13558_v55, 0.0  ;;  %v13560_v59 = vpop.eup %13559 }
 0x7a6   :  { %1203 = vadd.xlane.f32.xlu0 %v1202_v56  ;;  %v1211_v62 = vmul.f32 %v13560_v59, %v13556_v50  ;;  %v1875_v56 = vrot.slane %v14034_v8, %v14205_v54 }
 0x7bc   :  { %1288 = vrot.lane.b32.xlu0 %v14042_v13, %s13941_s27 }
 0x7c0   :  { %1532 = vrot.lane.b32.xlu0 %v14042_v13, %s13942_s28 }
 0x7c4   :  { %1530 = vrot.lane.b32.xlu0 %v14042_v13, %s13943_s29 }
 0x82f   :  { %v1204_v58 = vpop.xlane.xlu0 %1203 }
 0x830   :  { %13561 = vrcp.f32 %v1204_v58 }
 0x833   :  { %v1289_v61 = vpop.permute.xlu0 %1288 }
 0x834   :  { %12857 = vmatpush3.msra.mxu0 %v1289_v61 }
 0x835   :  { %12859 = vmatmul.mubr.msk.f32.vlgmr.msra.gmra.mxu0 %vm352_vm3, %v1211_v62  ;;  %12866 = vmatprep.subr.mxu0 %v13931_v4 }
 0x836   :  { %12867 = vmatpush3.xpose.msk.msra.mxu0 %vm198_vm2, %v1455_v60  ;;  %12868 = vmatprep.mubr.msk.f32.mxu0 %vm13932_vm1, %v13931_v4 }
 0x837   :  { %12876 = vmatprep.subr.mxu0 %v13931_v4  ;;  %v1533_v18 = vpop.permute.xlu0 %1532 }
 0x839   :  { %12869 = vmatmul.mubr.msk.f32.vlgmr.msra.gmra.mxu0 %vm198_vm2, %v1453_v63 }
 0x83a   :  { %12878 = vmatprep.mubr.msk.f32.mxu0 %vm13932_vm1, %v13931_v4 }
 0x83b   :  { %v1531_v21 = vpop.permute.xlu0 %1530 }
 0x83d   :  { %v13562_v5 = vpop.eup %13561 }
 0x83e   :  { %v1209_v9 = vmul.f32 %v13562_v5, %v13558_v55  ;;  %v1024_v55 = vadd.f32 %v14133_v33, %v14154_v45 }
 0x840   :  { %12854 = vmatmul.mubr.msk.f32.vlgmr.msra.gmra.mxu1 %vm352_vm3, %v1209_v9 }
 0x841   :  { %12862 = vmatpush3.msk.msra.mxu1 %vm869_vm4, %v1366_v41 }
 0x842   :  { %12871 = vmatprep.subr.mxu1 %v13931_v4 }
 0x8f5   :  { %v1360_v10 = vpop.f32.mrf.mxu0 }
 0x8f7   :  { %v12860_v11 = vpop.f32.mrf.mxu0 }
 0x8f9   :  { %v1526_v14 = vpop.f32.mrf.mxu0 }
 0x8fa   :  { %v1608_v15 = vmul.f32 0.5, %v1526_v14 }
 0x8fb   :  { %v12870_v16 = vpop.f32.mrf.mxu0 }
 0x8fc   :  { %v1610_v17 = vsel %vm352_vm3, %v1608_v15, -inf }
 0x8fd   :  { %1611 = vmax.xlane.f32.xlu1 %v1610_v17 }
 0x900   :  { %v1284_v19 = vpop.f32.mrf.mxu1 }
 0x901   :  { %12863 = vmatprep.mubr.msk.f32.mxu1 %vm198_vm2, %v1284_v19 }
 0x902   :  { %v12855_v20 = vpop.f32.mrf.mxu1  ;;  %12864 = vmatmul.mubr.msk.f32.vlgmr.msra.gmra.mxu1 %vm198_vm2, %v1360_v10 }
 0x903   :  { %12872 = vmatpush3.xpose.msk.msra.mxu1 %vm198_vm2, %v1533_v18  ;;  %12873 = vmatprep.mubr.msk.f32.mxu1 %vm13932_vm1, %v13931_v4 }
 0x904   :  { %12881 = vmatprep.subr.mxu1 %v13931_v4 }
 0x906   :  { %12874 = vmatmul.mubr.msk.f32.vlgmr.msra.gmra.mxu1 %vm198_vm2, %v1531_v21 }
 0x907   :  { %12883 = vmatprep.mubr.msk.f32.mxu1 %vm13932_vm1, %v13931_v4 }
 0x986   :  { %v1612_v22 = vpop.xlane.xlu1 %1611 }
 0x987   :  { %v1616_v23 = vsub.f32 %v1608_v15, %v1612_v22 }
 0x989   :  { %v1618_v24 = vmul.f32 1.442695, %v1616_v23 }
 0x98b   :  { %13563 = vpow2.f32 %v1618_v24 }
 0x998   :  { %v13564_v35 = vpop.eup %13563 }
 0x999   :  { %v1622_v36 = vsel %vm352_vm3, %v13564_v35, 0.0 }
 0x9c2   :  { %v12865_v26 = vpop.f32.mrf.mxu1 }
 0x9c3   :  { %v1451_v27 = vadd.f32 %v12865_v26, %v1029_v25 }
 0x9c4   :  { %v1441_v28 = vpop.f32.mrf.mxu1 }
 0x9c5   :  { %v1450_v58 = vadd.f32 %v1441_v28, %v1024_v55 }
 0x9c6   :  { %v1604_v29 = vpop.f32.mrf.mxu1 }
 0x9c7   :  { %v1609_v30 = vmul.f32 0.5, %v1604_v29 }
 0x9c8   :  { %v12875_v32 = vpop.f32.mrf.mxu1 }
 0x9c9   :  { %v1613_v34 = vsel %vm352_vm3, %v1609_v30, -inf  ;;  %v14225_v32 = vsub.s32 5, %v14025_v6 }
 0x9ca   :  { %1614 = vmax.xlane.f32.xlu0 %v1613_v34 }
 0x9ce   :  { %1623 = vadd.xlane.f32.xlu0 %v1622_v36 }
 0x9e4   :  { %1632 = vrot.lane.b32.xlu0 %v14038_v12, %s13944_s30  ;;  %v1784_v12 = vrot.slane %v14007_v0, 4 }
 0xa53   :  { %v1615_v37 = vpop.xlane.xlu0 %1614 }
 0xa54   :  { %v1617_v38 = vsub.f32 %v1609_v30, %v1615_v37  ;;  %v14222_v30 = vsub.s32 4, %v14025_v6 }
 0xa56   :  { %v1620_v31 = vmul.f32 1.442695, %v1617_v38  ;;  %v1920_v38 = vrot.slane %v14034_v8, %v14225_v32 }
 0xa57   :  { %v1624_v39 = vpop.xlane.xlu0 %1623 }
 0xa58   :  { %13565 = vpow2.f32 %v1620_v31 }
 0xa59   :  { %13567 = vrcp.f32 %v1624_v39 }
 0xa5b   :  { %v1633_v40 = vpop.permute.xlu0 %1632 }
 0xa5c   :  { %12877 = vmatpush3.msra.mxu0 %v1633_v40 }
 0xa65   :  { %v13566_v41 = vpop.eup %13565 }
 0xa66   :  { %v13568_v42 = vpop.eup %13567  ;;  %v1625_v43 = vsel %vm352_vm3, %v13566_v41, 0.0 }
 0xa67   :  { %1626 = vadd.xlane.f32.xlu1 %v1625_v43  ;;  %v1629_v44 = vmul.f32 %v13568_v42, %v13564_v35  ;;  %v1914_v35 = vrot.slane %v14034_v8, %v14222_v30 }
 0xa69   :  { %12879 = vmatmul.mubr.msk.f32.vlgmr.msra.gmra.mxu0 %vm352_vm3, %v1629_v44 }
 0xa78   :  { %1708 = vrot.lane.b32.xlu1 %v14042_v13, %s13944_s30 }
 0xa7c   :  { %1785 = vrot.lane.b32.xlu1 %v1784_v12, %s13940_s26  ;;  %v14233_v12 = vld [vmem:[#allocation8 + $0x18] sm:$0xff] }
 0xaf0   :  { %v1627_v46 = vpop.xlane.xlu1 %1626 }
 0xaf1   :  { %13569 = vrcp.f32 %v1627_v46  ;;  %v14237_v46 = vld [vmem:[#allocation8 + $0x10] sm:$0xff] }
 0xaf4   :  { %v1709_v47 = vpop.permute.xlu1 %1708 }
 0xaf5   :  { %12882 = vmatpush3.msra.mxu1 %v1709_v47  ;;  %v14241_v47 = vld [vmem:[#allocation8 + $0x8] sm:$0xff] }
 0xaf8   :  { %v1786_v50 = vpop.permute.xlu1 %1785 }
 0xaf9   :  { %12886 = vmatprep.subr.msk.mxu0 %vm869_vm4, %v1786_v50 }
 0xafa   :  { %12887 = vmatpush3.msk.msra.mxu0 %vm869_vm4, %v1786_v50 }
 0xafb   :  { %12898 = vmatprep.subr.mxu0 %v14233_v12 }
 0xafe   :  { %v13570_v48 = vpop.eup %13569 }
 0xaff   :  { %v1631_v49 = vmul.f32 %v13570_v48, %v13566_v41  ;;  %v14244_v48 = vld [vmem:[#allocation8] sm:$0xff] }
 0xb01   :  { %12884 = vmatmul.mubr.msk.f32.vlgmr.msra.gmra.mxu1 %vm352_vm3, %v1631_v49  ;;  %v14251_v49 = vsub.s32 2, %v14025_v6 }
 0xb03   :  { %v1926_v50 = vrot.slane %v14034_v8, %v14251_v49 }
 0xb29   :  { %v1704_v51 = vpop.f32.mrf.mxu0 }
 0xb2a   :  { %12888 = vmatprep.mubr.msk.f32.mxu0 %vm198_vm2, %v1704_v51 }
 0xb2b   :  { %v12880_v13 = vpop.f32.mrf.mxu0 }
 0xbc1   :  { %v1780_v52 = vpop.f32.mrf.mxu1 }
 0xbc2   :  { %12889 = vmatmul.mubr.msk.f32.vlgmr.msra.gmra.mxu0 %vm198_vm2, %v1780_v52 }
 0xbc3   :  { %v12885_v53 = vpop.f32.mrf.mxu1  ;;  %12899 = vmatpush3.msra.mxu0 %v14233_v12 }
 0xbc4   :  { %12900 = vmatprep.subr.mxu0 %v14237_v46 }
 0xbc5   :  { %12901 = vmatpush3.msra.mxu0 %v14237_v46 }
 0xbc6   :  { %12902 = vmatprep.subr.mxu0 %v14241_v47 }
 0xbc7   :  { %12903 = vmatpush3.msra.mxu0 %v14241_v47 }
 0xbc8   :  { %12904 = vmatprep.subr.mxu0 %v14244_v48 }
 0xbc9   :  { %12905 = vmatpush3.msra.mxu0 %v14244_v48 }
 0xbca   :  { %12921 = vmatprep.subr.mxu0 %v13931_v4 }
 0xc82   :  { %v12890_v57 = vpop.f32.mrf.mxu0 }
 0xc83   :  { %v1871_v59 = vadd.f32 %v12890_v57, %v1451_v27  ;;  %v14260_v57 = vsub.s32 3, %v14025_v6 }
 0xc84   :  { %v1861_v60 = vpop.f32.mrf.mxu0 }
 0xc85   :  { %v1877_v61 = vadd.f32 %v1875_v56, %v1871_v59  ;;  %v1870_v62 = vadd.f32 %v1861_v60, %v1450_v58  ;;  %v2019_v58 = vrot.slane %v14034_v8, %v14260_v57 }
 0xc87   :  { %v1879_v63 = vadd.f32 %v1877_v61, %v14017_v3  ;;  %v1876_v5 = vadd.f32 %v1875_v56, %v1870_v62 }
 0xc89   :  { %v1883_v9 = vsel %vm113_vm0, %v1879_v63, 0.0  ;;  %v1878_v10 = vadd.f32 %v1876_v5, %v14011_v2  ;;  %v1890_v14 = vmul.f32 %v1879_v63, %v1879_v63 }
 0xc8a   :  { %1884 = vadd.xlane.f32.xlu1 %v1883_v9 }
 0xc8b   :  { %v1880_v11 = vsel %vm113_vm0, %v1878_v10, 0.0  ;;  %v1889_v33 = vmul.f32 %v1878_v10, %v1878_v10  ;;  %v1894_v15 = vsel %vm113_vm0, %v1890_v14, 0.0 }
 0xc8c   :  { %1881 = vadd.xlane.f32.xlu0 %v1880_v11 }
 0xc8d   :  { %v1891_v45 = vsel %vm113_vm0, %v1889_v33, 0.0 }
 0xc90   :  { %1892 = vadd.xlane.f32.xlu0 %v1891_v45  ;;  %v14271_v45 = vld [vmem:[#allocation7 + $0x28] sm:$0xff] }
 0xc94   :  { %1895 = vadd.xlane.f32.xlu0 %v1894_v15 }
 0xc9b   :  { %1929 = vrot.lane.b32.xlu1 %v14007_v0, %s13945_s6 }
 0xcaa   :  { %1927 = vrot.lane.b32.xlu0 %v14009_v1, %s13945_s6 }
 0xd13   :  { %v1885_v2 = vpop.xlane.xlu1 %1884 }
 0xd14   :  { %v1888_v19 = vmul.f32 0.0625, %v1885_v2  ;;  %v14276_v2 = vld [vmem:[#allocation7 + $0x8] sm:$0xff] }
 0xd15   :  { %v1882_v3 = vpop.xlane.xlu0 %1881 }
 0xd16   :  { %v1887_v16 = vmul.f32 0.0625, %v1882_v3  ;;  %v1900_v24 = vmul.f32 %v1888_v19, %v1888_v19  ;;  %v1904_v31 = vsub.f32 %v1879_v63, %v1888_v19 }
 0xd17   :  { %v1930_v17 = vpop.permute.xlu1 %1929 }
 0xd18   :  { %12891 = vmatprep.subr.mxu1 %v1930_v17  ;;  %v1899_v20 = vmul.f32 %v1887_v16, %v1887_v16  ;;  %v1903_v34 = vsub.f32 %v1878_v10, %v1887_v16 }
 0xd19   :  { %v1893_v18 = vpop.xlane.xlu0 %1892  ;;  %12892 = vmatpush3.msra.mxu1 %v1930_v17 }
 0xd1a   :  { %v1897_v21 = vmul.f32 0.0625, %v1893_v18 }
 0xd1c   :  { %v1901_v22 = vsub.f32 %v1897_v21, %v1899_v20 }
 0xd1d   :  { %v1896_v23 = vpop.xlane.xlu0 %1895 }
 0xd1e   :  { %v1905_v25 = vadd.f32 1e-05, %v1901_v22  ;;  %v1898_v26 = vmul.f32 0.0625, %v1896_v23 }
 0xd20   :  { %13571 = vrsqrt.f32 %v1905_v25  ;;  %v1902_v27 = vsub.f32 %v1898_v26, %v1900_v24 }
 0xd21   :  { %v1928_v28 = vpop.permute.xlu0 %1927 }
 0xd22   :  { %v1906_v29 = vadd.f32 1e-05, %v1902_v27  ;;  %12893 = vmatprep.subr.mxu1 %v1928_v28 }
 0xd23   :  { %12894 = vmatpush3.msra.mxu1 %v1928_v28 }
 0xd24   :  { %13573 = vrsqrt.f32 %v1906_v29 }
 0xd2d   :  { %v13572_v36 = vpop.eup %13571 }
 0xd2e   :  { %v1909_v37 = vmul.f32 %v13572_v36, %v1903_v34 }
 0xd30   :  { %v1915_v39 = vmul.f32 %v1914_v35, %v1909_v37  ;;  %v14284_v37 = vsub.s32 6, %v14025_v6 }
 0xd31   :  { %v13574_v40 = vpop.eup %13573 }
 0xd32   :  { %v1910_v41 = vmul.f32 %v13574_v40, %v1904_v31  ;;  %v1921_v42 = vadd.f32 %v1920_v38, %v1915_v39  ;;  %v2137_v40 = vrot.slane %v14034_v8, %v14284_v37 }
 0xd34   :  { %v1916_v43 = vmul.f32 %v1914_v35, %v1910_v41  ;;  %12895 = vmatprep.mubr.msk.f32.mxu1 %vm113_vm0, %v1921_v42  ;;  %v14289_v41 = vsub.s32 7, %v14025_v6  ;;  %v14303_v6 = vld [vmem:[#allocation10 + $0x8] sm:$0xff] }
 0xd36   :  { %v1922_v44 = vadd.f32 %v1920_v38, %v1916_v43 }
 0xd38   :  { %12896 = vmatmul.mubr.msk.f32.vlgmr.msra.gmra.mxu1 %vm113_vm0, %v1922_v44 }
 0xdf8   :  { %v12897_v51 = vpop.f32.mrf.mxu1 }
 0xdf9   :  { %v2011_v13 = vadd.f32 %v12897_v51, %v1926_v50  ;;  %v2143_v51 = vrot.slane %v14034_v8, %v14289_v41 }
 0xdfa   :  { %v2005_v52 = vpop.f32.mrf.mxu1 }
 0xdfb   :  { %v2006_v53 = vadd.f32 %v2005_v52, %v1926_v50  ;;  %v2015_v56 = vmax.f32 %v2011_v13, 0.0 }
 0xdfd   :  { %v2014_v55 = vmax.f32 %v2006_v53, 0.0 }
 0xdff   :  { %12906 = vmatprep.mubr.msk.f32.mxu0 %vm2020_vm5, %v2014_v55  ;;  %v2149_v55 = vrot.slane %v14303_v6, %v14032_v7 }
 0xe00   :  { %12907 = vmatmul.mubr.msk.f32.vlgmr.msra.gmra.mxu0 %vm2020_vm5, %v2015_v56 }
 0xe01   :  { %12923 = vmatprep.mubr.msk.f32.mxu0 %vm13932_vm1, %v13931_v4 }
 0xec0   :  { %v12908_v59 = vpop.f32.mrf.mxu0 }
 0xec1   :  { %v2099_v60 = vadd.f32 %v12908_v59, %v2019_v58 }
 0xec2   :  { %v2093_v61 = vpop.f32.mrf.mxu0 }
 0xec3   :  { %v2103_v62 = vadd.f32 %v2099_v60, %v1922_v44  ;;  %v2094_v63 = vadd.f32 %v2093_v61, %v2019_v58 }
 0xec5   :  { %v2102_v5 = vadd.f32 %v2094_v63, %v1921_v42  ;;  %v2107_v9 = vsel %vm113_vm0, %v2103_v62, 0.0  ;;  %v2113_v10 = vmul.f32 %v2103_v62, %v2103_v62 }
 0xec6   :  { %2108 = vadd.xlane.f32.xlu0 %v2107_v9 }
 0xec7   :  { %v2104_v11 = vsel %vm113_vm0, %v2102_v5, 0.0  ;;  %v2117_v33 = vsel %vm113_vm0, %v2113_v10, 0.0  ;;  %v2112_v14 = vmul.f32 %v2102_v5, %v2102_v5 }
 0xec8   :  { %2105 = vadd.xlane.f32.xlu1 %v2104_v11 }
 0xec9   :  { %v2114_v15 = vsel %vm113_vm0, %v2112_v14, 0.0 }
 0xeca   :  { %2118 = vadd.xlane.f32.xlu0 %v2117_v33 }
 0xed9   :  { %2156 = vrot.lane.b32.xlu1 %v14007_v0, %s13929_s12 }
 0xedd   :  { %2152 = vrot.lane.b32.xlu1 %v14009_v1, %s13929_s12 }
 0xee0   :  { %2158 = vrot.lane.b32.xlu0 %v14271_v45, %s13929_s12 }
 0xf01   :  { %2115 = vadd.xlane.f32.xlu1 %v2114_v15 }
 0xf12   :  { %2154 = vrot.lane.b32.xlu1 %v14276_v2, %s13929_s12 }
 0xf4f   :  { %v2109_v3 = vpop.xlane.xlu0 %2108 }
 0xf50   :  { %v2111_v19 = vmul.f32 0.0625, %v2109_v3 }
 0xf51   :  { %v2106_v16 = vpop.xlane.xlu1 %2105 }
 0xf52   :  { %v2123_v21 = vmul.f32 %v2111_v19, %v2111_v19  ;;  %v2110_v24 = vmul.f32 0.0625, %v2106_v16  ;;  %v2127_v31 = vsub.f32 %v2103_v62, %v2111_v19 }
 0xf53   :  { %v2119_v0 = vpop.xlane.xlu0 %2118 }
 0xf54   :  { %v2121_v20 = vmul.f32 0.0625, %v2119_v0  ;;  %v2122_v27 = vmul.f32 %v2110_v24, %v2110_v24  ;;  %v2126_v42 = vsub.f32 %v2102_v5, %v2110_v24 }
 0xf55   :  { %v2157_v17 = vpop.permute.xlu1 %2156 }
 0xf56   :  { %v2125_v22 = vsub.f32 %v2121_v20, %v2123_v21 }
 0xf57   :  { %v2159_v18 = vpop.permute.xlu0 %2158 }
 0xf58   :  { %v2161_v1 = vsel %vm2020_vm5, %v2157_v17, %v2159_v18  ;;  %v2129_v25 = vadd.f32 1e-05, %v2125_v22 }
 0xf59   :  { %12909 = vmatprep.subr.mxu1 %v2161_v1  ;;  %v2153_v23 = vpop.permute.xlu1 %2152 }
 0xf5a   :  { %12910 = vmatpush3.msra.mxu1 %v2161_v1  ;;  %13575 = vrsqrt.f32 %v2129_v25 }
 0xf67   :  { %v13576_v38 = vpop.eup %13575 }
 0xf68   :  { %v2133_v39 = vmul.f32 %v13576_v38, %v2127_v31 }
 0xf6a   :  { %v2139_v50 = vmul.f32 %v2137_v40, %v2133_v39 }
 0xf6c   :  { %v14295_v53 = vadd.f32 %v2143_v51, %v2139_v50 }
 0xf8a   :  { %v2116_v26 = vpop.xlane.xlu1 %2115 }
 0xf8b   :  { %v2120_v28 = vmul.f32 0.0625, %v2116_v26 }
 0xf8d   :  { %v2124_v29 = vsub.f32 %v2120_v28, %v2122_v27 }
 0xf8e   :  { %v2155_v34 = vpop.permute.xlu1 %2154 }
 0xf8f   :  { %v2128_v35 = vadd.f32 1e-05, %v2124_v29  ;;  %v2160_v36 = vsel %vm2020_vm5, %v2153_v23, %v2155_v34 }
 0xf90   :  { %12911 = vmatprep.subr.mxu1 %v2160_v36 }
 0xf91   :  { %13577 = vrsqrt.f32 %v2128_v35  ;;  %12912 = vmatpush3.msra.mxu1 %v2160_v36 }
 0xf92   :  { %12916 = vmatprep.subr.mxu1 %v13931_v4 }
 0xf9e   :  { %v13578_v43 = vpop.eup %13577 }
 0xf9f   :  { %v2132_v44 = vmul.f32 %v13578_v43, %v2126_v42 }
 0xfa1   :  { %v2138_v13 = vmul.f32 %v2137_v40, %v2132_v44 }
 0xfa3   :  { %v14293_v52 = vadd.f32 %v2143_v51, %v2138_v13 }
 0xfa5   :  { %12913 = vmatprep.mubr.msk.f32.mxu1 %vm113_vm0, %v14293_v52 }
 0xfa6   :  { %12914 = vmatmul.mubr.msk.f32.vlgmr.msra.gmra.mxu1 %vm113_vm0, %v14295_v53 }
 0xfa7   :  { %12918 = vmatprep.mubr.msk.f32.mxu1 %vm13932_vm1, %v13931_v4 }
0x1066   :  { %v12915_v8 = vpop.f32.mrf.mxu1 }
0x1067   :  { %v14307_v56 = vadd.f32 %v12915_v8, %v2149_v55 }
0x1068   :  { %v2236_v58 = vpop.f32.mrf.mxu1 }
0x1069   :  { %v14309_v59 = vadd.f32 %v2236_v58, %v2149_v55  ;;  %2323 = vrot.lane.b32.xlu1 %v14307_v56, %s13933_s2 }
0x106b   :  { %2246 = vrot.lane.b32.xlu0 %v14309_v59, %s13933_s2 }
0x10db   :  { %v2324_v60 = vpop.permute.xlu1 %2323 }
0x10dc   :  { %12922 = vmatpush3.xpose.msk.msra.mxu0 %vm198_vm2, %v2324_v60  ;;  %v2907_v60 = vrot.slane %v14276_v2, 4 }
0x10dd   :  { %v2247_v61 = vpop.permute.xlu0 %2246  ;;  %12931 = vmatprep.subr.mxu0 %v13931_v4 }
0x10de   :  { %12917 = vmatpush3.xpose.msk.msra.mxu1 %vm198_vm2, %v2247_v61 }
0x10df   :  { %12924 = vmatmul.mubr.msk.f32.vlgmr.msra.gmra.mxu0 %vm198_vm2, %v14307_v56  ;;  %12926 = vmatprep.subr.mxu1 %v13931_v4 }
0x10e0   :  { %12933 = vmatprep.mubr.msk.f32.mxu0 %vm13932_vm1, %v13931_v4 }
0x10e1   :  { %12919 = vmatmul.mubr.msk.f32.vlgmr.msra.gmra.mxu1 %vm198_vm2, %v14309_v59 }
0x10e2   :  { %12928 = vmatprep.mubr.msk.f32.mxu1 %vm13932_vm1, %v13931_v4 }
0x119f   :  { %v2395_v62 = vpop.f32.mrf.mxu0 }
0x11a0   :  { %v2400_v63 = vmul.f32 0.5, %v2395_v62 }
0x11a1   :  { %v2318_v5 = vpop.f32.mrf.mxu1  ;;  %v12925_v9 = vpop.f32.mrf.mxu0 }
0x11a2   :  { %v2399_v10 = vmul.f32 0.5, %v2318_v5  ;;  %v2404_v11 = vsel %vm352_vm3, %v2400_v63, -inf }
0x11a3   :  { %2405 = vmax.xlane.f32.xlu1 %v2404_v11  ;;  %v12920_v33 = vpop.f32.mrf.mxu1 }
0x11a4   :  { %v2401_v14 = vsel %vm352_vm3, %v2399_v10, -inf }
0x11a5   :  { %2402 = vmax.xlane.f32.xlu0 %v2401_v14 }
0x11b4   :  { %2423 = vrot.lane.b32.xlu1 %v14309_v59, %s13934_s4 }
0x11b8   :  { %2577 = vrot.lane.b32.xlu1 %v14309_v59, %s13936_s20 }
0x11bc   :  { %2655 = vrot.lane.b32.xlu1 %v14307_v56, %s13936_s20 }
0x11c0   :  { %2653 = vrot.lane.b32.xlu1 %v14307_v56, %s13935_s19 }
0x122c   :  { %v2406_v15 = vpop.xlane.xlu1 %2405 }
0x122d   :  { %v2408_v3 = vsub.f32 %v2400_v63, %v2406_v15 }
0x122e   :  { %v2403_v16 = vpop.xlane.xlu0 %2402 }
0x122f   :  { %v2411_v0 = vmul.f32 1.442695, %v2408_v3  ;;  %v2407_v17 = vsub.f32 %v2399_v10, %v2403_v16 }
0x1230   :  { %v2424_v18 = vpop.permute.xlu1 %2423 }
0x1231   :  { %13579 = vpow2.f32 %v2411_v0  ;;  %v2409_v1 = vmul.f32 1.442695, %v2407_v17  ;;  %12927 = vmatpush3.msra.mxu1 %v2424_v18 }
0x1232   :  { %12936 = vmatprep.subr.mxu1 %v13931_v4 }
0x1233   :  { %13581 = vpow2.f32 %v2409_v1 }
0x1234   :  { %v2578_v25 = vpop.permute.xlu1 %2577 }
0x1238   :  { %v2656_v28 = vpop.permute.xlu1 %2655 }
0x123c   :  { %v2654_v36 = vpop.permute.xlu1 %2653 }
0x123e   :  { %v13580_v19 = vpop.eup %13579 }
0x123f   :  { %v2416_v20 = vsel %vm352_vm3, %v13580_v19, 0.0 }
0x1240   :  { %v13582_v21 = vpop.eup %13581  ;;  %2417 = vadd.xlane.f32.xlu0 %v2416_v20 }
0x1241   :  { %v2413_v22 = vsel %vm352_vm3, %v13582_v21, 0.0 }
0x1244   :  { %2414 = vadd.xlane.f32.xlu0 %v2413_v22 }
0x125a   :  { %2499 = vrot.lane.b32.xlu0 %v14307_v56, %s13934_s4 }
0x125e   :  { %2575 = vrot.lane.b32.xlu0 %v14309_v59, %s13935_s19 }
0x12c9   :  { %v2418_v23 = vpop.xlane.xlu0 %2417 }
0x12ca   :  { %13583 = vrcp.f32 %v2418_v23 }
0x12cd   :  { %v2415_v24 = vpop.xlane.xlu0 %2414 }
0x12ce   :  { %13585 = vrcp.f32 %v2415_v24 }
0x12d1   :  { %v2500_v26 = vpop.permute.xlu0 %2499 }
0x12d2   :  { %12932 = vmatpush3.msra.mxu0 %v2500_v26 }
0x12d3   :  { %12941 = vmatprep.subr.mxu0 %v13931_v4 }
0x12d5   :  { %v2576_v38 = vpop.permute.xlu0 %2575 }
0x12d7   :  { %v13584_v27 = vpop.eup %13583 }
0x12d8   :  { %v2422_v29 = vmul.f32 %v13584_v27, %v13580_v19 }
0x12da   :  { %12934 = vmatmul.mubr.msk.f32.vlgmr.msra.gmra.mxu0 %vm352_vm3, %v2422_v29 }
0x12db   :  { %v13586_v34 = vpop.eup %13585  ;;  %12942 = vmatpush3.xpose.msk.msra.mxu0 %vm198_vm2, %v2656_v28  ;;  %12943 = vmatprep.mubr.msk.f32.mxu0 %vm13932_vm1, %v13931_v4 }
0x12dc   :  { %v2420_v35 = vmul.f32 %v13586_v34, %v13582_v21  ;;  %12951 = vmatprep.subr.mxu0 %v13931_v4 }
0x12de   :  { %12929 = vmatmul.mubr.msk.f32.vlgmr.msra.gmra.mxu1 %vm352_vm3, %v2420_v35  ;;  %12944 = vmatmul.mubr.msk.f32.vlgmr.msra.gmra.mxu0 %vm198_vm2, %v2654_v36 }
0x12df   :  { %12937 = vmatpush3.xpose.msk.msra.mxu1 %vm198_vm2, %v2578_v25  ;;  %12938 = vmatprep.mubr.msk.f32.mxu1 %vm13932_vm1, %v13931_v4 }
0x12e0   :  { %12946 = vmatprep.subr.mxu1 %v13931_v4  ;;  %12953 = vmatprep.mubr.msk.f32.mxu0 %vm13932_vm1, %v13931_v4 }
0x12e2   :  { %12939 = vmatmul.mubr.msk.f32.vlgmr.msra.gmra.mxu1 %vm198_vm2, %v2576_v38 }
0x12e3   :  { %12948 = vmatprep.mubr.msk.f32.mxu1 %vm13932_vm1, %v13931_v4 }
0x139a   :  { %v2571_v31 = vpop.f32.mrf.mxu0 }
0x139c   :  { %v12935_v39 = vpop.f32.mrf.mxu0 }
0x139e   :  { %v2495_v40 = vpop.f32.mrf.mxu1  ;;  %v2727_v42 = vpop.f32.mrf.mxu0 }
0x139f   :  { %v2732_v43 = vmul.f32 0.5, %v2727_v42 }
0x13a0   :  { %v12930_v44 = vpop.f32.mrf.mxu1  ;;  %v12945_v50 = vpop.f32.mrf.mxu0 }
0x13a1   :  { %v2736_v51 = vsel %vm352_vm3, %v2732_v43, -inf }
0x13a2   :  { %2737 = vmax.xlane.f32.xlu1 %v2736_v51  ;;  %v2649_v13 = vpop.f32.mrf.mxu1 }
0x13a3   :  { %v2731_v55 = vmul.f32 0.5, %v2649_v13 }
0x13a4   :  { %v12940_v8 = vpop.f32.mrf.mxu1 }
0x13a5   :  { %v2733_v58 = vsel %vm352_vm3, %v2731_v55, -inf }
0x13a6   :  { %2734 = vmax.xlane.f32.xlu0 %v2733_v58 }
0x13b3   :  { %2755 = vrot.lane.b32.xlu1 %v14309_v59, %s13937_s21 }
0x13b7   :  { %2908 = vrot.lane.b32.xlu1 %v2907_v60, %s13933_s2 }
0x13bb   :  { %2993 = vrot.lane.b32.xlu1 %v14276_v2, %s13933_s2 }
0x13bf   :  { %3158 = vrot.lane.b32.xlu1 %v14307_v56, %s13938_s22 }
0x13c3   :  { %3156 = vrot.lane.b32.xlu1 %v14307_v56, %s13939_s25 }
0x142b   :  { %v2738_v61 = vpop.xlane.xlu1 %2737 }
0x142c   :  { %v2740_v62 = vsub.f32 %v2732_v43, %v2738_v61 }
0x142e   :  { %v2743_v63 = vmul.f32 1.442695, %v2740_v62 }
0x142f   :  { %v2756_v5 = vpop.permute.xlu1 %2755  ;;  %v2735_v9 = vpop.xlane.xlu0 %2734 }
0x1430   :  { %13587 = vpow2.f32 %v2743_v63  ;;  %v2739_v10 = vsub.f32 %v2731_v55, %v2735_v9  ;;  %12947 = vmatpush3.msra.mxu1 %v2756_v5 }
0x1432   :  { %v2741_v11 = vmul.f32 1.442695, %v2739_v10 }
0x1433   :  { %v2909_v33 = vpop.permute.xlu1 %2908 }
0x1434   :  { %13589 = vpow2.f32 %v2741_v11  ;;  %12956 = vmatprep.subr.msk.mxu1 %vm869_vm4, %v2909_v33 }
0x1437   :  { %v2994_v1 = vpop.permute.xlu1 %2993 }
0x143b   :  { %v3159_v22 = vpop.permute.xlu1 %3158 }
0x143d   :  { %v13588_v14 = vpop.eup %13587 }
0x143e   :  { %v2748_v15 = vsel %vm352_vm3, %v13588_v14, 0.0 }
0x143f   :  { %2749 = vadd.xlane.f32.xlu0 %v2748_v15  ;;  %v3157_v24 = vpop.permute.xlu1 %3156 }
0x1441   :  { %v13590_v3 = vpop.eup %13589 }
0x1442   :  { %v2745_v16 = vsel %vm352_vm3, %v13590_v3, 0.0 }
0x1443   :  { %2746 = vadd.xlane.f32.xlu0 %v2745_v16 }
0x1459   :  { %2831 = vrot.lane.b32.xlu0 %v14307_v56, %s13937_s21 }
0x145d   :  { %3080 = vrot.lane.b32.xlu0 %v14309_v59, %s13938_s22 }
0x1461   :  { %3078 = vrot.lane.b32.xlu0 %v14309_v59, %s13939_s25 }
0x14c8   :  { %v2750_v0 = vpop.xlane.xlu0 %2749 }
0x14c9   :  { %13591 = vrcp.f32 %v2750_v0 }
0x14cc   :  { %v2747_v17 = vpop.xlane.xlu0 %2746 }
0x14cd   :  { %13593 = vrcp.f32 %v2747_v17 }
0x14d0   :  { %v2832_v18 = vpop.permute.xlu0 %2831 }
0x14d1   :  { %12952 = vmatpush3.msra.mxu0 %v2832_v18 }
0x14d2   :  { %12961 = vmatprep.subr.msk.mxu0 %vm869_vm4, %v2994_v1 }
0x14d4   :  { %v3081_v27 = vpop.permute.xlu0 %3080 }
0x14d6   :  { %v13592_v19 = vpop.eup %13591 }
0x14d7   :  { %v2754_v20 = vmul.f32 %v13592_v19, %v13588_v14 }
0x14d8   :  { %v3079_v38 = vpop.permute.xlu0 %3078 }
0x14d9   :  { %12954 = vmatmul.mubr.msk.f32.vlgmr.msra.gmra.mxu0 %vm352_vm3, %v2754_v20 }
0x14da   :  { %v13594_v21 = vpop.eup %13593  ;;  %12963 = vmatprep.mubr.msk.f32.mxu0 %vm198_vm2, %v2495_v40  ;;  %12962 = vmatpush3.msk.msra.mxu0 %vm869_vm4, %v2994_v1 }
0x14db   :  { %12971 = vmatprep.subr.mxu0 %v13931_v4  ;;  %v2752_v23 = vmul.f32 %v13594_v21, %v13590_v3 }
0x14dd   :  { %12949 = vmatmul.mubr.msk.f32.vlgmr.msra.gmra.mxu1 %vm352_vm3, %v2752_v23  ;;  %12964 = vmatmul.mubr.msk.f32.vlgmr.msra.gmra.mxu0 %vm198_vm2, %v2571_v31 }
0x14de   :  { %12972 = vmatpush3.xpose.msk.msra.mxu0 %vm198_vm2, %v3159_v22  ;;  %12973 = vmatprep.mubr.msk.f32.mxu0 %vm13932_vm1, %v13931_v4 }
0x14df   :  { %12957 = vmatpush3.msk.msra.mxu1 %vm869_vm4, %v2909_v33  ;;  %12981 = vmatprep.subr.mxu0 %v13931_v4 }
0x14e0   :  { %12966 = vmatprep.subr.mxu1 %v13931_v4 }
0x14e1   :  { %12974 = vmatmul.mubr.msk.f32.vlgmr.msra.gmra.mxu0 %vm198_vm2, %v3157_v24 }
0x14e2   :  { %12983 = vmatprep.mubr.msk.f32.mxu0 %vm13932_vm1, %v13931_v4 }
0x1599   :  { %v2903_v25 = vpop.f32.mrf.mxu0 }
0x159b   :  { %v12955_v26 = vpop.f32.mrf.mxu0 }
0x159d   :  { %v2827_v28 = vpop.f32.mrf.mxu1  ;;  %v14400_v29 = vpop.f32.mrf.mxu0 }
0x159e   :  { %12958 = vmatprep.mubr.msk.f32.mxu1 %vm198_vm2, %v2827_v28 }
0x159f   :  { %v12950_v34 = vpop.f32.mrf.mxu1  ;;  %12959 = vmatmul.mubr.msk.f32.vlgmr.msra.gmra.mxu1 %vm198_vm2, %v2903_v25  ;;  %v14404_v35 = vpop.f32.mrf.mxu0 }
0x15a0   :  { %12967 = vmatpush3.xpose.msk.msra.mxu1 %vm198_vm2, %v3081_v27  ;;  %12968 = vmatprep.mubr.msk.f32.mxu1 %vm13932_vm1, %v13931_v4 }
0x15a1   :  { %v3230_v36 = vpop.f32.mrf.mxu0  ;;  %12976 = vmatprep.subr.mxu1 %v13931_v4 }
0x15a2   :  { %v3235_v31 = vmul.f32 0.5, %v3230_v36 }
0x15a3   :  { %12969 = vmatmul.mubr.msk.f32.vlgmr.msra.gmra.mxu1 %vm198_vm2, %v3079_v38  ;;  %v12975_v39 = vpop.f32.mrf.mxu0 }
0x15a4   :  { %v3239_v40 = vsel %vm352_vm3, %v3235_v31, -inf  ;;  %12978 = vmatprep.mubr.msk.f32.mxu1 %vm13932_vm1, %v13931_v4 }
0x15a5   :  { %3240 = vmax.xlane.f32.xlu1 %v3239_v40 }
0x15b6   :  { %3258 = vrot.lane.b32.xlu1 %v14309_v59, %s13941_s27 }
0x15ba   :  { %3410 = vrot.lane.b32.xlu1 %v14271_v45, %s13933_s2 }
0x15be   :  { %3499 = vrot.lane.b32.xlu1 %v14309_v59, %s13942_s28 }
0x15c2   :  { %3497 = vrot.lane.b32.xlu1 %v14309_v59, %s13943_s29 }
0x162e   :  { %v3241_v42 = vpop.xlane.xlu1 %3240 }
0x162f   :  { %v3243_v50 = vsub.f32 %v3235_v31, %v3241_v42 }
0x1631   :  { %v3246_v51 = vmul.f32 1.442695, %v3243_v50 }
0x1632   :  { %v3259_v43 = vpop.permute.xlu1 %3258 }
0x1633   :  { %12977 = vmatpush3.msra.mxu1 %v3259_v43  ;;  %13595 = vpow2.f32 %v3246_v51 }
0x1636   :  { %v3411_v44 = vpop.permute.xlu1 %3410 }
0x1637   :  { %12986 = vmatprep.subr.msk.mxu1 %vm869_vm4, %v3411_v44 }
0x163a   :  { %v3500_v0 = vpop.permute.xlu1 %3499 }
0x163e   :  { %v3498_v1 = vpop.permute.xlu1 %3497 }
0x1640   :  { %v13596_v63 = vpop.eup %13595 }
0x1641   :  { %v3251_v5 = vsel %vm352_vm3, %v13596_v63, 0.0 }
0x165f   :  { %v14423_v13 = vpop.f32.mrf.mxu1 }
0x1660   :  { %v3075_v40 = vadd.f32 %v14400_v29, %v14423_v13 }
0x1661   :  { %v14425_v55 = vpop.f32.mrf.mxu1 }
0x1662   :  { %v3070_v43 = vadd.f32 %v14404_v35, %v14425_v55 }
0x1663   :  { %v3152_v8 = vpop.f32.mrf.mxu1 }
0x1664   :  { %v3234_v58 = vmul.f32 0.5, %v3152_v8 }
0x1665   :  { %v12970_v61 = vpop.f32.mrf.mxu1 }
0x1666   :  { %v3236_v62 = vsel %vm352_vm3, %v3234_v58, -inf }
0x1667   :  { %3237 = vmax.xlane.f32.xlu0 %v3236_v62 }
0x166b   :  { %3252 = vadd.xlane.f32.xlu0 %v3251_v5 }
0x16f0   :  { %v3238_v9 = vpop.xlane.xlu0 %3237 }
0x16f1   :  { %v3242_v10 = vsub.f32 %v3234_v58, %v3238_v9 }
0x16f3   :  { %v3244_v11 = vmul.f32 1.442695, %v3242_v10 }
0x16f4   :  { %v3253_v15 = vpop.xlane.xlu0 %3252 }
0x16f5   :  { %13597 = vpow2.f32 %v3244_v11 }
0x16f6   :  { %13599 = vrcp.f32 %v3253_v15 }
0x1702   :  { %v13598_v33 = vpop.eup %13597 }
0x1703   :  { %v3248_v14 = vsel %vm352_vm3, %v13598_v33, 0.0  ;;  %v13600_v16 = vpop.eup %13599 }
0x1704   :  { %3249 = vadd.xlane.f32.xlu0 %v3248_v14  ;;  %v3257_v18 = vmul.f32 %v13600_v16, %v13596_v63 }
0x171a   :  { %3334 = vrot.lane.b32.xlu0 %v14307_v56, %s13941_s27 }
0x171e   :  { %3577 = vrot.lane.b32.xlu0 %v14307_v56, %s13942_s28 }
0x1722   :  { %3575 = vrot.lane.b32.xlu0 %v14307_v56, %s13943_s29 }
0x178d   :  { %v3250_v3 = vpop.xlane.xlu0 %3249 }
0x178e   :  { %13601 = vrcp.f32 %v3250_v3 }
0x1791   :  { %v3335_v17 = vpop.permute.xlu0 %3334 }
0x1792   :  { %12982 = vmatpush3.msra.mxu0 %v3335_v17 }
0x1793   :  { %12984 = vmatmul.mubr.msk.f32.vlgmr.msra.gmra.mxu0 %vm352_vm3, %v3257_v18  ;;  %12991 = vmatprep.subr.mxu0 %v13931_v4 }
0x1794   :  { %12992 = vmatpush3.xpose.msk.msra.mxu0 %vm198_vm2, %v3500_v0  ;;  %12993 = vmatprep.mubr.msk.f32.mxu0 %vm13932_vm1, %v13931_v4 }
0x1795   :  { %13001 = vmatprep.subr.mxu0 %v13931_v4  ;;  %v3578_v27 = vpop.permute.xlu0 %3577 }
0x1797   :  { %12994 = vmatmul.mubr.msk.f32.vlgmr.msra.gmra.mxu0 %vm198_vm2, %v3498_v1 }
0x1798   :  { %13003 = vmatprep.mubr.msk.f32.mxu0 %vm13932_vm1, %v13931_v4 }
0x1799   :  { %v3576_v36 = vpop.permute.xlu0 %3575 }
0x179b   :  { %v13602_v19 = vpop.eup %13601 }
0x179c   :  { %v3255_v20 = vmul.f32 %v13602_v19, %v13598_v33 }
0x179e   :  { %12979 = vmatmul.mubr.msk.f32.vlgmr.msra.gmra.mxu1 %vm352_vm3, %v3255_v20  ;;  %v3920_v20 = vrot.slane %v14303_v6, %v14205_v54 }
0x179f   :  { %12987 = vmatpush3.msk.msra.mxu1 %vm869_vm4, %v3411_v44 }
0x17a0   :  { %12996 = vmatprep.subr.mxu1 %v13931_v4 }
0x1853   :  { %v3406_v21 = vpop.f32.mrf.mxu0 }
0x1855   :  { %v12985_v22 = vpop.f32.mrf.mxu0 }
0x1857   :  { %v3571_v23 = vpop.f32.mrf.mxu0 }
0x1858   :  { %v3653_v24 = vmul.f32 0.5, %v3571_v23 }
0x1859   :  { %v12995_v25 = vpop.f32.mrf.mxu0 }
0x185a   :  { %v3655_v26 = vsel %vm352_vm3, %v3653_v24, -inf }
0x185b   :  { %3656 = vmax.xlane.f32.xlu1 %v3655_v26 }
0x185e   :  { %v3330_v28 = vpop.f32.mrf.mxu1 }
0x185f   :  { %12988 = vmatprep.mubr.msk.f32.mxu1 %vm198_vm2, %v3330_v28 }
0x1860   :  { %v12980_v34 = vpop.f32.mrf.mxu1  ;;  %12989 = vmatmul.mubr.msk.f32.vlgmr.msra.gmra.mxu1 %vm198_vm2, %v3406_v21 }
0x1861   :  { %12997 = vmatpush3.xpose.msk.msra.mxu1 %vm198_vm2, %v3578_v27  ;;  %12998 = vmatprep.mubr.msk.f32.mxu1 %vm13932_vm1, %v13931_v4 }
0x1862   :  { %13006 = vmatprep.subr.mxu1 %v13931_v4 }
0x1864   :  { %12999 = vmatmul.mubr.msk.f32.vlgmr.msra.gmra.mxu1 %vm198_vm2, %v3576_v36 }
0x1865   :  { %13008 = vmatprep.mubr.msk.f32.mxu1 %vm13932_vm1, %v13931_v4 }
0x18e4   :  { %v3657_v38 = vpop.xlane.xlu1 %3656 }
0x18e5   :  { %v3661_v31 = vsub.f32 %v3653_v24, %v3657_v38 }
0x18e7   :  { %v3663_v39 = vmul.f32 1.442695, %v3661_v31 }
0x18e9   :  { %13603 = vpow2.f32 %v3663_v39 }
0x18f6   :  { %v13604_v63 = vpop.eup %13603 }
0x18f7   :  { %v3667_v5 = vsel %vm352_vm3, %v13604_v63, 0.0 }
0x1920   :  { %v12990_v42 = vpop.f32.mrf.mxu1 }
0x1921   :  { %v3496_v44 = vadd.f32 %v12990_v42, %v3075_v40 }
0x1922   :  { %v3486_v50 = vpop.f32.mrf.mxu1 }
0x1923   :  { %v3495_v51 = vadd.f32 %v3486_v50, %v3070_v43 }
0x1924   :  { %v3649_v8 = vpop.f32.mrf.mxu1 }
0x1925   :  { %v3654_v58 = vmul.f32 0.5, %v3649_v8 }
0x1926   :  { %v13000_v61 = vpop.f32.mrf.mxu1 }
0x1927   :  { %v3658_v62 = vsel %vm352_vm3, %v3654_v58, -inf }
0x1928   :  { %3659 = vmax.xlane.f32.xlu0 %v3658_v62 }
0x192c   :  { %3668 = vadd.xlane.f32.xlu0 %v3667_v5 }
0x1942   :  { %3677 = vrot.lane.b32.xlu0 %v14309_v59, %s13944_s30  ;;  %v3829_v59 = vrot.slane %v14271_v45, 4 }
0x19b1   :  { %v3660_v29 = vpop.xlane.xlu0 %3659 }
0x19b2   :  { %v3662_v13 = vsub.f32 %v3654_v58, %v3660_v29 }
0x19b4   :  { %v3665_v9 = vmul.f32 1.442695, %v3662_v13 }
0x19b5   :  { %v3669_v35 = vpop.xlane.xlu0 %3668 }
0x19b6   :  { %13605 = vpow2.f32 %v3665_v9  ;;  %v3958_v9 = vrot.slane %v14303_v6, %v14222_v30 }
0x19b7   :  { %13607 = vrcp.f32 %v3669_v35 }
0x19b9   :  { %v3678_v55 = vpop.permute.xlu0 %3677 }
0x19ba   :  { %13002 = vmatpush3.msra.mxu0 %v3678_v55 }
0x19c3   :  { %v13606_v10 = vpop.eup %13605 }
0x19c4   :  { %v13608_v11 = vpop.eup %13607  ;;  %v3670_v33 = vsel %vm352_vm3, %v13606_v10, 0.0 }
0x19c5   :  { %3671 = vadd.xlane.f32.xlu1 %v3670_v33  ;;  %v3674_v14 = vmul.f32 %v13608_v11, %v13604_v63 }
0x19c7   :  { %13004 = vmatmul.mubr.msk.f32.vlgmr.msra.gmra.mxu0 %vm352_vm3, %v3674_v14 }
0x19d6   :  { %3753 = vrot.lane.b32.xlu1 %v14307_v56, %s13944_s30 }
0x19da   :  { %3830 = vrot.lane.b32.xlu1 %v3829_v59, %s13933_s2 }
0x1a4e   :  { %v3672_v15 = vpop.xlane.xlu1 %3671 }
0x1a4f   :  { %13609 = vrcp.f32 %v3672_v15 }
0x1a52   :  { %v3754_v3 = vpop.permute.xlu1 %3753 }
0x1a53   :  { %13007 = vmatpush3.msra.mxu1 %v3754_v3 }
0x1a56   :  { %v3831_v17 = vpop.permute.xlu1 %3830 }
0x1a57   :  { %13011 = vmatprep.subr.msk.mxu0 %vm869_vm4, %v3831_v17 }
0x1a58   :  { %13012 = vmatpush3.msk.msra.mxu0 %vm869_vm4, %v3831_v17  ;;  %v14513_v17 = vld [vmem:[#allocation5] sm:$0xff] }
0x1a5c   :  { %v13610_v16 = vpop.eup %13609 }
0x1a5d   :  { %v3676_v0 = vmul.f32 %v13610_v16, %v13606_v10  ;;  %v3964_v10 = vrot.slane %v14303_v6, %v14225_v32 }
0x1a5f   :  { %13009 = vmatmul.mubr.msk.f32.vlgmr.msra.gmra.mxu1 %vm352_vm3, %v3676_v0 }
0x1a87   :  { %v3749_v56 = vpop.f32.mrf.mxu0 }
0x1a88   :  { %13013 = vmatprep.mubr.msk.f32.mxu0 %vm198_vm2, %v3749_v56 }
0x1a89   :  { %v13005_v18 = vpop.f32.mrf.mxu0 }
0x1a8a   :  { %v14519_v18 = vld [vmem:[#allocation5 + $0x8] sm:$0xff] }
0x1b1f   :  { %v3825_v1 = vpop.f32.mrf.mxu1 }
0x1b20   :  { %13014 = vmatmul.mubr.msk.f32.vlgmr.msra.gmra.mxu0 %vm198_vm2, %v3825_v1 }
0x1b21   :  { %v13010_v19 = vpop.f32.mrf.mxu1 }
0x1be0   :  { %v13015_v21 = vpop.f32.mrf.mxu0 }
0x1be1   :  { %v3916_v22 = vadd.f32 %v13015_v21, %v3496_v44  ;;  %v3970_v21 = vrot.slane %v14303_v6, %v14251_v49 }
0x1be2   :  { %v3906_v23 = vpop.f32.mrf.mxu0 }
0x1be3   :  { %v3922_v24 = vadd.f32 %v3920_v20, %v3916_v22  ;;  %v3915_v25 = vadd.f32 %v3906_v23, %v3495_v51  ;;  %v14529_v22 = vld [vmem:[#allocation10 + $0x10] sm:$0xff] }
0x1be5   :  { %v3924_v26 = vadd.f32 %v3922_v24, %v14295_v53  ;;  %v3921_v27 = vadd.f32 %v3920_v20, %v3915_v25  ;;  %v4252_v24 = vrot.slane %v14529_v22, %v14032_v7 }
0x1be7   :  { %v3923_v28 = vadd.f32 %v3921_v27, %v14293_v52  ;;  %v3928_v34 = vsel %vm113_vm0, %v3924_v26, 0.0  ;;  %v3934_v39 = vmul.f32 %v3924_v26, %v3924_v26 }
0x1be8   :  { %3929 = vadd.xlane.f32.xlu1 %v3928_v34 }
0x1be9   :  { %v3925_v36 = vsel %vm113_vm0, %v3923_v28, 0.0  ;;  %v3933_v38 = vmul.f32 %v3923_v28, %v3923_v28  ;;  %v3938_v40 = vsel %vm113_vm0, %v3934_v39, 0.0 }
0x1bea   :  { %3926 = vadd.xlane.f32.xlu0 %v3925_v36 }
0x1beb   :  { %v3935_v31 = vsel %vm113_vm0, %v3933_v38, 0.0 }
0x1bee   :  { %3936 = vadd.xlane.f32.xlu0 %v3935_v31 }
0x1bf2   :  { %3939 = vadd.xlane.f32.xlu0 %v3938_v40 }
0x1bf9   :  { %3973 = vrot.lane.b32.xlu1 %v14271_v45, %s13934_s4 }
0x1bfd   :  { %4255 = vrot.lane.b32.xlu1 %v14271_v45, %s13945_s6 }
0x1c01   :  { %4253 = vrot.lane.b32.xlu1 %v14276_v2, %s13945_s6 }
0x1c05   :  { %4072 = vrot.lane.b32.xlu1 %v14237_v46, %s13933_s2 }
0x1c08   :  { %3971 = vrot.lane.b32.xlu0 %v14276_v2, %s13934_s4 }
0x1c09   :  { %4068 = vrot.lane.b32.xlu1 %v14244_v48, %s13933_s2 }
0x1c0c   :  { %4074 = vrot.lane.b32.xlu0 %v14233_v12, %s13933_s2 }
0x1c10   :  { %4070 = vrot.lane.b32.xlu0 %v14241_v47, %s13933_s2 }
0x1c71   :  { %v3930_v52 = vpop.xlane.xlu1 %3929 }
0x1c72   :  { %v3932_v46 = vmul.f32 0.0625, %v3930_v52 }
0x1c73   :  { %v3927_v53 = vpop.xlane.xlu0 %3926 }
0x1c74   :  { %v3931_v42 = vmul.f32 0.0625, %v3927_v53  ;;  %v3944_v61 = vmul.f32 %v3932_v46, %v3932_v46  ;;  %v3948_v11 = vsub.f32 %v3924_v26, %v3932_v46 }
0x1c75   :  { %v3974_v43 = vpop.permute.xlu1 %3973 }
0x1c76   :  { %13016 = vmatprep.subr.mxu1 %v3974_v43  ;;  %v3943_v50 = vmul.f32 %v3931_v42, %v3931_v42  ;;  %v3947_v13 = vsub.f32 %v3923_v28, %v3931_v42 }
0x1c77   :  { %v3937_v44 = vpop.xlane.xlu0 %3936  ;;  %13017 = vmatpush3.msra.mxu1 %v3974_v43 }
0x1c78   :  { %v3941_v51 = vmul.f32 0.0625, %v3937_v44 }
0x1c79   :  { %v4256_v5 = vpop.permute.xlu1 %4255 }
0x1c7a   :  { %v3945_v8 = vsub.f32 %v3941_v51, %v3943_v50 }
0x1c7b   :  { %v3940_v58 = vpop.xlane.xlu0 %3939 }
0x1c7c   :  { %v3949_v48 = vadd.f32 1e-05, %v3945_v8  ;;  %v3942_v62 = vmul.f32 0.0625, %v3940_v58 }
0x1c7d   :  { %v4254_v56 = vpop.permute.xlu1 %4253 }
0x1c7e   :  { %13611 = vrsqrt.f32 %v3949_v48  ;;  %v3946_v12 = vsub.f32 %v3942_v62, %v3944_v61 }
0x1c7f   :  { %v3972_v63 = vpop.permute.xlu0 %3971 }
0x1c80   :  { %v3950_v47 = vadd.f32 1e-05, %v3946_v12  ;;  %13018 = vmatprep.subr.mxu1 %v3972_v63 }
0x1c81   :  { %13019 = vmatpush3.msra.mxu1 %v3972_v63  ;;  %v4073_v1 = vpop.permute.xlu1 %4072 }
0x1c82   :  { %13613 = vrsqrt.f32 %v3950_v47  ;;  %13034 = vmatprep.subr.mxu1 %v4256_v5 }
0x1c83   :  { %v4075_v29 = vpop.permute.xlu0 %4074 }
0x1c84   :  { %13023 = vmatprep.subr.mxu0 %v4075_v29 }
0x1c85   :  { %13024 = vmatpush3.msra.mxu0 %v4075_v29  ;;  %v4069_v20 = vpop.permute.xlu1 %4068 }
0x1c86   :  { %13025 = vmatprep.subr.mxu0 %v4073_v1 }
0x1c87   :  { %13026 = vmatpush3.msra.mxu0 %v4073_v1  ;;  %v4071_v19 = vpop.permute.xlu0 %4070 }
0x1c88   :  { %13027 = vmatprep.subr.mxu0 %v4071_v19 }
0x1c89   :  { %13028 = vmatpush3.msra.mxu0 %v4071_v19 }
0x1c8a   :  { %13029 = vmatprep.subr.mxu0 %v4069_v20 }
0x1c8b   :  { %v13612_v35 = vpop.eup %13611  ;;  %13030 = vmatpush3.msra.mxu0 %v4069_v20 }
0x1c8c   :  { %v3953_v55 = vmul.f32 %v13612_v35, %v3947_v13  ;;  %13046 = vmatprep.subr.mxu0 %v13931_v4 }
0x1c8e   :  { %v3959_v33 = vmul.f32 %v3958_v9, %v3953_v55 }
0x1c8f   :  { %v13614_v14 = vpop.eup %13613 }
0x1c90   :  { %v3954_v15 = vmul.f32 %v13614_v14, %v3948_v11  ;;  %v14507_v3 = vadd.f32 %v3964_v10, %v3959_v33 }
0x1c92   :  { %v3960_v16 = vmul.f32 %v3958_v9, %v3954_v15  ;;  %13020 = vmatprep.mubr.msk.f32.mxu1 %vm113_vm0, %v14507_v3 }
0x1c94   :  { %v14511_v0 = vadd.f32 %v3964_v10, %v3960_v16 }
0x1c96   :  { %13021 = vmatmul.mubr.msk.f32.vlgmr.msra.gmra.mxu1 %vm113_vm0, %v14511_v0 }
0x1c97   :  { %13035 = vmatpush3.msra.mxu1 %v4256_v5  ;;  %13038 = vmatprep.mubr.msk.f32.mxu1 %vm113_vm0, %v14513_v17 }
0x1c98   :  { %13036 = vmatprep.subr.mxu1 %v4254_v56 }
0x1c99   :  { %13037 = vmatpush3.msra.mxu1 %v4254_v56 }
0x1c9a   :  { %13039 = vmatmul.mubr.msk.f32.vlgmr.msra.gmra.mxu1 %vm113_vm0, %v14519_v18  ;;  %13041 = vmatprep.subr.mxu1 %v13931_v4 }
0x1c9b   :  { %13043 = vmatprep.mubr.msk.f32.mxu1 %vm13932_vm1, %v13931_v4 }
0x1d56   :  { %v13022_v23 = vpop.f32.mrf.mxu1 }
0x1d57   :  { %v4055_v25 = vadd.f32 %v13022_v23, %v3970_v21 }
0x1d58   :  { %v4049_v26 = vpop.f32.mrf.mxu1 }
0x1d59   :  { %v4050_v27 = vadd.f32 %v4049_v26, %v3970_v21  ;;  %v4059_v38 = vmax.f32 %v4055_v25, 0.0 }
0x1d5a   :  { %v13040_v28 = vpop.f32.mrf.mxu1 }
0x1d5b   :  { %v4058_v34 = vmax.f32 %v4050_v27, 0.0  ;;  %v14533_v36 = vadd.f32 %v13040_v28, %v4252_v24 }
0x1d5c   :  { %v4331_v31 = vpop.f32.mrf.mxu1 }
0x1d5d   :  { %v14535_v39 = vadd.f32 %v4331_v31, %v4252_v24  ;;  %4418 = vrot.lane.b32.xlu1 %v14533_v36, %s13933_s2  ;;  %13031 = vmatprep.mubr.msk.f32.mxu0 %vm2020_vm5, %v4058_v34 }
0x1d5e   :  { %13032 = vmatmul.mubr.msk.f32.vlgmr.msra.gmra.mxu0 %vm2020_vm5, %v4059_v38 }
0x1d5f   :  { %4341 = vrot.lane.b32.xlu0 %v14535_v39, %s13933_s2  ;;  %13048 = vmatprep.mubr.msk.f32.mxu0 %vm13932_vm1, %v13931_v4 }
0x1dcf   :  { %v4419_v6 = vpop.permute.xlu1 %4418 }
0x1dd0   :  { %13047 = vmatpush3.xpose.msk.msra.mxu0 %vm198_vm2, %v4419_v6 }
0x1dd1   :  { %v4342_v40 = vpop.permute.xlu0 %4341  ;;  %13056 = vmatprep.subr.mxu0 %v13931_v4 }
0x1dd2   :  { %13042 = vmatpush3.xpose.msk.msra.mxu1 %vm198_vm2, %v4342_v40 }
0x1dd3   :  { %13049 = vmatmul.mubr.msk.f32.vlgmr.msra.gmra.mxu0 %vm198_vm2, %v14533_v36  ;;  %13051 = vmatprep.subr.mxu1 %v13931_v4 }
0x1dd4   :  { %13058 = vmatprep.mubr.msk.f32.mxu0 %vm13932_vm1, %v13931_v4 }
0x1dd5   :  { %13044 = vmatmul.mubr.msk.f32.vlgmr.msra.gmra.mxu1 %vm198_vm2, %v14535_v39 }
0x1dd6   :  { %13053 = vmatprep.mubr.msk.f32.mxu1 %vm13932_vm1, %v13931_v4 }
0x1e1e   :  { %v14557_v52 = vpop.f32.mrf.mxu0 }
0x1e20   :  { %v14559_v53 = vpop.f32.mrf.mxu0 }
0x1e93   :  { %v4490_v42 = vpop.f32.mrf.mxu0 }
0x1e94   :  { %v4495_v43 = vmul.f32 0.5, %v4490_v42  ;;  %v13779_v42 = vld [vmem:[#allocation7 + $0x8] sm:$0xff] }
0x1e95   :  { %v4413_v44 = vpop.f32.mrf.mxu1  ;;  %v13050_v46 = vpop.f32.mrf.mxu0 }
0x1e96   :  { %v4494_v50 = vmul.f32 0.5, %v4413_v44  ;;  %v4499_v51 = vsel %vm352_vm3, %v4495_v43, -inf }
0x1e97   :  { %4500 = vmax.xlane.f32.xlu1 %v4499_v51  ;;  %v13045_v8 = vpop.f32.mrf.mxu1 }
0x1e98   :  { %v4496_v58 = vsel %vm352_vm3, %v4494_v50, -inf }
0x1e99   :  { %4497 = vmax.xlane.f32.xlu0 %v4496_v58 }
0x1ea8   :  { %4518 = vrot.lane.b32.xlu1 %v14535_v39, %s13934_s4 }
0x1eac   :  { %4672 = vrot.lane.b32.xlu1 %v14535_v39, %s13936_s20 }
0x1eb0   :  { %4750 = vrot.lane.b32.xlu1 %v14533_v36, %s13936_s20 }
0x1eb4   :  { %4748 = vrot.lane.b32.xlu1 %v14533_v36, %s13935_s19 }
0x1f20   :  { %v4501_v61 = vpop.xlane.xlu1 %4500 }
0x1f21   :  { %v4503_v48 = vsub.f32 %v4495_v43, %v4501_v61 }
0x1f22   :  { %v4498_v62 = vpop.xlane.xlu0 %4497 }
0x1f23   :  { %v4506_v12 = vmul.f32 1.442695, %v4503_v48  ;;  %v4502_v63 = vsub.f32 %v4494_v50, %v4498_v62 }
0x1f24   :  { %v4519_v5 = vpop.permute.xlu1 %4518 }
0x1f25   :  { %13615 = vpow2.f32 %v4506_v12  ;;  %v4504_v47 = vmul.f32 1.442695, %v4502_v63  ;;  %13052 = vmatpush3.msra.mxu1 %v4519_v5 }
0x1f26   :  { %13061 = vmatprep.subr.mxu1 %v13931_v4 }
0x1f27   :  { %13617 = vpow2.f32 %v4504_v47 }
0x1f28   :  { %v4673_v11 = vpop.permute.xlu1 %4672 }
0x1f2c   :  { %v4751_v15 = vpop.permute.xlu1 %4750 }
0x1f30   :  { %v4749_v19 = vpop.permute.xlu1 %4748 }
0x1f32   :  { %v13616_v29 = vpop.eup %13615 }
0x1f33   :  { %v4511_v13 = vsel %vm352_vm3, %v13616_v29, 0.0 }
0x1f34   :  { %v13618_v9 = vpop.eup %13617  ;;  %4512 = vadd.xlane.f32.xlu0 %v4511_v13 }
0x1f35   :  { %v4508_v35 = vsel %vm352_vm3, %v13618_v9, 0.0 }
0x1f38   :  { %4509 = vadd.xlane.f32.xlu0 %v4508_v35 }
0x1f4e   :  { %4594 = vrot.lane.b32.xlu0 %v14533_v36, %s13934_s4 }
0x1f52   :  { %4670 = vrot.lane.b32.xlu0 %v14535_v39, %s13935_s19 }
0x1fbd   :  { %v4513_v55 = vpop.xlane.xlu0 %4512 }
0x1fbe   :  { %13619 = vrcp.f32 %v4513_v55 }
0x1fc1   :  { %v4510_v10 = vpop.xlane.xlu0 %4509 }
0x1fc2   :  { %13621 = vrcp.f32 %v4510_v10 }
0x1fc5   :  { %v4595_v33 = vpop.permute.xlu0 %4594 }
0x1fc6   :  { %13057 = vmatpush3.msra.mxu0 %v4595_v33 }
0x1fc7   :  { %13066 = vmatprep.subr.mxu0 %v13931_v4 }
0x1fc9   :  { %v4671_v20 = vpop.permute.xlu0 %4670 }
0x1fcb   :  { %v13620_v14 = vpop.eup %13619 }
0x1fcc   :  { %v4517_v16 = vmul.f32 %v13620_v14, %v13616_v29 }
0x1fce   :  { %13059 = vmatmul.mubr.msk.f32.vlgmr.msra.gmra.mxu0 %vm352_vm3, %v4517_v16 }
0x1fcf   :  { %v13622_v56 = vpop.eup %13621  ;;  %13067 = vmatpush3.xpose.msk.msra.mxu0 %vm198_vm2, %v4751_v15  ;;  %13068 = vmatprep.mubr.msk.f32.mxu0 %vm13932_vm1, %v13931_v4 }
0x1fd0   :  { %v4515_v1 = vmul.f32 %v13622_v56, %v13618_v9  ;;  %13076 = vmatprep.subr.mxu0 %v13931_v4 }
0x1fd2   :  { %13054 = vmatmul.mubr.msk.f32.vlgmr.msra.gmra.mxu1 %vm352_vm3, %v4515_v1  ;;  %13069 = vmatmul.mubr.msk.f32.vlgmr.msra.gmra.mxu0 %vm198_vm2, %v4749_v19 }
0x1fd3   :  { %13062 = vmatpush3.xpose.msk.msra.mxu1 %vm198_vm2, %v4673_v11  ;;  %13063 = vmatprep.mubr.msk.f32.mxu1 %vm13932_vm1, %v13931_v4 }
0x1fd4   :  { %13071 = vmatprep.subr.mxu1 %v13931_v4  ;;  %13078 = vmatprep.mubr.msk.f32.mxu0 %vm13932_vm1, %v13931_v4 }
0x1fd6   :  { %13064 = vmatmul.mubr.msk.f32.vlgmr.msra.gmra.mxu1 %vm198_vm2, %v4671_v20 }
0x1fd7   :  { %13073 = vmatprep.mubr.msk.f32.mxu1 %vm13932_vm1, %v13931_v4 }
0x208e   :  { %v4666_v21 = vpop.f32.mrf.mxu0 }
0x2090   :  { %v13060_v23 = vpop.f32.mrf.mxu0 }
0x2092   :  { %v4590_v24 = vpop.f32.mrf.mxu1  ;;  %v4822_v25 = vpop.f32.mrf.mxu0 }
0x2093   :  { %v4827_v26 = vmul.f32 0.5, %v4822_v25  ;;  %v13780_v25 = vld [vmem:[#allocation7 + $0x28] sm:$0xff] }
0x2094   :  { %v13055_v27 = vpop.f32.mrf.mxu1  ;;  %v13070_v28 = vpop.f32.mrf.mxu0 }
0x2095   :  { %v4831_v34 = vsel %vm352_vm3, %v4827_v26, -inf }
0x2096   :  { %4832 = vmax.xlane.f32.xlu1 %v4831_v34  ;;  %v4744_v38 = vpop.f32.mrf.mxu1 }
0x2097   :  { %v4826_v31 = vmul.f32 0.5, %v4744_v38 }
0x2098   :  { %v13065_v6 = vpop.f32.mrf.mxu1 }
0x2099   :  { %v4828_v40 = vsel %vm352_vm3, %v4826_v31, -inf }
0x209a   :  { %4829 = vmax.xlane.f32.xlu0 %v4828_v40 }
0x20a7   :  { %4850 = vrot.lane.b32.xlu1 %v14535_v39, %s13937_s21 }
0x20ab   :  { %5002 = vrot.lane.b32.xlu1 %v2907_v60, %s13946_s7 }
0x20af   :  { %5087 = vrot.lane.b32.xlu1 %v13779_v42, %s13946_s7 }
0x20b3   :  { %5252 = vrot.lane.b32.xlu1 %v14533_v36, %s13938_s22 }
0x20b7   :  { %5250 = vrot.lane.b32.xlu1 %v14533_v36, %s13939_s25 }
0x211f   :  { %v4833_v43 = vpop.xlane.xlu1 %4832 }
0x2120   :  { %v4835_v44 = vsub.f32 %v4827_v26, %v4833_v43 }
0x2122   :  { %v4838_v46 = vmul.f32 1.442695, %v4835_v44 }
0x2123   :  { %v4851_v50 = vpop.permute.xlu1 %4850  ;;  %v4830_v51 = vpop.xlane.xlu0 %4829 }
0x2124   :  { %13623 = vpow2.f32 %v4838_v46  ;;  %v4834_v8 = vsub.f32 %v4826_v31, %v4830_v51  ;;  %13072 = vmatpush3.msra.mxu1 %v4851_v50 }
0x2126   :  { %v4836_v58 = vmul.f32 1.442695, %v4834_v8 }
0x2127   :  { %v5003_v2 = vpop.permute.xlu1 %5002 }
0x2128   :  { %13625 = vpow2.f32 %v4836_v58  ;;  %13081 = vmatprep.subr.msk.mxu1 %vm869_vm4, %v5003_v2 }
0x212b   :  { %v5088_v47 = vpop.permute.xlu1 %5087 }
0x212f   :  { %v5253_v35 = vpop.permute.xlu1 %5252 }
0x2131   :  { %v13624_v60 = vpop.eup %13623 }
0x2132   :  { %v4843_v61 = vsel %vm352_vm3, %v13624_v60, 0.0 }
0x2133   :  { %4844 = vadd.xlane.f32.xlu0 %v4843_v61  ;;  %v5251_v10 = vpop.permute.xlu1 %5250 }
0x2135   :  { %v13626_v48 = vpop.eup %13625 }
0x2136   :  { %v4840_v62 = vsel %vm352_vm3, %v13626_v48, 0.0 }
0x2137   :  { %4841 = vadd.xlane.f32.xlu0 %v4840_v62 }
0x214d   :  { %4926 = vrot.lane.b32.xlu0 %v14533_v36, %s13937_s21 }
0x2151   :  { %5174 = vrot.lane.b32.xlu0 %v14535_v39, %s13938_s22 }
0x2155   :  { %5172 = vrot.lane.b32.xlu0 %v14535_v39, %s13939_s25 }
0x21bc   :  { %v4845_v12 = vpop.xlane.xlu0 %4844 }
0x21bd   :  { %13627 = vrcp.f32 %v4845_v12 }
0x21c0   :  { %v4842_v63 = vpop.xlane.xlu0 %4841 }
0x21c1   :  { %13629 = vrcp.f32 %v4842_v63 }
0x21c4   :  { %v4927_v5 = vpop.permute.xlu0 %4926 }
0x21c5   :  { %13077 = vmatpush3.msra.mxu0 %v4927_v5 }
0x21c6   :  { %13086 = vmatprep.subr.msk.mxu0 %vm869_vm4, %v5088_v47 }
0x21c8   :  { %v5175_v14 = vpop.permute.xlu0 %5174 }
0x21ca   :  { %v13628_v29 = vpop.eup %13627 }
0x21cb   :  { %v4849_v13 = vmul.f32 %v13628_v29, %v13624_v60 }
0x21cc   :  { %v5173_v20 = vpop.permute.xlu0 %5172 }
0x21cd   :  { %13079 = vmatmul.mubr.msk.f32.vlgmr.msra.gmra.mxu0 %vm352_vm3, %v4849_v13 }
0x21ce   :  { %v13630_v9 = vpop.eup %13629  ;;  %13088 = vmatprep.mubr.msk.f32.mxu0 %vm198_vm2, %v4590_v24  ;;  %13087 = vmatpush3.msk.msra.mxu0 %vm869_vm4, %v5088_v47 }
0x21cf   :  { %13096 = vmatprep.subr.mxu0 %v13931_v4  ;;  %v4847_v55 = vmul.f32 %v13630_v9, %v13626_v48 }
0x21d1   :  { %13074 = vmatmul.mubr.msk.f32.vlgmr.msra.gmra.mxu1 %vm352_vm3, %v4847_v55  ;;  %13089 = vmatmul.mubr.msk.f32.vlgmr.msra.gmra.mxu0 %vm198_vm2, %v4666_v21 }
0x21d2   :  { %13097 = vmatpush3.xpose.msk.msra.mxu0 %vm198_vm2, %v5253_v35  ;;  %13098 = vmatprep.mubr.msk.f32.mxu0 %vm13932_vm1, %v13931_v4 }
0x21d3   :  { %13082 = vmatpush3.msk.msra.mxu1 %vm869_vm4, %v5003_v2  ;;  %13106 = vmatprep.subr.mxu0 %v13931_v4 }
0x21d4   :  { %13091 = vmatprep.subr.mxu1 %v13931_v4 }
0x21d5   :  { %13099 = vmatmul.mubr.msk.f32.vlgmr.msra.gmra.mxu0 %vm198_vm2, %v5251_v10 }
0x21d6   :  { %13108 = vmatprep.mubr.msk.f32.mxu0 %vm13932_vm1, %v13931_v4 }
0x228d   :  { %v4998_v11 = vpop.f32.mrf.mxu0 }
0x228f   :  { %v13080_v33 = vpop.f32.mrf.mxu0 }
0x2291   :  { %v4922_v15 = vpop.f32.mrf.mxu1  ;;  %v14632_v16 = vpop.f32.mrf.mxu0 }
0x2292   :  { %13083 = vmatprep.mubr.msk.f32.mxu1 %vm198_vm2, %v4922_v15 }
0x2293   :  { %v13075_v56 = vpop.f32.mrf.mxu1  ;;  %13084 = vmatmul.mubr.msk.f32.vlgmr.msra.gmra.mxu1 %vm198_vm2, %v4998_v11  ;;  %v14636_v1 = vpop.f32.mrf.mxu0 }
0x2294   :  { %13092 = vmatpush3.xpose.msk.msra.mxu1 %vm198_vm2, %v5175_v14  ;;  %13093 = vmatprep.mubr.msk.f32.mxu1 %vm13932_vm1, %v13931_v4 }
0x2295   :  { %v5324_v19 = vpop.f32.mrf.mxu0  ;;  %13101 = vmatprep.subr.mxu1 %v13931_v4 }
0x2296   :  { %v5329_v21 = vmul.f32 0.5, %v5324_v19 }
0x2297   :  { %13094 = vmatmul.mubr.msk.f32.vlgmr.msra.gmra.mxu1 %vm198_vm2, %v5173_v20  ;;  %v13100_v23 = vpop.f32.mrf.mxu0 }
0x2298   :  { %v5333_v24 = vsel %vm352_vm3, %v5329_v21, -inf  ;;  %13103 = vmatprep.mubr.msk.f32.mxu1 %vm13932_vm1, %v13931_v4 }
0x2299   :  { %5334 = vmax.xlane.f32.xlu1 %v5333_v24 }
0x22aa   :  { %5352 = vrot.lane.b32.xlu1 %v14535_v39, %s13941_s27 }
0x22ae   :  { %5504 = vrot.lane.b32.xlu1 %v13780_v25, %s13946_s7 }
0x22b2   :  { %5593 = vrot.lane.b32.xlu1 %v14535_v39, %s13942_s28 }
0x22b6   :  { %5591 = vrot.lane.b32.xlu1 %v14535_v39, %s13943_s29 }
0x2322   :  { %v5335_v26 = vpop.xlane.xlu1 %5334 }
0x2323   :  { %v5337_v34 = vsub.f32 %v5329_v21, %v5335_v26 }
0x2325   :  { %v5340_v38 = vmul.f32 1.442695, %v5337_v34 }
0x2326   :  { %v5353_v27 = vpop.permute.xlu1 %5352 }
0x2327   :  { %13102 = vmatpush3.msra.mxu1 %v5353_v27  ;;  %13631 = vpow2.f32 %v5340_v38 }
0x232a   :  { %v5505_v28 = vpop.permute.xlu1 %5504 }
0x232b   :  { %13111 = vmatprep.subr.msk.mxu1 %vm869_vm4, %v5505_v28 }
0x232e   :  { %v5594_v12 = vpop.permute.xlu1 %5593 }
0x2332   :  { %v5592_v47 = vpop.permute.xlu1 %5591 }
0x2334   :  { %v13632_v46 = vpop.eup %13631 }
0x2335   :  { %v5345_v50 = vsel %vm352_vm3, %v13632_v46, 0.0 }
0x2353   :  { %v14654_v31 = vpop.f32.mrf.mxu1 }
0x2354   :  { %v5169_v24 = vadd.f32 %v14632_v16, %v14654_v31  ;;  %v13781_v16 = vld [vmem:[#allocation10 + $0x8] sm:$0xff] }
0x2355   :  { %v14656_v6 = vpop.f32.mrf.mxu1  ;;  %v4202_v45 = vrot.slane %v13781_v16, %v14289_v41 }
0x2356   :  { %v5164_v26 = vadd.f32 %v14636_v1, %v14656_v6  ;;  %v4063_v1 = vrot.slane %v13781_v16, %v14260_v57 }
0x2357   :  { %v5246_v40 = vpop.f32.mrf.mxu1 }
0x2358   :  { %v5328_v42 = vmul.f32 0.5, %v5246_v40  ;;  %v4153_v31 = vadd.f32 %v14559_v53, %v4063_v1  ;;  %v4158_v6 = vadd.f32 %v14557_v52, %v4063_v1 }
0x2359   :  { %v13095_v43 = vpop.f32.mrf.mxu1 }
0x235a   :  { %v5330_v44 = vsel %vm352_vm3, %v5328_v42, -inf }
0x235b   :  { %5331 = vmax.xlane.f32.xlu0 %v5330_v44 }
0x235f   :  { %5346 = vadd.xlane.f32.xlu0 %v5345_v50  ;;  %v4161_v50 = vadd.f32 %v4153_v31, %v14507_v3 }
0x23e4   :  { %v5332_v51 = vpop.xlane.xlu0 %5331 }
0x23e5   :  { %v5336_v8 = vsub.f32 %v5328_v42, %v5332_v51  ;;  %v14706_v51 = vadd.f32 %v4158_v6, %v14511_v0 }
0x23e7   :  { %v5338_v58 = vmul.f32 1.442695, %v5336_v8  ;;  %v4163_v8 = vsel %vm113_vm0, %v4161_v50, 0.0 }
0x23e8   :  { %v5347_v61 = vpop.xlane.xlu0 %5346 }
0x23e9   :  { %13633 = vpow2.f32 %v5338_v58  ;;  %v4171_v58 = vmul.f32 %v4161_v50, %v4161_v50 }
0x23ea   :  { %13635 = vrcp.f32 %v5347_v61 }
0x23f6   :  { %v13634_v2 = vpop.eup %13633 }
0x23f7   :  { %v5342_v60 = vsel %vm352_vm3, %v13634_v2, 0.0  ;;  %v13636_v62 = vpop.eup %13635 }
0x23f8   :  { %5343 = vadd.xlane.f32.xlu0 %v5342_v60  ;;  %v5351_v5 = vmul.f32 %v13636_v62, %v13632_v46 }
0x240e   :  { %5428 = vrot.lane.b32.xlu0 %v14533_v36, %s13941_s27 }
0x2412   :  { %5671 = vrot.lane.b32.xlu0 %v14533_v36, %s13942_s28 }
0x2416   :  { %5669 = vrot.lane.b32.xlu0 %v14533_v36, %s13943_s29 }
0x2481   :  { %v5344_v48 = vpop.xlane.xlu0 %5343 }
0x2482   :  { %13637 = vrcp.f32 %v5344_v48 }
0x2485   :  { %v5429_v63 = vpop.permute.xlu0 %5428 }
0x2486   :  { %13107 = vmatpush3.msra.mxu0 %v5429_v63 }
0x2487   :  { %13109 = vmatmul.mubr.msk.f32.vlgmr.msra.gmra.mxu0 %vm352_vm3, %v5351_v5  ;;  %13116 = vmatprep.subr.mxu0 %v13931_v4 }
0x2488   :  { %13117 = vmatpush3.xpose.msk.msra.mxu0 %vm198_vm2, %v5594_v12  ;;  %13118 = vmatprep.mubr.msk.f32.mxu0 %vm13932_vm1, %v13931_v4 }
0x2489   :  { %13126 = vmatprep.subr.mxu0 %v13931_v4  ;;  %v5672_v14 = vpop.permute.xlu0 %5671 }
0x248b   :  { %13119 = vmatmul.mubr.msk.f32.vlgmr.msra.gmra.mxu0 %vm198_vm2, %v5592_v47 }
0x248c   :  { %13128 = vmatprep.mubr.msk.f32.mxu0 %vm13932_vm1, %v13931_v4 }
0x248d   :  { %v5670_v19 = vpop.permute.xlu0 %5669 }
0x248f   :  { %v13638_v29 = vpop.eup %13637 }
0x2490   :  { %v5349_v13 = vmul.f32 %v13638_v29, %v13634_v2  ;;  %v4173_v2 = vsel %vm113_vm0, %v4171_v58, 0.0 }
0x2492   :  { %13104 = vmatmul.mubr.msk.f32.vlgmr.msra.gmra.mxu1 %vm352_vm3, %v5349_v13 }
0x2493   :  { %13112 = vmatpush3.msk.msra.mxu1 %vm869_vm4, %v5505_v28 }
0x2494   :  { %13121 = vmatprep.subr.mxu1 %v13931_v4 }
0x2547   :  { %v5500_v9 = vpop.f32.mrf.mxu0 }
0x2549   :  { %v13110_v35 = vpop.f32.mrf.mxu0 }
0x254b   :  { %v5665_v55 = vpop.f32.mrf.mxu0 }
0x254c   :  { %v5747_v10 = vmul.f32 0.5, %v5665_v55 }
0x254d   :  { %v13120_v11 = vpop.f32.mrf.mxu0 }
0x254e   :  { %v5749_v33 = vsel %vm352_vm3, %v5747_v10, -inf }
0x254f   :  { %5750 = vmax.xlane.f32.xlu1 %v5749_v33  ;;  %v4196_v33 = vrot.slane %v13781_v16, %v14284_v37 }
0x2552   :  { %v5424_v15 = vpop.f32.mrf.mxu1 }
0x2553   :  { %13113 = vmatprep.mubr.msk.f32.mxu1 %vm198_vm2, %v5424_v15 }
0x2554   :  { %v13105_v56 = vpop.f32.mrf.mxu1  ;;  %13114 = vmatmul.mubr.msk.f32.vlgmr.msra.gmra.mxu1 %vm198_vm2, %v5500_v9 }
0x2555   :  { %13122 = vmatpush3.xpose.msk.msra.mxu1 %vm198_vm2, %v5672_v14  ;;  %13123 = vmatprep.mubr.msk.f32.mxu1 %vm13932_vm1, %v13931_v4 }
0x2556   :  { %13131 = vmatprep.subr.mxu1 %v13931_v4 }
0x2558   :  { %13124 = vmatmul.mubr.msk.f32.vlgmr.msra.gmra.mxu1 %vm198_vm2, %v5670_v19 }
0x2559   :  { %13133 = vmatprep.mubr.msk.f32.mxu1 %vm13932_vm1, %v13931_v4 }
0x25d8   :  { %v5751_v20 = vpop.xlane.xlu1 %5750 }
0x25d9   :  { %v5755_v21 = vsub.f32 %v5747_v10, %v5751_v20  ;;  %v4166_v10 = vsel %vm113_vm0, %v14706_v51, 0.0 }
0x25db   :  { %v5757_v23 = vmul.f32 1.442695, %v5755_v21 }
0x25dd   :  { %13639 = vpow2.f32 %v5757_v23 }
0x25ea   :  { %v13640_v44 = vpop.eup %13639 }
0x25eb   :  { %v5761_v46 = vsel %vm352_vm3, %v13640_v44, 0.0 }
0x2614   :  { %v13115_v25 = vpop.f32.mrf.mxu1 }
0x2615   :  { %v14693_v27 = vadd.f32 %v13115_v25, %v5169_v24 }
0x2616   :  { %v5580_v28 = vpop.f32.mrf.mxu1 }
0x2617   :  { %v14695_v34 = vadd.f32 %v5580_v28, %v5164_v26 }
0x2618   :  { %v5743_v38 = vpop.f32.mrf.mxu1 }
0x2619   :  { %v5748_v40 = vmul.f32 0.5, %v5743_v38 }
0x261a   :  { %v13125_v42 = vpop.f32.mrf.mxu1 }
0x261b   :  { %v5752_v43 = vsel %vm352_vm3, %v5748_v40, -inf }
0x261c   :  { %5753 = vmax.xlane.f32.xlu0 %v5752_v43 }
0x2620   :  { %5762 = vadd.xlane.f32.xlu0 %v5761_v46 }
0x2636   :  { %5771 = vrot.lane.b32.xlu0 %v14535_v39, %s13944_s30  ;;  %v4172_v39 = vmul.f32 %v14706_v51, %v14706_v51 }
0x2638   :  { %v4176_v60 = vsel %vm113_vm0, %v4172_v39, 0.0 }
0x2655   :  { %4164 = vadd.xlane.f32.xlu0 %v4163_v8 }
0x2659   :  { %4174 = vadd.xlane.f32.xlu0 %v4173_v2 }
0x265d   :  { %4177 = vadd.xlane.f32.xlu0 %v4176_v60 }
0x26a5   :  { %v5754_v53 = vpop.xlane.xlu0 %5753 }
0x26a6   :  { %v5756_v52 = vsub.f32 %v5748_v40, %v5754_v53 }
0x26a8   :  { %v5759_v61 = vmul.f32 1.442695, %v5756_v52 }
0x26a9   :  { %v5763_v3 = vpop.xlane.xlu0 %5762 }
0x26aa   :  { %13641 = vpow2.f32 %v5759_v61 }
0x26ab   :  { %13643 = vrcp.f32 %v5763_v3 }
0x26ad   :  { %v5772_v0 = vpop.permute.xlu0 %5771 }
0x26ae   :  { %13127 = vmatpush3.msra.mxu0 %v5772_v0 }
0x26b7   :  { %v13642_v48 = vpop.eup %13641 }
0x26b8   :  { %v13644_v62 = vpop.eup %13643  ;;  %v5764_v12 = vsel %vm352_vm3, %v13642_v48, 0.0 }
0x26b9   :  { %5765 = vadd.xlane.f32.xlu1 %v5764_v12  ;;  %v5768_v63 = vmul.f32 %v13644_v62, %v13640_v44  ;;  %v106_v12 = vld [vmem:[#allocation10 + $0x28] sm:$0x3f] }
0x26bb   :  { %13129 = vmatmul.mubr.msk.f32.vlgmr.msra.gmra.mxu0 %vm352_vm3, %v5768_v63 }
0x26ca   :  { %5847 = vrot.lane.b32.xlu1 %v14533_v36, %s13944_s30 }
0x26ce   :  { %5923 = vrot.lane.b32.xlu1 %v3829_v59, %s13946_s7 }
0x26de   :  { %v4165_v5 = vpop.xlane.xlu0 %4164 }
0x26df   :  { %v4169_v47 = vmul.f32 0.0625, %v4165_v5 }
0x26e1   :  { %v4181_v13 = vmul.f32 %v4169_v47, %v4169_v47  ;;  %v4185_v11 = vsub.f32 %v4161_v50, %v4169_v47  ;;  %v4238_v47 = vrot.slane %v106_v12, %v14251_v49 }
0x26e2   :  { %v4175_v29 = vpop.xlane.xlu0 %4174 }
0x26e3   :  { %v4179_v9 = vmul.f32 0.0625, %v4175_v29 }
0x26e5   :  { %v4183_v35 = vsub.f32 %v4179_v9, %v4181_v13  ;;  %v14740_v13 = vrot.slane %v106_v12, %v14260_v57 }
0x26e6   :  { %v4178_v28 = vpop.xlane.xlu0 %4177 }
0x26e7   :  { %v4187_v55 = vadd.f32 1e-05, %v4183_v35  ;;  %v4180_v44 = vmul.f32 0.0625, %v4178_v28 }
0x26e9   :  { %13645 = vrsqrt.f32 %v4187_v55 }
0x26f2   :  { %4167 = vadd.xlane.f32.xlu1 %v4166_v10  ;;  %v14748_v10 = vld [vmem:[#allocation7 + $0x30] sm:$0xff] }
0x26f6   :  { %v13646_v36 = vpop.eup %13645 }
0x26f7   :  { %v4191_v14 = vmul.f32 %v13646_v36, %v4185_v11  ;;  %v14752_v11 = vld [vmem:[#allocation7 + $0x10] sm:$0xff] }
0x26f9   :  { %v4197_v59 = vmul.f32 %v4196_v33, %v4191_v14 }
0x26fb   :  { %v4203_v15 = vadd.f32 %v4202_v45, %v4197_v59 }
0x26fd   :  { %v4205_v56 = vsel %vm113_vm0, %v4203_v15, 0.0  ;;  %v4213_v19 = vmul.f32 %v4203_v15, %v4203_v15 }
0x26fe   :  { %4206 = vadd.xlane.f32.xlu1 %v4205_v56 }
0x26ff   :  { %v4215_v20 = vsel %vm113_vm0, %v4213_v19, 0.0 }
0x2702   :  { %4216 = vadd.xlane.f32.xlu1 %v4215_v20 }
0x2742   :  { %v5766_v21 = vpop.xlane.xlu1 %5765 }
0x2743   :  { %13647 = vrcp.f32 %v5766_v21 }
0x2746   :  { %v5848_v23 = vpop.permute.xlu1 %5847 }
0x2747   :  { %13132 = vmatpush3.msra.mxu1 %v5848_v23 }
0x2748   :  { %13141 = vmatprep.subr.mxu1 %v14748_v10 }
0x274a   :  { %v5924_v24 = vpop.permute.xlu1 %5923 }
0x274b   :  { %13136 = vmatprep.subr.msk.mxu0 %vm869_vm4, %v5924_v24 }
0x274c   :  { %13137 = vmatpush3.msk.msra.mxu0 %vm869_vm4, %v5924_v24 }
0x2750   :  { %v13648_v25 = vpop.eup %13647 }
0x2751   :  { %v5770_v26 = vmul.f32 %v13648_v25, %v13642_v48 }
0x2753   :  { %13134 = vmatmul.mubr.msk.f32.vlgmr.msra.gmra.mxu1 %vm352_vm3, %v5770_v26 }
0x2754   :  { %13142 = vmatpush3.msra.mxu1 %v14748_v10 }
0x2755   :  { %13143 = vmatprep.subr.mxu1 %v14752_v11 }
0x2756   :  { %13144 = vmatpush3.msra.mxu1 %v14752_v11 }
0x2757   :  { %13155 = vmatprep.subr.mxu1 %v13931_v4 }
0x277b   :  { %v5843_v38 = vpop.f32.mrf.mxu0  ;;  %v4168_v40 = vpop.xlane.xlu1 %4167 }
0x277c   :  { %v4170_v42 = vmul.f32 0.0625, %v4168_v40  ;;  %13138 = vmatprep.mubr.msk.f32.mxu0 %vm198_vm2, %v5843_v38 }
0x277d   :  { %v13130_v43 = vpop.f32.mrf.mxu0 }
0x277e   :  { %v4182_v46 = vmul.f32 %v4170_v42, %v4170_v42  ;;  %v4186_v31 = vsub.f32 %v14706_v51, %v4170_v42 }
0x2780   :  { %v4184_v16 = vsub.f32 %v4180_v44, %v4182_v46 }
0x2782   :  { %v4188_v1 = vadd.f32 1e-05, %v4184_v16 }
0x2784   :  { %13649 = vrsqrt.f32 %v4188_v1 }
0x2787   :  { %v4207_v53 = vpop.xlane.xlu1 %4206 }
0x2788   :  { %v4211_v61 = vmul.f32 0.0625, %v4207_v53 }
0x278a   :  { %v4223_v51 = vmul.f32 %v4211_v61, %v4211_v61  ;;  %v4227_v63 = vsub.f32 %v4203_v15, %v4211_v61 }
0x278b   :  { %v4217_v52 = vpop.xlane.xlu1 %4216 }
0x278c   :  { %v4221_v3 = vmul.f32 0.0625, %v4217_v52 }
0x278e   :  { %v4225_v0 = vsub.f32 %v4221_v3, %v4223_v51 }
0x2790   :  { %v4229_v48 = vadd.f32 1e-05, %v4225_v0 }
0x2791   :  { %v13650_v6 = vpop.eup %13649 }
0x2792   :  { %v4192_v50 = vmul.f32 %v13650_v6, %v4186_v31  ;;  %13651 = vrsqrt.f32 %v4229_v48 }
0x2794   :  { %v4198_v8 = vmul.f32 %v4196_v33, %v4192_v50  ;;  %v6013_v33 = vrot.slane %v14529_v22, %v14205_v54 }
0x2796   :  { %v14731_v58 = vadd.f32 %v4202_v45, %v4198_v8 }
0x2798   :  { %v4208_v2 = vsel %vm113_vm0, %v14731_v58, 0.0  ;;  %v4214_v39 = vmul.f32 %v14731_v58, %v14731_v58 }
0x2799   :  { %4209 = vadd.xlane.f32.xlu0 %v4208_v2 }
0x279a   :  { %v4218_v60 = vsel %vm113_vm0, %v4214_v39, 0.0 }
0x279d   :  { %4219 = vadd.xlane.f32.xlu0 %v4218_v60 }
0x279f   :  { %v13652_v62 = vpop.eup %13651 }
0x27a0   :  { %v4233_v5 = vmul.f32 %v13652_v62, %v4227_v63 }
0x27a2   :  { %v4239_v29 = vmul.f32 %v4238_v47, %v4233_v5  ;;  %v6051_v5 = vrot.slane %v14529_v22, %v14289_v41 }
0x27a4   :  { %v14743_v35 = vadd.f32 %v14740_v13, %v4239_v29  ;;  %v14782_v29 = vld [vmem:[#allocation10 + $0x18] sm:$0xff] }
0x2813   :  { %v5919_v9 = vpop.f32.mrf.mxu1 }
0x2814   :  { %13139 = vmatmul.mubr.msk.f32.vlgmr.msra.gmra.mxu0 %vm198_vm2, %v5919_v9 }
0x2815   :  { %v13135_v55 = vpop.f32.mrf.mxu1  ;;  %13152 = vmatprep.mubr.msk.f32.mxu0 %vm113_vm0, %v14743_v35 }
0x28d4   :  { %v13140_v36 = vpop.f32.mrf.mxu0 }
0x28d5   :  { %v6009_v14 = vadd.f32 %v13140_v36, %v14693_v27  ;;  %v6057_v36 = vrot.slane %v14782_v29, %v14032_v7 }
0x28d6   :  { %v5999_v45 = vpop.f32.mrf.mxu0 }
0x28d7   :  { %v6015_v59 = vadd.f32 %v6013_v33, %v6009_v14  ;;  %v6008_v15 = vadd.f32 %v5999_v45, %v14695_v34 }
0x28d9   :  { %v6017_v56 = vadd.f32 %v6015_v59, %v14519_v18  ;;  %v6014_v19 = vadd.f32 %v6013_v33, %v6008_v15  ;;  %v6148_v15 = vrot.slane %v14529_v22, %v14260_v57 }
0x28db   :  { %v6016_v20 = vadd.f32 %v6014_v19, %v14513_v17  ;;  %v6021_v21 = vsel %vm113_vm0, %v6017_v56, 0.0  ;;  %v6027_v23 = vmul.f32 %v6017_v56, %v6017_v56  ;;  %v4210_v17 = vpop.xlane.xlu0 %4209 }
0x28dc   :  { %6022 = vadd.xlane.f32.xlu0 %v6021_v21  ;;  %v4212_v34 = vmul.f32 0.0625, %v4210_v17 }
0x28dd   :  { %v6018_v24 = vsel %vm113_vm0, %v6016_v20, 0.0  ;;  %v6026_v25 = vmul.f32 %v6016_v20, %v6016_v20  ;;  %v6031_v26 = vsel %vm113_vm0, %v6027_v23, 0.0  ;;  %v6063_v23 = vrot.slane %v14529_v22, %v14251_v49 }
0x28de   :  { %6019 = vadd.xlane.f32.xlu1 %v6018_v24  ;;  %v4224_v38 = vmul.f32 %v4212_v34, %v4212_v34  ;;  %v4228_v1 = vsub.f32 %v14731_v58, %v4212_v34 }
0x28df   :  { %v6028_v27 = vsel %vm113_vm0, %v6026_v25, 0.0  ;;  %v4220_v18 = vpop.xlane.xlu0 %4219 }
0x28e0   :  { %6032 = vadd.xlane.f32.xlu0 %v6031_v26  ;;  %v4222_v28 = vmul.f32 0.0625, %v4220_v18 }
0x28e2   :  { %6029 = vadd.xlane.f32.xlu1 %v6028_v27  ;;  %v4226_v40 = vsub.f32 %v4222_v28, %v4224_v38 }
0x28e4   :  { %v4230_v42 = vadd.f32 1e-05, %v4226_v40 }
0x28e6   :  { %13653 = vrsqrt.f32 %v4230_v42 }
0x28f3   :  { %6153 = vrot.lane.b32.xlu1 %v14748_v10, %s13933_s2  ;;  %v13654_v46 = vpop.eup %13653 }
0x28f4   :  { %v4234_v2 = vmul.f32 %v13654_v46, %v4228_v1 }
0x28f6   :  { %6151 = vrot.lane.b32.xlu0 %v14752_v11, %s13933_s2  ;;  %v4240_v51 = vmul.f32 %v4238_v47, %v4234_v2 }
0x28f8   :  { %v14773_v58 = vadd.f32 %v14740_v13, %v4240_v51 }
0x2965   :  { %v6023_v43 = vpop.xlane.xlu0 %6022 }
0x2966   :  { %v6025_v44 = vmul.f32 0.0625, %v6023_v43 }
0x2967   :  { %v6020_v16 = vpop.xlane.xlu1 %6019 }
0x2968   :  { %v6024_v31 = vmul.f32 0.0625, %v6020_v16  ;;  %v6037_v50 = vmul.f32 %v6025_v44, %v6025_v44  ;;  %v6041_v12 = vsub.f32 %v6017_v56, %v6025_v44 }
0x2969   :  { %v6033_v6 = vpop.xlane.xlu0 %6032 }
0x296a   :  { %v6035_v8 = vmul.f32 0.0625, %v6033_v6  ;;  %v6036_v60 = vmul.f32 %v6024_v31, %v6024_v31  ;;  %v6040_v47 = vsub.f32 %v6016_v20, %v6024_v31 }
0x296b   :  { %v6030_v39 = vpop.xlane.xlu1 %6029 }
0x296c   :  { %v6039_v53 = vsub.f32 %v6035_v8, %v6037_v50  ;;  %v6034_v52 = vmul.f32 0.0625, %v6030_v39 }
0x296d   :  { %v6152_v48 = vpop.permute.xlu0 %6151 }
0x296e   :  { %v6043_v61 = vadd.f32 1e-05, %v6039_v53  ;;  %v6038_v3 = vsub.f32 %v6034_v52, %v6036_v60 }
0x296f   :  { %v6154_v0 = vpop.permute.xlu1 %6153 }
0x2970   :  { %13655 = vrsqrt.f32 %v6043_v61  ;;  %v6042_v62 = vadd.f32 1e-05, %v6038_v3  ;;  %13148 = vmatprep.subr.mxu0 %v6154_v0 }
0x2971   :  { %13149 = vmatpush3.msra.mxu0 %v6154_v0 }
0x2972   :  { %13657 = vrsqrt.f32 %v6042_v62  ;;  %13150 = vmatprep.subr.mxu0 %v6152_v48 }
0x2973   :  { %13151 = vmatpush3.msra.mxu0 %v6152_v48 }
0x2974   :  { %13153 = vmatmul.mubr.msk.f32.vlgmr.msra.gmra.mxu0 %vm113_vm0, %v14773_v58  ;;  %13160 = vmatprep.subr.mxu0 %v13931_v4 }
0x2975   :  { %13162 = vmatprep.mubr.msk.f32.mxu0 %vm13932_vm1, %v13931_v4 }
0x297d   :  { %v13656_v63 = vpop.eup %13655 }
0x297e   :  { %v6047_v9 = vmul.f32 %v13656_v63, %v6041_v12 }
0x297f   :  { %v13658_v13 = vpop.eup %13657 }
0x2980   :  { %v6046_v55 = vmul.f32 %v13658_v13, %v6040_v47  ;;  %v6053_v33 = vmul.f32 %v6051_v5, %v6047_v9 }
0x2982   :  { %v6052_v14 = vmul.f32 %v6051_v5, %v6046_v55  ;;  %v14788_v59 = vadd.f32 %v6057_v36, %v6053_v33 }
0x2984   :  { %v14786_v45 = vadd.f32 %v6057_v36, %v6052_v14 }
0x2986   :  { %13145 = vmatprep.mubr.msk.f32.mxu1 %vm113_vm0, %v14786_v45 }
0x2987   :  { %13146 = vmatmul.mubr.msk.f32.vlgmr.msra.gmra.mxu1 %vm113_vm0, %v14788_v59 }
0x2988   :  { %13157 = vmatprep.mubr.msk.f32.mxu1 %vm13932_vm1, %v13931_v4 }
0x2a34   :  { %v13154_v56 = vpop.f32.mrf.mxu0 }
0x2a35   :  { %v14798_v19 = vadd.f32 %v13154_v56, %v6148_v15 }
0x2a36   :  { %v6229_v20 = vpop.f32.mrf.mxu0 }
0x2a37   :  { %v14800_v21 = vadd.f32 %v6229_v20, %v6148_v15  ;;  %13161 = vmatpush3.xpose.msk.msra.mxu0 %vm198_vm2, %v14798_v19 }
0x2a38   :  { %13170 = vmatprep.subr.mxu0 %v13931_v4 }
0x2a39   :  { %13156 = vmatpush3.xpose.msk.msra.mxu1 %vm198_vm2, %v14800_v21 }
0x2a3a   :  { %13165 = vmatprep.subr.mxu1 %v13931_v4 }
0x2a47   :  { %v13147_v24 = vpop.f32.mrf.mxu1 }
0x2a48   :  { %v14810_v25 = vadd.f32 %v13147_v24, %v6063_v23  ;;  %v6898_v24 = vrot.slane %v14752_v11, 4 }
0x2a49   :  { %v6136_v26 = vpop.f32.mrf.mxu1 }
0x2a4a   :  { %v14812_v27 = vadd.f32 %v6136_v26, %v6063_v23  ;;  %13163 = vmatmul.mubr.msk.f32.vlgmr.msra.gmra.mxu0 %vm198_vm2, %v14810_v25 }
0x2a4b   :  { %13172 = vmatprep.mubr.msk.f32.mxu0 %vm13932_vm1, %v13931_v4 }
0x2a4c   :  { %13158 = vmatmul.mubr.msk.f32.vlgmr.msra.gmra.mxu1 %vm198_vm2, %v14812_v27 }
0x2a4d   :  { %13167 = vmatprep.mubr.msk.f32.mxu1 %vm13932_vm1, %v13931_v4 }
0x2b0a   :  { %v6386_v17 = vpop.f32.mrf.mxu0 }
0x2b0b   :  { %v6391_v22 = vmul.f32 0.5, %v6386_v17 }
0x2b0c   :  { %v6310_v18 = vpop.f32.mrf.mxu1  ;;  %v13164_v34 = vpop.f32.mrf.mxu0 }
0x2b0d   :  { %v6390_v28 = vmul.f32 0.5, %v6310_v18  ;;  %v6395_v38 = vsel %vm352_vm3, %v6391_v22, -inf }
0x2b0e   :  { %6396 = vmax.xlane.f32.xlu0 %v6395_v38  ;;  %v13159_v40 = vpop.f32.mrf.mxu1 }
0x2b0f   :  { %v6392_v42 = vsel %vm352_vm3, %v6390_v28, -inf }
0x2b10   :  { %6393 = vmax.xlane.f32.xlu1 %v6392_v42 }
0x2b21   :  { %6414 = vrot.lane.b32.xlu1 %v14800_v21, %s13933_s2 }
0x2b24   :  { %6490 = vrot.lane.b32.xlu0 %v14798_v19, %s13933_s2 }
0x2b25   :  { %6568 = vrot.lane.b32.xlu1 %v14800_v21, %s13935_s19 }
0x2b29   :  { %6646 = vrot.lane.b32.xlu1 %v14798_v19, %s13935_s19 }
0x2b97   :  { %v6397_v43 = vpop.xlane.xlu0 %6396 }
0x2b98   :  { %v6399_v44 = vsub.f32 %v6391_v22, %v6397_v43 }
0x2b99   :  { %v6394_v46 = vpop.xlane.xlu1 %6393 }
0x2b9a   :  { %v6402_v16 = vmul.f32 1.442695, %v6399_v44  ;;  %v6398_v1 = vsub.f32 %v6390_v28, %v6394_v46 }
0x2b9b   :  { %v6491_v31 = vpop.permute.xlu0 %6490 }
0x2b9c   :  { %13659 = vpow2.f32 %v6402_v16  ;;  %v6400_v6 = vmul.f32 1.442695, %v6398_v1  ;;  %13171 = vmatpush3.msra.mxu0 %v6491_v31 }
0x2b9d   :  { %v6415_v50 = vpop.permute.xlu1 %6414  ;;  %13180 = vmatprep.subr.mxu0 %v13931_v4 }
0x2b9e   :  { %13661 = vpow2.f32 %v6400_v6  ;;  %13166 = vmatpush3.msra.mxu1 %v6415_v50 }
0x2b9f   :  { %13175 = vmatprep.subr.mxu1 %v13931_v4 }
0x2ba1   :  { %v6569_v53 = vpop.permute.xlu1 %6568 }
0x2ba5   :  { %v6647_v52 = vpop.permute.xlu1 %6646 }
0x2ba9   :  { %v13660_v8 = vpop.eup %13659 }
0x2baa   :  { %v6407_v2 = vsel %vm352_vm3, %v13660_v8, 0.0 }
0x2bab   :  { %v13662_v39 = vpop.eup %13661  ;;  %6408 = vadd.xlane.f32.xlu0 %v6407_v2 }
0x2bac   :  { %v6404_v60 = vsel %vm352_vm3, %v13662_v39, 0.0 }
0x2bad   :  { %6405 = vadd.xlane.f32.xlu1 %v6404_v60 }
0x2bbe   :  { %6644 = vrot.lane.b32.xlu1 %v14810_v25, %s13935_s19 }
0x2bc1   :  { %6566 = vrot.lane.b32.xlu0 %v14812_v27, %s13935_s19 }
0x2c34   :  { %v6409_v61 = vpop.xlane.xlu0 %6408 }
0x2c35   :  { %13663 = vrcp.f32 %v6409_v61 }
0x2c36   :  { %v6406_v3 = vpop.xlane.xlu1 %6405 }
0x2c37   :  { %13665 = vrcp.f32 %v6406_v3 }
0x2c38   :  { %v6567_v63 = vpop.permute.xlu0 %6566 }
0x2c3a   :  { %v6645_v12 = vpop.permute.xlu1 %6644 }
0x2c42   :  { %v13664_v51 = vpop.eup %13663 }
0x2c43   :  { %v6413_v0 = vmul.f32 %v13664_v51, %v13660_v8 }
0x2c44   :  { %v13666_v48 = vpop.eup %13665 }
0x2c45   :  { %13173 = vmatmul.mubr.msk.f32.vlgmr.msra.gmra.mxu0 %vm352_vm3, %v6413_v0  ;;  %v6411_v62 = vmul.f32 %v13666_v48, %v13662_v39 }
0x2c46   :  { %13181 = vmatpush3.xpose.msk.msra.mxu0 %vm198_vm2, %v6647_v52  ;;  %13182 = vmatprep.mubr.msk.f32.mxu0 %vm13932_vm1, %v13931_v4 }
0x2c47   :  { %13168 = vmatmul.mubr.msk.f32.vlgmr.msra.gmra.mxu1 %vm352_vm3, %v6411_v62  ;;  %13190 = vmatprep.subr.mxu0 %v13931_v4 }
0x2c48   :  { %13176 = vmatpush3.xpose.msk.msra.mxu1 %vm198_vm2, %v6569_v53  ;;  %13177 = vmatprep.mubr.msk.f32.mxu1 %vm13932_vm1, %v13931_v4 }
0x2c49   :  { %13183 = vmatmul.mubr.msk.f32.vlgmr.msra.gmra.mxu0 %vm198_vm2, %v6645_v12  ;;  %13185 = vmatprep.subr.mxu1 %v13931_v4 }
0x2c4a   :  { %13192 = vmatprep.mubr.msk.f32.mxu0 %vm13932_vm1, %v13931_v4 }
0x2c4b   :  { %13178 = vmatmul.mubr.msk.f32.vlgmr.msra.gmra.mxu1 %vm198_vm2, %v6567_v63 }
0x2c4c   :  { %13187 = vmatprep.mubr.msk.f32.mxu1 %vm13932_vm1, %v13931_v4 }
0x2d05   :  { %v6562_v5 = vpop.f32.mrf.mxu0 }
0x2d07   :  { %v6486_v47 = vpop.f32.mrf.mxu1  ;;  %v13174_v9 = vpop.f32.mrf.mxu0 }
0x2d09   :  { %v13169_v13 = vpop.f32.mrf.mxu1  ;;  %v6718_v55 = vpop.f32.mrf.mxu0 }
0x2d0a   :  { %v6723_v33 = vmul.f32 0.5, %v6718_v55 }
0x2d0b   :  { %v6640_v36 = vpop.f32.mrf.mxu1  ;;  %v13184_v14 = vpop.f32.mrf.mxu0 }
0x2d0c   :  { %v6722_v15 = vmul.f32 0.5, %v6640_v36  ;;  %v6727_v56 = vsel %vm352_vm3, %v6723_v33, -inf }
0x2d0d   :  { %6728 = vmax.xlane.f32.xlu1 %v6727_v56  ;;  %v13179_v20 = vpop.f32.mrf.mxu1 }
0x2d0e   :  { %v6724_v23 = vsel %vm352_vm3, %v6722_v15, -inf }
0x2d0f   :  { %6725 = vmax.xlane.f32.xlu0 %v6724_v23 }
0x2d1e   :  { %6746 = vrot.lane.b32.xlu1 %v14800_v21, %s13936_s20 }
0x2d22   :  { %6899 = vrot.lane.b32.xlu1 %v6898_v24, %s13940_s26 }
0x2d26   :  { %6984 = vrot.lane.b32.xlu1 %v14752_v11, %s13940_s26 }
0x2d2a   :  { %7149 = vrot.lane.b32.xlu1 %v14798_v19, %s13939_s25 }
0x2d2e   :  { %7147 = vrot.lane.b32.xlu1 %v14810_v25, %s13939_s25 }
0x2d96   :  { %v6729_v26 = vpop.xlane.xlu1 %6728 }
0x2d97   :  { %v6731_v17 = vsub.f32 %v6723_v33, %v6729_v26 }
0x2d98   :  { %v6726_v22 = vpop.xlane.xlu0 %6725 }
0x2d99   :  { %v6734_v18 = vmul.f32 1.442695, %v6731_v17  ;;  %v6730_v34 = vsub.f32 %v6722_v15, %v6726_v22 }
0x2d9a   :  { %v6747_v28 = vpop.permute.xlu1 %6746 }
0x2d9b   :  { %13667 = vpow2.f32 %v6734_v18  ;;  %v6732_v38 = vmul.f32 1.442695, %v6730_v34  ;;  %13186 = vmatpush3.msra.mxu1 %v6747_v28 }
0x2d9d   :  { %13669 = vpow2.f32 %v6732_v38 }
0x2d9e   :  { %v6900_v40 = vpop.permute.xlu1 %6899 }
0x2d9f   :  { %13195 = vmatprep.subr.msk.mxu1 %vm869_vm4, %v6900_v40 }
0x2da2   :  { %v6985_v6 = vpop.permute.xlu1 %6984 }
0x2da6   :  { %v7150_v39 = vpop.permute.xlu1 %7149 }
0x2da8   :  { %v13668_v42 = vpop.eup %13667 }
0x2da9   :  { %v6739_v43 = vsel %vm352_vm3, %v13668_v42, 0.0 }
0x2daa   :  { %v13670_v44 = vpop.eup %13669  ;;  %6740 = vadd.xlane.f32.xlu0 %v6739_v43  ;;  %v7148_v53 = vpop.permute.xlu1 %7147 }
0x2dab   :  { %v6736_v46 = vsel %vm352_vm3, %v13670_v44, 0.0 }
0x2dae   :  { %6737 = vadd.xlane.f32.xlu0 %v6736_v46 }
0x2dc4   :  { %6822 = vrot.lane.b32.xlu0 %v14798_v19, %s13936_s20 }
0x2dc8   :  { %7071 = vrot.lane.b32.xlu0 %v14800_v21, %s13939_s25 }
0x2dcc   :  { %7069 = vrot.lane.b32.xlu0 %v14812_v27, %s13939_s25 }
0x2e33   :  { %v6741_v16 = vpop.xlane.xlu0 %6740 }
0x2e34   :  { %13671 = vrcp.f32 %v6741_v16 }
0x2e37   :  { %v6738_v1 = vpop.xlane.xlu0 %6737 }
0x2e38   :  { %13673 = vrcp.f32 %v6738_v1 }
0x2e3b   :  { %v6823_v31 = vpop.permute.xlu0 %6822 }
0x2e3c   :  { %13191 = vmatpush3.msra.mxu0 %v6823_v31 }
0x2e3d   :  { %13200 = vmatprep.subr.msk.mxu0 %vm869_vm4, %v6985_v6 }
0x2e3f   :  { %v7072_v3 = vpop.permute.xlu0 %7071 }
0x2e41   :  { %v13672_v50 = vpop.eup %13671 }
0x2e42   :  { %v6745_v8 = vmul.f32 %v13672_v50, %v13668_v42 }
0x2e43   :  { %v7070_v63 = vpop.permute.xlu0 %7069 }
0x2e44   :  { %13193 = vmatmul.mubr.msk.f32.vlgmr.msra.gmra.mxu0 %vm352_vm3, %v6745_v8 }
0x2e45   :  { %v13674_v2 = vpop.eup %13673  ;;  %13202 = vmatprep.mubr.msk.f32.mxu0 %vm198_vm2, %v6486_v47  ;;  %13201 = vmatpush3.msk.msra.mxu0 %vm869_vm4, %v6985_v6 }
0x2e46   :  { %13210 = vmatprep.subr.mxu0 %v13931_v4  ;;  %v6743_v60 = vmul.f32 %v13674_v2, %v13670_v44 }
0x2e48   :  { %13188 = vmatmul.mubr.msk.f32.vlgmr.msra.gmra.mxu1 %vm352_vm3, %v6743_v60  ;;  %13203 = vmatmul.mubr.msk.f32.vlgmr.msra.gmra.mxu0 %vm198_vm2, %v6562_v5 }
0x2e49   :  { %13211 = vmatpush3.xpose.msk.msra.mxu0 %vm198_vm2, %v7150_v39  ;;  %13212 = vmatprep.mubr.msk.f32.mxu0 %vm13932_vm1, %v13931_v4 }
0x2e4a   :  { %13196 = vmatpush3.msk.msra.mxu1 %vm869_vm4, %v6900_v40  ;;  %13220 = vmatprep.subr.mxu0 %v13931_v4 }
0x2e4b   :  { %13205 = vmatprep.subr.mxu1 %v13931_v4 }
0x2e4c   :  { %13213 = vmatmul.mubr.msk.f32.vlgmr.msra.gmra.mxu0 %vm198_vm2, %v7148_v53 }
0x2e4d   :  { %13222 = vmatprep.mubr.msk.f32.mxu0 %vm13932_vm1, %v13931_v4 }
0x2f04   :  { %v6894_v52 = vpop.f32.mrf.mxu0 }
0x2f06   :  { %v13194_v61 = vpop.f32.mrf.mxu0 }
0x2f08   :  { %v6818_v51 = vpop.f32.mrf.mxu1  ;;  %v14893_v0 = vpop.f32.mrf.mxu0 }
0x2f09   :  { %13197 = vmatprep.mubr.msk.f32.mxu1 %vm198_vm2, %v6818_v51 }
0x2f0a   :  { %v13189_v48 = vpop.f32.mrf.mxu1  ;;  %13198 = vmatmul.mubr.msk.f32.vlgmr.msra.gmra.mxu1 %vm198_vm2, %v6894_v52  ;;  %v14897_v62 = vpop.f32.mrf.mxu0 }
0x2f0b   :  { %13206 = vmatpush3.xpose.msk.msra.mxu1 %vm198_vm2, %v7072_v3  ;;  %13207 = vmatprep.mubr.msk.f32.mxu1 %vm13932_vm1, %v13931_v4 }
0x2f0c   :  { %v7221_v12 = vpop.f32.mrf.mxu0  ;;  %13215 = vmatprep.subr.mxu1 %v13931_v4 }
0x2f0d   :  { %v7226_v5 = vmul.f32 0.5, %v7221_v12 }
0x2f0e   :  { %13208 = vmatmul.mubr.msk.f32.vlgmr.msra.gmra.mxu1 %vm198_vm2, %v7070_v63  ;;  %v13214_v47 = vpop.f32.mrf.mxu0 }
0x2f0f   :  { %v7230_v9 = vsel %vm352_vm3, %v7226_v5, -inf  ;;  %13217 = vmatprep.mubr.msk.f32.mxu1 %vm13932_vm1, %v13931_v4 }
0x2f10   :  { %7231 = vmax.xlane.f32.xlu1 %v7230_v9 }
0x2f21   :  { %7249 = vrot.lane.b32.xlu1 %v14800_v21, %s13938_s22 }
0x2f25   :  { %7401 = vrot.lane.b32.xlu1 %v14748_v10, %s13940_s26 }
0x2f29   :  { %7490 = vrot.lane.b32.xlu1 %v14800_v21, %s13943_s29 }
0x2f2d   :  { %7488 = vrot.lane.b32.xlu1 %v14812_v27, %s13943_s29 }
0x2f99   :  { %v7232_v13 = vpop.xlane.xlu1 %7231 }
0x2f9a   :  { %v7234_v36 = vsub.f32 %v7226_v5, %v7232_v13 }
0x2f9c   :  { %v7237_v14 = vmul.f32 1.442695, %v7234_v36 }
0x2f9d   :  { %v7250_v55 = vpop.permute.xlu1 %7249 }
0x2f9e   :  { %13216 = vmatpush3.msra.mxu1 %v7250_v55  ;;  %13675 = vpow2.f32 %v7237_v14 }
0x2fa1   :  { %v7402_v33 = vpop.permute.xlu1 %7401 }
0x2fa2   :  { %13225 = vmatprep.subr.msk.mxu1 %vm869_vm4, %v7402_v33 }
0x2fa5   :  { %v7491_v44 = vpop.permute.xlu1 %7490 }
0x2fab   :  { %v13676_v17 = vpop.eup %13675 }
0x2fac   :  { %v7242_v27 = vsel %vm352_vm3, %v13676_v17, 0.0 }
0x2fca   :  { %v14916_v15 = vpop.f32.mrf.mxu1 }
0x2fcb   :  { %v7066_v63 = vadd.f32 %v14893_v0, %v14916_v15 }
0x2fcc   :  { %v14918_v56 = vpop.f32.mrf.mxu1 }
0x2fcd   :  { %v7061_v47 = vadd.f32 %v14897_v62, %v14918_v56 }
0x2fce   :  { %v7143_v20 = vpop.f32.mrf.mxu1 }
0x2fcf   :  { %v7225_v23 = vmul.f32 0.5, %v7143_v20 }
0x2fd0   :  { %v13209_v24 = vpop.f32.mrf.mxu1 }
0x2fd1   :  { %v7227_v26 = vsel %vm352_vm3, %v7225_v23, -inf }
0x2fd2   :  { %7228 = vmax.xlane.f32.xlu0 %v7227_v26 }
0x2fd6   :  { %7243 = vadd.xlane.f32.xlu0 %v7242_v27 }
0x305b   :  { %v7229_v22 = vpop.xlane.xlu0 %7228 }
0x305c   :  { %v7233_v18 = vsub.f32 %v7225_v23, %v7229_v22 }
0x305e   :  { %v7235_v34 = vmul.f32 1.442695, %v7233_v18 }
0x305f   :  { %v7244_v40 = vpop.xlane.xlu0 %7243 }
0x3060   :  { %13677 = vpow2.f32 %v7235_v34 }
0x3061   :  { %13679 = vrcp.f32 %v7244_v40 }
0x306d   :  { %v13678_v28 = vpop.eup %13677 }
0x306e   :  { %v7239_v38 = vsel %vm352_vm3, %v13678_v28, 0.0  ;;  %v13680_v43 = vpop.eup %13679 }
0x306f   :  { %7240 = vadd.xlane.f32.xlu0 %v7239_v38  ;;  %v7248_v16 = vmul.f32 %v13680_v43, %v13676_v17 }
0x3085   :  { %7325 = vrot.lane.b32.xlu0 %v14798_v19, %s13938_s22 }
0x3089   :  { %7568 = vrot.lane.b32.xlu0 %v14798_v19, %s13943_s29 }
0x308d   :  { %7566 = vrot.lane.b32.xlu0 %v14810_v25, %s13943_s29  ;;  %v7489_v25 = vpop.permute.xlu1 %7488 }
0x30f8   :  { %v7241_v42 = vpop.xlane.xlu0 %7240 }
0x30f9   :  { %13681 = vrcp.f32 %v7241_v42 }
0x30fc   :  { %v7326_v46 = vpop.permute.xlu0 %7325 }
0x30fd   :  { %13221 = vmatpush3.msra.mxu0 %v7326_v46 }
0x30fe   :  { %13223 = vmatmul.mubr.msk.f32.vlgmr.msra.gmra.mxu0 %vm352_vm3, %v7248_v16  ;;  %13230 = vmatprep.subr.mxu0 %v13931_v4  ;;  %v14970_v16 = vld [vmem:[#allocation10 + $0x10] sm:$0xff] }
0x30ff   :  { %13231 = vmatpush3.xpose.msk.msra.mxu0 %vm198_vm2, %v7491_v44  ;;  %13232 = vmatprep.mubr.msk.f32.mxu0 %vm13932_vm1, %v13931_v4 }
0x3100   :  { %13240 = vmatprep.subr.mxu0 %v13931_v4  ;;  %v7569_v53 = vpop.permute.xlu0 %7568 }
0x3102   :  { %13233 = vmatmul.mubr.msk.f32.vlgmr.msra.gmra.mxu0 %vm198_vm2, %v7489_v25  ;;  %v7911_v25 = vrot.slane %v14970_v16, %v14222_v30 }
0x3103   :  { %13242 = vmatprep.mubr.msk.f32.mxu0 %vm13932_vm1, %v13931_v4 }
0x3104   :  { %v7567_v3 = vpop.permute.xlu0 %7566 }
0x3106   :  { %v13682_v1 = vpop.eup %13681 }
0x3107   :  { %v7246_v31 = vmul.f32 %v13682_v1, %v13678_v28 }
0x3109   :  { %13218 = vmatmul.mubr.msk.f32.vlgmr.msra.gmra.mxu1 %vm352_vm3, %v7246_v31 }
0x310a   :  { %13226 = vmatpush3.msk.msra.mxu1 %vm869_vm4, %v7402_v33 }
0x310b   :  { %13235 = vmatprep.subr.mxu1 %v13931_v4 }
0x31be   :  { %v7397_v6 = vpop.f32.mrf.mxu0 }
0x31c0   :  { %v13224_v50 = vpop.f32.mrf.mxu0 }
0x31c2   :  { %v7562_v8 = vpop.f32.mrf.mxu0 }
0x31c3   :  { %v7644_v2 = vmul.f32 0.5, %v7562_v8 }
0x31c4   :  { %v13234_v39 = vpop.f32.mrf.mxu0 }
0x31c5   :  { %v7646_v60 = vsel %vm352_vm3, %v7644_v2, -inf }
0x31c6   :  { %7647 = vmax.xlane.f32.xlu1 %v7646_v60 }
0x31c9   :  { %v7321_v52 = vpop.f32.mrf.mxu1 }
0x31ca   :  { %13227 = vmatprep.mubr.msk.f32.mxu1 %vm198_vm2, %v7321_v52 }
0x31cb   :  { %v13219_v61 = vpop.f32.mrf.mxu1  ;;  %13228 = vmatmul.mubr.msk.f32.vlgmr.msra.gmra.mxu1 %vm198_vm2, %v7397_v6 }
0x31cc   :  { %13236 = vmatpush3.xpose.msk.msra.mxu1 %vm198_vm2, %v7569_v53  ;;  %13237 = vmatprep.mubr.msk.f32.mxu1 %vm13932_vm1, %v13931_v4 }
0x31cd   :  { %13245 = vmatprep.subr.mxu1 %v13931_v4 }
0x31cf   :  { %13238 = vmatmul.mubr.msk.f32.vlgmr.msra.gmra.mxu1 %vm198_vm2, %v7567_v3 }
0x31d0   :  { %13247 = vmatprep.mubr.msk.f32.mxu1 %vm13932_vm1, %v13931_v4 }
0x324f   :  { %v7648_v51 = vpop.xlane.xlu1 %7647 }
0x3250   :  { %v7652_v48 = vsub.f32 %v7644_v2, %v7648_v51 }
0x3252   :  { %v7654_v12 = vmul.f32 1.442695, %v7652_v48 }
0x3254   :  { %13683 = vpow2.f32 %v7654_v12  ;;  %v13785_v12 = vld [vmem:[#allocation8] sm:$0xff] }
0x3261   :  { %v13684_v23 = vpop.eup %13683 }
0x3262   :  { %v7658_v24 = vsel %vm352_vm3, %v13684_v23, 0.0 }
0x328b   :  { %v13229_v5 = vpop.f32.mrf.mxu1 }
0x328c   :  { %v7487_v9 = vadd.f32 %v13229_v5, %v7066_v63  ;;  %v13786_v63 = vld [vmem:[#allocation8 + $0x8] sm:$0xff] }
0x328d   :  { %v7477_v13 = vpop.f32.mrf.mxu1 }
0x328e   :  { %v7486_v55 = vadd.f32 %v7477_v13, %v7061_v47 }
0x328f   :  { %v7640_v33 = vpop.f32.mrf.mxu1 }
0x3290   :  { %v7645_v36 = vmul.f32 0.5, %v7640_v33 }
0x3291   :  { %v13239_v14 = vpop.f32.mrf.mxu1 }
0x3292   :  { %v7649_v20 = vsel %vm352_vm3, %v7645_v36, -inf }
0x3293   :  { %7650 = vmax.xlane.f32.xlu0 %v7649_v20 }
0x3297   :  { %7659 = vadd.xlane.f32.xlu0 %v7658_v24 }
0x32ad   :  { %7668 = vrot.lane.b32.xlu0 %v14800_v21, %s13942_s28  ;;  %v7820_v21 = vrot.slane %v14748_v10, 4 }
0x331c   :  { %v7651_v0 = vpop.xlane.xlu0 %7650 }
0x331d   :  { %v7653_v15 = vsub.f32 %v7645_v36, %v7651_v0 }
0x331f   :  { %v7656_v26 = vmul.f32 1.442695, %v7653_v15 }
0x3320   :  { %v7660_v62 = vpop.xlane.xlu0 %7659 }
0x3321   :  { %13685 = vpow2.f32 %v7656_v26 }
0x3322   :  { %13687 = vrcp.f32 %v7660_v62 }
0x3324   :  { %v7669_v56 = vpop.permute.xlu0 %7668 }
0x3325   :  { %13241 = vmatpush3.msra.mxu0 %v7669_v56 }
0x332e   :  { %v13686_v17 = vpop.eup %13685 }
0x332f   :  { %v13688_v27 = vpop.eup %13687  ;;  %v7661_v22 = vsel %vm352_vm3, %v13686_v17, 0.0 }
0x3330   :  { %7662 = vadd.xlane.f32.xlu1 %v7661_v22  ;;  %v7665_v18 = vmul.f32 %v13688_v27, %v13684_v23 }
0x3332   :  { %13243 = vmatmul.mubr.msk.f32.vlgmr.msra.gmra.mxu0 %vm352_vm3, %v7665_v18  ;;  %v7949_v18 = vrot.slane %v14782_v29, %v14205_v54 }
0x3341   :  { %7744 = vrot.lane.b32.xlu1 %v14798_v19, %s13942_s28 }
0x3345   :  { %7821 = vrot.lane.b32.xlu1 %v7820_v21, %s13940_s26 }
0x33b9   :  { %v7663_v34 = vpop.xlane.xlu1 %7662 }
0x33ba   :  { %13689 = vrcp.f32 %v7663_v34 }
0x33bd   :  { %v7745_v28 = vpop.permute.xlu1 %7744 }
0x33be   :  { %13246 = vmatpush3.msra.mxu1 %v7745_v28  ;;  %v7955_v28 = vrot.slane %v14782_v29, %v14251_v49 }
0x33c1   :  { %v7822_v42 = vpop.permute.xlu1 %7821 }
0x33c2   :  { %13250 = vmatprep.subr.msk.mxu0 %vm869_vm4, %v7822_v42 }
0x33c3   :  { %13251 = vmatpush3.msk.msra.mxu0 %vm869_vm4, %v7822_v42 }
0x33c7   :  { %v13690_v38 = vpop.eup %13689 }
0x33c8   :  { %v7667_v40 = vmul.f32 %v13690_v38, %v13686_v17 }
0x33ca   :  { %13248 = vmatmul.mubr.msk.f32.vlgmr.msra.gmra.mxu1 %vm352_vm3, %v7667_v40 }
0x33f2   :  { %v7740_v43 = vpop.f32.mrf.mxu0 }
0x33f3   :  { %13252 = vmatprep.mubr.msk.f32.mxu0 %vm198_vm2, %v7740_v43 }
0x33f4   :  { %v13244_v19 = vpop.f32.mrf.mxu0 }
0x348a   :  { %v7816_v44 = vpop.f32.mrf.mxu1 }
0x348b   :  { %13253 = vmatmul.mubr.msk.f32.vlgmr.msra.gmra.mxu0 %vm198_vm2, %v7816_v44 }
0x348c   :  { %v13249_v46 = vpop.f32.mrf.mxu1 }
0x354b   :  { %v13254_v1 = vpop.f32.mrf.mxu0 }
0x354c   :  { %v7907_v31 = vadd.f32 %v13254_v1, %v7487_v9 }
0x354d   :  { %v7897_v6 = vpop.f32.mrf.mxu0 }
0x354e   :  { %v7913_v50 = vadd.f32 %v7911_v25, %v7907_v31  ;;  %v7906_v8 = vadd.f32 %v7897_v6, %v7486_v55  ;;  %v7961_v31 = vrot.slane %v14970_v16, %v14225_v32 }
0x3550   :  { %v7915_v2 = vadd.f32 %v7913_v50, %v14788_v59  ;;  %v7912_v39 = vadd.f32 %v7911_v25, %v7906_v8  ;;  %v13783_v59 = vld [vmem:[#allocation8 + $0x18] sm:$0xff] }
0x3552   :  { %v7914_v60 = vadd.f32 %v7912_v39, %v14786_v45  ;;  %v7919_v53 = vsel %vm113_vm0, %v7915_v2, 0.0  ;;  %v7925_v51 = vmul.f32 %v7915_v2, %v7915_v2  ;;  %v13784_v45 = vld [vmem:[#allocation8 + $0x10] sm:$0xff] }
0x3553   :  { %7920 = vadd.xlane.f32.xlu1 %v7919_v53  ;;  %v8054_v53 = vrot.slane %v14970_v16, %v14284_v37  ;;  %v15011_v16 = vld [vmem:[#allocation7 + $0x18] sm:$0xff] }
0x3554   :  { %v7916_v52 = vsel %vm113_vm0, %v7914_v60, 0.0  ;;  %v7924_v61 = vmul.f32 %v7914_v60, %v7914_v60  ;;  %v7929_v48 = vsel %vm113_vm0, %v7925_v51, 0.0 }
0x3555   :  { %7917 = vadd.xlane.f32.xlu0 %v7916_v52 }
0x3556   :  { %v7926_v3 = vsel %vm113_vm0, %v7924_v61, 0.0 }
0x3559   :  { %7927 = vadd.xlane.f32.xlu0 %v7926_v3 }
0x355d   :  { %7930 = vadd.xlane.f32.xlu0 %v7929_v48 }
0x3564   :  { %7964 = vrot.lane.b32.xlu1 %v14748_v10, %s13945_s6 }
0x3568   :  { %8061 = vrot.lane.b32.xlu1 %v13783_v59, %s13934_s4 }
0x356c   :  { %8059 = vrot.lane.b32.xlu1 %v13784_v45, %s13934_s4 }
0x3570   :  { %8055 = vrot.lane.b32.xlu1 %v13785_v12, %s13934_s4 }
0x3573   :  { %7962 = vrot.lane.b32.xlu0 %v14752_v11, %s13945_s6 }
0x3577   :  { %8057 = vrot.lane.b32.xlu0 %v13786_v63, %s13934_s4 }
0x35dc   :  { %v7921_v5 = vpop.xlane.xlu1 %7920 }
0x35dd   :  { %v7923_v33 = vmul.f32 0.0625, %v7921_v5 }
0x35de   :  { %v7918_v47 = vpop.xlane.xlu0 %7917 }
0x35df   :  { %v7922_v9 = vmul.f32 0.0625, %v7918_v47  ;;  %v7935_v0 = vmul.f32 %v7923_v33, %v7923_v33  ;;  %v7939_v38 = vsub.f32 %v7915_v2, %v7923_v33 }
0x35e0   :  { %v7965_v13 = vpop.permute.xlu1 %7964 }
0x35e1   :  { %13255 = vmatprep.subr.mxu1 %v7965_v13  ;;  %v7934_v36 = vmul.f32 %v7922_v9, %v7922_v9  ;;  %v7938_v22 = vsub.f32 %v7914_v60, %v7922_v9 }
0x35e2   :  { %v7928_v55 = vpop.xlane.xlu0 %7927  ;;  %13256 = vmatpush3.msra.mxu1 %v7965_v13  ;;  %v15015_v13 = vld [vmem:[#allocation7 + $0x38] sm:$0xff] }
0x35e3   :  { %v7932_v14 = vmul.f32 0.0625, %v7928_v55 }
0x35e4   :  { %v8062_v20 = vpop.permute.xlu1 %8061 }
0x35e5   :  { %v7936_v23 = vsub.f32 %v7932_v14, %v7934_v36  ;;  %13262 = vmatprep.subr.mxu0 %v8062_v20 }
0x35e6   :  { %v7931_v24 = vpop.xlane.xlu0 %7930  ;;  %13263 = vmatpush3.msra.mxu0 %v8062_v20 }
0x35e7   :  { %v7940_v15 = vadd.f32 1e-05, %v7936_v23  ;;  %v7933_v26 = vmul.f32 0.0625, %v7931_v24 }
0x35e8   :  { %v8060_v62 = vpop.permute.xlu1 %8059 }
0x35e9   :  { %13691 = vrsqrt.f32 %v7940_v15  ;;  %v7937_v56 = vsub.f32 %v7933_v26, %v7935_v0  ;;  %13264 = vmatprep.subr.mxu0 %v8060_v62 }
0x35ea   :  { %v7963_v17 = vpop.permute.xlu0 %7962  ;;  %13265 = vmatpush3.msra.mxu0 %v8060_v62 }
0x35eb   :  { %v7941_v27 = vadd.f32 1e-05, %v7937_v56  ;;  %13257 = vmatprep.subr.mxu1 %v7963_v17 }
0x35ec   :  { %13258 = vmatpush3.msra.mxu1 %v7963_v17  ;;  %v8056_v1 = vpop.permute.xlu1 %8055 }
0x35ed   :  { %13693 = vrsqrt.f32 %v7941_v27 }
0x35ee   :  { %v8058_v25 = vpop.permute.xlu0 %8057 }
0x35ef   :  { %13266 = vmatprep.subr.mxu0 %v8058_v25 }
0x35f0   :  { %13267 = vmatpush3.msra.mxu0 %v8058_v25 }
0x35f1   :  { %13268 = vmatprep.subr.mxu0 %v8056_v1 }
0x35f2   :  { %13269 = vmatpush3.msra.mxu0 %v8056_v1 }
0x35f3   :  { %13285 = vmatprep.subr.mxu0 %v13931_v4 }
0x35f6   :  { %v13692_v21 = vpop.eup %13691 }
0x35f7   :  { %v7944_v34 = vmul.f32 %v13692_v21, %v7938_v22 }
0x35f9   :  { %v7950_v40 = vmul.f32 %v7949_v18, %v7944_v34 }
0x35fa   :  { %v13694_v42 = vpop.eup %13693 }
0x35fb   :  { %v7945_v43 = vmul.f32 %v13694_v42, %v7939_v38  ;;  %v7956_v19 = vadd.f32 %v7955_v28, %v7950_v40  ;;  %v8183_v38 = vrot.slane %v14782_v29, %v14260_v57 }
0x35fd   :  { %v7951_v44 = vmul.f32 %v7949_v18, %v7945_v43  ;;  %13259 = vmatprep.mubr.msk.f32.mxu1 %vm113_vm0, %v7956_v19  ;;  %v8189_v43 = vrot.slane %v14782_v29, %v14222_v30 }
0x35ff   :  { %v7957_v46 = vadd.f32 %v7955_v28, %v7951_v44 }
0x3601   :  { %13260 = vmatmul.mubr.msk.f32.vlgmr.msra.gmra.mxu1 %vm113_vm0, %v7957_v46 }
0x36c1   :  { %v13261_v6 = vpop.f32.mrf.mxu1 }
0x36c2   :  { %v8046_v50 = vadd.f32 %v13261_v6, %v7961_v31 }
0x36c3   :  { %v8040_v8 = vpop.f32.mrf.mxu1 }
0x36c4   :  { %v8041_v2 = vadd.f32 %v8040_v8, %v7961_v31  ;;  %v8050_v60 = vmax.f32 %v8046_v50, 0.0  ;;  %v8195_v50 = vrot.slane %v14782_v29, %v14225_v32 }
0x36c6   :  { %v8049_v39 = vmax.f32 %v8041_v2, 0.0 }
0x36c8   :  { %13270 = vmatprep.mubr.msk.f32.mxu0 %vm2020_vm5, %v8049_v39 }
0x36c9   :  { %13271 = vmatmul.mubr.msk.f32.vlgmr.msra.gmra.mxu0 %vm2020_vm5, %v8050_v60 }
0x36ca   :  { %13287 = vmatprep.mubr.msk.f32.mxu0 %vm13932_vm1, %v13931_v4 }
0x3789   :  { %v13272_v52 = vpop.f32.mrf.mxu0 }
0x378a   :  { %v8145_v61 = vadd.f32 %v13272_v52, %v8054_v53 }
0x378b   :  { %v8139_v3 = vpop.f32.mrf.mxu0 }
0x378c   :  { %v8149_v51 = vadd.f32 %v8145_v61, %v7957_v46  ;;  %v8140_v48 = vadd.f32 %v8139_v3, %v8054_v53 }
0x378e   :  { %v8148_v59 = vadd.f32 %v8140_v48, %v7956_v19  ;;  %v8153_v45 = vsel %vm113_vm0, %v8149_v51, 0.0  ;;  %v8159_v47 = vmul.f32 %v8149_v51, %v8149_v51 }
0x378f   :  { %8154 = vadd.xlane.f32.xlu1 %v8153_v45 }
0x3790   :  { %v8150_v12 = vsel %vm113_vm0, %v8148_v59, 0.0  ;;  %v8158_v63 = vmul.f32 %v8148_v59, %v8148_v59  ;;  %v8163_v9 = vsel %vm113_vm0, %v8159_v47, 0.0 }
0x3791   :  { %8151 = vadd.xlane.f32.xlu0 %v8150_v12 }
0x3792   :  { %v8160_v5 = vsel %vm113_vm0, %v8158_v63, 0.0 }
0x3795   :  { %8161 = vadd.xlane.f32.xlu0 %v8160_v5 }
0x3799   :  { %8164 = vadd.xlane.f32.xlu0 %v8163_v9 }
0x37a0   :  { %8202 = vrot.lane.b32.xlu1 %v14748_v10, %s13929_s12 }
0x37a4   :  { %8198 = vrot.lane.b32.xlu1 %v14752_v11, %s13929_s12 }
0x37a8   :  { %8200 = vrot.lane.b32.xlu1 %v15011_v16, %s13929_s12 }
0x37af   :  { %8204 = vrot.lane.b32.xlu0 %v15015_v13, %s13929_s12 }
0x3818   :  { %v8155_v55 = vpop.xlane.xlu1 %8154 }
0x3819   :  { %v8157_v23 = vmul.f32 0.0625, %v8155_v55 }
0x381a   :  { %v8152_v33 = vpop.xlane.xlu0 %8151 }
0x381b   :  { %v8156_v36 = vmul.f32 0.0625, %v8152_v33  ;;  %v8169_v26 = vmul.f32 %v8157_v23, %v8157_v23  ;;  %v8173_v19 = vsub.f32 %v8149_v51, %v8157_v23 }
0x381c   :  { %v8203_v14 = vpop.permute.xlu1 %8202 }
0x381d   :  { %v8168_v10 = vmul.f32 %v8156_v36, %v8156_v36  ;;  %v8172_v28 = vsub.f32 %v8148_v59, %v8156_v36 }
0x381e   :  { %v8162_v20 = vpop.xlane.xlu0 %8161 }
0x381f   :  { %v8166_v24 = vmul.f32 0.0625, %v8162_v20 }
0x3820   :  { %v8199_v0 = vpop.permute.xlu1 %8198 }
0x3821   :  { %v8170_v11 = vsub.f32 %v8166_v24, %v8168_v10 }
0x3822   :  { %v8165_v15 = vpop.xlane.xlu0 %8164 }
0x3823   :  { %v8174_v62 = vadd.f32 1e-05, %v8170_v11  ;;  %v8167_v56 = vmul.f32 0.0625, %v8165_v15 }
0x3824   :  { %v15019_v17 = vpop.permute.xlu1 %8200 }
0x3825   :  { %13695 = vrsqrt.f32 %v8174_v62  ;;  %v8171_v27 = vsub.f32 %v8167_v56, %v8169_v26  ;;  %v8206_v34 = vsel %vm2020_vm5, %v8199_v0, %v15019_v17 }
0x3826   :  { %v15021_v22 = vpop.permute.xlu0 %8204 }
0x3827   :  { %v8175_v18 = vadd.f32 1e-05, %v8171_v27  ;;  %v8207_v21 = vsel %vm2020_vm5, %v8203_v14, %v15021_v22 }
0x3828   :  { %13273 = vmatprep.subr.mxu1 %v8207_v21 }
0x3829   :  { %13697 = vrsqrt.f32 %v8175_v18  ;;  %13274 = vmatpush3.msra.mxu1 %v8207_v21 }
0x382a   :  { %13275 = vmatprep.subr.mxu1 %v8206_v34 }
0x382b   :  { %13276 = vmatpush3.msra.mxu1 %v8206_v34 }
0x382c   :  { %13280 = vmatprep.subr.mxu1 %v13931_v4 }
0x3832   :  { %v13696_v40 = vpop.eup %13695 }
0x3833   :  { %v8178_v42 = vmul.f32 %v13696_v40, %v8172_v28 }
0x3835   :  { %v8184_v44 = vmul.f32 %v8183_v38, %v8178_v42 }
0x3836   :  { %v13698_v46 = vpop.eup %13697 }
0x3837   :  { %v8179_v25 = vmul.f32 %v13698_v46, %v8173_v19  ;;  %v15032_v1 = vadd.f32 %v8189_v43, %v8184_v44 }
0x3839   :  { %v8185_v31 = vmul.f32 %v8183_v38, %v8179_v25  ;;  %13277 = vmatprep.mubr.msk.f32.mxu1 %vm113_vm0, %v15032_v1 }
0x383b   :  { %v15036_v6 = vadd.f32 %v8189_v43, %v8185_v31 }
0x383d   :  { %13278 = vmatmul.mubr.msk.f32.vlgmr.msra.gmra.mxu1 %vm113_vm0, %v15036_v6 }
0x383e   :  { %13282 = vmatprep.mubr.msk.f32.mxu1 %vm13932_vm1, %v13931_v4 }
0x38fd   :  { %v13279_v8 = vpop.f32.mrf.mxu1 }
0x38fe   :  { %v15044_v2 = vadd.f32 %v13279_v8, %v8195_v50 }
0x38ff   :  { %v8282_v39 = vpop.f32.mrf.mxu1 }
0x3900   :  { %v15046_v60 = vadd.f32 %v8282_v39, %v8195_v50  ;;  %8369 = vrot.lane.b32.xlu1 %v15044_v2, %s13933_s2  ;;  %v8953_v39 = vrot.slane %v15011_v16, 4 }
0x3902   :  { %8292 = vrot.lane.b32.xlu0 %v15046_v60, %s13933_s2 }
0x3972   :  { %v8370_v53 = vpop.permute.xlu1 %8369 }
0x3973   :  { %13286 = vmatpush3.xpose.msk.msra.mxu0 %vm198_vm2, %v8370_v53 }
0x3974   :  { %v8293_v52 = vpop.permute.xlu0 %8292  ;;  %13295 = vmatprep.subr.mxu0 %v13931_v4 }
0x3975   :  { %13281 = vmatpush3.xpose.msk.msra.mxu1 %vm198_vm2, %v8293_v52 }
0x3976   :  { %13288 = vmatmul.mubr.msk.f32.vlgmr.msra.gmra.mxu0 %vm198_vm2, %v15044_v2  ;;  %13290 = vmatprep.subr.mxu1 %v13931_v4 }
0x3977   :  { %13297 = vmatprep.mubr.msk.f32.mxu0 %vm13932_vm1, %v13931_v4 }
0x3978   :  { %13283 = vmatmul.mubr.msk.f32.vlgmr.msra.gmra.mxu1 %vm198_vm2, %v15046_v60 }
0x3979   :  { %13292 = vmatprep.mubr.msk.f32.mxu1 %vm13932_vm1, %v13931_v4 }
0x3a36   :  { %v8441_v29 = vpop.f32.mrf.mxu0 }
0x3a37   :  { %v8446_v61 = vmul.f32 0.5, %v8441_v29 }
0x3a38   :  { %v8364_v3 = vpop.f32.mrf.mxu1  ;;  %v13289_v51 = vpop.f32.mrf.mxu0 }
0x3a39   :  { %v8445_v48 = vmul.f32 0.5, %v8364_v3  ;;  %v8450_v59 = vsel %vm352_vm3, %v8446_v61, -inf }
0x3a3a   :  { %8451 = vmax.xlane.f32.xlu1 %v8450_v59  ;;  %v13284_v45 = vpop.f32.mrf.mxu1 }
0x3a3b   :  { %v8447_v12 = vsel %vm352_vm3, %v8445_v48, -inf }
0x3a3c   :  { %8448 = vmax.xlane.f32.xlu0 %v8447_v12 }
0x3a4b   :  { %8469 = vrot.lane.b32.xlu1 %v15046_v60, %s13934_s4 }
0x3a4f   :  { %8623 = vrot.lane.b32.xlu1 %v15046_v60, %s13936_s20 }
0x3a53   :  { %8701 = vrot.lane.b32.xlu1 %v15044_v2, %s13936_s20 }
0x3a57   :  { %8699 = vrot.lane.b32.xlu1 %v15044_v2, %s13935_s19 }
0x3ac3   :  { %v8452_v63 = vpop.xlane.xlu1 %8451 }
0x3ac4   :  { %v8454_v5 = vsub.f32 %v8446_v61, %v8452_v63 }
0x3ac5   :  { %v8449_v47 = vpop.xlane.xlu0 %8448 }
0x3ac6   :  { %v8457_v9 = vmul.f32 1.442695, %v8454_v5  ;;  %v8453_v55 = vsub.f32 %v8445_v48, %v8449_v47 }
0x3ac7   :  { %v8470_v33 = vpop.permute.xlu1 %8469 }
0x3ac8   :  { %13699 = vpow2.f32 %v8457_v9  ;;  %v8455_v36 = vmul.f32 1.442695, %v8453_v55  ;;  %13291 = vmatpush3.msra.mxu1 %v8470_v33 }
0x3ac9   :  { %13300 = vmatprep.subr.mxu1 %v13931_v4 }
0x3aca   :  { %13701 = vpow2.f32 %v8455_v36 }
0x3acb   :  { %v8624_v11 = vpop.permute.xlu1 %8623 }
0x3acf   :  { %v8702_v62 = vpop.permute.xlu1 %8701 }
0x3ad3   :  { %v8700_v21 = vpop.permute.xlu1 %8699 }
0x3ad5   :  { %v13700_v14 = vpop.eup %13699 }
0x3ad6   :  { %v8462_v20 = vsel %vm352_vm3, %v13700_v14, 0.0 }
0x3ad7   :  { %v13702_v23 = vpop.eup %13701  ;;  %8463 = vadd.xlane.f32.xlu0 %v8462_v20 }
0x3ad8   :  { %v8459_v10 = vsel %vm352_vm3, %v13702_v23, 0.0 }
0x3adb   :  { %8460 = vadd.xlane.f32.xlu0 %v8459_v10 }
0x3af1   :  { %8545 = vrot.lane.b32.xlu0 %v15044_v2, %s13934_s4 }
0x3af5   :  { %8621 = vrot.lane.b32.xlu0 %v15046_v60, %s13935_s19 }
0x3b60   :  { %v8464_v24 = vpop.xlane.xlu0 %8463 }
0x3b61   :  { %13703 = vrcp.f32 %v8464_v24 }
0x3b64   :  { %v8461_v0 = vpop.xlane.xlu0 %8460 }
0x3b65   :  { %13705 = vrcp.f32 %v8461_v0 }
0x3b68   :  { %v8546_v15 = vpop.permute.xlu0 %8545 }
0x3b69   :  { %13296 = vmatpush3.msra.mxu0 %v8546_v15 }
0x3b6a   :  { %13305 = vmatprep.subr.mxu0 %v13931_v4 }
0x3b6c   :  { %v8622_v34 = vpop.permute.xlu0 %8621 }
0x3b6e   :  { %v13704_v26 = vpop.eup %13703 }
0x3b6f   :  { %v8468_v56 = vmul.f32 %v13704_v26, %v13700_v14 }
0x3b71   :  { %13298 = vmatmul.mubr.msk.f32.vlgmr.msra.gmra.mxu0 %vm352_vm3, %v8468_v56 }
0x3b72   :  { %v13706_v27 = vpop.eup %13705  ;;  %13306 = vmatpush3.xpose.msk.msra.mxu0 %vm198_vm2, %v8702_v62  ;;  %13307 = vmatprep.mubr.msk.f32.mxu0 %vm13932_vm1, %v13931_v4 }
0x3b73   :  { %v8466_v18 = vmul.f32 %v13706_v27, %v13702_v23  ;;  %13315 = vmatprep.subr.mxu0 %v13931_v4 }
0x3b75   :  { %13293 = vmatmul.mubr.msk.f32.vlgmr.msra.gmra.mxu1 %vm352_vm3, %v8466_v18  ;;  %13308 = vmatmul.mubr.msk.f32.vlgmr.msra.gmra.mxu0 %vm198_vm2, %v8700_v21 }
0x3b76   :  { %13301 = vmatpush3.xpose.msk.msra.mxu1 %vm198_vm2, %v8624_v11  ;;  %13302 = vmatprep.mubr.msk.f32.mxu1 %vm13932_vm1, %v13931_v4 }
0x3b77   :  { %13310 = vmatprep.subr.mxu1 %v13931_v4  ;;  %13317 = vmatprep.mubr.msk.f32.mxu0 %vm13932_vm1, %v13931_v4 }
0x3b79   :  { %13303 = vmatmul.mubr.msk.f32.vlgmr.msra.gmra.mxu1 %vm198_vm2, %v8622_v34 }
0x3b7a   :  { %13312 = vmatprep.mubr.msk.f32.mxu1 %vm13932_vm1, %v13931_v4 }
0x3c31   :  { %v8617_v28 = vpop.f32.mrf.mxu0 }
0x3c33   :  { %v13299_v38 = vpop.f32.mrf.mxu0 }
0x3c35   :  { %v8541_v40 = vpop.f32.mrf.mxu1  ;;  %v8773_v42 = vpop.f32.mrf.mxu0 }
0x3c36   :  { %v8778_v43 = vmul.f32 0.5, %v8773_v42 }
0x3c37   :  { %v13294_v19 = vpop.f32.mrf.mxu1  ;;  %v13309_v44 = vpop.f32.mrf.mxu0 }
0x3c38   :  { %v8782_v46 = vsel %vm352_vm3, %v8778_v43, -inf }
0x3c39   :  { %8783 = vmax.xlane.f32.xlu1 %v8782_v46  ;;  %v8695_v25 = vpop.f32.mrf.mxu1 }
0x3c3a   :  { %v8777_v31 = vmul.f32 0.5, %v8695_v25 }
0x3c3b   :  { %v13304_v50 = vpop.f32.mrf.mxu1 }
0x3c3c   :  { %v8779_v8 = vsel %vm352_vm3, %v8777_v31, -inf }
0x3c3d   :  { %8780 = vmax.xlane.f32.xlu0 %v8779_v8 }
0x3c4a   :  { %8801 = vrot.lane.b32.xlu1 %v15046_v60, %s13937_s21 }
0x3c4e   :  { %8954 = vrot.lane.b32.xlu1 %v8953_v39, %s13933_s2 }
0x3c52   :  { %9039 = vrot.lane.b32.xlu1 %v15011_v16, %s13933_s2 }
0x3c56   :  { %9204 = vrot.lane.b32.xlu1 %v15044_v2, %s13938_s22 }
0x3c5a   :  { %9202 = vrot.lane.b32.xlu1 %v15044_v2, %s13939_s25 }
0x3cc2   :  { %v8784_v53 = vpop.xlane.xlu1 %8783 }
0x3cc3   :  { %v8786_v52 = vsub.f32 %v8778_v43, %v8784_v53 }
0x3cc5   :  { %v8789_v29 = vmul.f32 1.442695, %v8786_v52 }
0x3cc6   :  { %v8802_v61 = vpop.permute.xlu1 %8801  ;;  %v8781_v3 = vpop.xlane.xlu0 %8780 }
0x3cc7   :  { %13707 = vpow2.f32 %v8789_v29  ;;  %v8785_v51 = vsub.f32 %v8777_v31, %v8781_v3  ;;  %13311 = vmatpush3.msra.mxu1 %v8802_v61 }
0x3cc9   :  { %v8787_v48 = vmul.f32 1.442695, %v8785_v51 }
0x3cca   :  { %v8955_v59 = vpop.permute.xlu1 %8954 }
0x3ccb   :  { %13709 = vpow2.f32 %v8787_v48  ;;  %13320 = vmatprep.subr.msk.mxu1 %vm869_vm4, %v8955_v59 }
0x3cce   :  { %v9040_v33 = vpop.permute.xlu1 %9039 }
0x3cd2   :  { %v9205_v23 = vpop.permute.xlu1 %9204 }
0x3cd4   :  { %v13708_v45 = vpop.eup %13707 }
0x3cd5   :  { %v8794_v12 = vsel %vm352_vm3, %v13708_v45, 0.0 }
0x3cd6   :  { %8795 = vadd.xlane.f32.xlu0 %v8794_v12  ;;  %v9203_v24 = vpop.permute.xlu1 %9202 }
0x3cd8   :  { %v13710_v63 = vpop.eup %13709 }
0x3cd9   :  { %v8791_v5 = vsel %vm352_vm3, %v13710_v63, 0.0 }
0x3cda   :  { %8792 = vadd.xlane.f32.xlu0 %v8791_v5 }
0x3cf0   :  { %8877 = vrot.lane.b32.xlu0 %v15044_v2, %s13937_s21 }
0x3cf4   :  { %9126 = vrot.lane.b32.xlu0 %v15046_v60, %s13938_s22 }
0x3cf8   :  { %9124 = vrot.lane.b32.xlu0 %v15046_v60, %s13939_s25 }
0x3d5f   :  { %v8796_v47 = vpop.xlane.xlu0 %8795 }
0x3d60   :  { %13711 = vrcp.f32 %v8796_v47 }
0x3d63   :  { %v8793_v9 = vpop.xlane.xlu0 %8792 }
0x3d64   :  { %13713 = vrcp.f32 %v8793_v9 }
0x3d67   :  { %v8878_v55 = vpop.permute.xlu0 %8877 }
0x3d68   :  { %13316 = vmatpush3.msra.mxu0 %v8878_v55 }
0x3d69   :  { %13325 = vmatprep.subr.msk.mxu0 %vm869_vm4, %v9040_v33 }
0x3d6b   :  { %v9127_v15 = vpop.permute.xlu0 %9126 }
0x3d6d   :  { %v13712_v36 = vpop.eup %13711 }
0x3d6e   :  { %v8800_v14 = vmul.f32 %v13712_v36, %v13708_v45 }
0x3d6f   :  { %v9125_v21 = vpop.permute.xlu0 %9124 }
0x3d70   :  { %13318 = vmatmul.mubr.msk.f32.vlgmr.msra.gmra.mxu0 %vm352_vm3, %v8800_v14 }
0x3d71   :  { %v13714_v20 = vpop.eup %13713  ;;  %13327 = vmatprep.mubr.msk.f32.mxu0 %vm198_vm2, %v8541_v40  ;;  %13326 = vmatpush3.msk.msra.mxu0 %vm869_vm4, %v9040_v33 }
0x3d72   :  { %13335 = vmatprep.subr.mxu0 %v13931_v4  ;;  %v8798_v10 = vmul.f32 %v13714_v20, %v13710_v63 }
0x3d74   :  { %13313 = vmatmul.mubr.msk.f32.vlgmr.msra.gmra.mxu1 %vm352_vm3, %v8798_v10  ;;  %13328 = vmatmul.mubr.msk.f32.vlgmr.msra.gmra.mxu0 %vm198_vm2, %v8617_v28 }
0x3d75   :  { %13336 = vmatpush3.xpose.msk.msra.mxu0 %vm198_vm2, %v9205_v23  ;;  %13337 = vmatprep.mubr.msk.f32.mxu0 %vm13932_vm1, %v13931_v4 }
0x3d76   :  { %13321 = vmatpush3.msk.msra.mxu1 %vm869_vm4, %v8955_v59  ;;  %13345 = vmatprep.subr.mxu0 %v13931_v4 }
0x3d77   :  { %13330 = vmatprep.subr.mxu1 %v13931_v4 }
0x3d78   :  { %13338 = vmatmul.mubr.msk.f32.vlgmr.msra.gmra.mxu0 %vm198_vm2, %v9203_v24 }
0x3d79   :  { %13347 = vmatprep.mubr.msk.f32.mxu0 %vm13932_vm1, %v13931_v4 }
0x3e30   :  { %v8949_v0 = vpop.f32.mrf.mxu0 }
0x3e32   :  { %v13319_v11 = vpop.f32.mrf.mxu0 }
0x3e34   :  { %v8873_v26 = vpop.f32.mrf.mxu1  ;;  %v15137_v62 = vpop.f32.mrf.mxu0 }
0x3e35   :  { %13322 = vmatprep.mubr.msk.f32.mxu1 %vm198_vm2, %v8873_v26 }
0x3e36   :  { %v13314_v56 = vpop.f32.mrf.mxu1  ;;  %13323 = vmatmul.mubr.msk.f32.vlgmr.msra.gmra.mxu1 %vm198_vm2, %v8949_v0  ;;  %v15141_v27 = vpop.f32.mrf.mxu0 }
0x3e37   :  { %13331 = vmatpush3.xpose.msk.msra.mxu1 %vm198_vm2, %v9127_v15  ;;  %13332 = vmatprep.mubr.msk.f32.mxu1 %vm13932_vm1, %v13931_v4 }
0x3e38   :  { %v9276_v18 = vpop.f32.mrf.mxu0  ;;  %13340 = vmatprep.subr.mxu1 %v13931_v4 }
0x3e39   :  { %v9281_v34 = vmul.f32 0.5, %v9276_v18 }
0x3e3a   :  { %13333 = vmatmul.mubr.msk.f32.vlgmr.msra.gmra.mxu1 %vm198_vm2, %v9125_v21  ;;  %v13339_v28 = vpop.f32.mrf.mxu0 }
0x3e3b   :  { %v9285_v38 = vsel %vm352_vm3, %v9281_v34, -inf  ;;  %13342 = vmatprep.mubr.msk.f32.mxu1 %vm13932_vm1, %v13931_v4 }
0x3e3c   :  { %9286 = vmax.xlane.f32.xlu1 %v9285_v38 }
0x3e4d   :  { %9304 = vrot.lane.b32.xlu1 %v15046_v60, %s13941_s27 }
0x3e51   :  { %9456 = vrot.lane.b32.xlu1 %v15015_v13, %s13933_s2 }
0x3e55   :  { %9545 = vrot.lane.b32.xlu1 %v15046_v60, %s13942_s28 }
0x3e59   :  { %9543 = vrot.lane.b32.xlu1 %v15046_v60, %s13943_s29 }
0x3ec5   :  { %v9287_v40 = vpop.xlane.xlu1 %9286 }
0x3ec6   :  { %v9289_v19 = vsub.f32 %v9281_v34, %v9287_v40 }
0x3ec8   :  { %v9292_v44 = vmul.f32 1.442695, %v9289_v19 }
0x3ec9   :  { %v9305_v42 = vpop.permute.xlu1 %9304 }
0x3eca   :  { %13341 = vmatpush3.msra.mxu1 %v9305_v42  ;;  %13715 = vpow2.f32 %v9292_v44 }
0x3ecd   :  { %v9457_v43 = vpop.permute.xlu1 %9456 }
0x3ece   :  { %13350 = vmatprep.subr.msk.mxu1 %vm869_vm4, %v9457_v43 }
0x3ed1   :  { %v9546_v5 = vpop.permute.xlu1 %9545 }
0x3ed5   :  { %v9544_v55 = vpop.permute.xlu1 %9543 }
0x3ed7   :  { %v13716_v52 = vpop.eup %13715 }
0x3ed8   :  { %v9297_v29 = vsel %vm352_vm3, %v13716_v52, 0.0 }
0x3ef6   :  { %v15160_v46 = vpop.f32.mrf.mxu1 }
0x3ef7   :  { %v9121_v28 = vadd.f32 %v15137_v62, %v15160_v46 }
0x3ef8   :  { %v15162_v25 = vpop.f32.mrf.mxu1 }
0x3ef9   :  { %v9116_v40 = vadd.f32 %v15141_v27, %v15162_v25 }
0x3efa   :  { %v9198_v31 = vpop.f32.mrf.mxu1 }
0x3efb   :  { %v9280_v50 = vmul.f32 0.5, %v9198_v31 }
0x3efc   :  { %v13334_v8 = vpop.f32.mrf.mxu1 }
0x3efd   :  { %v9282_v53 = vsel %vm352_vm3, %v9280_v50, -inf }
0x3efe   :  { %9283 = vmax.xlane.f32.xlu0 %v9282_v53 }
0x3f02   :  { %9298 = vadd.xlane.f32.xlu0 %v9297_v29 }
0x3f87   :  { %v9284_v61 = vpop.xlane.xlu0 %9283 }
0x3f88   :  { %v9288_v3 = vsub.f32 %v9280_v50, %v9284_v61 }
0x3f8a   :  { %v9290_v51 = vmul.f32 1.442695, %v9288_v3 }
0x3f8b   :  { %v9299_v45 = vpop.xlane.xlu0 %9298 }
0x3f8c   :  { %13717 = vpow2.f32 %v9290_v51 }
0x3f8d   :  { %13719 = vrcp.f32 %v9299_v45 }
0x3f99   :  { %v13718_v48 = vpop.eup %13717 }
0x3f9a   :  { %v9294_v59 = vsel %vm352_vm3, %v13718_v48, 0.0  ;;  %v13720_v63 = vpop.eup %13719 }
0x3f9b   :  { %9295 = vadd.xlane.f32.xlu0 %v9294_v59  ;;  %v9303_v9 = vmul.f32 %v13720_v63, %v13716_v52 }
0x3fb1   :  { %9380 = vrot.lane.b32.xlu0 %v15044_v2, %s13941_s27 }
0x3fb5   :  { %9623 = vrot.lane.b32.xlu0 %v15044_v2, %s13942_s28 }
0x3fb9   :  { %9621 = vrot.lane.b32.xlu0 %v15044_v2, %s13943_s29 }
0x4024   :  { %v9296_v12 = vpop.xlane.xlu0 %9295 }
0x4025   :  { %13721 = vrcp.f32 %v9296_v12 }
0x4028   :  { %v9381_v47 = vpop.permute.xlu0 %9380 }
0x4029   :  { %13346 = vmatpush3.msra.mxu0 %v9381_v47 }
0x402a   :  { %13348 = vmatmul.mubr.msk.f32.vlgmr.msra.gmra.mxu0 %vm352_vm3, %v9303_v9  ;;  %13355 = vmatprep.subr.mxu0 %v13931_v4 }
0x402b   :  { %13356 = vmatpush3.xpose.msk.msra.mxu0 %vm198_vm2, %v9546_v5  ;;  %13357 = vmatprep.mubr.msk.f32.mxu0 %vm13932_vm1, %v13931_v4 }
0x402c   :  { %13365 = vmatprep.subr.mxu0 %v13931_v4  ;;  %v9624_v11 = vpop.permute.xlu0 %9623 }
0x402e   :  { %13358 = vmatmul.mubr.msk.f32.vlgmr.msra.gmra.mxu0 %vm198_vm2, %v9544_v55 }
0x402f   :  { %13367 = vmatprep.mubr.msk.f32.mxu0 %vm13932_vm1, %v13931_v4 }
0x4030   :  { %v9622_v56 = vpop.permute.xlu0 %9621 }
0x4032   :  { %v13722_v33 = vpop.eup %13721 }
0x4033   :  { %v9301_v36 = vmul.f32 %v13722_v33, %v13718_v48  ;;  %v15218_v33 = vld [vmem:[#allocation10 + $0x18] sm:$0xff] }
0x4035   :  { %13343 = vmatmul.mubr.msk.f32.vlgmr.msra.gmra.mxu1 %vm352_vm3, %v9301_v36  ;;  %v9966_v36 = vrot.slane %v15218_v33, %v14284_v37 }
0x4036   :  { %13351 = vmatpush3.msk.msra.mxu1 %vm869_vm4, %v9457_v43 }
0x4037   :  { %13360 = vmatprep.subr.mxu1 %v13931_v4 }
0x40ea   :  { %v9452_v14 = vpop.f32.mrf.mxu0 }
0x40ec   :  { %v13349_v20 = vpop.f32.mrf.mxu0 }
0x40ee   :  { %v9617_v23 = vpop.f32.mrf.mxu0 }
0x40ef   :  { %v9699_v10 = vmul.f32 0.5, %v9617_v23 }
0x40f0   :  { %v13359_v24 = vpop.f32.mrf.mxu0 }
0x40f1   :  { %v9701_v0 = vsel %vm352_vm3, %v9699_v10, -inf }
0x40f2   :  { %9702 = vmax.xlane.f32.xlu1 %v9701_v0 }
0x40f5   :  { %v9376_v15 = vpop.f32.mrf.mxu1 }
0x40f6   :  { %13352 = vmatprep.mubr.msk.f32.mxu1 %vm198_vm2, %v9376_v15 }
0x40f7   :  { %v13344_v26 = vpop.f32.mrf.mxu1  ;;  %13353 = vmatmul.mubr.msk.f32.vlgmr.msra.gmra.mxu1 %vm198_vm2, %v9452_v14 }
0x40f8   :  { %13361 = vmatpush3.xpose.msk.msra.mxu1 %vm198_vm2, %v9624_v11  ;;  %13362 = vmatprep.mubr.msk.f32.mxu1 %vm13932_vm1, %v13931_v4 }
0x40f9   :  { %13370 = vmatprep.subr.mxu1 %v13931_v4 }
0x40fb   :  { %13363 = vmatmul.mubr.msk.f32.vlgmr.msra.gmra.mxu1 %vm198_vm2, %v9622_v56 }
0x40fc   :  { %13372 = vmatprep.mubr.msk.f32.mxu1 %vm13932_vm1, %v13931_v4 }
0x417b   :  { %v9703_v18 = vpop.xlane.xlu1 %9702 }
0x417c   :  { %v9707_v21 = vsub.f32 %v9699_v10, %v9703_v18 }
0x417e   :  { %v9709_v34 = vmul.f32 1.442695, %v9707_v21 }
0x4180   :  { %13723 = vpow2.f32 %v9709_v34 }
0x418d   :  { %v13724_v53 = vpop.eup %13723 }
0x418e   :  { %v9713_v52 = vsel %vm352_vm3, %v13724_v53, 0.0 }
0x41b7   :  { %v13354_v38 = vpop.f32.mrf.mxu1 }
0x41b8   :  { %v9542_v42 = vadd.f32 %v13354_v38, %v9121_v28 }
0x41b9   :  { %v9532_v43 = vpop.f32.mrf.mxu1 }
0x41ba   :  { %v9541_v19 = vadd.f32 %v9532_v43, %v9116_v40 }
0x41bb   :  { %v9695_v44 = vpop.f32.mrf.mxu1 }
0x41bc   :  { %v9700_v31 = vmul.f32 0.5, %v9695_v44 }
0x41bd   :  { %v13364_v50 = vpop.f32.mrf.mxu1 }
0x41be   :  { %v9704_v8 = vsel %vm352_vm3, %v9700_v31, -inf }
0x41bf   :  { %9705 = vmax.xlane.f32.xlu0 %v9704_v8 }
0x41c3   :  { %9714 = vadd.xlane.f32.xlu0 %v9713_v52 }
0x41d9   :  { %9723 = vrot.lane.b32.xlu0 %v15046_v60, %s13944_s30  ;;  %v9875_v60 = vrot.slane %v15015_v13, 4 }
0x4248   :  { %v9706_v62 = vpop.xlane.xlu0 %9705 }
0x4249   :  { %v9708_v46 = vsub.f32 %v9700_v31, %v9706_v62 }
0x424b   :  { %v9711_v29 = vmul.f32 1.442695, %v9708_v46 }
0x424c   :  { %v9715_v27 = vpop.xlane.xlu0 %9714 }
0x424d   :  { %13725 = vpow2.f32 %v9711_v29 }
0x424e   :  { %13727 = vrcp.f32 %v9715_v27 }
0x4250   :  { %v9724_v25 = vpop.permute.xlu0 %9723 }
0x4251   :  { %13366 = vmatpush3.msra.mxu0 %v9724_v25  ;;  %v15242_v25 = vld [vmem:[#allocation10 + $0x20] sm:$0xff] }
0x425a   :  { %v13726_v61 = vpop.eup %13725 }
0x425b   :  { %v13728_v3 = vpop.eup %13727  ;;  %v9716_v51 = vsel %vm352_vm3, %v13726_v61, 0.0 }
0x425c   :  { %9717 = vadd.xlane.f32.xlu1 %v9716_v51  ;;  %v9720_v48 = vmul.f32 %v13728_v3, %v13724_v53  ;;  %v10004_v3 = vrot.slane %v15242_v25, %v14222_v30 }
0x425e   :  { %13368 = vmatmul.mubr.msk.f32.vlgmr.msra.gmra.mxu0 %vm352_vm3, %v9720_v48 }
0x426d   :  { %9799 = vrot.lane.b32.xlu1 %v15044_v2, %s13944_s30 }
0x4271   :  { %9876 = vrot.lane.b32.xlu1 %v9875_v60, %s13933_s2 }
0x42e5   :  { %v9718_v59 = vpop.xlane.xlu1 %9717 }
0x42e6   :  { %13729 = vrcp.f32 %v9718_v59  ;;  %v10010_v59 = vrot.slane %v15242_v25, %v14225_v32 }
0x42e9   :  { %v9800_v45 = vpop.permute.xlu1 %9799 }
0x42ea   :  { %13371 = vmatpush3.msra.mxu1 %v9800_v45 }
0x42ed   :  { %v9877_v5 = vpop.permute.xlu1 %9876 }
0x42ee   :  { %13375 = vmatprep.subr.msk.mxu0 %vm869_vm4, %v9877_v5 }
0x42ef   :  { %13376 = vmatpush3.msk.msra.mxu0 %vm869_vm4, %v9877_v5 }
0x42f3   :  { %v13730_v12 = vpop.eup %13729 }
0x42f4   :  { %v9722_v63 = vmul.f32 %v13730_v12, %v13726_v61 }
0x42f6   :  { %13373 = vmatmul.mubr.msk.f32.vlgmr.msra.gmra.mxu1 %vm352_vm3, %v9722_v63 }
0x431e   :  { %v9795_v2 = vpop.f32.mrf.mxu0 }
0x431f   :  { %13377 = vmatprep.mubr.msk.f32.mxu0 %vm198_vm2, %v9795_v2 }
0x4320   :  { %v13369_v47 = vpop.f32.mrf.mxu0 }
0x43b6   :  { %v9871_v9 = vpop.f32.mrf.mxu1 }
0x43b7   :  { %13378 = vmatmul.mubr.msk.f32.vlgmr.msra.gmra.mxu0 %vm198_vm2, %v9871_v9  ;;  %v10107_v9 = vrot.slane %v15242_v25, %v14032_v7 }
0x43b8   :  { %v13374_v55 = vpop.f32.mrf.mxu1  ;;  %13391 = vmatprep.mubr.msk.f32.mxu0 %vm113_vm0, %v14743_v35 }
0x4477   :  { %v13379_v14 = vpop.f32.mrf.mxu0 }
0x4478   :  { %v9962_v20 = vadd.f32 %v13379_v14, %v9542_v42 }
0x4479   :  { %v9952_v23 = vpop.f32.mrf.mxu0 }
0x447a   :  { %v9968_v10 = vadd.f32 %v9966_v36, %v9962_v20  ;;  %v9961_v24 = vadd.f32 %v9952_v23, %v9541_v19  ;;  %v10016_v23 = vrot.slane %v15218_v33, %v14289_v41 }
0x447c   :  { %v9970_v0 = vadd.f32 %v9968_v10, %v15036_v6  ;;  %v9967_v11 = vadd.f32 %v9966_v36, %v9961_v24 }
0x447e   :  { %v9969_v15 = vadd.f32 %v9967_v11, %v15032_v1  ;;  %v9974_v26 = vsel %vm113_vm0, %v9970_v0, 0.0  ;;  %v9980_v21 = vmul.f32 %v9970_v0, %v9970_v0 }
0x447f   :  { %9975 = vadd.xlane.f32.xlu1 %v9974_v26 }
0x4480   :  { %v9971_v35 = vsel %vm113_vm0, %v9969_v15, 0.0  ;;  %v9979_v56 = vmul.f32 %v9969_v15, %v9969_v15  ;;  %v9984_v34 = vsel %vm113_vm0, %v9980_v21, 0.0 }
0x4481   :  { %9972 = vadd.xlane.f32.xlu0 %v9971_v35 }
0x4482   :  { %v9981_v18 = vsel %vm113_vm0, %v9979_v56, 0.0 }
0x4485   :  { %9982 = vadd.xlane.f32.xlu0 %v9981_v18 }
0x4489   :  { %9985 = vadd.xlane.f32.xlu0 %v9984_v34 }
0x4490   :  { %10110 = vrot.lane.b32.xlu1 %v15015_v13, %s13940_s26 }
0x4494   :  { %10019 = vrot.lane.b32.xlu1 %v15015_v13, %s13934_s4 }
0x4498   :  { %10017 = vrot.lane.b32.xlu1 %v15011_v16, %s13934_s4 }
0x449f   :  { %10108 = vrot.lane.b32.xlu0 %v15011_v16, %s13940_s26 }
0x4508   :  { %v9976_v1 = vpop.xlane.xlu1 %9975 }
0x4509   :  { %v9978_v42 = vmul.f32 0.0625, %v9976_v1 }
0x450a   :  { %v9973_v6 = vpop.xlane.xlu0 %9972 }
0x450b   :  { %v9977_v28 = vmul.f32 0.0625, %v9973_v6  ;;  %v9990_v8 = vmul.f32 %v9978_v42, %v9978_v42  ;;  %v9994_v45 = vsub.f32 %v9970_v0, %v9978_v42 }
0x450c   :  { %v10111_v38 = vpop.permute.xlu1 %10110 }
0x450d   :  { %13387 = vmatprep.subr.mxu0 %v10111_v38  ;;  %v9989_v43 = vmul.f32 %v9977_v28, %v9977_v28  ;;  %v9993_v61 = vsub.f32 %v9969_v15, %v9977_v28 }
0x450e   :  { %v9983_v40 = vpop.xlane.xlu0 %9982  ;;  %13388 = vmatpush3.msra.mxu0 %v10111_v38 }
0x450f   :  { %v9987_v19 = vmul.f32 0.0625, %v9983_v40 }
0x4510   :  { %v10020_v44 = vpop.permute.xlu1 %10019 }
0x4511   :  { %v9991_v31 = vsub.f32 %v9987_v19, %v9989_v43  ;;  %13380 = vmatprep.subr.mxu1 %v10020_v44 }
0x4512   :  { %v9986_v50 = vpop.xlane.xlu0 %9985  ;;  %13381 = vmatpush3.msra.mxu1 %v10020_v44 }
0x4513   :  { %v9995_v53 = vadd.f32 1e-05, %v9991_v31  ;;  %v9988_v52 = vmul.f32 0.0625, %v9986_v50 }
0x4514   :  { %v10018_v62 = vpop.permute.xlu1 %10017 }
0x4515   :  { %13731 = vrsqrt.f32 %v9995_v53  ;;  %v9992_v46 = vsub.f32 %v9988_v52, %v9990_v8  ;;  %13382 = vmatprep.subr.mxu1 %v10018_v62 }
0x4516   :  { %v10109_v29 = vpop.permute.xlu0 %10108  ;;  %13383 = vmatpush3.msra.mxu1 %v10018_v62 }
0x4517   :  { %v9996_v27 = vadd.f32 1e-05, %v9992_v46  ;;  %13389 = vmatprep.subr.mxu0 %v10109_v29  ;;  %13394 = vmatprep.subr.mxu1 %v13931_v4 }
0x4518   :  { %13390 = vmatpush3.msra.mxu0 %v10109_v29 }
0x4519   :  { %13733 = vrsqrt.f32 %v9996_v27  ;;  %13392 = vmatmul.mubr.msk.f32.vlgmr.msra.gmra.mxu0 %vm113_vm0, %v14773_v58  ;;  %13399 = vmatprep.subr.mxu0 %v13931_v4 }
0x451a   :  { %13401 = vmatprep.mubr.msk.f32.mxu0 %vm13932_vm1, %v13931_v4 }
0x4522   :  { %v13732_v51 = vpop.eup %13731 }
0x4523   :  { %v9999_v48 = vmul.f32 %v13732_v51, %v9993_v61 }
0x4525   :  { %v10005_v12 = vmul.f32 %v10004_v3, %v9999_v48 }
0x4526   :  { %v13734_v63 = vpop.eup %13733 }
0x4527   :  { %v10000_v58 = vmul.f32 %v13734_v63, %v9994_v45  ;;  %v15248_v5 = vadd.f32 %v10010_v59, %v10005_v12 }
0x4529   :  { %v10006_v2 = vmul.f32 %v10004_v3, %v10000_v58  ;;  %13384 = vmatprep.mubr.msk.f32.mxu1 %vm113_vm0, %v15248_v5 }
0x452b   :  { %v15252_v47 = vadd.f32 %v10010_v59, %v10006_v2 }
0x452d   :  { %13385 = vmatmul.mubr.msk.f32.vlgmr.msra.gmra.mxu1 %vm113_vm0, %v15252_v47 }
0x452e   :  { %13396 = vmatprep.mubr.msk.f32.mxu1 %vm13932_vm1, %v13931_v4 }
0x45d9   :  { %v13393_v55 = vpop.f32.mrf.mxu0 }
0x45da   :  { %v15260_v36 = vadd.f32 %v13393_v55, %v10107_v9 }
0x45db   :  { %v10180_v14 = vpop.f32.mrf.mxu0 }
0x45dc   :  { %v15262_v20 = vadd.f32 %v10180_v14, %v10107_v9  ;;  %13400 = vmatpush3.xpose.msk.msra.mxu0 %vm198_vm2, %v15260_v36 }
0x45dd   :  { %13409 = vmatprep.subr.mxu0 %v13931_v4 }
0x45de   :  { %13395 = vmatpush3.xpose.msk.msra.mxu1 %vm198_vm2, %v15262_v20 }
0x45df   :  { %13404 = vmatprep.subr.mxu1 %v13931_v4 }
0x45ed   :  { %v13386_v10 = vpop.f32.mrf.mxu1 }
0x45ee   :  { %v15272_v24 = vadd.f32 %v13386_v10, %v10016_v23 }
0x45ef   :  { %v10095_v0 = vpop.f32.mrf.mxu1 }
0x45f0   :  { %v15274_v11 = vadd.f32 %v10095_v0, %v10016_v23  ;;  %13402 = vmatmul.mubr.msk.f32.vlgmr.msra.gmra.mxu0 %vm198_vm2, %v15272_v24 }
0x45f1   :  { %13411 = vmatprep.mubr.msk.f32.mxu0 %vm13932_vm1, %v13931_v4 }
0x45f2   :  { %13397 = vmatmul.mubr.msk.f32.vlgmr.msra.gmra.mxu1 %vm198_vm2, %v15274_v11 }
0x45f3   :  { %13406 = vmatprep.mubr.msk.f32.mxu1 %vm13932_vm1, %v13931_v4 }
0x46b0   :  { %v10337_v15 = vpop.f32.mrf.mxu0 }
0x46b1   :  { %v10342_v33 = vmul.f32 0.5, %v10337_v15 }
0x46b2   :  { %v10261_v26 = vpop.f32.mrf.mxu1  ;;  %v13403_v35 = vpop.f32.mrf.mxu0 }
0x46b3   :  { %v10341_v56 = vmul.f32 0.5, %v10261_v26  ;;  %v10346_v18 = vsel %vm352_vm3, %v10342_v33, -inf }
0x46b4   :  { %10347 = vmax.xlane.f32.xlu1 %v10346_v18  ;;  %v13398_v21 = vpop.f32.mrf.mxu1 }
0x46b5   :  { %v10343_v34 = vsel %vm352_vm3, %v10341_v56, -inf }
0x46b6   :  { %10344 = vmax.xlane.f32.xlu0 %v10343_v34 }
0x46c5   :  { %10365 = vrot.lane.b32.xlu1 %v15262_v20, %s13933_s2 }
0x46c9   :  { %10519 = vrot.lane.b32.xlu1 %v15262_v20, %s13935_s19 }
0x46cd   :  { %10597 = vrot.lane.b32.xlu1 %v15260_v36, %s13935_s19 }
0x46d1   :  { %10595 = vrot.lane.b32.xlu1 %v15272_v24, %s13935_s19 }
0x473d   :  { %v10348_v1 = vpop.xlane.xlu1 %10347 }
0x473e   :  { %v10350_v6 = vsub.f32 %v10342_v33, %v10348_v1 }
0x473f   :  { %v10345_v28 = vpop.xlane.xlu0 %10344 }
0x4740   :  { %v10353_v38 = vmul.f32 1.442695, %v10350_v6  ;;  %v10349_v40 = vsub.f32 %v10341_v56, %v10345_v28 }
0x4741   :  { %v10366_v42 = vpop.permute.xlu1 %10365 }
0x4742   :  { %13735 = vpow2.f32 %v10353_v38  ;;  %v10351_v43 = vmul.f32 1.442695, %v10349_v40  ;;  %13405 = vmatpush3.msra.mxu1 %v10366_v42 }
0x4743   :  { %13414 = vmatprep.subr.mxu1 %v13931_v4 }
0x4744   :  { %13737 = vpow2.f32 %v10351_v43 }
0x4745   :  { %v10520_v52 = vpop.permute.xlu1 %10519 }
0x4749   :  { %v10598_v29 = vpop.permute.xlu1 %10597 }
0x474d   :  { %v10596_v51 = vpop.permute.xlu1 %10595 }
0x474f   :  { %v13736_v19 = vpop.eup %13735 }
0x4750   :  { %v10358_v44 = vsel %vm352_vm3, %v13736_v19, 0.0 }
0x4751   :  { %v13738_v31 = vpop.eup %13737  ;;  %10359 = vadd.xlane.f32.xlu0 %v10358_v44 }
0x4752   :  { %v10355_v50 = vsel %vm352_vm3, %v13738_v31, 0.0 }
0x4755   :  { %10356 = vadd.xlane.f32.xlu0 %v10355_v50 }
0x476b   :  { %10441 = vrot.lane.b32.xlu0 %v15260_v36, %s13933_s2 }
0x476f   :  { %10517 = vrot.lane.b32.xlu0 %v15274_v11, %s13935_s19 }
0x47da   :  { %v10360_v8 = vpop.xlane.xlu0 %10359 }
0x47db   :  { %13739 = vrcp.f32 %v10360_v8 }
0x47de   :  { %v10357_v53 = vpop.xlane.xlu0 %10356 }
0x47df   :  { %13741 = vrcp.f32 %v10357_v53 }
0x47e2   :  { %v10442_v62 = vpop.permute.xlu0 %10441 }
0x47e3   :  { %13410 = vmatpush3.msra.mxu0 %v10442_v62 }
0x47e4   :  { %13419 = vmatprep.subr.mxu0 %v13931_v4 }
0x47e6   :  { %v10518_v48 = vpop.permute.xlu0 %10517 }
0x47e8   :  { %v13740_v46 = vpop.eup %13739 }
0x47e9   :  { %v10364_v27 = vmul.f32 %v13740_v46, %v13736_v19 }
0x47eb   :  { %13412 = vmatmul.mubr.msk.f32.vlgmr.msra.gmra.mxu0 %vm352_vm3, %v10364_v27 }
0x47ec   :  { %v13742_v61 = vpop.eup %13741  ;;  %13420 = vmatpush3.xpose.msk.msra.mxu0 %vm198_vm2, %v10598_v29  ;;  %13421 = vmatprep.mubr.msk.f32.mxu0 %vm13932_vm1, %v13931_v4 }
0x47ed   :  { %v10362_v3 = vmul.f32 %v13742_v61, %v13738_v31  ;;  %13429 = vmatprep.subr.mxu0 %v13931_v4 }
0x47ef   :  { %13407 = vmatmul.mubr.msk.f32.vlgmr.msra.gmra.mxu1 %vm352_vm3, %v10362_v3  ;;  %13422 = vmatmul.mubr.msk.f32.vlgmr.msra.gmra.mxu0 %vm198_vm2, %v10596_v51 }
0x47f0   :  { %13415 = vmatpush3.xpose.msk.msra.mxu1 %vm198_vm2, %v10520_v52  ;;  %13416 = vmatprep.mubr.msk.f32.mxu1 %vm13932_vm1, %v13931_v4 }
0x47f1   :  { %13424 = vmatprep.subr.mxu1 %v13931_v4  ;;  %13431 = vmatprep.mubr.msk.f32.mxu0 %vm13932_vm1, %v13931_v4 }
0x47f3   :  { %13417 = vmatmul.mubr.msk.f32.vlgmr.msra.gmra.mxu1 %vm198_vm2, %v10518_v48 }
0x47f4   :  { %13426 = vmatprep.mubr.msk.f32.mxu1 %vm13932_vm1, %v13931_v4 }
0x48ab   :  { %v10513_v59 = vpop.f32.mrf.mxu0 }
0x48ad   :  { %v13413_v45 = vpop.f32.mrf.mxu0 }
0x48af   :  { %v10437_v12 = vpop.f32.mrf.mxu1  ;;  %v10669_v63 = vpop.f32.mrf.mxu0 }
0x48b0   :  { %v10674_v58 = vmul.f32 0.5, %v10669_v63 }
0x48b1   :  { %v13408_v2 = vpop.f32.mrf.mxu1  ;;  %v13423_v9 = vpop.f32.mrf.mxu0 }
0x48b2   :  { %v10678_v55 = vsel %vm352_vm3, %v10674_v58, -inf }
0x48b3   :  { %10679 = vmax.xlane.f32.xlu1 %v10678_v55  ;;  %v10591_v14 = vpop.f32.mrf.mxu1 }
0x48b4   :  { %v10673_v23 = vmul.f32 0.5, %v10591_v14 }
0x48b5   :  { %v13418_v10 = vpop.f32.mrf.mxu1 }
0x48b6   :  { %v10675_v0 = vsel %vm352_vm3, %v10673_v23, -inf }
0x48b7   :  { %10676 = vmax.xlane.f32.xlu0 %v10675_v0 }
0x48c4   :  { %10697 = vrot.lane.b32.xlu1 %v15262_v20, %s13936_s20 }
0x48c8   :  { %10849 = vrot.lane.b32.xlu1 %v8953_v39, %s13947_s8 }
0x48cc   :  { %10934 = vrot.lane.b32.xlu1 %v15011_v16, %s13947_s8 }
0x48d0   :  { %11099 = vrot.lane.b32.xlu1 %v15260_v36, %s13939_s25 }
0x48d4   :  { %11097 = vrot.lane.b32.xlu1 %v15272_v24, %s13939_s25 }
0x493c   :  { %v10680_v15 = vpop.xlane.xlu1 %10679 }
0x493d   :  { %v10682_v33 = vsub.f32 %v10674_v58, %v10680_v15 }
0x493f   :  { %v10685_v26 = vmul.f32 1.442695, %v10682_v33 }
0x4940   :  { %v10698_v35 = vpop.permute.xlu1 %10697  ;;  %v10677_v56 = vpop.xlane.xlu0 %10676 }
0x4941   :  { %13743 = vpow2.f32 %v10685_v26  ;;  %v10681_v18 = vsub.f32 %v10673_v23, %v10677_v56  ;;  %13425 = vmatpush3.msra.mxu1 %v10698_v35 }
0x4943   :  { %v10683_v21 = vmul.f32 1.442695, %v10681_v18 }
0x4944   :  { %v10850_v34 = vpop.permute.xlu1 %10849 }
0x4945   :  { %13745 = vpow2.f32 %v10683_v21  ;;  %13434 = vmatprep.subr.msk.mxu1 %vm869_vm4, %v10850_v34 }
0x4948   :  { %v10935_v42 = vpop.permute.xlu1 %10934 }
0x494c   :  { %v11100_v31 = vpop.permute.xlu1 %11099 }
0x494e   :  { %v13744_v16 = vpop.eup %13743 }
0x494f   :  { %v10690_v39 = vsel %vm352_vm3, %v13744_v16, 0.0 }
0x4950   :  { %10691 = vadd.xlane.f32.xlu0 %v10690_v39  ;;  %v11098_v8 = vpop.permute.xlu1 %11097 }
0x4952   :  { %v13746_v1 = vpop.eup %13745 }
0x4953   :  { %v10687_v6 = vsel %vm352_vm3, %v13746_v1, 0.0 }
0x4954   :  { %10688 = vadd.xlane.f32.xlu0 %v10687_v6 }
0x496a   :  { %10773 = vrot.lane.b32.xlu0 %v15260_v36, %s13936_s20 }
0x496e   :  { %11021 = vrot.lane.b32.xlu0 %v15262_v20, %s13939_s25 }
0x4972   :  { %11019 = vrot.lane.b32.xlu0 %v15274_v11, %s13939_s25 }
0x49d9   :  { %v10692_v28 = vpop.xlane.xlu0 %10691 }
0x49da   :  { %13747 = vrcp.f32 %v10692_v28 }
0x49dd   :  { %v10689_v38 = vpop.xlane.xlu0 %10688 }
0x49de   :  { %13749 = vrcp.f32 %v10689_v38 }
0x49e1   :  { %v10774_v40 = vpop.permute.xlu0 %10773 }
0x49e2   :  { %13430 = vmatpush3.msra.mxu0 %v10774_v40 }
0x49e3   :  { %13439 = vmatprep.subr.msk.mxu0 %vm869_vm4, %v10935_v42 }
0x49e5   :  { %v11022_v62 = vpop.permute.xlu0 %11021 }
0x49e7   :  { %v13748_v43 = vpop.eup %13747 }
0x49e8   :  { %v10696_v19 = vmul.f32 %v13748_v43, %v13744_v16 }
0x49e9   :  { %v11020_v51 = vpop.permute.xlu0 %11019 }
0x49ea   :  { %13432 = vmatmul.mubr.msk.f32.vlgmr.msra.gmra.mxu0 %vm352_vm3, %v10696_v19 }
0x49eb   :  { %v13750_v44 = vpop.eup %13749  ;;  %13441 = vmatprep.mubr.msk.f32.mxu0 %vm198_vm2, %v10437_v12  ;;  %13440 = vmatpush3.msk.msra.mxu0 %vm869_vm4, %v10935_v42  ;;  %v13788_v12 = vld [vmem:[#allocation7 + $0x38] sm:$0xff] }
0x49ec   :  { %v10694_v50 = vmul.f32 %v13750_v44, %v13746_v1  ;;  %13449 = vmatprep.subr.mxu0 %v13931_v4 }
0x49ee   :  { %13427 = vmatmul.mubr.msk.f32.vlgmr.msra.gmra.mxu1 %vm352_vm3, %v10694_v50  ;;  %13442 = vmatmul.mubr.msk.f32.vlgmr.msra.gmra.mxu0 %vm198_vm2, %v10513_v59 }
0x49ef   :  { %13450 = vmatpush3.xpose.msk.msra.mxu0 %vm198_vm2, %v11100_v31  ;;  %13451 = vmatprep.mubr.msk.f32.mxu0 %vm13932_vm1, %v13931_v4 }
0x49f0   :  { %13435 = vmatpush3.msk.msra.mxu1 %vm869_vm4, %v10850_v34  ;;  %13459 = vmatprep.subr.mxu0 %v13931_v4 }
0x49f1   :  { %13444 = vmatprep.subr.mxu1 %v13931_v4 }
0x49f2   :  { %13452 = vmatmul.mubr.msk.f32.vlgmr.msra.gmra.mxu0 %vm198_vm2, %v11098_v8 }
0x49f3   :  { %13461 = vmatprep.mubr.msk.f32.mxu0 %vm13932_vm1, %v13931_v4 }
0x4aaa   :  { %v10845_v53 = vpop.f32.mrf.mxu0 }
0x4aac   :  { %v13433_v52 = vpop.f32.mrf.mxu0 }
0x4aae   :  { %v10769_v46 = vpop.f32.mrf.mxu1  ;;  %v15356_v29 = vpop.f32.mrf.mxu0 }
0x4aaf   :  { %13436 = vmatprep.mubr.msk.f32.mxu1 %vm198_vm2, %v10769_v46 }
0x4ab0   :  { %v13428_v27 = vpop.f32.mrf.mxu1  ;;  %13437 = vmatmul.mubr.msk.f32.vlgmr.msra.gmra.mxu1 %vm198_vm2, %v10845_v53  ;;  %v15360_v61 = vpop.f32.mrf.mxu0 }
0x4ab1   :  { %13445 = vmatpush3.xpose.msk.msra.mxu1 %vm198_vm2, %v11022_v62  ;;  %13446 = vmatprep.mubr.msk.f32.mxu1 %vm13932_vm1, %v13931_v4 }
0x4ab2   :  { %v11171_v3 = vpop.f32.mrf.mxu0  ;;  %13454 = vmatprep.subr.mxu1 %v13931_v4 }
0x4ab3   :  { %v11176_v48 = vmul.f32 0.5, %v11171_v3 }
0x4ab4   :  { %13447 = vmatmul.mubr.msk.f32.vlgmr.msra.gmra.mxu1 %vm198_vm2, %v11020_v51  ;;  %v13453_v59 = vpop.f32.mrf.mxu0 }
0x4ab5   :  { %v11180_v45 = vsel %vm352_vm3, %v11176_v48, -inf  ;;  %13456 = vmatprep.mubr.msk.f32.mxu1 %vm13932_vm1, %v13931_v4 }
0x4ab6   :  { %11181 = vmax.xlane.f32.xlu1 %v11180_v45 }
0x4ac7   :  { %11199 = vrot.lane.b32.xlu1 %v15262_v20, %s13938_s22 }
0x4acb   :  { %11351 = vrot.lane.b32.xlu1 %v13788_v12, %s13947_s8 }
0x4acf   :  { %11440 = vrot.lane.b32.xlu1 %v15262_v20, %s13943_s29 }
0x4ad3   :  { %11438 = vrot.lane.b32.xlu1 %v15274_v11, %s13943_s29 }
0x4b3f   :  { %v11182_v63 = vpop.xlane.xlu1 %11181 }
0x4b40   :  { %v11184_v9 = vsub.f32 %v11176_v48, %v11182_v63 }
0x4b42   :  { %v11187_v55 = vmul.f32 1.442695, %v11184_v9 }
0x4b43   :  { %v11200_v58 = vpop.permute.xlu1 %11199 }
0x4b44   :  { %13455 = vmatpush3.msra.mxu1 %v11200_v58  ;;  %13751 = vpow2.f32 %v11187_v55 }
0x4b47   :  { %v11352_v2 = vpop.permute.xlu1 %11351 }
0x4b48   :  { %13464 = vmatprep.subr.msk.mxu1 %vm869_vm4, %v11352_v2 }
0x4b4b   :  { %v11441_v6 = vpop.permute.xlu1 %11440 }
0x4b51   :  { %v13752_v26 = vpop.eup %13751 }
0x4b52   :  { %v11192_v11 = vsel %vm352_vm3, %v13752_v26, 0.0 }
0x4b70   :  { %v15378_v14 = vpop.f32.mrf.mxu1 }
0x4b71   :  { %v11016_v48 = vadd.f32 %v15356_v29, %v15378_v14 }
0x4b72   :  { %v15380_v23 = vpop.f32.mrf.mxu1 }
0x4b73   :  { %v11011_v45 = vadd.f32 %v15360_v61, %v15380_v23 }
0x4b74   :  { %v11093_v10 = vpop.f32.mrf.mxu1 }
0x4b75   :  { %v11175_v0 = vmul.f32 0.5, %v11093_v10 }
0x4b76   :  { %v13448_v15 = vpop.f32.mrf.mxu1 }
0x4b77   :  { %v11177_v33 = vsel %vm352_vm3, %v11175_v0, -inf }
0x4b78   :  { %11178 = vmax.xlane.f32.xlu0 %v11177_v33 }
0x4b7c   :  { %11193 = vadd.xlane.f32.xlu0 %v11192_v11 }
0x4c01   :  { %v11179_v35 = vpop.xlane.xlu0 %11178 }
0x4c02   :  { %v11183_v56 = vsub.f32 %v11175_v0, %v11179_v35 }
0x4c04   :  { %v11185_v18 = vmul.f32 1.442695, %v11183_v56 }
0x4c05   :  { %v11194_v16 = vpop.xlane.xlu0 %11193 }
0x4c06   :  { %13753 = vpow2.f32 %v11185_v18 }
0x4c07   :  { %13755 = vrcp.f32 %v11194_v16 }
0x4c13   :  { %v13754_v21 = vpop.eup %13753 }
0x4c14   :  { %v11189_v34 = vsel %vm352_vm3, %v13754_v21, 0.0  ;;  %v13756_v1 = vpop.eup %13755 }
0x4c15   :  { %11190 = vadd.xlane.f32.xlu0 %v11189_v34  ;;  %v11198_v28 = vmul.f32 %v13756_v1, %v13752_v26 }
0x4c2b   :  { %11275 = vrot.lane.b32.xlu0 %v15260_v36, %s13938_s22 }
0x4c2f   :  { %11518 = vrot.lane.b32.xlu0 %v15260_v36, %s13943_s29 }
0x4c33   :  { %11516 = vrot.lane.b32.xlu0 %v15272_v24, %s13943_s29  ;;  %v11439_v24 = vpop.permute.xlu1 %11438 }
0x4c9e   :  { %v11191_v39 = vpop.xlane.xlu0 %11190 }
0x4c9f   :  { %13757 = vrcp.f32 %v11191_v39  ;;  %v11860_v39 = vrot.slane %v15242_v25, %v14205_v54 }
0x4ca2   :  { %v11276_v38 = vpop.permute.xlu0 %11275 }
0x4ca3   :  { %13460 = vmatpush3.msra.mxu0 %v11276_v38 }
0x4ca4   :  { %13462 = vmatmul.mubr.msk.f32.vlgmr.msra.gmra.mxu0 %vm352_vm3, %v11198_v28  ;;  %13469 = vmatprep.subr.mxu0 %v13931_v4 }
0x4ca5   :  { %13470 = vmatpush3.xpose.msk.msra.mxu0 %vm198_vm2, %v11441_v6  ;;  %13471 = vmatprep.mubr.msk.f32.mxu0 %vm13932_vm1, %v13931_v4 }
0x4ca6   :  { %13479 = vmatprep.subr.mxu0 %v13931_v4  ;;  %v11519_v53 = vpop.permute.xlu0 %11518 }
0x4ca8   :  { %13472 = vmatmul.mubr.msk.f32.vlgmr.msra.gmra.mxu0 %vm198_vm2, %v11439_v24 }
0x4ca9   :  { %13481 = vmatprep.mubr.msk.f32.mxu0 %vm13932_vm1, %v13931_v4 }
0x4caa   :  { %v11517_v46 = vpop.permute.xlu0 %11516 }
0x4cac   :  { %v13758_v40 = vpop.eup %13757 }
0x4cad   :  { %v11196_v42 = vmul.f32 %v13758_v40, %v13754_v21 }
0x4caf   :  { %13457 = vmatmul.mubr.msk.f32.vlgmr.msra.gmra.mxu1 %vm352_vm3, %v11196_v42 }
0x4cb0   :  { %13465 = vmatpush3.msk.msra.mxu1 %vm869_vm4, %v11352_v2 }
0x4cb1   :  { %13474 = vmatprep.subr.mxu1 %v13931_v4 }
0x4d64   :  { %v11347_v43 = vpop.f32.mrf.mxu0 }
0x4d66   :  { %v13463_v19 = vpop.f32.mrf.mxu0 }
0x4d68   :  { %v11512_v44 = vpop.f32.mrf.mxu0 }
0x4d69   :  { %v11594_v31 = vmul.f32 0.5, %v11512_v44 }
0x4d6a   :  { %v13473_v50 = vpop.f32.mrf.mxu0 }
0x4d6b   :  { %v11596_v8 = vsel %vm352_vm3, %v11594_v31, -inf }
0x4d6c   :  { %11597 = vmax.xlane.f32.xlu1 %v11596_v8  ;;  %v13789_v8 = vld [vmem:[#allocation8 + $0x18] sm:$0xff] }
0x4d6f   :  { %v11271_v52 = vpop.f32.mrf.mxu1 }
0x4d70   :  { %13466 = vmatprep.mubr.msk.f32.mxu1 %vm198_vm2, %v11271_v52 }
0x4d71   :  { %v13458_v62 = vpop.f32.mrf.mxu1  ;;  %13467 = vmatmul.mubr.msk.f32.vlgmr.msra.gmra.mxu1 %vm198_vm2, %v11347_v43 }
0x4d72   :  { %13475 = vmatpush3.xpose.msk.msra.mxu1 %vm198_vm2, %v11519_v53  ;;  %13476 = vmatprep.mubr.msk.f32.mxu1 %vm13932_vm1, %v13931_v4  ;;  %v13792_v53 = vld [vmem:[#allocation8 + $0x10] sm:$0xff] }
0x4d73   :  { %13484 = vmatprep.subr.mxu1 %v13931_v4 }
0x4d75   :  { %13477 = vmatmul.mubr.msk.f32.vlgmr.msra.gmra.mxu1 %vm198_vm2, %v11517_v46 }
0x4d76   :  { %13486 = vmatprep.mubr.msk.f32.mxu1 %vm13932_vm1, %v13931_v4 }
0x4df5   :  { %v11598_v27 = vpop.xlane.xlu1 %11597 }
0x4df6   :  { %v11602_v3 = vsub.f32 %v11594_v31, %v11598_v27 }
0x4df8   :  { %v11604_v51 = vmul.f32 1.442695, %v11602_v3 }
0x4dfa   :  { %13759 = vpow2.f32 %v11604_v51 }
0x4e07   :  { %v13760_v4 = vpop.eup %13759 }
0x4e08   :  { %v11608_v0 = vsel %vm352_vm3, %v13760_v4, 0.0 }
0x4e31   :  { %v13468_v59 = vpop.f32.mrf.mxu1 }
0x4e32   :  { %v11437_v12 = vadd.f32 %v13468_v59, %v11016_v48 }
0x4e33   :  { %v11427_v63 = vpop.f32.mrf.mxu1 }
0x4e34   :  { %v11436_v58 = vadd.f32 %v11427_v63, %v11011_v45 }
0x4e35   :  { %v11590_v2 = vpop.f32.mrf.mxu1 }
0x4e36   :  { %v11595_v9 = vmul.f32 0.5, %v11590_v2 }
0x4e37   :  { %v13478_v55 = vpop.f32.mrf.mxu1 }
0x4e38   :  { %v11599_v10 = vsel %vm352_vm3, %v11595_v9, -inf }
0x4e39   :  { %11600 = vmax.xlane.f32.xlu0 %v11599_v10 }
0x4e3d   :  { %11609 = vadd.xlane.f32.xlu0 %v11608_v0  ;;  %v11898_v0 = vrot.slane %v15242_v25, %v14284_v37 }
0x4e53   :  { %11618 = vrot.lane.b32.xlu0 %v15262_v20, %s13942_s28 }
0x4ec2   :  { %v11601_v29 = vpop.xlane.xlu0 %11600 }
0x4ec3   :  { %v11603_v14 = vsub.f32 %v11595_v9, %v11601_v29 }
0x4ec5   :  { %v11606_v15 = vmul.f32 1.442695, %v11603_v14 }
0x4ec6   :  { %v11610_v61 = vpop.xlane.xlu0 %11609 }
0x4ec7   :  { %13761 = vpow2.f32 %v11606_v15  ;;  %v11904_v15 = vrot.slane %v15242_v25, %v14289_v41  ;;  %v11910_v41 = vrot.slane %v15242_v25, %v14251_v49 }
0x4ec8   :  { %13763 = vrcp.f32 %v11610_v61 }
0x4eca   :  { %v11619_v23 = vpop.permute.xlu0 %11618 }
0x4ecb   :  { %13480 = vmatpush3.msra.mxu0 %v11619_v23 }
0x4ed4   :  { %v13762_v33 = vpop.eup %13761 }
0x4ed5   :  { %v13764_v26 = vpop.eup %13763  ;;  %v11611_v11 = vsel %vm352_vm3, %v13762_v33, 0.0 }
0x4ed6   :  { %v11615_v35 = vmul.f32 %v13764_v26, %v13760_v4  ;;  %11612 = vadd.xlane.f32.xlu1 %v11611_v11 }
0x4ed8   :  { %13482 = vmatmul.mubr.msk.f32.vlgmr.msra.gmra.mxu0 %vm352_vm3, %v11615_v35 }
0x4ee7   :  { %11694 = vrot.lane.b32.xlu1 %v15260_v36, %s13942_s28 }
0x4eeb   :  { %11770 = vrot.lane.b32.xlu1 %v9875_v60, %s13947_s8 }
0x4f5f   :  { %v11613_v20 = vpop.xlane.xlu1 %11612 }
0x4f60   :  { %13765 = vrcp.f32 %v11613_v20 }
0x4f63   :  { %v11695_v56 = vpop.permute.xlu1 %11694 }
0x4f64   :  { %13485 = vmatpush3.msra.mxu1 %v11695_v56 }
0x4f65   :  { %13494 = vmatprep.subr.mxu1 %v15021_v22 }
0x4f67   :  { %v11771_v18 = vpop.permute.xlu1 %11770 }
0x4f68   :  { %13489 = vmatprep.subr.msk.mxu0 %vm869_vm4, %v11771_v18 }
0x4f69   :  { %13490 = vmatpush3.msk.msra.mxu0 %vm869_vm4, %v11771_v18 }
0x4f6d   :  { %v13766_v21 = vpop.eup %13765 }
0x4f6e   :  { %v11617_v34 = vmul.f32 %v13766_v21, %v13762_v33 }
0x4f70   :  { %13487 = vmatmul.mubr.msk.f32.vlgmr.msra.gmra.mxu1 %vm352_vm3, %v11617_v34 }
0x4f71   :  { %13495 = vmatpush3.msra.mxu1 %v15021_v22 }
0x4f72   :  { %13496 = vmatprep.subr.mxu1 %v15019_v17 }
0x4f73   :  { %13497 = vmatpush3.msra.mxu1 %v15019_v17 }
0x4f98   :  { %v11690_v13 = vpop.f32.mrf.mxu0 }
0x4f99   :  { %13491 = vmatprep.mubr.msk.f32.mxu0 %vm198_vm2, %v11690_v13 }
0x4f9a   :  { %v13483_v60 = vpop.f32.mrf.mxu0 }
0x5030   :  { %v11766_v36 = vpop.f32.mrf.mxu1 }
0x5031   :  { %13492 = vmatmul.mubr.msk.f32.vlgmr.msra.gmra.mxu0 %vm198_vm2, %v11766_v36 }
0x5032   :  { %v13488_v16 = vpop.f32.mrf.mxu1 }
0x5033   :  { %v11999_v16 = vrot.slane %v15242_v25, %v14260_v57 }
0x50f1   :  { %v13493_v1 = vpop.f32.mrf.mxu0 }
0x50f2   :  { %v11856_v6 = vadd.f32 %v13493_v1, %v11437_v12 }
0x50f3   :  { %v11846_v28 = vpop.f32.mrf.mxu0 }
0x50f4   :  { %v11862_v38 = vadd.f32 %v11860_v39, %v11856_v6  ;;  %v11855_v22 = vadd.f32 %v11846_v28, %v11436_v58 }
0x50f6   :  { %v11864_v24 = vadd.f32 %v11862_v38, %v15252_v47  ;;  %v11861_v40 = vadd.f32 %v11860_v39, %v11855_v22  ;;  %v13790_v47 = vld [vmem:[#allocation8 + $0x8] sm:$0xff] }
0x50f8   :  { %v11863_v17 = vadd.f32 %v11861_v40, %v15248_v5  ;;  %v11868_v42 = vsel %vm113_vm0, %v11864_v24, 0.0  ;;  %v11874_v31 = vmul.f32 %v11864_v24, %v11864_v24  ;;  %v13791_v5 = vld [vmem:[#allocation8] sm:$0xff] }
0x50f9   :  { %11869 = vadd.xlane.f32.xlu1 %v11868_v42 }
0x50fa   :  { %v11865_v43 = vsel %vm113_vm0, %v11863_v17, 0.0  ;;  %v11873_v19 = vmul.f32 %v11863_v17, %v11863_v17  ;;  %v11878_v50 = vsel %vm113_vm0, %v11874_v31, 0.0 }
0x50fb   :  { %11866 = vadd.xlane.f32.xlu0 %v11865_v43 }
0x50fc   :  { %v11875_v44 = vsel %vm113_vm0, %v11873_v19, 0.0 }
0x50ff   :  { %11876 = vadd.xlane.f32.xlu0 %v11875_v44 }
0x5103   :  { %11879 = vadd.xlane.f32.xlu0 %v11878_v50 }
0x510a   :  { %12006 = vrot.lane.b32.xlu1 %v13789_v8, %s13940_s26 }
0x510e   :  { %12002 = vrot.lane.b32.xlu1 %v13790_v47, %s13940_s26 }
0x5112   :  { %12000 = vrot.lane.b32.xlu1 %v13791_v5, %s13940_s26 }
0x5119   :  { %12004 = vrot.lane.b32.xlu0 %v13792_v53, %s13940_s26 }
0x5182   :  { %v11870_v52 = vpop.xlane.xlu1 %11869 }
0x5183   :  { %v11872_v51 = vmul.f32 0.0625, %v11870_v52 }
0x5184   :  { %v11867_v62 = vpop.xlane.xlu0 %11866 }
0x5185   :  { %v11871_v46 = vmul.f32 0.0625, %v11867_v62  ;;  %v11884_v63 = vmul.f32 %v11872_v51, %v11872_v51  ;;  %v11888_v61 = vsub.f32 %v11864_v24, %v11872_v51  ;;  %v13793_v51 = vld [vmem:[#allocation10 + $0x28] sm:$0x3f] }
0x5186   :  { %v12007_v27 = vpop.permute.xlu1 %12006 }
0x5187   :  { %13501 = vmatprep.subr.mxu0 %v12007_v27  ;;  %v11883_v48 = vmul.f32 %v11871_v46, %v11871_v46  ;;  %v11887_v4 = vsub.f32 %v11863_v17, %v11871_v46 }
0x5188   :  { %v11877_v3 = vpop.xlane.xlu0 %11876  ;;  %13502 = vmatpush3.msra.mxu0 %v12007_v27 }
0x5189   :  { %v11881_v59 = vmul.f32 0.0625, %v11877_v3 }
0x518a   :  { %v12003_v56 = vpop.permute.xlu1 %12002 }
0x518b   :  { %v11885_v45 = vsub.f32 %v11881_v59, %v11883_v48  ;;  %v12128_v48 = vrot.slane %v13793_v51, %v14032_v7 }
0x518c   :  { %v11880_v12 = vpop.xlane.xlu0 %11879 }
0x518d   :  { %v11889_v58 = vadd.f32 1e-05, %v11885_v45  ;;  %v11882_v2 = vmul.f32 0.0625, %v11880_v12  ;;  %v12134_v12 = vrot.slane %v13793_v51, %v14205_v54 }
0x518e   :  { %v12001_v37 = vpop.permute.xlu1 %12000 }
0x518f   :  { %13767 = vrsqrt.f32 %v11889_v58  ;;  %v11886_v9 = vsub.f32 %v11882_v2, %v11884_v63 }
0x5190   :  { %v12005_v55 = vpop.permute.xlu0 %12004 }
0x5191   :  { %v11890_v10 = vadd.f32 1e-05, %v11886_v9  ;;  %13503 = vmatprep.subr.mxu0 %v12005_v55 }
0x5192   :  { %13504 = vmatpush3.msra.mxu0 %v12005_v55 }
0x5193   :  { %13769 = vrsqrt.f32 %v11890_v10  ;;  %13505 = vmatprep.subr.mxu0 %v12003_v56 }
0x5194   :  { %13506 = vmatpush3.msra.mxu0 %v12003_v56 }
0x5195   :  { %13507 = vmatprep.subr.mxu0 %v12001_v37 }
0x5196   :  { %13508 = vmatpush3.msra.mxu0 %v12001_v37 }
0x519c   :  { %v13768_v29 = vpop.eup %13767 }
0x519d   :  { %v11893_v14 = vmul.f32 %v13768_v29, %v11887_v4 }
0x519f   :  { %v11899_v23 = vmul.f32 %v11898_v0, %v11893_v14 }
0x51a0   :  { %v13770_v33 = vpop.eup %13769 }
0x51a1   :  { %v11894_v26 = vmul.f32 %v13770_v33, %v11888_v61  ;;  %v11905_v11 = vadd.f32 %v11904_v15, %v11899_v23 }
0x51a3   :  { %v11900_v35 = vmul.f32 %v11898_v0, %v11894_v26  ;;  %13498 = vmatprep.mubr.msk.f32.mxu1 %vm113_vm0, %v11905_v11 }
0x51a5   :  { %v11906_v20 = vadd.f32 %v11904_v15, %v11900_v35 }
0x51a7   :  { %13499 = vmatmul.mubr.msk.f32.vlgmr.msra.gmra.mxu1 %vm113_vm0, %v11906_v20 }
0x5267   :  { %v13500_v18 = vpop.f32.mrf.mxu1 }
0x5268   :  { %v11991_v21 = vadd.f32 %v13500_v18, %v11910_v41 }
0x5269   :  { %v11985_v34 = vpop.f32.mrf.mxu1 }
0x526a   :  { %v11986_v13 = vadd.f32 %v11985_v34, %v11910_v41  ;;  %v11995_v36 = vmax.f32 %v11991_v21, 0.0 }
0x526c   :  { %v11994_v60 = vmax.f32 %v11986_v13, 0.0 }
0x526e   :  { %13509 = vmatprep.mubr.msk.f32.mxu0 %vm2020_vm5, %v11994_v60 }
0x526f   :  { %13510 = vmatmul.mubr.msk.f32.vlgmr.msra.gmra.mxu0 %vm2020_vm5, %v11995_v36  ;;  %v12170_v36 = vrot.slane %v13793_v51, %v14222_v30 }
0x532f   :  { %v13511_v39 = vpop.f32.mrf.mxu0 }
0x5330   :  { %v12090_v1 = vadd.f32 %v13511_v39, %v11999_v16 }
0x5331   :  { %v12084_v6 = vpop.f32.mrf.mxu0 }
0x5332   :  { %v12094_v28 = vadd.f32 %v12090_v1, %v11906_v20  ;;  %v12085_v38 = vadd.f32 %v12084_v6, %v11999_v16  ;;  %v12176_v1 = vrot.slane %v13793_v51, %v14225_v32 }
0x5334   :  { %v12093_v22 = vadd.f32 %v12085_v38, %v11905_v11  ;;  %v12098_v49 = vsel %vm113_vm0, %v12094_v28, 0.0  ;;  %v12104_v42 = vmul.f32 %v12094_v28, %v12094_v28 }
0x5335   :  { %12099 = vadd.xlane.f32.xlu1 %v12098_v49 }
0x5336   :  { %v12095_v24 = vsel %vm113_vm0, %v12093_v22, 0.0  ;;  %v12103_v40 = vmul.f32 %v12093_v22, %v12093_v22  ;;  %v12108_v43 = vsel %vm113_vm0, %v12104_v42, 0.0 }
0x5337   :  { %12096 = vadd.xlane.f32.xlu0 %v12095_v24 }
0x5338   :  { %v12105_v17 = vsel %vm113_vm0, %v12103_v40, 0.0 }
0x533b   :  { %12106 = vadd.xlane.f32.xlu0 %v12105_v17 }
0x533f   :  { %12109 = vadd.xlane.f32.xlu0 %v12108_v43 }
0x53be   :  { %v12100_v19 = vpop.xlane.xlu1 %12099 }
0x53bf   :  { %v12102_v31 = vmul.f32 0.0625, %v12100_v19 }
0x53c0   :  { %v12097_v57 = vpop.xlane.xlu0 %12096 }
0x53c1   :  { %v12101_v25 = vmul.f32 0.0625, %v12097_v57  ;;  %v12114_v53 = vmul.f32 %v12102_v31, %v12102_v31  ;;  %v12118_v63 = vsub.f32 %v12094_v28, %v12102_v31 }
0x53c3   :  { %v12113_v50 = vmul.f32 %v12101_v25, %v12101_v25  ;;  %v12117_v3 = vsub.f32 %v12093_v22, %v12101_v25 }
0x53c4   :  { %v12107_v44 = vpop.xlane.xlu0 %12106 }
0x53c5   :  { %v12111_v8 = vmul.f32 0.0625, %v12107_v44 }
0x53c7   :  { %v12115_v47 = vsub.f32 %v12111_v8, %v12113_v50 }
0x53c8   :  { %v12110_v5 = vpop.xlane.xlu0 %12109 }
0x53c9   :  { %v12119_v52 = vadd.f32 1e-05, %v12115_v47  ;;  %v12112_v62 = vmul.f32 0.0625, %v12110_v5 }
0x53cb   :  { %13771 = vrsqrt.f32 %v12119_v52  ;;  %v12116_v46 = vsub.f32 %v12112_v62, %v12114_v53 }
0x53cd   :  { %v12120_v27 = vadd.f32 1e-05, %v12116_v46 }
0x53cf   :  { %13773 = vrsqrt.f32 %v12120_v27 }
0x53d8   :  { %v13772_v59 = vpop.eup %13771 }
0x53d9   :  { %v12123_v45 = vmul.f32 %v13772_v59, %v12117_v3 }
0x53db   :  { %v12129_v58 = vmul.f32 %v12128_v48, %v12123_v45 }
0x53dc   :  { %v13774_v2 = vpop.eup %13773 }
0x53dd   :  { %v12135_v9 = vadd.f32 %v12134_v12, %v12129_v58  ;;  %v12124_v55 = vmul.f32 %v13774_v2, %v12118_v63 }
0x53df   :  { %v12137_v10 = vsel %vm113_vm0, %v12135_v9, 0.0  ;;  %v12145_v4 = vmul.f32 %v12135_v9, %v12135_v9  ;;  %v12130_v0 = vmul.f32 %v12128_v48, %v12124_v55 }
0x53e0   :  { %12138 = vadd.xlane.f32.xlu1 %v12137_v10 }
0x53e1   :  { %v12136_v29 = vadd.f32 %v12134_v12, %v12130_v0  ;;  %v12147_v14 = vsel %vm113_vm0, %v12145_v4, 0.0 }
0x53e3   :  { %v12140_v15 = vsel %vm113_vm0, %v12136_v29, 0.0  ;;  %v12146_v7 = vmul.f32 %v12136_v29, %v12136_v29 }
0x53e4   :  { %12148 = vadd.xlane.f32.xlu1 %v12147_v14  ;;  %12141 = vadd.xlane.f32.xlu0 %v12140_v15 }
0x53e5   :  { %v12150_v54 = vsel %vm113_vm0, %v12146_v7, 0.0 }
0x53e8   :  { %12151 = vadd.xlane.f32.xlu0 %v12150_v54 }
0x5469   :  { %v12139_v61 = vpop.xlane.xlu1 %12138 }
0x546a   :  { %v12143_v23 = vmul.f32 0.0625, %v12139_v61 }
0x546c   :  { %v12155_v11 = vmul.f32 %v12143_v23, %v12143_v23  ;;  %v12159_v60 = vsub.f32 %v12135_v9, %v12143_v23 }
0x546d   :  { %v12149_v33 = vpop.xlane.xlu1 %12148  ;;  %v12142_v26 = vpop.xlane.xlu0 %12141 }
0x546e   :  { %v12153_v35 = vmul.f32 0.0625, %v12149_v33  ;;  %v12144_v20 = vmul.f32 0.0625, %v12142_v26 }
0x5470   :  { %v12157_v56 = vsub.f32 %v12153_v35, %v12155_v11  ;;  %v12156_v18 = vmul.f32 %v12144_v20, %v12144_v20  ;;  %v12160_v6 = vsub.f32 %v12136_v29, %v12144_v20 }
0x5471   :  { %v12152_v37 = vpop.xlane.xlu0 %12151 }
0x5472   :  { %v12161_v41 = vadd.f32 1e-05, %v12157_v56  ;;  %v12154_v21 = vmul.f32 0.0625, %v12152_v37 }
0x5474   :  { %13775 = vrsqrt.f32 %v12161_v41  ;;  %v12158_v34 = vsub.f32 %v12154_v21, %v12156_v18 }
0x5476   :  { %v12162_v13 = vadd.f32 1e-05, %v12158_v34 }
0x5478   :  { %13777 = vrsqrt.f32 %v12162_v13 }
0x5481   :  { %v13776_v16 = vpop.eup %13775 }
0x5482   :  { %v12165_v39 = vmul.f32 %v13776_v16, %v12159_v60 }
0x5484   :  { %v12171_v28 = vmul.f32 %v12170_v36, %v12165_v39 }
0x5485   :  { %v13778_v38 = vpop.eup %13777 }
0x5486   :  { %v12166_v22 = vmul.f32 %v13778_v38, %v12160_v6  ;;  %v12177_v49 = vadd.f32 %v12176_v1, %v12171_v28 }
0x5488   :  { %v12172_v24 = vmul.f32 %v12170_v36, %v12166_v22  ;;  %12179 = vst.msk [vmem:[#allocation11] sm:$0xff] %vm113_vm0, %v12177_v49 }
0x548a   :  { %v12178_v40 = vadd.f32 %v12176_v1, %v12172_v24 }
0x548c   :  { %12180 = vst.msk [vmem:[#allocation11 + $0x8] sm:$0xff] %vm113_vm0, %v12178_v40 }
0x548d   :  { %13905 = shalt.err (!%p13902_p1)
}
0x548e   :  { %12192 = dma.vmem_to_hbm [thread:$0]  %s12187_s9, 256, %s15486_s5, [#allocation4], %s13924_s23, %s13924_s23, %s13925_s24  }
0x548f   :  { %13920 = dma.done.wait [#allocation4], 256  }
0x5490   :  { %13921 = vsyncadd [#allocation4], 4294967040 }
0x5491   :  { %12196 = vsyncpa [#allocation3], 1 }
0x5492   :  { %12197 = vsyncpa [#allocation6], 1 }
0x5493   :  { %12198 = vsyncpa [#allocation9], 1 }
0x5494   :  { %12199 = vsyncpa [#allocation4], 1 }

</bundles_post_ra>
